<compile_context>
chip_gen: v6e
topology: v6e:2x2x1
jax: 0.10.0
libtpu: 0.0.40
codegen_flags: <defaults>
</compile_context>

<pallas_src>
import jax
import jax.numpy as jnp
from jax.experimental import pallas as pl
from jax.experimental.pallas import tpu as pltpu

NEG_INF = -1e30
_VMEM_LIMIT = 32 * 1024 * 1024

# ---------------- fat / dilated flat-layout geometry (28x28 input, row stride 28) -------------
# Every layer is evaluated on the un-decimated 28-wide flat lattice (index p = h*28 + w).
# Pool decimation is folded into dilated offsets of the *next* layer, so all accesses are static
# contiguous slices.  Valid conv3 outputs live at p = 112*h5 + 4*w5, h5,w5 in [0,5).
_L1, _L2, _L3, _L4, _L5 = 752, 720, 656, 592, 472       # fat lengths: conv1, pool1, conv2, pool2, conv3
_OFF1 = (0, 1, 28, 29)      # conv1 & pool1: (di,dj) in {0,1}^2, dilation 1
_OFF2 = (0, 2, 56, 58)      # conv2 & pool2: dilation 2 (after one pool)
_OFF3 = (0, 4, 112, 116)    # conv3:         dilation 4 (after two pools)


# ----------------------------------- Pallas kernels -------------------------------------------

def _conv_stack_kernel(x_ref, w1_ref, b1_ref, w2_ref, b2_ref, w3_ref, b3_ref, o_ref):
    """Whole conv stack for ONE image: conv1->pool1->conv2->pool2->conv3 (+ ReLUs)."""
    x = x_ref[0]                               # (784, 1) f32, flat h*28 + w
    w1 = w1_ref[...]                           # (4, 32)  f32

    # Conv2d(1,32,2) + ReLU -- Cin=1, so 4 broadcast multiply-adds on the VPU
    # (a K=8 matmul would run the MXU at ~3% depth utilization).
    o0, o1, o2, o3 = _OFF1
    y = jnp.maximum(
        x[o0:o0 + _L1] * w1[0:1] + x[o1:o1 + _L1] * w1[1:2]
        + x[o2:o2 + _L1] * w1[2:3] + x[o3:o3 + _L1] * w1[3:4]
        + b1_ref[...], 0.0)                                              # (752, 32) f32

    # MaxPool2d(2)  (ReLU/max commute, so pooling the ReLU'd map is exact)
    y = jnp.maximum(jnp.maximum(y[o0:o0 + _L2], y[o1:o1 + _L2]),
                    jnp.maximum(y[o2:o2 + _L2], y[o3:o3 + _L2]))         # (720, 32)

    # Conv2d(32,64,2) + ReLU -- dilated in-kernel im2col (lane concat) + MXU, f32 accumulate
    o0, o1, o2, o3 = _OFF2
    pat = jnp.concatenate([y[o0:o0 + _L3], y[o1:o1 + _L3],
                           y[o2:o2 + _L3], y[o3:o3 + _L3]],
                          axis=1).astype(jnp.bfloat16)                   # (656, 128)
    y = jnp.maximum(
        jnp.dot(pat, w2_ref[...], preferred_element_type=jnp.float32)
        + b2_ref[...], 0.0)                                              # (656, 64) f32

    # MaxPool2d(2)  (dilation 2)
    y = jnp.maximum(jnp.maximum(y[o0:o0 + _L4], y[o1:o1 + _L4]),
                    jnp.maximum(y[o2:o2 + _L4], y[o3:o3 + _L4]))         # (592, 64)

    # Conv2d(64,128,2) + ReLU  (dilation 4)
    o0, o1, o2, o3 = _OFF3
    pat = jnp.concatenate([y[o0:o0 + _L5], y[o1:o1 + _L5],
                           y[o2:o2 + _L5], y[o3:o3 + _L5]],
                          axis=1).astype(jnp.bfloat16)                   # (472, 256)
    y3 = jnp.maximum(
        jnp.dot(pat, w3_ref[...], preferred_element_type=jnp.float32)
        + b3_ref[...], 0.0).astype(jnp.bfloat16)                         # (472, 128)

    # Valid conv3 outputs sit at flat positions 112*h5 + 4*w5.  Emit 5 contiguous lane-dense
    # (17, 128) row blocks; the stride-4 column pick is one cheap XLA slice outside the kernel.
    for i in range(5):
        o_ref[0, i] = y3[112 * i: 112 * i + 17]


def conv_stack(x_flat, kp):
    """x_flat: (B, 784, 1) f32  ->  (B, 5, 17, 128) bf16 conv3 row blocks."""
    B = x_flat.shape[0]
    return pl.pallas_call(
        _conv_stack_kernel,
        out_shape=jax.ShapeDtypeStruct((B, 5, 17, 128), jnp.bfloat16),
        grid=(B,),
        in_specs=[
            pl.BlockSpec((1, 784, 1), lambda b: (b, 0, 0)),
            pl.BlockSpec((4, 32), lambda b: (0, 0)),
            pl.BlockSpec((1, 32), lambda b: (0, 0)),
            pl.BlockSpec((128, 64), lambda b: (0, 0)),
            pl.BlockSpec((1, 64), lambda b: (0, 0)),
            pl.BlockSpec((256, 128), lambda b: (0, 0)),
            pl.BlockSpec((1, 128), lambda b: (0, 0)),
        ],
        out_specs=pl.BlockSpec((1, 5, 17, 128), lambda b: (b, 0, 0, 0)),
        compiler_params=pltpu.CompilerParams(
            dimension_semantics=("parallel",),
            vmem_limit_bytes=_VMEM_LIMIT),
    )(x_flat, kp["w1"], kp["b1"], kp["w2"], kp["b2"], kp["w3"], kp["b3"])


def _fc_tail_kernel(x_ref, w1_ref, b1_ref, w2_ref, b2_ref, o_ref):
    # out = log_softmax(relu(x @ w1 + b1) @ w2 + b2)   (padded classes carry -1e30 bias)
    h = jnp.dot(x_ref[...], w1_ref[...], preferred_element_type=jnp.float32)
    h = jnp.maximum(h + b1_ref[...], 0.0)
    z = jnp.dot(h.astype(w2_ref.dtype), w2_ref[...],
                preferred_element_type=jnp.float32)
    z = z + b2_ref[...]
    m = jnp.max(z, axis=-1, keepdims=True)
    lse = m + jnp.log(jnp.sum(jnp.exp(z - m), axis=-1, keepdims=True))
    o_ref[...] = (z - lse).astype(o_ref.dtype)


def fc_tail(x, w1, b1, w2, b2, *, tm=256):
    """Batch-wide fused fc1 + ReLU + fc2 + log_softmax; weights resident across the grid."""
    M, K = x.shape
    K1, N1 = w1.shape
    N1b, N2 = w2.shape
    assert K == K1 and N1 == N1b
    tm = min(tm, M)
    return pl.pallas_call(
        _fc_tail_kernel,
        out_shape=jax.ShapeDtypeStruct((M, N2), jnp.float32),
        grid=(pl.cdiv(M, tm),),
        in_specs=[
            pl.BlockSpec((tm, K), lambda i: (i, 0)),
            pl.BlockSpec((K, N1), lambda i: (0, 0)),
            pl.BlockSpec((1, N1), lambda i: (0, 0)),
            pl.BlockSpec((N1, N2), lambda i: (0, 0)),
            pl.BlockSpec((1, N2), lambda i: (0, 0)),
        ],
        out_specs=pl.BlockSpec((tm, N2), lambda i: (i, 0)),
        compiler_params=pltpu.CompilerParams(
            dimension_semantics=("parallel",),
            vmem_limit_bytes=_VMEM_LIMIT),
    )(x, w1, b1, w2, b2)


# -------------------------------------- Parameters --------------------------------------------

def init_torch_params(key):
    """Raw parameters in PyTorch layouts (what a state_dict would hold)."""
    ks = jax.random.split(key, 10)

    def winit(k, shape, fan_in):
        return jax.random.normal(k, shape, jnp.float32) / jnp.sqrt(fan_in)

    return {
        "conv1_w": winit(ks[0], (32, 1, 2, 2), 1 * 4),
        "conv1_b": winit(ks[1], (32,), 1 * 4),
        "conv2_w": winit(ks[2], (64, 32, 2, 2), 32 * 4),
        "conv2_b": winit(ks[3], (64,), 32 * 4),
        "conv3_w": winit(ks[4], (128, 64, 2, 2), 64 * 4),
        "conv3_b": winit(ks[5], (128,), 64 * 4),
        "fc1_w": winit(ks[6], (200, 3200), 3200),   # PyTorch Linear: (out, in)
        "fc1_b": winit(ks[7], (200,), 3200),
        "fc2_w": winit(ks[8], (10, 200), 200),
        "fc2_b": winit(ks[9], (10,), 200),
    }


def _conv_w_to_mat(w):
    """Torch conv weight (Cout, Cin, 2, 2) -> (4*Cin, Cout); row = (di*2+dj)*Cin + ci,
    matching the kernel's [(0,0), (0,1), (1,0), (1,1)] patch-concat order."""
    co, ci, kh, kw = w.shape
    return jnp.transpose(w, (2, 3, 1, 0)).reshape(kh * kw * ci, co)


def _pad_axis(a, axis, new_size):
    pad = [(0, 0)] * a.ndim
    pad[axis] = (0, new_size - a.shape[axis])
    return jnp.pad(a, pad)


def prepare_kernel_params(tp):
    """One-time conversion to kernel-ready matrices (bf16 matmul weights, f32 biases)."""
    p = {}
    p["w1"] = _conv_w_to_mat(tp["conv1_w"]).astype(jnp.float32)     # (4, 32)    VPU conv1
    p["b1"] = tp["conv1_b"].reshape(1, 32).astype(jnp.float32)
    p["w2"] = _conv_w_to_mat(tp["conv2_w"]).astype(jnp.bfloat16)    # (128, 64)
    p["b2"] = tp["conv2_b"].reshape(1, 64).astype(jnp.float32)
    p["w3"] = _conv_w_to_mat(tp["conv3_w"]).astype(jnp.bfloat16)    # (256, 128)
    p["b3"] = tp["conv3_b"].reshape(1, 128).astype(jnp.float32)
    # fc1: fold the NCHW flatten permutation (torch index c*25 + h*5 + w) into the weight so the
    # kernel-side flatten order (h*640 + w*128 + c) needs no runtime transpose; pad 200 -> 256.
    w = tp["fc1_w"].reshape(200, 128, 5, 5)                         # (out, c, h, w)
    w = jnp.transpose(w, (2, 3, 1, 0)).reshape(3200, 200)           # row = h*640 + w*128 + c
    p["wfc1"] = _pad_axis(w, 1, 256).astype(jnp.bfloat16)           # (3200, 256)
    p["bfc1"] = _pad_axis(tp["fc1_b"], 0, 256).reshape(1, 256).astype(jnp.float32)
    # fc2: (10,200) -> (256,128); padded classes get ~-inf bias so log_softmax stays exact.
    p["wfc2"] = _pad_axis(_pad_axis(tp["fc2_w"].T, 0, 256), 1, 128).astype(jnp.bfloat16)
    b = jnp.concatenate([tp["fc2_b"], jnp.full((128 - 10,), NEG_INF, jnp.float32)])
    p["bfc2"] = b.reshape(1, 128).astype(jnp.float32)
    return p


# ---------------------------------------- Forward ---------------------------------------------

@jax.jit
def mnist_l5_forward(x_nchw, kp):
    # dropout(p=0.0) -> identity
    B = x_nchw.shape[0]
    # NCHW with Cin=1 row-major == flat (h*28 + w): metadata-only reshape, no transpose/pad.
    x_flat = x_nchw.astype(jnp.float32).reshape(B, 28 * 28, 1)
    feat = conv_stack(x_flat, kp)                            # (B, 5, 17, 128) bf16, one fused kernel
    # pick the 5 valid columns (stride 4) of each row block and flatten -> (B, 3200)
    flat = feat[:, :, 0:17:4, :].reshape(B, 5 * 5 * 128)
    logp = fc_tail(flat, kp["wfc1"], kp["bfc1"], kp["wfc2"], kp["bfc2"])   # (B, 128) f32
    return logp[:, :10]


@jax.jit
def mnist_l5_reference(x, tp):
    """Pure-XLA f32 reference that mirrors the PyTorch module exactly."""
    def conv(v, w, b):
        y = jax.lax.conv_general_dilated(
            v, w, window_strides=(1, 1), padding="VALID",
            dimension_numbers=("NCHW", "OIHW", "NCHW"))
        return y + b.reshape(1, -1, 1, 1)

    def pool(v):
        return jax.lax.reduce_window(v, -jnp.inf, jax.lax.max,
                                     (1, 1, 2, 2), (1, 1, 2, 2), "VALID")

    y = jnp.maximum(pool(conv(x, tp["conv1_w"], tp["conv1_b"])), 0.0)
    y = jnp.maximum(pool(conv(y, tp["conv2_w"], tp["conv2_b"])), 0.0)
    y = jnp.maximum(conv(y, tp["conv3_w"], tp["conv3_b"]), 0.0)
    flat = y.reshape(y.shape[0], -1)                       # NCHW flatten: c*25 + h*5 + w
    h = jnp.maximum(flat @ tp["fc1_w"].T + tp["fc1_b"], 0.0)
    z = h @ tp["fc2_w"].T + tp["fc2_b"]
    return jax.nn.log_softmax(z, axis=-1)


# ------------------------------------------ Main ----------------------------------------------

if __name__ == "__main__":
    key = jax.random.PRNGKey(0)
    kx, kparam = jax.random.split(key)

    # MNIST-shaped input (NCHW), batch=2 -- the hard-coded 128*5*5 flatten implies 28x28 input.
    x = jax.random.normal(kx, (2, 1, 28, 28), jnp.float32)
    torch_params = init_torch_params(kparam)
    kparams = prepare_kernel_params(torch_params)

    out = jax.block_until_ready(mnist_l5_forward(x, kparams))

    assert out.shape == (2, 10), out.shape
    assert bool(jnp.all(jnp.isfinite(out)))
    # log_softmax rows must exponentiate-sum to 1 (padded classes contribute exp(-1e30) = 0)
    assert bool(jnp.allclose(jnp.exp(out).sum(axis=1), 1.0, atol=1e-3))
    # numerics vs the pure-XLA f32 reference (bf16 matmul weights -> loose tolerance)
    ref = jax.block_until_ready(mnist_l5_reference(x, torch_params))
    err = float(jnp.max(jnp.abs(out - ref)))
    assert err < 0.15, err

    print("KERNEL_OK")
</pallas_src>

<mosaic_0001>
module attributes {stable_mosaic.version = 11 : i64} {
  func.func @_conv_stack_kernel(%arg0: i32, %arg1: memref<1x784x1xf32, #tpu.memory_space<vmem>>, %arg2: memref<4x32xf32, #tpu.memory_space<vmem>>, %arg3: memref<1x32xf32, #tpu.memory_space<vmem>>, %arg4: memref<128x64xbf16, #tpu.memory_space<vmem>>, %arg5: memref<1x64xf32, #tpu.memory_space<vmem>>, %arg6: memref<256x128xbf16, #tpu.memory_space<vmem>>, %arg7: memref<1x128xf32, #tpu.memory_space<vmem>>, %arg8: memref<1x5x17x128xbf16, #tpu.memory_space<vmem>>) attributes {dimension_semantics = [#tpu.dimension_semantics<parallel>], iteration_bounds = array<i64: 2>, scalar_prefetch = 0 : i64, scratch_operands = 0 : i64, tpu.core_type = #tpu.core_type<tc>, window_params = [{transform_indices = @transform_0, window_bounds = array<i64: 1, 784, 1>}, {pipeline_mode = #tpu.pipeline_mode<synchronous>, transform_indices = @transform_1, window_bounds = array<i64: 4, 32>}, {pipeline_mode = #tpu.pipeline_mode<synchronous>, transform_indices = @transform_2, window_bounds = array<i64: 1, 32>}, {pipeline_mode = #tpu.pipeline_mode<synchronous>, transform_indices = @transform_3, window_bounds = array<i64: 128, 64>}, {pipeline_mode = #tpu.pipeline_mode<synchronous>, transform_indices = @transform_4, window_bounds = array<i64: 1, 64>}, {pipeline_mode = #tpu.pipeline_mode<synchronous>, transform_indices = @transform_5, window_bounds = array<i64: 256, 128>}, {pipeline_mode = #tpu.pipeline_mode<synchronous>, transform_indices = @transform_6, window_bounds = array<i64: 1, 128>}, {transform_indices = @transform_7, window_bounds = array<i64: 1, 5, 17, 128>}]} {
    %c0 = arith.constant 0 : index
    %c0_0 = arith.constant 0 : index
    %c0_1 = arith.constant 0 : index
    %0 = vector.load %arg1[%c0, %c0_0, %c0_1] : memref<1x784x1xf32, #tpu.memory_space<vmem>>, vector<1x784x1xf32>
    %1 = vector.shape_cast %0 : vector<1x784x1xf32> to vector<784x1xf32>
    %c0_2 = arith.constant 0 : index
    %c0_3 = arith.constant 0 : index
    %2 = vector.load %arg2[%c0_2, %c0_3] : memref<4x32xf32, #tpu.memory_space<vmem>>, vector<4x32xf32>
    %3 = vector.extract_strided_slice %1 {offsets = [0, 0], sizes = [752, 1], strides = [1, 1]} : vector<784x1xf32> to vector<752x1xf32>
    %4 = vector.extract_strided_slice %2 {offsets = [0, 0], sizes = [1, 32], strides = [1, 1]} : vector<4x32xf32> to vector<1x32xf32>
    %5 = vector.broadcast %3 : vector<752x1xf32> to vector<752x32xf32>
    %6 = vector.broadcast %4 : vector<1x32xf32> to vector<752x32xf32>
    %7 = arith.mulf %5, %6 : vector<752x32xf32>
    %8 = vector.extract_strided_slice %1 {offsets = [1, 0], sizes = [752, 1], strides = [1, 1]} : vector<784x1xf32> to vector<752x1xf32>
    %9 = vector.extract_strided_slice %2 {offsets = [1, 0], sizes = [1, 32], strides = [1, 1]} : vector<4x32xf32> to vector<1x32xf32>
    %10 = vector.broadcast %8 : vector<752x1xf32> to vector<752x32xf32>
    %11 = vector.broadcast %9 : vector<1x32xf32> to vector<752x32xf32>
    %12 = arith.mulf %10, %11 : vector<752x32xf32>
    %13 = arith.addf %7, %12 : vector<752x32xf32>
    %14 = vector.extract_strided_slice %1 {offsets = [28, 0], sizes = [752, 1], strides = [1, 1]} : vector<784x1xf32> to vector<752x1xf32>
    %15 = vector.extract_strided_slice %2 {offsets = [2, 0], sizes = [1, 32], strides = [1, 1]} : vector<4x32xf32> to vector<1x32xf32>
    %16 = vector.broadcast %14 : vector<752x1xf32> to vector<752x32xf32>
    %17 = vector.broadcast %15 : vector<1x32xf32> to vector<752x32xf32>
    %18 = arith.mulf %16, %17 : vector<752x32xf32>
    %19 = arith.addf %13, %18 : vector<752x32xf32>
    %20 = vector.extract_strided_slice %1 {offsets = [29, 0], sizes = [752, 1], strides = [1, 1]} : vector<784x1xf32> to vector<752x1xf32>
    %21 = vector.extract_strided_slice %2 {offsets = [3, 0], sizes = [1, 32], strides = [1, 1]} : vector<4x32xf32> to vector<1x32xf32>
    %22 = vector.broadcast %20 : vector<752x1xf32> to vector<752x32xf32>
    %23 = vector.broadcast %21 : vector<1x32xf32> to vector<752x32xf32>
    %24 = arith.mulf %22, %23 : vector<752x32xf32>
    %25 = arith.addf %19, %24 : vector<752x32xf32>
    %c0_4 = arith.constant 0 : index
    %c0_5 = arith.constant 0 : index
    %26 = vector.load %arg3[%c0_4, %c0_5] : memref<1x32xf32, #tpu.memory_space<vmem>>, vector<1x32xf32>
    %27 = vector.broadcast %26 : vector<1x32xf32> to vector<752x32xf32>
    %28 = arith.addf %25, %27 : vector<752x32xf32>
    %cst = arith.constant 0.000000e+00 : f32
    %29 = vector.broadcast %cst : f32 to vector<752x32xf32>
    %30 = arith.maximumf %28, %29 : vector<752x32xf32>
    %31 = vector.extract_strided_slice %30 {offsets = [0, 0], sizes = [720, 32], strides = [1, 1]} : vector<752x32xf32> to vector<720x32xf32>
    %32 = vector.extract_strided_slice %30 {offsets = [1, 0], sizes = [720, 32], strides = [1, 1]} : vector<752x32xf32> to vector<720x32xf32>
    %33 = arith.maximumf %31, %32 : vector<720x32xf32>
    %34 = vector.extract_strided_slice %30 {offsets = [28, 0], sizes = [720, 32], strides = [1, 1]} : vector<752x32xf32> to vector<720x32xf32>
    %35 = vector.extract_strided_slice %30 {offsets = [29, 0], sizes = [720, 32], strides = [1, 1]} : vector<752x32xf32> to vector<720x32xf32>
    %36 = arith.maximumf %34, %35 : vector<720x32xf32>
    %37 = arith.maximumf %33, %36 : vector<720x32xf32>
    %38 = vector.extract_strided_slice %37 {offsets = [0, 0], sizes = [656, 32], strides = [1, 1]} : vector<720x32xf32> to vector<656x32xf32>
    %39 = vector.extract_strided_slice %37 {offsets = [2, 0], sizes = [656, 32], strides = [1, 1]} : vector<720x32xf32> to vector<656x32xf32>
    %40 = vector.extract_strided_slice %37 {offsets = [56, 0], sizes = [656, 32], strides = [1, 1]} : vector<720x32xf32> to vector<656x32xf32>
    %41 = vector.extract_strided_slice %37 {offsets = [58, 0], sizes = [656, 32], strides = [1, 1]} : vector<720x32xf32> to vector<656x32xf32>
    %42 = tpu.concatenate %38, %39, %40, %41 in 1 : vector<656x32xf32>, vector<656x32xf32>, vector<656x32xf32>, vector<656x32xf32> -> vector<656x128xf32>
    %43 = arith.truncf %42 : vector<656x128xf32> to vector<656x128xbf16>
    %c0_6 = arith.constant 0 : index
    %c0_7 = arith.constant 0 : index
    %44 = vector.load %arg4[%c0_6, %c0_7] : memref<128x64xbf16, #tpu.memory_space<vmem>>, vector<128x64xbf16>
    %cst_8 = arith.constant dense<0.000000e+00> : vector<656x64xf32>
    %45 = tpu.matmul %43, %44, %cst_8 {dimension_numbers = #tpu.dot_dimension_numbers<[1], [0], [0], [1], [0, 0, 1, 1], [], []>} : vector<656x128xbf16>, vector<128x64xbf16>, vector<656x64xf32> -> vector<656x64xf32>
    %c0_9 = arith.constant 0 : index
    %c0_10 = arith.constant 0 : index
    %46 = vector.load %arg5[%c0_9, %c0_10] : memref<1x64xf32, #tpu.memory_space<vmem>>, vector<1x64xf32>
    %47 = vector.broadcast %46 : vector<1x64xf32> to vector<656x64xf32>
    %48 = arith.addf %45, %47 : vector<656x64xf32>
    %cst_11 = arith.constant 0.000000e+00 : f32
    %49 = vector.broadcast %cst_11 : f32 to vector<656x64xf32>
    %50 = arith.maximumf %48, %49 : vector<656x64xf32>
    %51 = vector.extract_strided_slice %50 {offsets = [0, 0], sizes = [592, 64], strides = [1, 1]} : vector<656x64xf32> to vector<592x64xf32>
    %52 = vector.extract_strided_slice %50 {offsets = [2, 0], sizes = [592, 64], strides = [1, 1]} : vector<656x64xf32> to vector<592x64xf32>
    %53 = arith.maximumf %51, %52 : vector<592x64xf32>
    %54 = vector.extract_strided_slice %50 {offsets = [56, 0], sizes = [592, 64], strides = [1, 1]} : vector<656x64xf32> to vector<592x64xf32>
    %55 = vector.extract_strided_slice %50 {offsets = [58, 0], sizes = [592, 64], strides = [1, 1]} : vector<656x64xf32> to vector<592x64xf32>
    %56 = arith.maximumf %54, %55 : vector<592x64xf32>
    %57 = arith.maximumf %53, %56 : vector<592x64xf32>
    %58 = vector.extract_strided_slice %57 {offsets = [0, 0], sizes = [472, 64], strides = [1, 1]} : vector<592x64xf32> to vector<472x64xf32>
    %59 = vector.extract_strided_slice %57 {offsets = [4, 0], sizes = [472, 64], strides = [1, 1]} : vector<592x64xf32> to vector<472x64xf32>
    %60 = vector.extract_strided_slice %57 {offsets = [112, 0], sizes = [472, 64], strides = [1, 1]} : vector<592x64xf32> to vector<472x64xf32>
    %61 = vector.extract_strided_slice %57 {offsets = [116, 0], sizes = [472, 64], strides = [1, 1]} : vector<592x64xf32> to vector<472x64xf32>
    %62 = tpu.concatenate %58, %59, %60, %61 in 1 : vector<472x64xf32>, vector<472x64xf32>, vector<472x64xf32>, vector<472x64xf32> -> vector<472x256xf32>
    %63 = arith.truncf %62 : vector<472x256xf32> to vector<472x256xbf16>
    %c0_12 = arith.constant 0 : index
    %c0_13 = arith.constant 0 : index
    %64 = vector.load %arg6[%c0_12, %c0_13] : memref<256x128xbf16, #tpu.memory_space<vmem>>, vector<256x128xbf16>
    %cst_14 = arith.constant dense<0.000000e+00> : vector<472x128xf32>
    %65 = tpu.matmul %63, %64, %cst_14 {dimension_numbers = #tpu.dot_dimension_numbers<[1], [0], [0], [1], [0, 0, 1, 1], [], []>} : vector<472x256xbf16>, vector<256x128xbf16>, vector<472x128xf32> -> vector<472x128xf32>
    %c0_15 = arith.constant 0 : index
    %c0_16 = arith.constant 0 : index
    %66 = vector.load %arg7[%c0_15, %c0_16] : memref<1x128xf32, #tpu.memory_space<vmem>>, vector<1x128xf32>
    %67 = vector.broadcast %66 : vector<1x128xf32> to vector<472x128xf32>
    %68 = arith.addf %65, %67 : vector<472x128xf32>
    %cst_17 = arith.constant 0.000000e+00 : f32
    %69 = vector.broadcast %cst_17 : f32 to vector<472x128xf32>
    %70 = arith.maximumf %68, %69 : vector<472x128xf32>
    %71 = arith.truncf %70 : vector<472x128xf32> to vector<472x128xbf16>
    %72 = vector.extract_strided_slice %71 {offsets = [0, 0], sizes = [17, 128], strides = [1, 1]} : vector<472x128xbf16> to vector<17x128xbf16>
    %c0_18 = arith.constant 0 : index
    %c0_19 = arith.constant 0 : index
    %c0_20 = arith.constant 0 : index
    %c0_21 = arith.constant 0 : index
    %73 = vector.load %arg8[%c0_18, %c0_19, %c0_20, %c0_21] : memref<1x5x17x128xbf16, #tpu.memory_space<vmem>>, vector<1x1x17x128xbf16>
    %74 = vector.shape_cast %73 : vector<1x1x17x128xbf16> to vector<17x128xbf16>
    %75 = vector.shape_cast %72 : vector<17x128xbf16> to vector<1x1x17x128xbf16>
    tpu.vector_store %arg8[%c0_18, %c0_19, %c0_20, %c0_21], %75 {strides = array<i32>} : memref<1x5x17x128xbf16, #tpu.memory_space<vmem>>, vector<1x1x17x128xbf16>,
    %76 = vector.extract_strided_slice %71 {offsets = [112, 0], sizes = [17, 128], strides = [1, 1]} : vector<472x128xbf16> to vector<17x128xbf16>
    %c0_22 = arith.constant 0 : index
    %c1 = arith.constant 1 : index
    %c0_23 = arith.constant 0 : index
    %c0_24 = arith.constant 0 : index
    %77 = vector.load %arg8[%c0_22, %c1, %c0_23, %c0_24] : memref<1x5x17x128xbf16, #tpu.memory_space<vmem>>, vector<1x1x17x128xbf16>
    %78 = vector.shape_cast %77 : vector<1x1x17x128xbf16> to vector<17x128xbf16>
    %79 = vector.shape_cast %76 : vector<17x128xbf16> to vector<1x1x17x128xbf16>
    tpu.vector_store %arg8[%c0_22, %c1, %c0_23, %c0_24], %79 {strides = array<i32>} : memref<1x5x17x128xbf16, #tpu.memory_space<vmem>>, vector<1x1x17x128xbf16>,
    %80 = vector.extract_strided_slice %71 {offsets = [224, 0], sizes = [17, 128], strides = [1, 1]} : vector<472x128xbf16> to vector<17x128xbf16>
    %c0_25 = arith.constant 0 : index
    %c2 = arith.constant 2 : index
    %c0_26 = arith.constant 0 : index
    %c0_27 = arith.constant 0 : index
    %81 = vector.load %arg8[%c0_25, %c2, %c0_26, %c0_27] : memref<1x5x17x128xbf16, #tpu.memory_space<vmem>>, vector<1x1x17x128xbf16>
    %82 = vector.shape_cast %81 : vector<1x1x17x128xbf16> to vector<17x128xbf16>
    %83 = vector.shape_cast %80 : vector<17x128xbf16> to vector<1x1x17x128xbf16>
    tpu.vector_store %arg8[%c0_25, %c2, %c0_26, %c0_27], %83 {strides = array<i32>} : memref<1x5x17x128xbf16, #tpu.memory_space<vmem>>, vector<1x1x17x128xbf16>,
    %84 = vector.extract_strided_slice %71 {offsets = [336, 0], sizes = [17, 128], strides = [1, 1]} : vector<472x128xbf16> to vector<17x128xbf16>
    %c0_28 = arith.constant 0 : index
    %c3 = arith.constant 3 : index
    %c0_29 = arith.constant 0 : index
    %c0_30 = arith.constant 0 : index
    %85 = vector.load %arg8[%c0_28, %c3, %c0_29, %c0_30] : memref<1x5x17x128xbf16, #tpu.memory_space<vmem>>, vector<1x1x17x128xbf16>
    %86 = vector.shape_cast %85 : vector<1x1x17x128xbf16> to vector<17x128xbf16>
    %87 = vector.shape_cast %84 : vector<17x128xbf16> to vector<1x1x17x128xbf16>
    tpu.vector_store %arg8[%c0_28, %c3, %c0_29, %c0_30], %87 {strides = array<i32>} : memref<1x5x17x128xbf16, #tpu.memory_space<vmem>>, vector<1x1x17x128xbf16>,
    %88 = vector.extract_strided_slice %71 {offsets = [448, 0], sizes = [17, 128], strides = [1, 1]} : vector<472x128xbf16> to vector<17x128xbf16>
    %c0_31 = arith.constant 0 : index
    %c4 = arith.constant 4 : index
    %c0_32 = arith.constant 0 : index
    %c0_33 = arith.constant 0 : index
    %89 = vector.load %arg8[%c0_31, %c4, %c0_32, %c0_33] : memref<1x5x17x128xbf16, #tpu.memory_space<vmem>>, vector<1x1x17x128xbf16>
    %90 = vector.shape_cast %89 : vector<1x1x17x128xbf16> to vector<17x128xbf16>
    %91 = vector.shape_cast %88 : vector<17x128xbf16> to vector<1x1x17x128xbf16>
    tpu.vector_store %arg8[%c0_31, %c4, %c0_32, %c0_33], %91 {strides = array<i32>} : memref<1x5x17x128xbf16, #tpu.memory_space<vmem>>, vector<1x1x17x128xbf16>,
    return
  }
  func.func @transform_0(%arg0: i32) -> (i32, i32, i32) {
    %c0_i32 = arith.constant 0 : i32
    %c0_i32_0 = arith.constant 0 : i32
    %c0_i32_1 = arith.constant 0 : i32
    return %arg0, %c0_i32, %c0_i32_0 : i32, i32, i32
  }
  func.func @transform_1(%arg0: i32) -> (i32, i32) {
    %c0_i32 = arith.constant 0 : i32
    %c0_i32_0 = arith.constant 0 : i32
    %c0_i32_1 = arith.constant 0 : i32
    return %c0_i32, %c0_i32_0 : i32, i32
  }
  func.func @transform_2(%arg0: i32) -> (i32, i32) {
    %c0_i32 = arith.constant 0 : i32
    %c0_i32_0 = arith.constant 0 : i32
    %c0_i32_1 = arith.constant 0 : i32
    return %c0_i32, %c0_i32_0 : i32, i32
  }
  func.func @transform_3(%arg0: i32) -> (i32, i32) {
    %c0_i32 = arith.constant 0 : i32
    %c0_i32_0 = arith.constant 0 : i32
    %c0_i32_1 = arith.constant 0 : i32
    return %c0_i32, %c0_i32_0 : i32, i32
  }
  func.func @transform_4(%arg0: i32) -> (i32, i32) {
    %c0_i32 = arith.constant 0 : i32
    %c0_i32_0 = arith.constant 0 : i32
    %c0_i32_1 = arith.constant 0 : i32
    return %c0_i32, %c0_i32_0 : i32, i32
  }
  func.func @transform_5(%arg0: i32) -> (i32, i32) {
    %c0_i32 = arith.constant 0 : i32
    %c0_i32_0 = arith.constant 0 : i32
    %c0_i32_1 = arith.constant 0 : i32
    return %c0_i32, %c0_i32_0 : i32, i32
  }
  func.func @transform_6(%arg0: i32) -> (i32, i32) {
    %c0_i32 = arith.constant 0 : i32
    %c0_i32_0 = arith.constant 0 : i32
    %c0_i32_1 = arith.constant 0 : i32
    return %c0_i32, %c0_i32_0 : i32, i32
  }
  func.func @transform_7(%arg0: i32) -> (i32, i32, i32, i32) {
    %c0_i32 = arith.constant 0 : i32
    %c0_i32_0 = arith.constant 0 : i32
    %c0_i32_1 = arith.constant 0 : i32
    %c0_i32_2 = arith.constant 0 : i32
    return %arg0, %c0_i32, %c0_i32_0, %c0_i32_1 : i32, i32, i32, i32
  }
}

module attributes {stable_mosaic.version = 11 : i64} {
  func.func @_fc_tail_kernel(%arg0: i32, %arg1: memref<2x3200xbf16, #tpu.memory_space<vmem>>, %arg2: memref<3200x256xbf16, #tpu.memory_space<vmem>>, %arg3: memref<1x256xf32, #tpu.memory_space<vmem>>, %arg4: memref<256x128xbf16, #tpu.memory_space<vmem>>, %arg5: memref<1x128xf32, #tpu.memory_space<vmem>>, %arg6: memref<2x128xf32, #tpu.memory_space<vmem>>) attributes {dimension_semantics = [#tpu.dimension_semantics<parallel>], iteration_bounds = array<i64: 1>, scalar_prefetch = 0 : i64, scratch_operands = 0 : i64, tpu.core_type = #tpu.core_type<tc>, window_params = [{transform_indices = @transform_0, window_bounds = array<i64: 2, 3200>}, {pipeline_mode = #tpu.pipeline_mode<synchronous>, transform_indices = @transform_1, window_bounds = array<i64: 3200, 256>}, {pipeline_mode = #tpu.pipeline_mode<synchronous>, transform_indices = @transform_2, window_bounds = array<i64: 1, 256>}, {pipeline_mode = #tpu.pipeline_mode<synchronous>, transform_indices = @transform_3, window_bounds = array<i64: 256, 128>}, {pipeline_mode = #tpu.pipeline_mode<synchronous>, transform_indices = @transform_4, window_bounds = array<i64: 1, 128>}, {transform_indices = @transform_5, window_bounds = array<i64: 2, 128>}]} {
    %c0 = arith.constant 0 : index
    %c0_0 = arith.constant 0 : index
    %0 = vector.load %arg1[%c0, %c0_0] : memref<2x3200xbf16, #tpu.memory_space<vmem>>, vector<2x3200xbf16>
    %c0_1 = arith.constant 0 : index
    %c0_2 = arith.constant 0 : index
    %1 = vector.load %arg2[%c0_1, %c0_2] : memref<3200x256xbf16, #tpu.memory_space<vmem>>, vector<3200x256xbf16>
    %cst = arith.constant dense<0.000000e+00> : vector<2x256xf32>
    %2 = tpu.matmul %0, %1, %cst {dimension_numbers = #tpu.dot_dimension_numbers<[1], [0], [0], [1], [0, 0, 1, 1], [], []>} : vector<2x3200xbf16>, vector<3200x256xbf16>, vector<2x256xf32> -> vector<2x256xf32>
    %c0_3 = arith.constant 0 : index
    %c0_4 = arith.constant 0 : index
    %3 = vector.load %arg3[%c0_3, %c0_4] : memref<1x256xf32, #tpu.memory_space<vmem>>, vector<1x256xf32>
    %4 = vector.broadcast %3 : vector<1x256xf32> to vector<2x256xf32>
    %5 = arith.addf %2, %4 : vector<2x256xf32>
    %cst_5 = arith.constant 0.000000e+00 : f32
    %6 = vector.broadcast %cst_5 : f32 to vector<2x256xf32>
    %7 = arith.maximumf %5, %6 : vector<2x256xf32>
    %8 = arith.truncf %7 : vector<2x256xf32> to vector<2x256xbf16>
    %c0_6 = arith.constant 0 : index
    %c0_7 = arith.constant 0 : index
    %9 = vector.load %arg4[%c0_6, %c0_7] : memref<256x128xbf16, #tpu.memory_space<vmem>>, vector<256x128xbf16>
    %cst_8 = arith.constant dense<0.000000e+00> : vector<2x128xf32>
    %10 = tpu.matmul %8, %9, %cst_8 {dimension_numbers = #tpu.dot_dimension_numbers<[1], [0], [0], [1], [0, 0, 1, 1], [], []>} : vector<2x256xbf16>, vector<256x128xbf16>, vector<2x128xf32> -> vector<2x128xf32>
    %c0_9 = arith.constant 0 : index
    %c0_10 = arith.constant 0 : index
    %11 = vector.load %arg5[%c0_9, %c0_10] : memref<1x128xf32, #tpu.memory_space<vmem>>, vector<1x128xf32>
    %12 = vector.broadcast %11 : vector<1x128xf32> to vector<2x128xf32>
    %13 = arith.addf %10, %12 : vector<2x128xf32>
    %cst_11 = arith.constant dense<0xFF800000> : vector<2xf32>
    %14 = vector.multi_reduction <maximumf>, %13, %cst_11 [1] : vector<2x128xf32> to vector<2xf32>
    %15 = vector.shape_cast %14 : vector<2xf32> to vector<2x1xf32>
    %16 = vector.broadcast %15 : vector<2x1xf32> to vector<2x128xf32>
    %17 = arith.subf %13, %16 : vector<2x128xf32>
    %18 = math.exp %17 : vector<2x128xf32>
    %cst_12 = arith.constant dense<0.000000e+00> : vector<2xf32>
    %19 = vector.multi_reduction <add>, %18, %cst_12 [1] : vector<2x128xf32> to vector<2xf32>
    %20 = vector.shape_cast %19 : vector<2xf32> to vector<2x1xf32>
    %21 = math.log %20 : vector<2x1xf32>
    %22 = arith.addf %15, %21 : vector<2x1xf32>
    %23 = vector.broadcast %22 : vector<2x1xf32> to vector<2x128xf32>
    %24 = arith.subf %13, %23 : vector<2x128xf32>
    %c0_13 = arith.constant 0 : index
    %c0_14 = arith.constant 0 : index
    %25 = vector.load %arg6[%c0_13, %c0_14] : memref<2x128xf32, #tpu.memory_space<vmem>>, vector<2x128xf32>
    tpu.vector_store %arg6[%c0_13, %c0_14], %24 {strides = array<i32>} : memref<2x128xf32, #tpu.memory_space<vmem>>, vector<2x128xf32>,
    return
  }
  func.func @transform_0(%arg0: i32) -> (i32, i32) {
    %c0_i32 = arith.constant 0 : i32
    %c0_i32_0 = arith.constant 0 : i32
    return %arg0, %c0_i32 : i32, i32
  }
  func.func @transform_1(%arg0: i32) -> (i32, i32) {
    %c0_i32 = arith.constant 0 : i32
    %c0_i32_0 = arith.constant 0 : i32
    %c0_i32_1 = arith.constant 0 : i32
    return %c0_i32, %c0_i32_0 : i32, i32
  }
  func.func @transform_2(%arg0: i32) -> (i32, i32) {
    %c0_i32 = arith.constant 0 : i32
    %c0_i32_0 = arith.constant 0 : i32
    %c0_i32_1 = arith.constant 0 : i32
    return %c0_i32, %c0_i32_0 : i32, i32
  }
  func.func @transform_3(%arg0: i32) -> (i32, i32) {
    %c0_i32 = arith.constant 0 : i32
    %c0_i32_0 = arith.constant 0 : i32
    %c0_i32_1 = arith.constant 0 : i32
    return %c0_i32, %c0_i32_0 : i32, i32
  }
  func.func @transform_4(%arg0: i32) -> (i32, i32) {
    %c0_i32 = arith.constant 0 : i32
    %c0_i32_0 = arith.constant 0 : i32
    %c0_i32_1 = arith.constant 0 : i32
    return %c0_i32, %c0_i32_0 : i32, i32
  }
  func.func @transform_5(%arg0: i32) -> (i32, i32) {
    %c0_i32 = arith.constant 0 : i32
    %c0_i32_0 = arith.constant 0 : i32
    return %arg0, %c0_i32 : i32, i32
  }
}

</mosaic_0001>

<bundles_post_ra>
// kernel: mnist_l5_forward.3
= control target key start
LH: loop header
LB: loop body
LE: loop exit
PB: predicated region body
PF: predicated region fallthrough
CT: control target
= control target key end

     0   :  { %v428_v35 = vlaneseq  ;;  %v4457_v36 = vmov 1966171168   ;;  %s5832_s0 = inlined_call_operand.vmem [shape: bf16[2,3200], index: 0, kind: input, shape index: {}]   ;;  %s5833_s1 = inlined_call_operand.vmem [shape: bf16[3200,256], index: 1, kind: input, shape index: {}]   ;;  %s5834_s2 = inlined_call_operand.vmem [shape: f32[1,256], index: 2, kind: input, shape index: {}]   ;;  %s5835_s3 = inlined_call_operand.vmem [shape: bf16[256,128], index: 3, kind: input, shape index: {}]   ;;  %s5836_s4 = inlined_call_operand.vmem [shape: f32[1,128], index: 4, kind: input, shape index: {}]   ;;  %s5837_s5 = inlined_call_operand.hbm [shape: f32[2,128], index: 5, kind: output, shape index: {}]  }
   0x1   :  { %v3812_v0 = vld [vmem:[%s5833_s1 + $0x74] ss:$8 sps:$4 sm:$0xff]   ;;  %v3814_v1 = vld [vmem:[%s5833_s1 + $0x70] ss:$8 sps:$4 sm:$0xff]   ;;  %v3818_v4 = vld [vmem:[%s5833_s1 + $0x64] ss:$8 sps:$4 sm:$0xff]   ;;  %v444_v37 = vunpack.c.l.s4 %v4457_v36 }
   0x2   :  { %2628 = vmatprep.subr.bf16.mxu0 %v3812_v0  ;;  %v3815_v2 = vld [vmem:[%s5833_s1 + $0x174] ss:$8 sps:$4 sm:$0xff]   ;;  %v3817_v3 = vld [vmem:[%s5833_s1 + $0x170] ss:$8 sps:$4 sm:$0xff]   ;;  %v3820_v5 = vld [vmem:[%s5833_s1 + $0x60] ss:$8 sps:$4 sm:$0xff]  }
   0x3   :  { %2629 = vmatpush1.bf16.msra.mxu0 %v3814_v1  ;;  %2669 = vmatprep.subr.bf16.mxu1 %v3815_v2  ;;  %v3821_v6 = vld [vmem:[%s5833_s1 + $0x164] ss:$8 sps:$4 sm:$0xff]   ;;  %v3823_v7 = vld [vmem:[%s5833_s1 + $0x160] ss:$8 sps:$4 sm:$0xff]   ;;  %v3824_v8 = vld [vmem:[%s5833_s1 + $0x54] ss:$8 sps:$4 sm:$0xff]   ;;  %v445_v43 = vunpack.c.0.s8 %v444_v37 }
   0x4   :  { %2670 = vmatpush1.bf16.msra.mxu1 %v3817_v3  ;;  %2630 = vmatprep.subr.bf16.mxu0 %v3818_v4  ;;  %v3826_v9 = vld [vmem:[%s5833_s1 + $0x50] ss:$8 sps:$4 sm:$0xff]   ;;  %v3827_v10 = vld [vmem:[%s5833_s1 + $0x154] ss:$8 sps:$4 sm:$0xff]   ;;  %v3830_v11 = vld [vmem:[%s5833_s1 + $0x44] ss:$8 sps:$4 sm:$0xff]  }
   0x5   :  { %2671 = vmatprep.subr.bf16.mxu1 %v3821_v6  ;;  %v3829_v12 = vld [vmem:[%s5833_s1 + $0x150] ss:$8 sps:$4 sm:$0xff]   ;;  %v3833_v13 = vld [vmem:[%s5833_s1 + $0x144] ss:$8 sps:$4 sm:$0xff]   ;;  %v3832_v14 = vld [vmem:[%s5833_s1 + $0x40] ss:$8 sps:$4 sm:$0xff]  }
   0x6   :  { %v3836_v15 = vld [vmem:[%s5833_s1 + $0x34] ss:$8 sps:$4 sm:$0xff]   ;;  %v3835_v16 = vld [vmem:[%s5833_s1 + $0x140] ss:$8 sps:$4 sm:$0xff]   ;;  %v3838_v18 = vld [vmem:[%s5833_s1 + $0x30] ss:$8 sps:$4 sm:$0xff]  }
   0x7   :  { %2631 = vmatpush1.bf16.msra.mxu0 %v3820_v5  ;;  %v3839_v17 = vld [vmem:[%s5833_s1 + $0x134] ss:$8 sps:$4 sm:$0xff]   ;;  %v3842_v19 = vld [vmem:[%s5833_s1 + $0x24] ss:$8 sps:$4 sm:$0xff]   ;;  %v3841_v20 = vld [vmem:[%s5833_s1 + $0x130] ss:$8 sps:$4 sm:$0xff]  }
   0x8   :  { %2632 = vmatprep.subr.bf16.mxu0 %v3824_v8  ;;  %2672 = vmatpush1.bf16.msra.mxu1 %v3823_v7  ;;  %v3845_v21 = vld [vmem:[%s5833_s1 + $0x124] ss:$8 sps:$4 sm:$0xff]   ;;  %v3844_v22 = vld [vmem:[%s5833_s1 + $0x20] ss:$8 sps:$4 sm:$0xff]   ;;  %v3848_v23 = vld [vmem:[%s5833_s1 + $0x14] ss:$8 sps:$4 sm:$0xff]  }
   0x9   :  { %2673 = vmatprep.subr.bf16.mxu1 %v3827_v10  ;;  %v3847_v24 = vld [vmem:[%s5833_s1 + $0x120] ss:$8 sps:$4 sm:$0xff]   ;;  %v3851_v25 = vld [vmem:[%s5833_s1 + $0x114] ss:$8 sps:$4 sm:$0xff]   ;;  %v3850_v26 = vld [vmem:[%s5833_s1 + $0x10] ss:$8 sps:$4 sm:$0xff]  }
   0xa   :  { %v3854_v27 = vld [vmem:[%s5833_s1 + $0x4] ss:$8 sps:$4 sm:$0xff]   ;;  %v3853_v28 = vld [vmem:[%s5833_s1 + $0x110] ss:$8 sps:$4 sm:$0xff]   ;;  %v3856_v30 = vld [vmem:[%s5833_s1] ss:$8 sps:$4 sm:$0xff]  }
   0xb   :  { %2633 = vmatpush1.bf16.msra.mxu0 %v3826_v9  ;;  %v3857_v29 = vld [vmem:[%s5833_s1 + $0x104] ss:$8 sps:$4 sm:$0xff]   ;;  %v3860_v31 = vld [vmem:[%s5833_s1 + $0xf4] ss:$8 sps:$4 sm:$0xff]   ;;  %v3859_v32 = vld [vmem:[%s5833_s1 + $0x100] ss:$8 sps:$4 sm:$0xff]  }
   0xc   :  { %2634 = vmatprep.subr.bf16.mxu0 %v3830_v11  ;;  %2674 = vmatpush1.bf16.msra.mxu1 %v3829_v12  ;;  %v3863_v33 = vld [vmem:[%s5833_s1 + $0x1f4] ss:$8 sps:$4 sm:$0xff]   ;;  %v3862_v34 = vld [vmem:[%s5833_s1 + $0xf0] ss:$8 sps:$4 sm:$0xff]   ;;  %v3866_v38 = vld [vmem:[%s5833_s1 + $0xe4] ss:$8 sps:$4 sm:$0xff]  }
   0xd   :  { %2675 = vmatprep.subr.bf16.mxu1 %v3833_v13  ;;  %v3865_v39 = vld [vmem:[%s5833_s1 + $0x1f0] ss:$8 sps:$4 sm:$0xff]   ;;  %v3869_v40 = vld [vmem:[%s5833_s1 + $0x1e4] ss:$8 sps:$4 sm:$0xff]   ;;  %v3868_v41 = vld [vmem:[%s5833_s1 + $0xe0] ss:$8 sps:$4 sm:$0xff]  }
   0xe   :  { %v4607_v42 = vshrl.u32 %v428_v35, 7  ;;  %v3872_v44 = vld [vmem:[%s5833_s1 + $0xd4] ss:$8 sps:$4 sm:$0xff]   ;;  %v3871_v45 = vld [vmem:[%s5833_s1 + $0x1e0] ss:$8 sps:$4 sm:$0xff]  }
   0xf   :  { %2635 = vmatpush1.bf16.msra.mxu0 %v3832_v14  ;;  %v3875_v46 = vld [vmem:[%s5833_s1 + $0x1d4] ss:$8 sps:$4 sm:$0xff]   ;;  %v3874_v47 = vld [vmem:[%s5833_s1 + $0xd0] ss:$8 sps:$4 sm:$0xff]   ;;  %v3878_v49 = vld [vmem:[%s5833_s1 + $0xc4] ss:$8 sps:$4 sm:$0xff]  }
  0x10   :  { %2636 = vmatprep.subr.bf16.mxu0 %v3836_v15  ;;  %2676 = vmatpush1.bf16.msra.mxu1 %v3835_v16  ;;  %v4622_v48 = vsub.s32 %v445_v43, %v4607_v42  ;;  %v3877_v50 = vld [vmem:[%s5833_s1 + $0x1d0] ss:$8 sps:$4 sm:$0xff]   ;;  %v3881_v51 = vld [vmem:[%s5833_s1 + $0x1c4] ss:$8 sps:$4 sm:$0xff]   ;;  %v3880_v53 = vld [vmem:[%s5833_s1 + $0xc0] ss:$8 sps:$4 sm:$0xff]  }
  0x11   :  { %2677 = vmatprep.subr.bf16.mxu1 %v3839_v17  ;;  %v22_v52 = vld [vmem:[%s5832_s0] sm:$0xff]  ;;  %v3884_v55 = vld [vmem:[%s5833_s1 + $0xb4] ss:$8 sps:$4 sm:$0xff]   ;;  %v3886_v59 = vld [vmem:[%s5833_s1 + $0xb0] ss:$8 sps:$4 sm:$0xff]  }
  0x12   :  { %v449_v54 = vrot.slane %v22_v52, %v4622_v48  ;;  %v3883_v56 = vld [vmem:[%s5833_s1 + $0x1c0] ss:$8 sps:$4 sm:$0xff]   ;;  %v3887_v58 = vld [vmem:[%s5833_s1 + $0x1b4] ss:$8 sps:$4 sm:$0xff]   ;;  %v3890_v61 = vld [vmem:[%s5833_s1 + $0xa4] ss:$8 sps:$4 sm:$0xff]   ;;  %v442_v63 = vcombine.high %v22_v52, %v22_v52 }
  0x13   :  { %2637 = vmatpush1.bf16.msra.mxu0 %v3838_v18  ;;  %v3889_v62 = vld [vmem:[%s5833_s1 + $0x1b0] ss:$8 sps:$4 sm:$0xff]   ;;  %v3893_v1 = vld [vmem:[%s5833_s1 + $0x1a4] ss:$8 sps:$4 sm:$0xff]   ;;  %v3892_v2 = vld [vmem:[%s5833_s1 + $0xa0] ss:$8 sps:$4 sm:$0xff]  }
  0x14   :  { %2638 = vmatprep.subr.bf16.mxu0 %v3842_v19  ;;  %2678 = vmatpush1.bf16.msra.mxu1 %v3841_v20  ;;  %v457_v57 = vcombine.high %v449_v54, %v449_v54  ;;  %v3896_v3 = vld [vmem:[%s5833_s1 + $0x94] ss:$8 sps:$4 sm:$0xff]   ;;  %v3895_v4 = vld [vmem:[%s5833_s1 + $0x1a0] ss:$8 sps:$4 sm:$0xff]   ;;  %v4672_v5 = vrot.slane %v442_v63, %v4622_v48  ;;  %v3898_v7 = vld [vmem:[%s5833_s1 + $0x90] ss:$8 sps:$4 sm:$0xff]   ;;  %v465_v13 = vrot.slane %v449_v54, %v4622_v48 }
  0x15   :  { %2679 = vmatprep.subr.bf16.mxu1 %v3845_v21  ;;  %v3899_v6 = vld [vmem:[%s5833_s1 + $0x194] ss:$8 sps:$4 sm:$0xff]   ;;  %v3902_v8 = vld [vmem:[%s5833_s1 + $0x84] ss:$8 sps:$4 sm:$0xff]   ;;  %v3901_v9 = vld [vmem:[%s5833_s1 + $0x190] ss:$8 sps:$4 sm:$0xff]  }
  0x16   :  { %v479_v60 = vrot.slane %v457_v57, %v4622_v48  ;;  %v458_v10 = vcombine.high %v4672_v5, %v4672_v5  ;;  %v3905_v11 = vld [vmem:[%s5833_s1 + $0x184] ss:$8 sps:$4 sm:$0xff]   ;;  %v3904_v12 = vld [vmem:[%s5833_s1 + $0x80] ss:$8 sps:$4 sm:$0xff]   ;;  %v3911_v14 = vld [vmem:[%s5833_s1 + $0x274] ss:$8 sps:$4 sm:$0xff]   ;;  %v487_v19 = vcombine.high %v465_v13, %v465_v13 }
  0x17   :  { %2639 = vmatpush1.bf16.msra.mxu0 %v3844_v22  ;;  %v3908_v15 = vld [vmem:[%s5833_s1 + $0x180] ss:$8 sps:$4 sm:$0xff]   ;;  %v3914_v17 = vld [vmem:[%s5833_s1 + $0x374] ss:$8 sps:$4 sm:$0xff]   ;;  %v3909_v18 = vld [vmem:[%s5833_s1 + $0x270] ss:$8 sps:$4 sm:$0xff]  }
  0x18   :  { %2640 = vmatprep.subr.bf16.mxu0 %v3848_v23  ;;  %2680 = vmatpush1.bf16.msra.mxu1 %v3847_v24  ;;  %v489_v0 = vcombine.high %v479_v60, %v479_v60  ;;  %v486_v16 = vrot.slane %v458_v10, %v4622_v48  ;;  %v3917_v20 = vld [vmem:[%s5833_s1 + $0x264] ss:$8 sps:$4 sm:$0xff]   ;;  %v3912_v21 = vld [vmem:[%s5833_s1 + $0x370] ss:$8 sps:$4 sm:$0xff]   ;;  %v3915_v24 = vld [vmem:[%s5833_s1 + $0x260] ss:$8 sps:$4 sm:$0xff]  }
  0x19   :  { %2681 = vmatprep.subr.bf16.mxu1 %v3851_v25  ;;  %2660 = vmatprep.mubr.bf16.mxu0 %v479_v60  ;;  %v3920_v23 = vld [vmem:[%s5833_s1 + $0x364] ss:$8 sps:$4 sm:$0xff]   ;;  %v3923_v25 = vld [vmem:[%s5833_s1 + $0x254] ss:$8 sps:$4 sm:$0xff]   ;;  %v3933_v36 = vld [vmem:[%s5833_s1 + $0x230] ss:$8 sps:$4 sm:$0xff]  }
  0x1a   :  { %2701 = vmatprep.mubr.bf16.mxu1 %v489_v0  ;;  %v490_v22 = vcombine.high %v486_v16, %v486_v16  ;;  %v3938_v35 = vld [vmem:[%s5833_s1 + $0x334] ss:$8 sps:$4 sm:$0xff]   ;;  %v3941_v37 = vld [vmem:[%s5833_s1 + $0x224] ss:$8 sps:$4 sm:$0xff]   ;;  %v3942_v43 = vld [vmem:[%s5833_s1 + $0x320] ss:$8 sps:$4 sm:$0xff]  }
  0x1b   :  { %2641 = vmatpush1.bf16.msra.mxu0 %v3850_v26  ;;  %v3918_v26 = vld [vmem:[%s5833_s1 + $0x360] ss:$8 sps:$4 sm:$0xff]   ;;  %v3957_v54 = vld [vmem:[%s5833_s1 + $0x2f0] ss:$8 sps:$4 sm:$0xff]   ;;  %v3968_v57 = vld [vmem:[%s5833_s1 + $0x3e4] ss:$8 sps:$4 sm:$0xff]  }
  0x1c   :  { %2642 = vmatprep.subr.bf16.mxu0 %v3854_v27  ;;  %2682 = vmatpush1.bf16.msra.mxu1 %v3853_v28  ;;  %v3926_v27 = vld [vmem:[%s5833_s1 + $0x354] ss:$8 sps:$4 sm:$0xff]   ;;  %v3921_v28 = vld [vmem:[%s5833_s1 + $0x250] ss:$8 sps:$4 sm:$0xff]   ;;  %v3954_v52 = vld [vmem:[%s5833_s1 + $0x300] ss:$8 sps:$4 sm:$0xff]  }
  0x1d   :  { %2683 = vmatprep.subr.bf16.mxu1 %v3857_v29  ;;  %v3929_v29 = vld [vmem:[%s5833_s1 + $0x244] ss:$8 sps:$4 sm:$0xff]   ;;  %v3966_v60 = vld [vmem:[%s5833_s1 + $0x3e0] ss:$8 sps:$4 sm:$0xff]   ;;  %v3972_v0 = vld [vmem:[%s5833_s1 + $0x3d0] ss:$8 sps:$4 sm:$0xff]  }
  0x1e   :  { %v3977_v63 = vld [vmem:[%s5833_s1 + $0x2c4] ss:$8 sps:$4 sm:$0xff]  }
  0x1f   :  { %2643 = vmatpush1.bf16.msra.mxu0 %v3856_v30  ;;  %v3924_v30 = vld [vmem:[%s5833_s1 + $0x350] ss:$8 sps:$4 sm:$0xff]   ;;  %v3992_v10 = vld [vmem:[%s5833_s1 + $0x3a4] ss:$8 sps:$4 sm:$0xff]  }
  0x20   :  { %2644 = vmatprep.subr.bf16.mxu0 %v3860_v31  ;;  %2684 = vmatpush1.bf16.msra.mxu1 %v3859_v32  ;;  %v3932_v31 = vld [vmem:[%s5833_s1 + $0x344] ss:$8 sps:$4 sm:$0xff]   ;;  %v3927_v32 = vld [vmem:[%s5833_s1 + $0x240] ss:$8 sps:$4 sm:$0xff]  }
  0x21   :  { %2685 = vmatprep.subr.bf16.mxu1 %v3863_v33  ;;  %v3935_v33 = vld [vmem:[%s5833_s1 + $0x234] ss:$8 sps:$4 sm:$0xff]  }
  0x23   :  { %2645 = vmatpush2.bf16.msra.mxu0 %v3862_v34  ;;  %v3930_v34 = vld [vmem:[%s5833_s1 + $0x340] ss:$8 sps:$4 sm:$0xff]  }
  0x24   :  { %2646 = vmatprep.subr.bf16.mxu0 %v3866_v38  ;;  %2686 = vmatpush2.bf16.msra.mxu1 %v3865_v39  ;;  %v3936_v38 = vld [vmem:[%s5833_s1 + $0x330] ss:$8 sps:$4 sm:$0xff]   ;;  %v3944_v39 = vld [vmem:[%s5833_s1 + $0x324] ss:$8 sps:$4 sm:$0xff]  }
  0x25   :  { %2687 = vmatprep.subr.bf16.mxu1 %v3869_v40  ;;  %v3939_v40 = vld [vmem:[%s5833_s1 + $0x220] ss:$8 sps:$4 sm:$0xff]  }
  0x27   :  { %2647 = vmatpush2.bf16.msra.mxu0 %v3868_v41  ;;  %v3947_v41 = vld [vmem:[%s5833_s1 + $0x214] ss:$8 sps:$4 sm:$0xff]  }
  0x28   :  { %2648 = vmatprep.subr.bf16.mxu0 %v3872_v44  ;;  %2688 = vmatpush2.bf16.msra.mxu1 %v3871_v45  ;;  %v3950_v44 = vld [vmem:[%s5833_s1 + $0x314] ss:$8 sps:$4 sm:$0xff]   ;;  %v3945_v45 = vld [vmem:[%s5833_s1 + $0x210] ss:$8 sps:$4 sm:$0xff]  }
  0x29   :  { %2689 = vmatprep.subr.bf16.mxu1 %v3875_v46  ;;  %v3953_v46 = vld [vmem:[%s5833_s1 + $0x204] ss:$8 sps:$4 sm:$0xff]  }
  0x2b   :  { %2649 = vmatpush2.bf16.msra.mxu0 %v3874_v47  ;;  %v3948_v47 = vld [vmem:[%s5833_s1 + $0x310] ss:$8 sps:$4 sm:$0xff]  }
  0x2c   :  { %2650 = vmatprep.subr.bf16.mxu0 %v3878_v49  ;;  %2690 = vmatpush2.bf16.msra.mxu1 %v3877_v50  ;;  %v3956_v49 = vld [vmem:[%s5833_s1 + $0x304] ss:$8 sps:$4 sm:$0xff]   ;;  %v3951_v50 = vld [vmem:[%s5833_s1 + $0x200] ss:$8 sps:$4 sm:$0xff]  }
  0x2d   :  { %2691 = vmatprep.subr.bf16.mxu1 %v3881_v51  ;;  %v3959_v51 = vld [vmem:[%s5833_s1 + $0x2f4] ss:$8 sps:$4 sm:$0xff]  }
  0x2f   :  { %2651 = vmatpush2.bf16.msra.mxu0 %v3880_v53  ;;  %v3962_v53 = vld [vmem:[%s5833_s1 + $0x3f4] ss:$8 sps:$4 sm:$0xff]  }
  0x30   :  { %2652 = vmatprep.subr.bf16.mxu0 %v3884_v55  ;;  %2692 = vmatpush2.bf16.msra.mxu1 %v3883_v56  ;;  %v3965_v55 = vld [vmem:[%s5833_s1 + $0x2e4] ss:$8 sps:$4 sm:$0xff]   ;;  %v3960_v56 = vld [vmem:[%s5833_s1 + $0x3f0] ss:$8 sps:$4 sm:$0xff]  }
  0x31   :  { %2693 = vmatprep.subr.bf16.mxu1 %v3887_v58  ;;  %v3963_v58 = vld [vmem:[%s5833_s1 + $0x2e0] ss:$8 sps:$4 sm:$0xff]  }
  0x33   :  { %2653 = vmatpush2.bf16.msra.mxu0 %v3886_v59  ;;  %v3971_v59 = vld [vmem:[%s5833_s1 + $0x2d4] ss:$8 sps:$4 sm:$0xff]  }
  0x34   :  { %2654 = vmatprep.subr.bf16.mxu0 %v3890_v61  ;;  %2694 = vmatpush2.bf16.msra.mxu1 %v3889_v62  ;;  %v3974_v61 = vld [vmem:[%s5833_s1 + $0x3d4] ss:$8 sps:$4 sm:$0xff]   ;;  %v3969_v62 = vld [vmem:[%s5833_s1 + $0x2d0] ss:$8 sps:$4 sm:$0xff]  }
  0x35   :  { %2695 = vmatprep.subr.bf16.mxu1 %v3893_v1  ;;  %v3980_v1 = vld [vmem:[%s5833_s1 + $0x3c4] ss:$8 sps:$4 sm:$0xff]  }
  0x37   :  { %2655 = vmatpush2.bf16.msra.mxu0 %v3892_v2  ;;  %v3975_v2 = vld [vmem:[%s5833_s1 + $0x2c0] ss:$8 sps:$4 sm:$0xff]  }
  0x38   :  { %2656 = vmatprep.subr.bf16.mxu0 %v3896_v3  ;;  %2696 = vmatpush2.bf16.msra.mxu1 %v3895_v4  ;;  %v3983_v3 = vld [vmem:[%s5833_s1 + $0x2b4] ss:$8 sps:$4 sm:$0xff]   ;;  %v3978_v4 = vld [vmem:[%s5833_s1 + $0x3c0] ss:$8 sps:$4 sm:$0xff]  }
  0x39   :  { %2697 = vmatprep.subr.bf16.mxu1 %v3899_v6  ;;  %v3986_v6 = vld [vmem:[%s5833_s1 + $0x3b4] ss:$8 sps:$4 sm:$0xff]  }
  0x3b   :  { %2657 = vmatpush2.bf16.msra.mxu0 %v3898_v7  ;;  %v3981_v7 = vld [vmem:[%s5833_s1 + $0x2b0] ss:$8 sps:$4 sm:$0xff]  }
  0x3c   :  { %2658 = vmatprep.subr.bf16.mxu0 %v3902_v8  ;;  %2698 = vmatpush2.bf16.msra.mxu1 %v3901_v9  ;;  %v3989_v8 = vld [vmem:[%s5833_s1 + $0x2a4] ss:$8 sps:$4 sm:$0xff]   ;;  %v3984_v9 = vld [vmem:[%s5833_s1 + $0x3b0] ss:$8 sps:$4 sm:$0xff]  }
  0x3d   :  { %2699 = vmatprep.subr.bf16.mxu1 %v3905_v11  ;;  %v3987_v11 = vld [vmem:[%s5833_s1 + $0x2a0] ss:$8 sps:$4 sm:$0xff]  }
  0x3f   :  { %2659 = vmatpush2.bf16.msra.mxu0 %v3904_v12  ;;  %v3995_v12 = vld [vmem:[%s5833_s1 + $0x294] ss:$8 sps:$4 sm:$0xff]  }
  0x40   :  { %2710 = vmatprep.subr.bf16.mxu0 %v3911_v14  ;;  %2700 = vmatpush2.bf16.msra.mxu1 %v3908_v15  ;;  %v3998_v14 = vld [vmem:[%s5833_s1 + $0x394] ss:$8 sps:$4 sm:$0xff]   ;;  %v3993_v15 = vld [vmem:[%s5833_s1 + $0x290] ss:$8 sps:$4 sm:$0xff]  }
  0x41   :  { %2751 = vmatprep.subr.bf16.mxu1 %v3914_v17  ;;  %v3996_v17 = vld [vmem:[%s5833_s1 + $0x390] ss:$8 sps:$4 sm:$0xff]  }
  0x42   :  { %2661 = vmatmul.mubr.bf16.vlgmr.msra.gmra.mxu0 %v465_v13  ;;  %v3990_v13 = vld [vmem:[%s5833_s1 + $0x3a0] ss:$8 sps:$4 sm:$0xff]  }
  0x43   :  { %2711 = vmatpush1.bf16.msra.mxu0 %v3909_v18  ;;  %2742 = vmatprep.mubr.bf16.mxu0 %v486_v16  ;;  %v4001_v16 = vld [vmem:[%s5833_s1 + $0x284] ss:$8 sps:$4 sm:$0xff]  }
  0x44   :  { %2702 = vmatmul.mubr.bf16.vlgmr.msra.gmra.mxu1 %v487_v19  ;;  %2712 = vmatprep.subr.bf16.mxu0 %v3917_v20  ;;  %v4004_v18 = vld [vmem:[%s5833_s1 + $0x384] ss:$8 sps:$4 sm:$0xff]   ;;  %v3999_v19 = vld [vmem:[%s5833_s1 + $0x280] ss:$8 sps:$4 sm:$0xff]   ;;  %v472_v20 = vrot.slane %v4672_v5, %v4622_v48 }
  0x45   :  { %2752 = vmatpush1.bf16.msra.mxu1 %v3912_v21  ;;  %2783 = vmatprep.mubr.bf16.mxu1 %v490_v22  ;;  %v4007_v21 = vld [vmem:[%s5833_s1 + $0x474] ss:$8 sps:$4 sm:$0xff]   ;;  %v4002_v22 = vld [vmem:[%s5833_s1 + $0x380] ss:$8 sps:$4 sm:$0xff]  }
  0x46   :  { %2753 = vmatprep.subr.bf16.mxu1 %v3920_v23  ;;  %v4010_v23 = vld [vmem:[%s5833_s1 + $0x574] ss:$8 sps:$4 sm:$0xff]   ;;  %v488_v5 = vcombine.high %v472_v20, %v472_v20 }
  0x47   :  { %2713 = vmatpush1.bf16.msra.mxu0 %v3915_v24  ;;  %v4005_v24 = vld [vmem:[%s5833_s1 + $0x470] ss:$8 sps:$4 sm:$0xff]  }
  0x48   :  { %2714 = vmatprep.subr.bf16.mxu0 %v3923_v25  ;;  %v4013_v25 = vld [vmem:[%s5833_s1 + $0x464] ss:$8 sps:$4 sm:$0xff]  }
  0x49   :  { %2754 = vmatpush1.bf16.msra.mxu1 %v3918_v26  ;;  %v4908_v26 = vld [vmem:[%s5832_s0 + $0x8] sm:$0xff] }
  0x4a   :  { %2755 = vmatprep.subr.bf16.mxu1 %v3926_v27  ;;  %v4008_v27 = vld [vmem:[%s5833_s1 + $0x570] ss:$8 sps:$4 sm:$0xff]  }
  0x4b   :  { %2715 = vmatpush1.bf16.msra.mxu0 %v3921_v28  ;;  %v4915_v28 = vrot.slane %v4908_v26, %v4622_v48 }
  0x4c   :  { %2716 = vmatprep.subr.bf16.mxu0 %v3929_v29  ;;  %v4016_v29 = vld [vmem:[%s5833_s1 + $0x564] ss:$8 sps:$4 sm:$0xff]  }
  0x4d   :  { %2756 = vmatpush1.bf16.msra.mxu1 %v3924_v30  ;;  %v4011_v30 = vld [vmem:[%s5833_s1 + $0x460] ss:$8 sps:$4 sm:$0xff]  }
  0x4e   :  { %2757 = vmatprep.subr.bf16.mxu1 %v3932_v31  ;;  %v506_v31 = vcombine.high %v4915_v28, %v4915_v28 }
  0x4f   :  { %2717 = vmatpush1.bf16.msra.mxu0 %v3927_v32  ;;  %v4019_v32 = vld [vmem:[%s5833_s1 + $0x454] ss:$8 sps:$4 sm:$0xff]  }
  0x50   :  { %2718 = vmatprep.subr.bf16.mxu0 %v3935_v33  ;;  %v4014_v33 = vld [vmem:[%s5833_s1 + $0x560] ss:$8 sps:$4 sm:$0xff]  }
  0x51   :  { %2758 = vmatpush1.bf16.msra.mxu1 %v3930_v34  ;;  %v528_v34 = vrot.slane %v506_v31, %v4622_v48  ;;  %v4095_v31 = vld [vmem:[%s5833_s1 + $0x480] ss:$8 sps:$4 sm:$0xff]  }
  0x52   :  { %2759 = vmatprep.subr.bf16.mxu1 %v3938_v35  ;;  %v4022_v35 = vld [vmem:[%s5833_s1 + $0x554] ss:$8 sps:$4 sm:$0xff]  }
  0x53   :  { %2719 = vmatpush1.bf16.msra.mxu0 %v3933_v36  ;;  %v4017_v36 = vld [vmem:[%s5833_s1 + $0x450] ss:$8 sps:$4 sm:$0xff]  }
  0x54   :  { %2720 = vmatprep.subr.bf16.mxu0 %v3941_v37  ;;  %v538_v37 = vcombine.high %v528_v34, %v528_v34 }
  0x55   :  { %2760 = vmatpush1.bf16.msra.mxu1 %v3936_v38  ;;  %v4025_v38 = vld [vmem:[%s5833_s1 + $0x444] ss:$8 sps:$4 sm:$0xff]  }
  0x56   :  { %2761 = vmatprep.subr.bf16.mxu1 %v3944_v39  ;;  %v4020_v39 = vld [vmem:[%s5833_s1 + $0x550] ss:$8 sps:$4 sm:$0xff]  }
  0x57   :  { %2721 = vmatpush1.bf16.msra.mxu0 %v3939_v40  ;;  %v4028_v40 = vld [vmem:[%s5833_s1 + $0x544] ss:$8 sps:$4 sm:$0xff]  }
  0x58   :  { %2722 = vmatprep.subr.bf16.mxu0 %v3947_v41  ;;  %v4023_v41 = vld [vmem:[%s5833_s1 + $0x440] ss:$8 sps:$4 sm:$0xff]  }
  0x59   :  { %2762 = vmatpush1.bf16.msra.mxu1 %v3942_v43  ;;  %v4031_v43 = vld [vmem:[%s5833_s1 + $0x434] ss:$8 sps:$4 sm:$0xff]  }
  0x5a   :  { %2763 = vmatprep.subr.bf16.mxu1 %v3950_v44  ;;  %v4026_v44 = vld [vmem:[%s5833_s1 + $0x540] ss:$8 sps:$4 sm:$0xff]  }
  0x5b   :  { %2723 = vmatpush1.bf16.msra.mxu0 %v3945_v45  ;;  %v4034_v45 = vld [vmem:[%s5833_s1 + $0x534] ss:$8 sps:$4 sm:$0xff]  }
  0x5c   :  { %2724 = vmatprep.subr.bf16.mxu0 %v3953_v46  ;;  %v4029_v46 = vld [vmem:[%s5833_s1 + $0x430] ss:$8 sps:$4 sm:$0xff]  }
  0x5d   :  { %2764 = vmatpush1.bf16.msra.mxu1 %v3948_v47  ;;  %v4037_v47 = vld [vmem:[%s5833_s1 + $0x424] ss:$8 sps:$4 sm:$0xff]  }
  0x5e   :  { %2765 = vmatprep.subr.bf16.mxu1 %v3956_v49  ;;  %v4032_v49 = vld [vmem:[%s5833_s1 + $0x530] ss:$8 sps:$4 sm:$0xff]  }
  0x5f   :  { %2725 = vmatpush1.bf16.msra.mxu0 %v3951_v50  ;;  %v4040_v50 = vld [vmem:[%s5833_s1 + $0x524] ss:$8 sps:$4 sm:$0xff]  }
  0x60   :  { %2726 = vmatprep.subr.bf16.mxu0 %v3959_v51  ;;  %v4035_v51 = vld [vmem:[%s5833_s1 + $0x420] ss:$8 sps:$4 sm:$0xff]  }
  0x61   :  { %2766 = vmatpush1.bf16.msra.mxu1 %v3954_v52  ;;  %v4043_v52 = vld [vmem:[%s5833_s1 + $0x414] ss:$8 sps:$4 sm:$0xff]  }
  0x62   :  { %2767 = vmatprep.subr.bf16.mxu1 %v3962_v53  ;;  %v4038_v53 = vld [vmem:[%s5833_s1 + $0x520] ss:$8 sps:$4 sm:$0xff]  }
  0x63   :  { %2727 = vmatpush2.bf16.msra.mxu0 %v3957_v54  ;;  %v4046_v54 = vld [vmem:[%s5833_s1 + $0x514] ss:$8 sps:$4 sm:$0xff]  }
  0x64   :  { %2728 = vmatprep.subr.bf16.mxu0 %v3965_v55  ;;  %v4041_v55 = vld [vmem:[%s5833_s1 + $0x410] ss:$8 sps:$4 sm:$0xff]  }
  0x65   :  { %2768 = vmatpush2.bf16.msra.mxu1 %v3960_v56  ;;  %v4049_v56 = vld [vmem:[%s5833_s1 + $0x404] ss:$8 sps:$4 sm:$0xff]  }
  0x66   :  { %2769 = vmatprep.subr.bf16.mxu1 %v3968_v57  ;;  %v4044_v57 = vld [vmem:[%s5833_s1 + $0x510] ss:$8 sps:$4 sm:$0xff]  }
  0x67   :  { %2729 = vmatpush2.bf16.msra.mxu0 %v3963_v58  ;;  %v4052_v58 = vld [vmem:[%s5833_s1 + $0x504] ss:$8 sps:$4 sm:$0xff]  }
  0x68   :  { %2730 = vmatprep.subr.bf16.mxu0 %v3971_v59  ;;  %v4047_v59 = vld [vmem:[%s5833_s1 + $0x400] ss:$8 sps:$4 sm:$0xff]  }
  0x69   :  { %2770 = vmatpush2.bf16.msra.mxu1 %v3966_v60  ;;  %v4055_v60 = vld [vmem:[%s5833_s1 + $0x4f4] ss:$8 sps:$4 sm:$0xff]  }
  0x6a   :  { %2771 = vmatprep.subr.bf16.mxu1 %v3974_v61  ;;  %v4050_v61 = vld [vmem:[%s5833_s1 + $0x500] ss:$8 sps:$4 sm:$0xff]  }
  0x6b   :  { %2731 = vmatpush2.bf16.msra.mxu0 %v3969_v62  ;;  %v4058_v62 = vld [vmem:[%s5833_s1 + $0x5f4] ss:$8 sps:$4 sm:$0xff]  }
  0x6c   :  { %2732 = vmatprep.subr.bf16.mxu0 %v3977_v63  ;;  %v4053_v63 = vld [vmem:[%s5833_s1 + $0x4f0] ss:$8 sps:$4 sm:$0xff]  }
  0x6d   :  { %2772 = vmatpush2.bf16.msra.mxu1 %v3972_v0  ;;  %v4061_v0 = vld [vmem:[%s5833_s1 + $0x4e4] ss:$8 sps:$4 sm:$0xff]  }
  0x6e   :  { %2773 = vmatprep.subr.bf16.mxu1 %v3980_v1  ;;  %v4056_v1 = vld [vmem:[%s5833_s1 + $0x5f0] ss:$8 sps:$4 sm:$0xff]  }
  0x6f   :  { %2733 = vmatpush2.bf16.msra.mxu0 %v3975_v2  ;;  %v4064_v2 = vld [vmem:[%s5833_s1 + $0x5e4] ss:$8 sps:$4 sm:$0xff]  }
  0x70   :  { %2734 = vmatprep.subr.bf16.mxu0 %v3983_v3  ;;  %v4059_v3 = vld [vmem:[%s5833_s1 + $0x4e0] ss:$8 sps:$4 sm:$0xff]  }
  0x71   :  { %2774 = vmatpush2.bf16.msra.mxu1 %v3978_v4  ;;  %v4067_v4 = vld [vmem:[%s5833_s1 + $0x4d4] ss:$8 sps:$4 sm:$0xff]  }
  0x72   :  { %2775 = vmatprep.subr.bf16.mxu1 %v3986_v6  ;;  %v4062_v6 = vld [vmem:[%s5833_s1 + $0x5e0] ss:$8 sps:$4 sm:$0xff]  }
  0x73   :  { %2735 = vmatpush2.bf16.msra.mxu0 %v3981_v7  ;;  %v4070_v7 = vld [vmem:[%s5833_s1 + $0x5d4] ss:$8 sps:$4 sm:$0xff]  }
  0x74   :  { %2736 = vmatprep.subr.bf16.mxu0 %v3989_v8  ;;  %v4065_v8 = vld [vmem:[%s5833_s1 + $0x4d0] ss:$8 sps:$4 sm:$0xff]  }
  0x75   :  { %2776 = vmatpush2.bf16.msra.mxu1 %v3984_v9  ;;  %v4073_v9 = vld [vmem:[%s5833_s1 + $0x4c4] ss:$8 sps:$4 sm:$0xff]  }
  0x76   :  { %2777 = vmatprep.subr.bf16.mxu1 %v3992_v10  ;;  %v4068_v10 = vld [vmem:[%s5833_s1 + $0x5d0] ss:$8 sps:$4 sm:$0xff]  }
  0x77   :  { %2737 = vmatpush2.bf16.msra.mxu0 %v3987_v11  ;;  %v4076_v11 = vld [vmem:[%s5833_s1 + $0x5c4] ss:$8 sps:$4 sm:$0xff]  }
  0x78   :  { %2738 = vmatprep.subr.bf16.mxu0 %v3995_v12  ;;  %v4071_v12 = vld [vmem:[%s5833_s1 + $0x4c0] ss:$8 sps:$4 sm:$0xff]  }
  0x79   :  { %2778 = vmatpush2.bf16.msra.mxu1 %v3990_v13  ;;  %v4079_v13 = vld [vmem:[%s5833_s1 + $0x4b4] ss:$8 sps:$4 sm:$0xff]  }
  0x7a   :  { %2779 = vmatprep.subr.bf16.mxu1 %v3998_v14  ;;  %v4074_v14 = vld [vmem:[%s5833_s1 + $0x5c0] ss:$8 sps:$4 sm:$0xff]  }
  0x7b   :  { %2739 = vmatpush2.bf16.msra.mxu0 %v3993_v15  ;;  %v4082_v15 = vld [vmem:[%s5833_s1 + $0x5b4] ss:$8 sps:$4 sm:$0xff]  }
  0x7c   :  { %2740 = vmatprep.subr.bf16.mxu0 %v4001_v16  ;;  %v4077_v16 = vld [vmem:[%s5833_s1 + $0x4b0] ss:$8 sps:$4 sm:$0xff]  }
  0x7d   :  { %2780 = vmatpush2.bf16.msra.mxu1 %v3996_v17  ;;  %v4085_v17 = vld [vmem:[%s5833_s1 + $0x4a4] ss:$8 sps:$4 sm:$0xff]  }
  0x7e   :  { %2781 = vmatprep.subr.bf16.mxu1 %v4004_v18  ;;  %v4080_v18 = vld [vmem:[%s5833_s1 + $0x5b0] ss:$8 sps:$4 sm:$0xff]  }
  0x7f   :  { %2741 = vmatpush2.bf16.msra.mxu0 %v3999_v19  ;;  %v491_v19 = vcombine.high %v4908_v26, %v4908_v26  ;;  %v4097_v26 = vld [vmem:[%s5833_s1 + $0x484] ss:$8 sps:$4 sm:$0xff]  }
  0x80   :  { %2792 = vmatprep.subr.bf16.mxu0 %v4007_v21  ;;  %v4083_v21 = vld [vmem:[%s5833_s1 + $0x4a0] ss:$8 sps:$4 sm:$0xff]  }
  0x81   :  { %2782 = vmatpush2.bf16.msra.mxu1 %v4002_v22  ;;  %v4091_v22 = vld [vmem:[%s5833_s1 + $0x494] ss:$8 sps:$4 sm:$0xff]  }
  0x82   :  { %2743 = vmatmul.mubr.bf16.vlgmr.msra.gmra.mxu0 %v472_v20  ;;  %2833 = vmatprep.subr.bf16.mxu1 %v4010_v23  ;;  %v4088_v20 = vld [vmem:[%s5833_s1 + $0x5a4] ss:$8 sps:$4 sm:$0xff]   ;;  %v4086_v23 = vld [vmem:[%s5833_s1 + $0x5a0] ss:$8 sps:$4 sm:$0xff]  }
  0x83   :  { %2793 = vmatpush1.bf16.msra.mxu0 %v4005_v24  ;;  %2824 = vmatprep.mubr.bf16.mxu0 %v528_v34  ;;  %v5079_v24 = vrot.slane %v491_v19, %v4622_v48  ;;  %v4098_v34 = vld [vmem:[%s5833_s1 + $0x580] ss:$8 sps:$4 sm:$0xff]   ;;  %v4164_v19 = vld [vmem:[%s5833_s1 + $0x7d0] ss:$8 sps:$4 sm:$0xff]  }
  0x84   :  { %2784 = vmatmul.mubr.bf16.vlgmr.msra.gmra.mxu1 %v488_v5  ;;  %2794 = vmatprep.subr.bf16.mxu0 %v4013_v25  ;;  %v4094_v5 = vld [vmem:[%s5833_s1 + $0x594] ss:$8 sps:$4 sm:$0xff]   ;;  %v4089_v25 = vld [vmem:[%s5833_s1 + $0x490] ss:$8 sps:$4 sm:$0xff]  }
  0x85   :  { %2834 = vmatpush1.bf16.msra.mxu1 %v4008_v27  ;;  %2865 = vmatprep.mubr.bf16.mxu1 %v538_v37  ;;  %v4092_v27 = vld [vmem:[%s5833_s1 + $0x590] ss:$8 sps:$4 sm:$0xff]  }
  0x86   :  { %2835 = vmatprep.subr.bf16.mxu1 %v4016_v29  ;;  %v507_v29 = vcombine.high %v5079_v24, %v5079_v24 }
  0x87   :  { %2795 = vmatpush1.bf16.msra.mxu0 %v4011_v30  ;;  %v4100_v30 = vld [vmem:[%s5833_s1 + $0x584] ss:$8 sps:$4 sm:$0xff]  }
  0x88   :  { %2796 = vmatprep.subr.bf16.mxu0 %v4019_v32  ;;  %v514_v32 = vrot.slane %v4915_v28, %v4622_v48  ;;  %v4101_v28 = vld [vmem:[%s5833_s1 + $0x670] ss:$8 sps:$4 sm:$0xff]  }
  0x89   :  { %2836 = vmatpush1.bf16.msra.mxu1 %v4014_v33  ;;  %v4103_v33 = vld [vmem:[%s5833_s1 + $0x674] ss:$8 sps:$4 sm:$0xff]  }
  0x8a   :  { %2837 = vmatprep.subr.bf16.mxu1 %v4022_v35  ;;  %v535_v35 = vrot.slane %v507_v29, %v4622_v48  ;;  %v536_v37 = vcombine.high %v514_v32, %v514_v32  ;;  %v4184_v29 = vld [vmem:[%s5833_s1 + $0x7a4] ss:$8 sps:$4 sm:$0xff]  }
  0x8b   :  { %2797 = vmatpush1.bf16.msra.mxu0 %v4017_v36  ;;  %v4106_v36 = vld [vmem:[%s5833_s1 + $0x774] ss:$8 sps:$4 sm:$0xff]  }
  0x8c   :  { %2798 = vmatprep.subr.bf16.mxu0 %v4025_v38  ;;  %v4109_v38 = vld [vmem:[%s5833_s1 + $0x664] ss:$8 sps:$4 sm:$0xff]  }
  0x8d   :  { %2838 = vmatpush1.bf16.msra.mxu1 %v4020_v39  ;;  %v4104_v39 = vld [vmem:[%s5833_s1 + $0x770] ss:$8 sps:$4 sm:$0xff]  }
  0x8e   :  { %2839 = vmatprep.subr.bf16.mxu1 %v4028_v40  ;;  %v539_v40 = vcombine.high %v535_v35, %v535_v35 }
  0x8f   :  { %2799 = vmatpush1.bf16.msra.mxu0 %v4023_v41  ;;  %v4112_v41 = vld [vmem:[%s5833_s1 + $0x764] ss:$8 sps:$4 sm:$0xff]  }
  0x90   :  { %2800 = vmatprep.subr.bf16.mxu0 %v4031_v43  ;;  %v4107_v43 = vld [vmem:[%s5833_s1 + $0x660] ss:$8 sps:$4 sm:$0xff]  }
  0x91   :  { %2840 = vmatpush1.bf16.msra.mxu1 %v4026_v44  ;;  %v4115_v44 = vld [vmem:[%s5833_s1 + $0x654] ss:$8 sps:$4 sm:$0xff]  }
  0x92   :  { %2841 = vmatprep.subr.bf16.mxu1 %v4034_v45  ;;  %v4110_v45 = vld [vmem:[%s5833_s1 + $0x760] ss:$8 sps:$4 sm:$0xff]  }
  0x93   :  { %2801 = vmatpush1.bf16.msra.mxu0 %v4029_v46  ;;  %v4118_v46 = vld [vmem:[%s5833_s1 + $0x754] ss:$8 sps:$4 sm:$0xff]  }
  0x94   :  { %2802 = vmatprep.subr.bf16.mxu0 %v4037_v47  ;;  %v4113_v47 = vld [vmem:[%s5833_s1 + $0x650] ss:$8 sps:$4 sm:$0xff]  }
  0x95   :  { %2842 = vmatpush1.bf16.msra.mxu1 %v4032_v49  ;;  %v4121_v49 = vld [vmem:[%s5833_s1 + $0x644] ss:$8 sps:$4 sm:$0xff]  }
  0x96   :  { %2843 = vmatprep.subr.bf16.mxu1 %v4040_v50  ;;  %v4116_v50 = vld [vmem:[%s5833_s1 + $0x750] ss:$8 sps:$4 sm:$0xff]  }
  0x97   :  { %2803 = vmatpush1.bf16.msra.mxu0 %v4035_v51  ;;  %v4124_v51 = vld [vmem:[%s5833_s1 + $0x744] ss:$8 sps:$4 sm:$0xff]  }
  0x98   :  { %2804 = vmatprep.subr.bf16.mxu0 %v4043_v52  ;;  %v4119_v52 = vld [vmem:[%s5833_s1 + $0x640] ss:$8 sps:$4 sm:$0xff]  }
  0x99   :  { %2844 = vmatpush1.bf16.msra.mxu1 %v4038_v53  ;;  %v4127_v53 = vld [vmem:[%s5833_s1 + $0x634] ss:$8 sps:$4 sm:$0xff]  }
  0x9a   :  { %2845 = vmatprep.subr.bf16.mxu1 %v4046_v54  ;;  %v4122_v54 = vld [vmem:[%s5833_s1 + $0x740] ss:$8 sps:$4 sm:$0xff]  }
  0x9b   :  { %2805 = vmatpush1.bf16.msra.mxu0 %v4041_v55  ;;  %v4130_v55 = vld [vmem:[%s5833_s1 + $0x734] ss:$8 sps:$4 sm:$0xff]  }
  0x9c   :  { %2806 = vmatprep.subr.bf16.mxu0 %v4049_v56  ;;  %v4125_v56 = vld [vmem:[%s5833_s1 + $0x630] ss:$8 sps:$4 sm:$0xff]  }
  0x9d   :  { %2846 = vmatpush1.bf16.msra.mxu1 %v4044_v57  ;;  %v4133_v57 = vld [vmem:[%s5833_s1 + $0x624] ss:$8 sps:$4 sm:$0xff]  }
  0x9e   :  { %2847 = vmatprep.subr.bf16.mxu1 %v4052_v58  ;;  %v4128_v58 = vld [vmem:[%s5833_s1 + $0x730] ss:$8 sps:$4 sm:$0xff]  }
  0x9f   :  { %2807 = vmatpush1.bf16.msra.mxu0 %v4047_v59  ;;  %v4136_v59 = vld [vmem:[%s5833_s1 + $0x724] ss:$8 sps:$4 sm:$0xff]  }
  0xa0   :  { %2808 = vmatprep.subr.bf16.mxu0 %v4055_v60  ;;  %v4131_v60 = vld [vmem:[%s5833_s1 + $0x620] ss:$8 sps:$4 sm:$0xff]  }
  0xa1   :  { %2848 = vmatpush1.bf16.msra.mxu1 %v4050_v61  ;;  %v4139_v61 = vld [vmem:[%s5833_s1 + $0x614] ss:$8 sps:$4 sm:$0xff]  }
  0xa2   :  { %2849 = vmatprep.subr.bf16.mxu1 %v4058_v62  ;;  %v4134_v62 = vld [vmem:[%s5833_s1 + $0x720] ss:$8 sps:$4 sm:$0xff]  }
  0xa3   :  { %2809 = vmatpush2.bf16.msra.mxu0 %v4053_v63  ;;  %v4142_v63 = vld [vmem:[%s5833_s1 + $0x714] ss:$8 sps:$4 sm:$0xff]  }
  0xa4   :  { %2810 = vmatprep.subr.bf16.mxu0 %v4061_v0  ;;  %v4137_v0 = vld [vmem:[%s5833_s1 + $0x610] ss:$8 sps:$4 sm:$0xff]  }
  0xa5   :  { %2850 = vmatpush2.bf16.msra.mxu1 %v4056_v1  ;;  %v4145_v1 = vld [vmem:[%s5833_s1 + $0x604] ss:$8 sps:$4 sm:$0xff]  }
  0xa6   :  { %2851 = vmatprep.subr.bf16.mxu1 %v4064_v2  ;;  %v4140_v2 = vld [vmem:[%s5833_s1 + $0x710] ss:$8 sps:$4 sm:$0xff]  }
  0xa7   :  { %2811 = vmatpush2.bf16.msra.mxu0 %v4059_v3  ;;  %v4148_v3 = vld [vmem:[%s5833_s1 + $0x704] ss:$8 sps:$4 sm:$0xff]  }
  0xa8   :  { %2812 = vmatprep.subr.bf16.mxu0 %v4067_v4  ;;  %v4143_v4 = vld [vmem:[%s5833_s1 + $0x600] ss:$8 sps:$4 sm:$0xff]  }
  0xa9   :  { %2852 = vmatpush2.bf16.msra.mxu1 %v4062_v6  ;;  %v4151_v6 = vld [vmem:[%s5833_s1 + $0x6f4] ss:$8 sps:$4 sm:$0xff]  }
  0xaa   :  { %2853 = vmatprep.subr.bf16.mxu1 %v4070_v7  ;;  %v4146_v7 = vld [vmem:[%s5833_s1 + $0x700] ss:$8 sps:$4 sm:$0xff]  }
  0xab   :  { %2813 = vmatpush2.bf16.msra.mxu0 %v4065_v8  ;;  %v4154_v8 = vld [vmem:[%s5833_s1 + $0x7f4] ss:$8 sps:$4 sm:$0xff]  }
  0xac   :  { %2814 = vmatprep.subr.bf16.mxu0 %v4073_v9  ;;  %v4149_v9 = vld [vmem:[%s5833_s1 + $0x6f0] ss:$8 sps:$4 sm:$0xff]  }
  0xad   :  { %2854 = vmatpush2.bf16.msra.mxu1 %v4068_v10  ;;  %v4157_v10 = vld [vmem:[%s5833_s1 + $0x6e4] ss:$8 sps:$4 sm:$0xff]  }
  0xae   :  { %2855 = vmatprep.subr.bf16.mxu1 %v4076_v11  ;;  %v4152_v11 = vld [vmem:[%s5833_s1 + $0x7f0] ss:$8 sps:$4 sm:$0xff]  }
  0xaf   :  { %2815 = vmatpush2.bf16.msra.mxu0 %v4071_v12  ;;  %v4160_v12 = vld [vmem:[%s5833_s1 + $0x7e4] ss:$8 sps:$4 sm:$0xff]  }
  0xb0   :  { %2816 = vmatprep.subr.bf16.mxu0 %v4079_v13  ;;  %v4155_v13 = vld [vmem:[%s5833_s1 + $0x6e0] ss:$8 sps:$4 sm:$0xff]  }
  0xb1   :  { %2856 = vmatpush2.bf16.msra.mxu1 %v4074_v14  ;;  %v4163_v14 = vld [vmem:[%s5833_s1 + $0x6d4] ss:$8 sps:$4 sm:$0xff]  }
  0xb2   :  { %2857 = vmatprep.subr.bf16.mxu1 %v4082_v15  ;;  %v4158_v15 = vld [vmem:[%s5833_s1 + $0x7e0] ss:$8 sps:$4 sm:$0xff]  }
  0xb3   :  { %2817 = vmatpush2.bf16.msra.mxu0 %v4077_v16  ;;  %v4166_v16 = vld [vmem:[%s5833_s1 + $0x7d4] ss:$8 sps:$4 sm:$0xff]  }
  0xb4   :  { %2818 = vmatprep.subr.bf16.mxu0 %v4085_v17  ;;  %v4161_v17 = vld [vmem:[%s5833_s1 + $0x6d0] ss:$8 sps:$4 sm:$0xff]  }
  0xb5   :  { %2858 = vmatpush2.bf16.msra.mxu1 %v4080_v18  ;;  %v4169_v18 = vld [vmem:[%s5833_s1 + $0x6c4] ss:$8 sps:$4 sm:$0xff]  }
  0xb6   :  { %2859 = vmatprep.subr.bf16.mxu1 %v4088_v20  ;;  %v4172_v20 = vld [vmem:[%s5833_s1 + $0x7c4] ss:$8 sps:$4 sm:$0xff]  }
  0xb7   :  { %2819 = vmatpush2.bf16.msra.mxu0 %v4083_v21  ;;  %v4167_v21 = vld [vmem:[%s5833_s1 + $0x6c0] ss:$8 sps:$4 sm:$0xff]  }
  0xb8   :  { %2820 = vmatprep.subr.bf16.mxu0 %v4091_v22  ;;  %v4175_v22 = vld [vmem:[%s5833_s1 + $0x6b4] ss:$8 sps:$4 sm:$0xff]  }
  0xb9   :  { %2860 = vmatpush2.bf16.msra.mxu1 %v4086_v23  ;;  %v4170_v23 = vld [vmem:[%s5833_s1 + $0x7c0] ss:$8 sps:$4 sm:$0xff]  }
  0xba   :  { %2861 = vmatprep.subr.bf16.mxu1 %v4094_v5  ;;  %v4178_v5 = vld [vmem:[%s5833_s1 + $0x7b4] ss:$8 sps:$4 sm:$0xff]  }
  0xbb   :  { %2821 = vmatpush2.bf16.msra.mxu0 %v4089_v25  ;;  %v4173_v25 = vld [vmem:[%s5833_s1 + $0x6b0] ss:$8 sps:$4 sm:$0xff]  }
  0xbc   :  { %2822 = vmatprep.subr.bf16.mxu0 %v4097_v26  ;;  %v4181_v26 = vld [vmem:[%s5833_s1 + $0x6a4] ss:$8 sps:$4 sm:$0xff]  }
  0xbd   :  { %2862 = vmatpush2.bf16.msra.mxu1 %v4092_v27  ;;  %v4176_v27 = vld [vmem:[%s5833_s1 + $0x7b0] ss:$8 sps:$4 sm:$0xff]  }
  0xbe   :  { %2863 = vmatprep.subr.bf16.mxu1 %v4100_v30  ;;  %v5272_v30 = vld [vmem:[%s5832_s0 + $0x10] sm:$0xff] }
  0xbf   :  { %2823 = vmatpush2.bf16.msra.mxu0 %v4095_v31  ;;  %v4179_v31 = vld [vmem:[%s5833_s1 + $0x6a0] ss:$8 sps:$4 sm:$0xff]  }
  0xc0   :  { %2874 = vmatprep.subr.bf16.mxu0 %v4103_v33  ;;  %v4182_v33 = vld [vmem:[%s5833_s1 + $0x7a0] ss:$8 sps:$4 sm:$0xff]  }
  0xc1   :  { %2864 = vmatpush2.bf16.msra.mxu1 %v4098_v34  ;;  %v5285_v34 = vrot.slane %v5272_v30, %v4622_v48 }
  0xc2   :  { %2825 = vmatmul.mubr.bf16.vlgmr.msra.gmra.mxu0 %v514_v32  ;;  %2915 = vmatprep.subr.bf16.mxu1 %v4106_v36  ;;  %v4187_v32 = vld [vmem:[%s5833_s1 + $0x694] ss:$8 sps:$4 sm:$0xff]   ;;  %v4185_v36 = vld [vmem:[%s5833_s1 + $0x690] ss:$8 sps:$4 sm:$0xff]  }
  0xc3   :  { %2875 = vmatpush1.bf16.msra.mxu0 %v4101_v28  ;;  %2906 = vmatprep.mubr.bf16.mxu0 %v535_v35  ;;  %v4190_v35 = vld [vmem:[%s5833_s1 + $0x794] ss:$8 sps:$4 sm:$0xff]   ;;  %v4193_v28 = vld [vmem:[%s5833_s1 + $0x684] ss:$8 sps:$4 sm:$0xff]  }
  0xc4   :  { %2866 = vmatmul.mubr.bf16.vlgmr.msra.gmra.mxu1 %v536_v37  ;;  %2876 = vmatprep.subr.bf16.mxu0 %v4109_v38  ;;  %v4188_v37 = vld [vmem:[%s5833_s1 + $0x790] ss:$8 sps:$4 sm:$0xff]   ;;  %v555_v38 = vcombine.high %v5285_v34, %v5285_v34 }
  0xc5   :  { %2916 = vmatpush1.bf16.msra.mxu1 %v4104_v39  ;;  %2947 = vmatprep.mubr.bf16.mxu1 %v539_v40  ;;  %v4196_v39 = vld [vmem:[%s5833_s1 + $0x784] ss:$8 sps:$4 sm:$0xff]   ;;  %v4191_v40 = vld [vmem:[%s5833_s1 + $0x680] ss:$8 sps:$4 sm:$0xff]  }
  0xc6   :  { %2917 = vmatprep.subr.bf16.mxu1 %v4112_v41  ;;  %v426_v41 = vld [vmem:[%s5834_s2] sm:$0x3] }
  0xc7   :  { %2877 = vmatpush1.bf16.msra.mxu0 %v4107_v43  ;;  %v430_v43 = vsub.s32 0, %v4607_v42 }
  0xc8   :  { %2878 = vmatprep.subr.bf16.mxu0 %v4115_v44  ;;  %v521_v44 = vrot.slane %v5079_v24, %v4622_v48 }
  0xc9   :  { %2918 = vmatpush1.bf16.msra.mxu1 %v4110_v45  ;;  %v4200_v45 = vld [vmem:[%s5833_s1 + $0x874] ss:$8 sps:$4 sm:$0xff]   ;;  %v431_v24 = vrot.slane %v426_v41, %v430_v43 }
  0xca   :  { %2919 = vmatprep.subr.bf16.mxu1 %v4118_v46  ;;  %v4194_v46 = vld [vmem:[%s5833_s1 + $0x780] ss:$8 sps:$4 sm:$0xff]  }
  0xcb   :  { %2879 = vmatpush1.bf16.msra.mxu0 %v4113_v47  ;;  %v434_v47 = vsub.s32 1, %v4607_v42 }
  0xcc   :  { %2880 = vmatprep.subr.bf16.mxu0 %v4121_v49  ;;  %v577_v49 = vrot.slane %v555_v38, %v4622_v48 }
  0xcd   :  { %2920 = vmatpush1.bf16.msra.mxu1 %v4116_v50  ;;  %v4203_v50 = vld [vmem:[%s5833_s1 + $0x974] ss:$8 sps:$4 sm:$0xff]   ;;  %v435_v42 = vrot.slane %v426_v41, %v434_v47 }
  0xce   :  { %2921 = vmatprep.subr.bf16.mxu1 %v4124_v51  ;;  %v4198_v51 = vld [vmem:[%s5833_s1 + $0x870] ss:$8 sps:$4 sm:$0xff]  }
  0xcf   :  { %2881 = vmatpush1.bf16.msra.mxu0 %v4119_v52  ;;  %v537_v52 = vcombine.high %v521_v44, %v521_v44 }
  0xd0   :  { %2882 = vmatprep.subr.bf16.mxu0 %v4127_v53  ;;  %v4206_v53 = vld [vmem:[%s5833_s1 + $0x864] ss:$8 sps:$4 sm:$0xff]  }
  0xd1   :  { %2922 = vmatpush1.bf16.msra.mxu1 %v4122_v54  ;;  %v4201_v54 = vld [vmem:[%s5833_s1 + $0x970] ss:$8 sps:$4 sm:$0xff]  }
  0xd2   :  { %2923 = vmatprep.subr.bf16.mxu1 %v4130_v55  ;;  %v587_v55 = vcombine.high %v577_v49, %v577_v49 }
  0xd3   :  { %2883 = vmatpush1.bf16.msra.mxu0 %v4125_v56 }
  0xd4   :  { %2884 = vmatprep.subr.bf16.mxu0 %v4133_v57  ;;  %v4204_v57 = vld [vmem:[%s5833_s1 + $0x860] ss:$8 sps:$4 sm:$0xff]  }
  0xd5   :  { %2924 = vmatpush1.bf16.msra.mxu1 %v4128_v58  ;;  %v4209_v58 = vld [vmem:[%s5833_s1 + $0x964] ss:$8 sps:$4 sm:$0xff]  }
  0xd6   :  { %2925 = vmatprep.subr.bf16.mxu1 %v4136_v59 }
  0xd7   :  { %2885 = vmatpush1.bf16.msra.mxu0 %v4131_v60  ;;  %v4207_v60 = vld [vmem:[%s5833_s1 + $0x960] ss:$8 sps:$4 sm:$0xff]  }
  0xd8   :  { %2886 = vmatprep.subr.bf16.mxu0 %v4139_v61 }
  0xd9   :  { %2926 = vmatpush1.bf16.msra.mxu1 %v4134_v62 }
  0xda   :  { %2927 = vmatprep.subr.bf16.mxu1 %v4142_v63  ;;  %v4212_v63 = vld [vmem:[%s5833_s1 + $0x854] ss:$8 sps:$4 sm:$0xff]  }
  0xdb   :  { %2887 = vmatpush1.bf16.msra.mxu0 %v4137_v0 }
  0xdc   :  { %2888 = vmatprep.subr.bf16.mxu0 %v4145_v1 }
  0xdd   :  { %2928 = vmatpush1.bf16.msra.mxu1 %v4140_v2  ;;  %v4210_v2 = vld [vmem:[%s5833_s1 + $0x850] ss:$8 sps:$4 sm:$0xff]  }
  0xde   :  { %2929 = vmatprep.subr.bf16.mxu1 %v4148_v3  ;;  %v4215_v3 = vld [vmem:[%s5833_s1 + $0x954] ss:$8 sps:$4 sm:$0xff]  }
  0xdf   :  { %2889 = vmatpush1.bf16.msra.mxu0 %v4143_v4 }
  0xe0   :  { %2890 = vmatprep.subr.bf16.mxu0 %v4151_v6 }
  0xe1   :  { %2930 = vmatpush1.bf16.msra.mxu1 %v4146_v7 }
  0xe2   :  { %2931 = vmatprep.subr.bf16.mxu1 %v4154_v8  ;;  %v4213_v8 = vld [vmem:[%s5833_s1 + $0x950] ss:$8 sps:$4 sm:$0xff]  }
  0xe3   :  { %2891 = vmatpush2.bf16.msra.mxu0 %v4149_v9 }
  0xe4   :  { %2892 = vmatprep.subr.bf16.mxu0 %v4157_v10  ;;  %v4218_v10 = vld [vmem:[%s5833_s1 + $0x844] ss:$8 sps:$4 sm:$0xff]  }
  0xe5   :  { %2932 = vmatpush2.bf16.msra.mxu1 %v4152_v11  ;;  %v4221_v11 = vld [vmem:[%s5833_s1 + $0x944] ss:$8 sps:$4 sm:$0xff]  }
  0xe6   :  { %2933 = vmatprep.subr.bf16.mxu1 %v4160_v12 }
  0xe7   :  { %2893 = vmatpush2.bf16.msra.mxu0 %v4155_v13  ;;  %v4216_v13 = vld [vmem:[%s5833_s1 + $0x840] ss:$8 sps:$4 sm:$0xff]  }
  0xe8   :  { %2894 = vmatprep.subr.bf16.mxu0 %v4163_v14 }
  0xe9   :  { %2934 = vmatpush2.bf16.msra.mxu1 %v4158_v15  ;;  %v4219_v15 = vld [vmem:[%s5833_s1 + $0x940] ss:$8 sps:$4 sm:$0xff]  }
  0xea   :  { %2935 = vmatprep.subr.bf16.mxu1 %v4166_v16  ;;  %v4224_v16 = vld [vmem:[%s5833_s1 + $0x834] ss:$8 sps:$4 sm:$0xff]  }
  0xeb   :  { %2895 = vmatpush2.bf16.msra.mxu0 %v4161_v17  ;;  %v4227_v17 = vld [vmem:[%s5833_s1 + $0x934] ss:$8 sps:$4 sm:$0xff]  }
  0xec   :  { %2896 = vmatprep.subr.bf16.mxu0 %v4169_v18  ;;  %v4222_v18 = vld [vmem:[%s5833_s1 + $0x830] ss:$8 sps:$4 sm:$0xff]  }
  0xed   :  { %2936 = vmatpush2.bf16.msra.mxu1 %v4164_v19  ;;  %v4225_v19 = vld [vmem:[%s5833_s1 + $0x930] ss:$8 sps:$4 sm:$0xff]  }
  0xee   :  { %2937 = vmatprep.subr.bf16.mxu1 %v4172_v20  ;;  %v4230_v20 = vld [vmem:[%s5833_s1 + $0x824] ss:$8 sps:$4 sm:$0xff]  }
  0xef   :  { %2897 = vmatpush2.bf16.msra.mxu0 %v4167_v21  ;;  %v4233_v21 = vld [vmem:[%s5833_s1 + $0x924] ss:$8 sps:$4 sm:$0xff]  }
  0xf0   :  { %2898 = vmatprep.subr.bf16.mxu0 %v4175_v22  ;;  %v4228_v22 = vld [vmem:[%s5833_s1 + $0x820] ss:$8 sps:$4 sm:$0xff]  }
  0xf1   :  { %2938 = vmatpush2.bf16.msra.mxu1 %v4170_v23  ;;  %v4236_v23 = vld [vmem:[%s5833_s1 + $0x814] ss:$8 sps:$4 sm:$0xff]  }
  0xf2   :  { %2939 = vmatprep.subr.bf16.mxu1 %v4178_v5  ;;  %v4231_v5 = vld [vmem:[%s5833_s1 + $0x920] ss:$8 sps:$4 sm:$0xff]  }
  0xf3   :  { %2899 = vmatpush2.bf16.msra.mxu0 %v4173_v25 }
  0xf4   :  { %2900 = vmatprep.subr.bf16.mxu0 %v4181_v26 }
  0xf5   :  { %2940 = vmatpush2.bf16.msra.mxu1 %v4176_v27 }
  0xf6   :  { %2941 = vmatprep.subr.bf16.mxu1 %v4184_v29 }
  0xf7   :  { %2901 = vmatpush2.bf16.msra.mxu0 %v4179_v31 }
  0xf8   :  { %2902 = vmatprep.subr.bf16.mxu0 %v4187_v32 }
  0xf9   :  { %2942 = vmatpush2.bf16.msra.mxu1 %v4182_v33 }
  0xfa   :  { %2943 = vmatprep.subr.bf16.mxu1 %v4190_v35 }
  0xfb   :  { %2903 = vmatpush2.bf16.msra.mxu0 %v4185_v36 }
  0xfc   :  { %2904 = vmatprep.subr.bf16.mxu0 %v4193_v28 }
  0xfd   :  { %2944 = vmatpush2.bf16.msra.mxu1 %v4188_v37 }
  0xfe   :  { %2945 = vmatprep.subr.bf16.mxu1 %v4196_v39 }
  0xff   :  { %2905 = vmatpush2.bf16.msra.mxu0 %v4191_v40 }
 0x100   :  { %2956 = vmatprep.subr.bf16.mxu0 %v4200_v45 }
 0x101   :  { %2946 = vmatpush2.bf16.msra.mxu1 %v4194_v46 }
 0x102   :  { %v2662_v56 = vpop.f32.mrf.mxu0  ;;  %2907 = vmatmul.mubr.bf16.vlgmr.msra.gmra.mxu0 %v521_v44  ;;  %2997 = vmatprep.subr.bf16.mxu1 %v4203_v50 }
 0x103   :  { %v2663_v59 = vadd.f32 %v2662_v56, %v431_v24  ;;  %2957 = vmatpush1.bf16.msra.mxu0 %v4198_v51  ;;  %2988 = vmatprep.mubr.bf16.mxu0 %v577_v49 }
 0x104   :  { %v2664_v61 = vpop.f32.mrf.mxu0  ;;  %v2703_v62 = vpop.f32.mrf.mxu1  ;;  %2948 = vmatmul.mubr.bf16.vlgmr.msra.gmra.mxu1 %v537_v52  ;;  %2958 = vmatprep.subr.bf16.mxu0 %v4206_v53 }
 0x105   :  { %v2665_v0 = vadd.f32 %v2664_v61, %v435_v42  ;;  %v5345_v1 = vadd.f32 %v2703_v62, %v2663_v59  ;;  %2998 = vmatpush1.bf16.msra.mxu1 %v4201_v54  ;;  %3029 = vmatprep.mubr.bf16.mxu1 %v587_v55 }
 0x106   :  { %v2666_v4 = vpop.f32.mrf.mxu0  ;;  %v2705_v6 = vpop.f32.mrf.mxu1  ;;  %2999 = vmatprep.subr.bf16.mxu1 %v4209_v58 }
 0x107   :  { %v5353_v7 = vadd.f32 %v2705_v6, %v2665_v0  ;;  %2959 = vmatpush1.bf16.msra.mxu0 %v4204_v57 }
 0x108   :  { %v2667_v9 = vpop.f32.mrf.mxu0  ;;  %2960 = vmatprep.subr.bf16.mxu0 %v4212_v63  ;;  %v2707_v12 = vpop.f32.mrf.mxu1 }
 0x109   :  { %3000 = vmatpush1.bf16.msra.mxu1 %v4207_v60 }
 0x10a   :  { %3001 = vmatprep.subr.bf16.mxu1 %v4215_v3  ;;  %v2708_v14 = vpop.f32.mrf.mxu1 }
 0x10b   :  { %2961 = vmatpush1.bf16.msra.mxu0 %v4210_v2 }
 0x10c   :  { %2962 = vmatprep.subr.bf16.mxu0 %v4218_v10 }
 0x10d   :  { %3002 = vmatpush1.bf16.msra.mxu1 %v4213_v8 }
 0x10e   :  { %3003 = vmatprep.subr.bf16.mxu1 %v4221_v11 }
 0x10f   :  { %2963 = vmatpush1.bf16.msra.mxu0 %v4216_v13 }
 0x110   :  { %2964 = vmatprep.subr.bf16.mxu0 %v4224_v16 }
 0x111   :  { %3004 = vmatpush1.bf16.msra.mxu1 %v4219_v15 }
 0x112   :  { %3005 = vmatprep.subr.bf16.mxu1 %v4227_v17 }
 0x113   :  { %2965 = vmatpush1.bf16.msra.mxu0 %v4222_v18 }
 0x114   :  { %2966 = vmatprep.subr.bf16.mxu0 %v4230_v20 }
 0x115   :  { %3006 = vmatpush1.bf16.msra.mxu1 %v4225_v19 }
 0x116   :  { %10 = vsyncpa [#allocation3], 0  ;;  %3007 = vmatprep.subr.bf16.mxu1 %v4233_v21  ;;  %v4239_v25 = vld [vmem:[%s5833_s1 + $0x914] ss:$8 sps:$4 sm:$0xff]   ;;  %v4234_v26 = vld [vmem:[%s5833_s1 + $0x810] ss:$8 sps:$4 sm:$0xff]   ;;  %v540_v55 = vcombine.high %v5272_v30, %v5272_v30  ;;  %v563_v4 = vrot.slane %v5285_v34, %v4622_v48 }
 0x117   :  { %2967 = vmatpush1.bf16.msra.mxu0 %v4228_v22  ;;  %v4242_v27 = vld [vmem:[%s5833_s1 + $0x804] ss:$8 sps:$4 sm:$0xff]   ;;  %v4237_v29 = vld [vmem:[%s5833_s1 + $0x910] ss:$8 sps:$4 sm:$0xff]   ;;  %v4240_v32 = vld [vmem:[%s5833_s1 + $0x800] ss:$8 sps:$4 sm:$0xff]  }
 0x118   :  { %2968 = vmatprep.subr.bf16.mxu0 %v4236_v23  ;;  %v4245_v31 = vld [vmem:[%s5833_s1 + $0x904] ss:$8 sps:$4 sm:$0xff]   ;;  %v4248_v33 = vld [vmem:[%s5833_s1 + $0x8f4] ss:$8 sps:$4 sm:$0xff]   ;;  %v4243_v35 = vld [vmem:[%s5833_s1 + $0x900] ss:$8 sps:$4 sm:$0xff]   ;;  %v5496_v59 = vrot.slane %v540_v55, %v4622_v48  ;;  %v585_v11 = vcombine.high %v563_v4, %v563_v4 }
 0x119   :  { %3008 = vmatpush1.bf16.msra.mxu1 %v4231_v5  ;;  %v4251_v36 = vld [vmem:[%s5833_s1 + $0x9f4] ss:$8 sps:$4 sm:$0xff]   ;;  %v4246_v28 = vld [vmem:[%s5833_s1 + $0x8f0] ss:$8 sps:$4 sm:$0xff]   ;;  %v4254_v37 = vld [vmem:[%s5833_s1 + $0x8e4] ss:$8 sps:$4 sm:$0xff]  }
 0x11a   :  { %3009 = vmatprep.subr.bf16.mxu1 %v4239_v25  ;;  %v4249_v38 = vld [vmem:[%s5833_s1 + $0x9f0] ss:$8 sps:$4 sm:$0xff]   ;;  %v4257_v39 = vld [vmem:[%s5833_s1 + $0x9e4] ss:$8 sps:$4 sm:$0xff]   ;;  %v4252_v40 = vld [vmem:[%s5833_s1 + $0x8e0] ss:$8 sps:$4 sm:$0xff]   ;;  %v556_v0 = vcombine.high %v5496_v59, %v5496_v59 }
 0x11b   :  { %2969 = vmatpush1.bf16.msra.mxu0 %v4234_v26  ;;  %v4260_v41 = vld [vmem:[%s5833_s1 + $0x8d4] ss:$8 sps:$4 sm:$0xff]   ;;  %v4255_v43 = vld [vmem:[%s5833_s1 + $0x9e0] ss:$8 sps:$4 sm:$0xff]   ;;  %v4258_v45 = vld [vmem:[%s5833_s1 + $0x8d0] ss:$8 sps:$4 sm:$0xff]  }
 0x11c   :  { %2970 = vmatprep.subr.bf16.mxu0 %v4242_v27  ;;  %v4263_v44 = vld [vmem:[%s5833_s1 + $0x9d4] ss:$8 sps:$4 sm:$0xff]   ;;  %v4266_v46 = vld [vmem:[%s5833_s1 + $0x8c4] ss:$8 sps:$4 sm:$0xff]   ;;  %v4261_v47 = vld [vmem:[%s5833_s1 + $0x9d0] ss:$8 sps:$4 sm:$0xff]   ;;  %v584_v9 = vrot.slane %v556_v0, %v4622_v48 }
 0x11d   :  { %3010 = vmatpush1.bf16.msra.mxu1 %v4237_v29  ;;  %v4269_v49 = vld [vmem:[%s5833_s1 + $0x9c4] ss:$8 sps:$4 sm:$0xff]   ;;  %v4264_v50 = vld [vmem:[%s5833_s1 + $0x8c0] ss:$8 sps:$4 sm:$0xff]   ;;  %v4272_v24 = vld [vmem:[%s5833_s1 + $0x8b4] ss:$8 sps:$4 sm:$0xff]  }
 0x11e   :  { %3011 = vmatprep.subr.bf16.mxu1 %v4245_v31  ;;  %v4267_v51 = vld [vmem:[%s5833_s1 + $0x9c0] ss:$8 sps:$4 sm:$0xff]   ;;  %v4275_v52 = vld [vmem:[%s5833_s1 + $0x9b4] ss:$8 sps:$4 sm:$0xff]   ;;  %v4270_v53 = vld [vmem:[%s5833_s1 + $0x8b0] ss:$8 sps:$4 sm:$0xff]   ;;  %v588_v14 = vcombine.high %v584_v9, %v584_v9 }
 0x11f   :  { %2971 = vmatpush1.bf16.msra.mxu0 %v4240_v32  ;;  %v4278_v42 = vld [vmem:[%s5833_s1 + $0x8a4] ss:$8 sps:$4 sm:$0xff]   ;;  %v4273_v54 = vld [vmem:[%s5833_s1 + $0x9b0] ss:$8 sps:$4 sm:$0xff]   ;;  %v4276_v57 = vld [vmem:[%s5833_s1 + $0x8a0] ss:$8 sps:$4 sm:$0xff]  }
 0x120   :  { %2972 = vmatprep.subr.bf16.mxu0 %v4248_v33  ;;  %v4281_v56 = vld [vmem:[%s5833_s1 + $0x9a4] ss:$8 sps:$4 sm:$0xff]   ;;  %v4284_v58 = vld [vmem:[%s5833_s1 + $0x894] ss:$8 sps:$4 sm:$0xff]   ;;  %v4279_v30 = vld [vmem:[%s5833_s1 + $0x9a0] ss:$8 sps:$4 sm:$0xff]  }
 0x121   :  { %3012 = vmatpush1.bf16.msra.mxu1 %v4243_v35  ;;  %v4287_v60 = vld [vmem:[%s5833_s1 + $0x994] ss:$8 sps:$4 sm:$0xff]   ;;  %v4282_v61 = vld [vmem:[%s5833_s1 + $0x890] ss:$8 sps:$4 sm:$0xff]   ;;  %v4290_v62 = vld [vmem:[%s5833_s1 + $0x884] ss:$8 sps:$4 sm:$0xff]  }
 0x122   :  { %3013 = vmatprep.subr.bf16.mxu1 %v4251_v36  ;;  %v4285_v63 = vld [vmem:[%s5833_s1 + $0x990] ss:$8 sps:$4 sm:$0xff]   ;;  %v4293_v2 = vld [vmem:[%s5833_s1 + $0x984] ss:$8 sps:$4 sm:$0xff]   ;;  %v4288_v3 = vld [vmem:[%s5833_s1 + $0x880] ss:$8 sps:$4 sm:$0xff]  }
 0x123   :  { %2973 = vmatpush2.bf16.msra.mxu0 %v4246_v28  ;;  %v4296_v6 = vld [vmem:[%s5833_s1 + $0xa74] ss:$8 sps:$4 sm:$0xff]   ;;  %v4291_v8 = vld [vmem:[%s5833_s1 + $0x980] ss:$8 sps:$4 sm:$0xff]   ;;  %v4294_v34 = vld [vmem:[%s5833_s1 + $0xa70] ss:$8 sps:$4 sm:$0xff]  }
 0x124   :  { %2974 = vmatprep.subr.bf16.mxu0 %v4254_v37  ;;  %v4299_v10 = vld [vmem:[%s5833_s1 + $0xb74] ss:$8 sps:$4 sm:$0xff]   ;;  %v4302_v12 = vld [vmem:[%s5833_s1 + $0xa64] ss:$8 sps:$4 sm:$0xff]   ;;  %v4297_v13 = vld [vmem:[%s5833_s1 + $0xb70] ss:$8 sps:$4 sm:$0xff]  }
 0x125   :  { %3014 = vmatpush2.bf16.msra.mxu1 %v4249_v38  ;;  %v4305_v16 = vld [vmem:[%s5833_s1 + $0xb64] ss:$8 sps:$4 sm:$0xff]   ;;  %v4300_v18 = vld [vmem:[%s5833_s1 + $0xa60] ss:$8 sps:$4 sm:$0xff]   ;;  %v4308_v21 = vld [vmem:[%s5833_s1 + $0xa54] ss:$8 sps:$4 sm:$0xff]  }
 0x126   :  { %3015 = vmatprep.subr.bf16.mxu1 %v4257_v39  ;;  %v4311_v26 = vld [vmem:[%s5833_s1 + $0xb54] ss:$8 sps:$4 sm:$0xff]   ;;  %v4314_v31 = vld [vmem:[%s5833_s1 + $0xa44] ss:$8 sps:$4 sm:$0xff]   ;;  %v4309_v33 = vld [vmem:[%s5833_s1 + $0xb50] ss:$8 sps:$4 sm:$0xff]  }
 0x127   :  { %2975 = vmatpush2.bf16.msra.mxu0 %v4252_v40  ;;  %v4317_v35 = vld [vmem:[%s5833_s1 + $0xb44] ss:$8 sps:$4 sm:$0xff]   ;;  %v4312_v28 = vld [vmem:[%s5833_s1 + $0xa40] ss:$8 sps:$4 sm:$0xff]   ;;  %v4320_v37 = vld [vmem:[%s5833_s1 + $0xa34] ss:$8 sps:$4 sm:$0xff]  }
 0x128   :  { %2976 = vmatprep.subr.bf16.mxu0 %v4260_v41  ;;  %v4315_v38 = vld [vmem:[%s5833_s1 + $0xb40] ss:$8 sps:$4 sm:$0xff]   ;;  %v4323_v39 = vld [vmem:[%s5833_s1 + $0xb34] ss:$8 sps:$4 sm:$0xff]   ;;  %v4318_v40 = vld [vmem:[%s5833_s1 + $0xa30] ss:$8 sps:$4 sm:$0xff]  }
 0x129   :  { %3016 = vmatpush2.bf16.msra.mxu1 %v4255_v43  ;;  %v4326_v41 = vld [vmem:[%s5833_s1 + $0xa24] ss:$8 sps:$4 sm:$0xff]   ;;  %v4321_v43 = vld [vmem:[%s5833_s1 + $0xb30] ss:$8 sps:$4 sm:$0xff]   ;;  %v4347_v55 = vld [vmem:[%s5833_s1 + $0xbf4] ss:$8 sps:$4 sm:$0xff]  }
 0x12a   :  { %3017 = vmatprep.subr.bf16.mxu1 %v4263_v44  ;;  %v4329_v44 = vld [vmem:[%s5833_s1 + $0xb24] ss:$8 sps:$4 sm:$0xff]   ;;  %v4354_v0 = vld [vmem:[%s5833_s1 + $0xad0] ss:$8 sps:$4 sm:$0xff]   ;;  %vm3340_vm0 = vcmask 1041408  }
 0x12b   :  { %2977 = vmatpush2.bf16.msra.mxu0 %v4258_v45  ;;  %v4324_v45 = vld [vmem:[%s5833_s1 + $0xa20] ss:$8 sps:$4 sm:$0xff]  }
 0x12c   :  { %2978 = vmatprep.subr.bf16.mxu0 %v4266_v46  ;;  %v4332_v46 = vld [vmem:[%s5833_s1 + $0xa14] ss:$8 sps:$4 sm:$0xff]  }
 0x12d   :  { %3018 = vmatpush2.bf16.msra.mxu1 %v4261_v47  ;;  %v4327_v47 = vld [vmem:[%s5833_s1 + $0xb20] ss:$8 sps:$4 sm:$0xff]  }
 0x12e   :  { %3019 = vmatprep.subr.bf16.mxu1 %v4269_v49  ;;  %v4335_v49 = vld [vmem:[%s5833_s1 + $0xb14] ss:$8 sps:$4 sm:$0xff]  }
 0x12f   :  { %2979 = vmatpush2.bf16.msra.mxu0 %v4264_v50  ;;  %v4330_v50 = vld [vmem:[%s5833_s1 + $0xa10] ss:$8 sps:$4 sm:$0xff]  }
 0x130   :  { %2980 = vmatprep.subr.bf16.mxu0 %v4272_v24  ;;  %v4338_v24 = vld [vmem:[%s5833_s1 + $0xa04] ss:$8 sps:$4 sm:$0xff]  }
 0x131   :  { %3020 = vmatpush2.bf16.msra.mxu1 %v4267_v51  ;;  %v4333_v51 = vld [vmem:[%s5833_s1 + $0xb10] ss:$8 sps:$4 sm:$0xff]  }
 0x132   :  { %3021 = vmatprep.subr.bf16.mxu1 %v4275_v52  ;;  %v4341_v52 = vld [vmem:[%s5833_s1 + $0xb04] ss:$8 sps:$4 sm:$0xff]  }
 0x133   :  { %2981 = vmatpush2.bf16.msra.mxu0 %v4270_v53  ;;  %v4336_v53 = vld [vmem:[%s5833_s1 + $0xa00] ss:$8 sps:$4 sm:$0xff]  }
 0x134   :  { %2982 = vmatprep.subr.bf16.mxu0 %v4278_v42  ;;  %v4344_v42 = vld [vmem:[%s5833_s1 + $0xaf4] ss:$8 sps:$4 sm:$0xff]  }
 0x135   :  { %3022 = vmatpush2.bf16.msra.mxu1 %v4273_v54  ;;  %v4339_v54 = vld [vmem:[%s5833_s1 + $0xb00] ss:$8 sps:$4 sm:$0xff]  }
 0x136   :  { %3023 = vmatprep.subr.bf16.mxu1 %v4281_v56  ;;  %v4342_v56 = vld [vmem:[%s5833_s1 + $0xaf0] ss:$8 sps:$4 sm:$0xff]  }
 0x137   :  { %2983 = vmatpush2.bf16.msra.mxu0 %v4276_v57  ;;  %v4350_v57 = vld [vmem:[%s5833_s1 + $0xae4] ss:$8 sps:$4 sm:$0xff]  }
 0x138   :  { %2984 = vmatprep.subr.bf16.mxu0 %v4284_v58  ;;  %v4345_v58 = vld [vmem:[%s5833_s1 + $0xbf0] ss:$8 sps:$4 sm:$0xff]  }
 0x139   :  { %3024 = vmatpush2.bf16.msra.mxu1 %v4279_v30  ;;  %v4353_v30 = vld [vmem:[%s5833_s1 + $0xbe4] ss:$8 sps:$4 sm:$0xff]  }
 0x13a   :  { %3025 = vmatprep.subr.bf16.mxu1 %v4287_v60  ;;  %v4348_v60 = vld [vmem:[%s5833_s1 + $0xae0] ss:$8 sps:$4 sm:$0xff]  }
 0x13b   :  { %2985 = vmatpush2.bf16.msra.mxu0 %v4282_v61  ;;  %v4356_v61 = vld [vmem:[%s5833_s1 + $0xad4] ss:$8 sps:$4 sm:$0xff]  }
 0x13c   :  { %2986 = vmatprep.subr.bf16.mxu0 %v4290_v62  ;;  %v4351_v62 = vld [vmem:[%s5833_s1 + $0xbe0] ss:$8 sps:$4 sm:$0xff]  }
 0x13d   :  { %3026 = vmatpush2.bf16.msra.mxu1 %v4285_v63  ;;  %v4359_v63 = vld [vmem:[%s5833_s1 + $0xbd4] ss:$8 sps:$4 sm:$0xff]  }
 0x13e   :  { %3027 = vmatprep.subr.bf16.mxu1 %v4293_v2  ;;  %v4362_v2 = vld [vmem:[%s5833_s1 + $0xac4] ss:$8 sps:$4 sm:$0xff]  }
 0x13f   :  { %2987 = vmatpush2.bf16.msra.mxu0 %v4288_v3  ;;  %v4357_v3 = vld [vmem:[%s5833_s1 + $0xbd0] ss:$8 sps:$4 sm:$0xff]  }
 0x140   :  { %3038 = vmatprep.subr.bf16.mxu0 %v4296_v6  ;;  %v4360_v6 = vld [vmem:[%s5833_s1 + $0xac0] ss:$8 sps:$4 sm:$0xff]  }
 0x141   :  { %3028 = vmatpush2.bf16.msra.mxu1 %v4291_v8  ;;  %v4368_v8 = vld [vmem:[%s5833_s1 + $0xab4] ss:$8 sps:$4 sm:$0xff]  }
 0x142   :  { %v2744_v15 = vpop.f32.mrf.mxu0  ;;  %2989 = vmatmul.mubr.bf16.vlgmr.msra.gmra.mxu0 %v563_v4  ;;  %3079 = vmatprep.subr.bf16.mxu1 %v4299_v10  ;;  %v4365_v4 = vld [vmem:[%s5833_s1 + $0xbc4] ss:$8 sps:$4 sm:$0xff]   ;;  %v4371_v10 = vld [vmem:[%s5833_s1 + $0xbb4] ss:$8 sps:$4 sm:$0xff]  }
 0x143   :  { %v2745_v17 = vadd.f32 %v2744_v15, %v5345_v1  ;;  %3039 = vmatpush1.bf16.msra.mxu0 %v4294_v34  ;;  %3070 = vmatprep.mubr.bf16.mxu0 %v584_v9  ;;  %v4303_v1 = vld [vmem:[%s5833_s1 + $0xb60] ss:$8 sps:$4 sm:$0xff]   ;;  %v4366_v34 = vld [vmem:[%s5833_s1 + $0xab0] ss:$8 sps:$4 sm:$0xff]   ;;  %v4380_v15 = vld [vmem:[%s5833_s1 + $0xa94] ss:$8 sps:$4 sm:$0xff]  }
 0x144   :  { %v2746_v19 = vpop.f32.mrf.mxu0  ;;  %v2785_v20 = vpop.f32.mrf.mxu1  ;;  %3030 = vmatmul.mubr.bf16.vlgmr.msra.gmra.mxu1 %v585_v11  ;;  %3040 = vmatprep.subr.bf16.mxu0 %v4302_v12  ;;  %v4363_v9 = vld [vmem:[%s5833_s1 + $0xbc0] ss:$8 sps:$4 sm:$0xff]   ;;  %v4374_v11 = vld [vmem:[%s5833_s1 + $0xaa4] ss:$8 sps:$4 sm:$0xff]   ;;  %v4369_v12 = vld [vmem:[%s5833_s1 + $0xbb0] ss:$8 sps:$4 sm:$0xff]  }
 0x145   :  { %v2747_v22 = vadd.f32 %v2746_v19, %v5353_v7  ;;  %v5550_v23 = vadd.f32 %v2785_v20, %v2745_v17  ;;  %3080 = vmatpush1.bf16.msra.mxu1 %v4297_v13  ;;  %3111 = vmatprep.mubr.bf16.mxu1 %v588_v14  ;;  %v4306_v7 = vld [vmem:[%s5833_s1 + $0xa50] ss:$8 sps:$4 sm:$0xff]   ;;  %v4377_v13 = vld [vmem:[%s5833_s1 + $0xba4] ss:$8 sps:$4 sm:$0xff]   ;;  %v4372_v14 = vld [vmem:[%s5833_s1 + $0xaa0] ss:$8 sps:$4 sm:$0xff]  }
 0x146   :  { %v2748_v5 = vpop.f32.mrf.mxu0  ;;  %v2787_v25 = vpop.f32.mrf.mxu1  ;;  %3081 = vmatprep.subr.bf16.mxu1 %v4305_v16  ;;  %v4375_v16 = vld [vmem:[%s5833_s1 + $0xba0] ss:$8 sps:$4 sm:$0xff]   ;;  %v4383_v17 = vld [vmem:[%s5833_s1 + $0xb94] ss:$8 sps:$4 sm:$0xff]   ;;  %v4386_v19 = vld [vmem:[%s5833_s1 + $0xa84] ss:$8 sps:$4 sm:$0xff]  }
 0x147   :  { %v5558_v27 = vadd.f32 %v2787_v25, %v2747_v22  ;;  %3041 = vmatpush1.bf16.msra.mxu0 %v4300_v18  ;;  %v4378_v18 = vld [vmem:[%s5833_s1 + $0xa90] ss:$8 sps:$4 sm:$0xff]   ;;  %v4384_v22 = vld [vmem:[%s5833_s1 + $0xa80] ss:$8 sps:$4 sm:$0xff]   ;;  %v4393_v5 = vld [vmem:[%s5833_s1 + $0xc74] ss:$8 sps:$4 sm:$0xff]  }
 0x148   :  { %v2749_v29 = vpop.f32.mrf.mxu0  ;;  %3042 = vmatprep.subr.bf16.mxu0 %v4308_v21  ;;  %v2789_v32 = vpop.f32.mrf.mxu1  ;;  %v4381_v20 = vld [vmem:[%s5833_s1 + $0xb90] ss:$8 sps:$4 sm:$0xff]   ;;  %v4389_v21 = vld [vmem:[%s5833_s1 + $0xb84] ss:$8 sps:$4 sm:$0xff]   ;;  %v4387_v25 = vld [vmem:[%s5833_s1 + $0xb80] ss:$8 sps:$4 sm:$0xff]  }
 0x149   :  { %3082 = vmatpush1.bf16.msra.mxu1 %v4303_v1  ;;  %v570_v1 = vrot.slane %v5496_v59, %v4622_v48  ;;  %v4396_v59 = vld [vmem:[%s5833_s1 + $0xc64] ss:$8 sps:$4 sm:$0xff]   ;;  %v4394_v32 = vld [vmem:[%s5833_s1 + $0xc60] ss:$8 sps:$4 sm:$0xff]  }
 0x14a   :  { %3083 = vmatprep.subr.bf16.mxu1 %v4311_v26  ;;  %v2790_v36 = vpop.f32.mrf.mxu1  ;;  %v4391_v26 = vld [vmem:[%s5833_s1 + $0xc70] ss:$8 sps:$4 sm:$0xff]  }
 0x14b   :  { %3043 = vmatpush1.bf16.msra.mxu0 %v4306_v7  ;;  %v586_v7 = vcombine.high %v570_v1, %v570_v1 }
 0x14c   :  { %3044 = vmatprep.subr.bf16.mxu0 %v4314_v31 }
 0x14d   :  { %3084 = vmatpush1.bf16.msra.mxu1 %v4309_v33  ;;  %v4458_v33 = vmov 0  }
 0x14e   :  { %3085 = vmatprep.subr.bf16.mxu1 %v4317_v35 }
 0x14f   :  { %3045 = vmatpush1.bf16.msra.mxu0 %v4312_v28  ;;  %v4399_v28 = vld [vmem:[%s5833_s1 + $0xc54] ss:$8 sps:$4 sm:$0xff]  }
 0x150   :  { %3046 = vmatprep.subr.bf16.mxu0 %v4320_v37 }
 0x151   :  { %3086 = vmatpush1.bf16.msra.mxu1 %v4315_v38 }
 0x152   :  { %3087 = vmatprep.subr.bf16.mxu1 %v4323_v39 }
 0x153   :  { %3047 = vmatpush1.bf16.msra.mxu0 %v4318_v40 }
 0x154   :  { %3048 = vmatprep.subr.bf16.mxu0 %v4326_v41  ;;  %v4397_v41 = vld [vmem:[%s5833_s1 + $0xc50] ss:$8 sps:$4 sm:$0xff]  }
 0x155   :  { %3088 = vmatpush1.bf16.msra.mxu1 %v4321_v43 }
 0x156   :  { %3089 = vmatprep.subr.bf16.mxu1 %v4329_v44  ;;  %v4402_v44 = vld [vmem:[%s5833_s1 + $0xc44] ss:$8 sps:$4 sm:$0xff]  }
 0x157   :  { %3049 = vmatpush1.bf16.msra.mxu0 %v4324_v45 }
 0x158   :  { %3050 = vmatprep.subr.bf16.mxu0 %v4332_v46 }
 0x159   :  { %3090 = vmatpush1.bf16.msra.mxu1 %v4327_v47  ;;  %v4405_v47 = vld [vmem:[%s5833_s1 + $0xc34] ss:$8 sps:$4 sm:$0xff]  }
 0x15a   :  { %3091 = vmatprep.subr.bf16.mxu1 %v4335_v49  ;;  %v4403_v49 = vld [vmem:[%s5833_s1 + $0xc30] ss:$8 sps:$4 sm:$0xff]  }
 0x15b   :  { %3051 = vmatpush1.bf16.msra.mxu0 %v4330_v50  ;;  %v4408_v50 = vld [vmem:[%s5833_s1 + $0xc24] ss:$8 sps:$4 sm:$0xff]  }
 0x15c   :  { %3052 = vmatprep.subr.bf16.mxu0 %v4338_v24  ;;  %v4406_v24 = vld [vmem:[%s5833_s1 + $0xc20] ss:$8 sps:$4 sm:$0xff]  }
 0x15d   :  { %3092 = vmatpush1.bf16.msra.mxu1 %v4333_v51  ;;  %v4411_v51 = vld [vmem:[%s5833_s1 + $0xc14] ss:$8 sps:$4 sm:$0xff]  }
 0x15e   :  { %3093 = vmatprep.subr.bf16.mxu1 %v4341_v52  ;;  %v4409_v52 = vld [vmem:[%s5833_s1 + $0xc10] ss:$8 sps:$4 sm:$0xff]  }
 0x15f   :  { %3053 = vmatpush1.bf16.msra.mxu0 %v4336_v53  ;;  %v4414_v53 = vld [vmem:[%s5833_s1 + $0xc04] ss:$8 sps:$4 sm:$0xff]  }
 0x160   :  { %3054 = vmatprep.subr.bf16.mxu0 %v4344_v42  ;;  %v4412_v42 = vld [vmem:[%s5833_s1 + $0xc00] ss:$8 sps:$4 sm:$0xff]  }
 0x161   :  { %3094 = vmatpush1.bf16.msra.mxu1 %v4339_v54  ;;  %v3369_v54 = vld.sshfl [vmem:[%s5832_s0 + $0x18] sm:$0x1 pattern:$0x75316420] }
 0x162   :  { %3095 = vmatprep.subr.bf16.mxu1 %v4347_v55  ;;  %v602_v55 = vrot.slane %v3369_v54, %v4622_v48  ;;  %v4416_v48 = vld [vmem:[%s5835_s3 + $0x38] sm:$0xff]  }
 0x163   :  { %3055 = vmatpush2.bf16.msra.mxu0 %v4342_v56 }
 0x164   :  { %3056 = vmatprep.subr.bf16.mxu0 %v4350_v57 }
 0x165   :  { %3096 = vmatpush2.bf16.msra.mxu1 %v4345_v58 }
 0x166   :  { %3097 = vmatprep.subr.bf16.mxu1 %v4353_v30 }
 0x167   :  { %3057 = vmatpush2.bf16.msra.mxu0 %v4348_v60 }
 0x168   :  { %3058 = vmatprep.subr.bf16.mxu0 %v4356_v61 }
 0x169   :  { %3098 = vmatpush2.bf16.msra.mxu1 %v4351_v62 }
 0x16a   :  { %3099 = vmatprep.subr.bf16.mxu1 %v4359_v63 }
 0x16b   :  { %3059 = vmatpush2.bf16.msra.mxu0 %v4354_v0 }
 0x16c   :  { %3060 = vmatprep.subr.bf16.mxu0 %v4362_v2 }
 0x16d   :  { %3100 = vmatpush2.bf16.msra.mxu1 %v4357_v3 }
 0x16e   :  { %3101 = vmatprep.subr.bf16.mxu1 %v4365_v4  ;;  %v4415_v4 = vld [vmem:[%s5835_s3 + $0x78] sm:$0xff]  }
 0x16f   :  { %3061 = vmatpush2.bf16.msra.mxu0 %v4360_v6  ;;  %v4417_v6 = vld [vmem:[%s5835_s3 + $0x70] sm:$0xff]  }
 0x170   :  { %3062 = vmatprep.subr.bf16.mxu0 %v4368_v8 }
 0x171   :  { %3102 = vmatpush2.bf16.msra.mxu1 %v4363_v9  ;;  %v4418_v9 = vld [vmem:[%s5835_s3 + $0x30] sm:$0xff]  }
 0x172   :  { %3103 = vmatprep.subr.bf16.mxu1 %v4371_v10  ;;  %v4419_v10 = vld [vmem:[%s5835_s3 + $0x68] sm:$0xff]  }
 0x173   :  { %3063 = vmatpush2.bf16.msra.mxu0 %v4366_v34  ;;  %v4420_v34 = vld [vmem:[%s5835_s3 + $0x28] sm:$0xff]  }
 0x174   :  { %3064 = vmatprep.subr.bf16.mxu0 %v4374_v11  ;;  %v4421_v11 = vld [vmem:[%s5835_s3 + $0x60] sm:$0xff]  }
 0x175   :  { %3104 = vmatpush2.bf16.msra.mxu1 %v4369_v12  ;;  %v4422_v12 = vld [vmem:[%s5835_s3 + $0x20] sm:$0xff]  }
 0x176   :  { %3105 = vmatprep.subr.bf16.mxu1 %v4377_v13  ;;  %v4423_v13 = vld [vmem:[%s5835_s3 + $0x58] sm:$0xff]  }
 0x177   :  { %3065 = vmatpush2.bf16.msra.mxu0 %v4372_v14  ;;  %v4424_v14 = vld [vmem:[%s5835_s3 + $0x18] sm:$0xff]  }
 0x178   :  { %3066 = vmatprep.subr.bf16.mxu0 %v4380_v15  ;;  %v4425_v15 = vld [vmem:[%s5835_s3 + $0x50] sm:$0xff]  }
 0x179   :  { %3106 = vmatpush2.bf16.msra.mxu1 %v4375_v16  ;;  %v4426_v16 = vld [vmem:[%s5835_s3 + $0x10] sm:$0xff]  }
 0x17a   :  { %3107 = vmatprep.subr.bf16.mxu1 %v4383_v17  ;;  %v4427_v17 = vld [vmem:[%s5835_s3 + $0x48] sm:$0xff]  }
 0x17b   :  { %3067 = vmatpush2.bf16.msra.mxu0 %v4378_v18  ;;  %v4428_v18 = vld [vmem:[%s5835_s3 + $0x8] sm:$0xff]  }
 0x17c   :  { %3068 = vmatprep.subr.bf16.mxu0 %v4386_v19  ;;  %v4429_v19 = vld [vmem:[%s5835_s3 + $0x40] sm:$0xff]  }
 0x17d   :  { %3108 = vmatpush2.bf16.msra.mxu1 %v4381_v20  ;;  %v4430_v20 = vld [vmem:[%s5835_s3] sm:$0xff]  }
 0x17e   :  { %3109 = vmatprep.subr.bf16.mxu1 %v4389_v21 }
 0x17f   :  { %3069 = vmatpush2.bf16.msra.mxu0 %v4384_v22 }
 0x180   :  { %3120 = vmatprep.subr.bf16.mxu0 %v4393_v5 }
 0x181   :  { %3110 = vmatpush2.bf16.msra.mxu1 %v4387_v25 }
 0x182   :  { %v2826_v29 = vpop.f32.mrf.mxu0  ;;  %3071 = vmatmul.mubr.bf16.vlgmr.msra.gmra.mxu0 %v570_v1  ;;  %3787 = vmatprep.subr.bf16.mxu1 %v4415_v4 }
 0x183   :  { %v2827_v31 = vadd.f32 %v2826_v29, %v5550_v23  ;;  %3121 = vmatpush1.bf16.msra.mxu0 %v4391_v26  ;;  %3152 = vmatprep.mubr.bf16.mxu0 %v4458_v33 }
 0x184   :  { %v2828_v35 = vpop.f32.mrf.mxu0  ;;  %v2867_v36 = vpop.f32.mrf.mxu1  ;;  %3112 = vmatmul.mubr.bf16.vlgmr.msra.gmra.mxu1 %v586_v7  ;;  %3122 = vmatprep.subr.bf16.mxu0 %v4396_v59 }
 0x185   :  { %v2829_v37 = vadd.f32 %v2828_v35, %v5558_v27  ;;  %v2868_v38 = vadd.f32 %v2867_v36, %v2827_v31  ;;  %v4400_v27 = vld [vmem:[%s5833_s1 + $0xc40] ss:$8 sps:$4 sm:$0xff]   ;;  %3788 = vmatpush3.bf16.msra.mxu1 %v4416_v48 }
 0x186   :  { %v2830_v39 = vpop.f32.mrf.mxu0  ;;  %v2869_v23 = vpop.f32.mrf.mxu1  ;;  %3789 = vmatprep.subr.bf16.mxu1 %v4417_v6 }
 0x187   :  { %v2870_v40 = vadd.f32 %v2869_v23, %v2829_v37  ;;  %3123 = vmatpush1.bf16.msra.mxu0 %v4394_v32 }
 0x188   :  { %v2831_v43 = vpop.f32.mrf.mxu0  ;;  %3124 = vmatprep.subr.bf16.mxu0 %v4399_v28  ;;  %v2871_v45 = vpop.f32.mrf.mxu1 }
 0x189   :  { %3790 = vmatpush3.bf16.msra.mxu1 %v4418_v9 }
 0x18a   :  { %v2872_v46 = vpop.f32.mrf.mxu1  ;;  %3791 = vmatprep.subr.bf16.mxu1 %v4419_v10 }
 0x18b   :  { %3125 = vmatpush1.bf16.msra.mxu0 %v4397_v41 }
 0x18c   :  { %3126 = vmatprep.subr.bf16.mxu0 %v4402_v44 }
 0x18d   :  { %3792 = vmatpush3.bf16.msra.mxu1 %v4420_v34 }
 0x18e   :  { %3793 = vmatprep.subr.bf16.mxu1 %v4421_v11 }
 0x18f   :  { %3127 = vmatpush1.bf16.msra.mxu0 %v4400_v27 }
 0x190   :  { %3128 = vmatprep.subr.bf16.mxu0 %v4405_v47 }
 0x191   :  { %3794 = vmatpush3.bf16.msra.mxu1 %v4422_v12 }
 0x192   :  { %3795 = vmatprep.subr.bf16.mxu1 %v4423_v13 }
 0x193   :  { %3129 = vmatpush1.bf16.msra.mxu0 %v4403_v49 }
 0x194   :  { %3130 = vmatprep.subr.bf16.mxu0 %v4408_v50 }
 0x195   :  { %3796 = vmatpush3.bf16.msra.mxu1 %v4424_v14 }
 0x196   :  { %3797 = vmatprep.subr.bf16.mxu1 %v4425_v15 }
 0x197   :  { %3131 = vmatpush1.bf16.msra.mxu0 %v4406_v24 }
 0x198   :  { %3132 = vmatprep.subr.bf16.mxu0 %v4411_v51 }
 0x199   :  { %3798 = vmatpush3.bf16.msra.mxu1 %v4426_v16 }
 0x19a   :  { %3799 = vmatprep.subr.bf16.mxu1 %v4427_v17 }
 0x19b   :  { %3133 = vmatpush1.bf16.msra.mxu0 %v4409_v52 }
 0x19c   :  { %3134 = vmatprep.subr.bf16.mxu0 %v4414_v53 }
 0x19d   :  { %3800 = vmatpush3.bf16.msra.mxu1 %v4428_v18 }
 0x19e   :  { %3801 = vmatprep.subr.bf16.mxu1 %v4429_v19 }
 0x19f   :  { %3135 = vmatpush1.bf16.msra.mxu0 %v4412_v42 }
 0x1a1   :  { %3802 = vmatpush3.bf16.msra.mxu1 %v4430_v20 }
 0x1a2   :  { %3153 = vmatmul.mubr.bf16.vlgmr.msra.gmra.mxu0 %v602_v55  ;;  %v3770_v55 = vld [vmem:[%s5836_s4] ss:$0 sm:$0xff]  ;;  %s4459_s4 = smov [#allocation2]  }
 0x1a3   :  { %s3361_s19 = sshll.u32 %s4459_s4, 4  ;;  %s3362_s19 = int_to_ptr.vmem [resolvable:$true] %s3361_s19 }
 0x1a4   :  { %s4435_s20 = scalar_lea.vmem %s3362_s19, 32  ;;  %p4440_p1 = scmp.lt.s32.totalorder %s3362_s19, %s3362_s19 }
 0x1a5   :  { %p4436_p0 = scmp.ne.s32.totalorder %s3362_s19, %s4435_s20  ;;  %p4441_p2 = scmp.lt.s32.totalorder %s4435_s20, %s4435_s20 }
 0x1a7   :  { %p4442_p3 = por %p4441_p2, %p4440_p1 }
 0x1a9   :  { %p4443_p4 = pnand %p4442_p3, %p4436_p0 }
 0x1c2   :  { %v2908_v56 = vpop.f32.mrf.mxu0 }
 0x1c3   :  { %v2909_v57 = vadd.f32 %v2908_v56, %v2868_v38 }
 0x1c4   :  { %v2910_v58 = vpop.f32.mrf.mxu0  ;;  %v2949_v30 = vpop.f32.mrf.mxu1 }
 0x1c5   :  { %v2911_v60 = vadd.f32 %v2910_v58, %v2870_v40  ;;  %v2950_v61 = vadd.f32 %v2949_v30, %v2909_v57 }
 0x1c6   :  { %v2912_v62 = vpop.f32.mrf.mxu0  ;;  %v2951_v63 = vpop.f32.mrf.mxu1 }
 0x1c7   :  { %v2952_v0 = vadd.f32 %v2951_v63, %v2911_v60 }
 0x1c8   :  { %v2913_v2 = vpop.f32.mrf.mxu0  ;;  %v2953_v3 = vpop.f32.mrf.mxu1 }
 0x1ca   :  { %v2954_v8 = vpop.f32.mrf.mxu1 }
 0x202   :  { %v2990_v21 = vpop.f32.mrf.mxu0 }
 0x203   :  { %v2991_v22 = vadd.f32 %v2990_v21, %v2950_v61 }
 0x204   :  { %v2992_v1 = vpop.f32.mrf.mxu0  ;;  %v3031_v5 = vpop.f32.mrf.mxu1 }
 0x205   :  { %v2993_v25 = vadd.f32 %v2992_v1, %v2952_v0  ;;  %v3032_v26 = vadd.f32 %v3031_v5, %v2991_v22 }
 0x206   :  { %v2994_v7 = vpop.f32.mrf.mxu0  ;;  %v3033_v59 = vpop.f32.mrf.mxu1 }
 0x207   :  { %v3034_v29 = vadd.f32 %v3033_v59, %v2993_v25 }
 0x208   :  { %v2995_v31 = vpop.f32.mrf.mxu0  ;;  %v3035_v32 = vpop.f32.mrf.mxu1 }
 0x20a   :  { %v3036_v33 = vpop.f32.mrf.mxu1 }
 0x242   :  { %v3072_v35 = vpop.f32.mrf.mxu0 }
 0x243   :  { %v3073_v41 = vadd.f32 %v3072_v35, %v3032_v26 }
 0x244   :  { %v3074_v36 = vpop.f32.mrf.mxu0  ;;  %v3113_v28 = vpop.f32.mrf.mxu1 }
 0x245   :  { %v3075_v43 = vadd.f32 %v3074_v36, %v3034_v29  ;;  %v3114_v44 = vadd.f32 %v3113_v28, %v3073_v41 }
 0x246   :  { %v3076_v37 = vpop.f32.mrf.mxu0  ;;  %v3115_v38 = vpop.f32.mrf.mxu1 }
 0x247   :  { %v3116_v46 = vadd.f32 %v3115_v38, %v3075_v43 }
 0x248   :  { %v3077_v39 = vpop.f32.mrf.mxu0  ;;  %v3117_v23 = vpop.f32.mrf.mxu1 }
 0x24a   :  { %v3118_v40 = vpop.f32.mrf.mxu1 }
 0x262   :  { %v3154_v45 = vpop.f32.mrf.mxu0 }
 0x263   :  { %v3155_v27 = vadd.f32 %v3154_v45, %v3114_v44 }
 0x264   :  { %v3156_v47 = vpop.f32.mrf.mxu0 }
 0x265   :  { %v3157_v49 = vadd.f32 %v3156_v47, %v3116_v46  ;;  %v3161_v50 = vmax.f32 %v3155_v27, 0.0 }
 0x266   :  { %v3158_v24 = vpop.f32.mrf.mxu0 }
 0x267   :  { %v3162_v51 = vmax.f32 %v3157_v49, 0.0  ;;  %v3163_v42 = vpack.c.bf16 %v3161_v50, %v3161_v50 }
 0x268   :  { %v3159_v52 = vpop.f32.mrf.mxu0 }
 0x269   :  { %v3164_v53 = vpack.c.bf16 %v3162_v51, %v3162_v51 }
 0x26b   :  { %3332 = vmatprep.mubr.bf16.mxu1 %v3164_v53 }
 0x26c   :  { %3333 = vmatmul.mubr.bf16.vlgmr.msra.gmra.mxu1 %v3163_v42 }
 0x32c   :  { %v3803_v54 = vpop.f32.mrf.mxu1 }
 0x32e   :  { %v3804_v56 = vpop.f32.mrf.mxu1 }
 0x32f   :  { %v3805_v57 = vadd.f32 %v3804_v56, %v3803_v54 }
 0x330   :  { %v3806_v58 = vpop.f32.mrf.mxu1 }
 0x331   :  { %v3335_v30 = vadd.f32 %v3805_v57, %v3770_v55 }
 0x332   :  { %v3807_v60 = vpop.f32.mrf.mxu1 }
 0x333   :  { %v3341_v61 = vsel %vm3340_vm0, %v3335_v30, -inf }
 0x334   :  { %3342 = vmax.xlane.f32.xlu0 %v3341_v61 }
 0x3bd   :  { %v3343_v62 = vpop.xlane.xlu0 %3342 }
 0x3be   :  { %v3344_v63 = vsub.f32 %v3335_v30, %v3343_v62 }
 0x3c0   :  { %v3345_v0 = vmul.f32 1.442695, %v3344_v63 }
 0x3c2   :  { %4431 = vpow2.f32 %v3345_v0 }
 0x3cf   :  { %v4432_v2 = vpop.eup %4431 }
 0x3d0   :  { %v3347_v3 = vsel %vm3340_vm0, %v4432_v2, 0.0 }
 0x3d1   :  { %3348 = vadd.xlane.f32.xlu0 %v3347_v3 }
 0x45a   :  { %v3349_v4 = vpop.xlane.xlu0 %3348 }
 0x45b   :  { %4433 = vlog2.f32 %v3349_v4 }
 0x468   :  { %v4434_v48 = vpop.eup %4433 }
 0x469   :  { %v3351_v6 = vmul.f32 0.6931472, %v4434_v48 }
 0x46b   :  { %v3352_v8 = vadd.f32 %v3351_v6, %v3343_v62 }
 0x46d   :  { %v3353_v9 = vsub.f32 %v3335_v30, %v3352_v8 }
 0x46f   :  { %3354 = vst [vmem:[#allocation2] sm:$0x3] %v3353_v9 }
 0x470   :  { %4446 = shalt.err (!%p4443_p4)
}
 0x471   :  { %3364 = dma.vmem_to_hbm [thread:$0]  %s3362_s19, 32, %s5837_s5, [#allocation3]  }
 0x472   :  { %4455 = dma.done.wait [#allocation3], 32  }
 0x473   :  { %4456 = vsyncadd [#allocation3], 4294967264 }
 0x474   :  { %3368 = vsyncpa [#allocation3], 1 }

// kernel: mnist_l5_forward.2
= control target key start
LH: loop header
LB: loop body
LE: loop exit
PB: predicated region body
PF: predicated region fallthrough
CT: control target
= control target key end

     0   :  { %12 = vsyncpa [#allocation3], 0  ;;  %s15922_s0 = inlined_call_operand.vmem [shape: f32[2,784,1], index: 0, kind: input, shape index: {}]   ;;  %s15923_s1 = inlined_call_operand.hbm [shape: f32[4,32], index: 1, kind: input, shape index: {}]   ;;  %s15924_s2 = inlined_call_operand.hbm [shape: f32[1,32], index: 2, kind: input, shape index: {}]   ;;  %s15925_s3 = inlined_call_operand.vmem [shape: bf16[128,64], index: 3, kind: input, shape index: {}]   ;;  %s15926_s4 = inlined_call_operand.hbm [shape: f32[1,64], index: 4, kind: input, shape index: {}]   ;;  %s15927_s5 = inlined_call_operand.hbm [shape: bf16[256,128], index: 5, kind: input, shape index: {}]   ;;  %s15928_s6 = inlined_call_operand.hbm [shape: f32[1,128], index: 6, kind: input, shape index: {}]   ;;  %s15929_s7 = inlined_call_operand.vmem [shape: bf16[2,5,17,128], index: 7, kind: output, shape index: {}]  }
   0x1   :  { %13 = vsyncpa [#allocation5], 0 }
   0x2   :  { %14 = vsyncpa [#allocation8], 0  ;;  %s8735_s24 = smov 0  }
   0x3 LB: > { %s8682_s25 = smov [#allocation4]   ;;  %s8741_s27 = sadd.s32 4294967295, %s8680_s24   ;;  %s8680_s24 = sphi %s8735_s24, %s20_s24  }
   0x4   : > { %s227_s26 = sshll.u32 %s8682_s25, 4  ;;  %p7298_p0 = scmp.ge.s32.totalorder %s8680_s24, 1  ;;  %s228_s26 = int_to_ptr.vmem [resolvable:$true] %s227_s26 }
   0x5   : > { %p203_p1 = scmp.lt.s32.totalorder %s8680_s24, 3  ;;  %p7672_p2 = scmp.eq.s32.totalorder %s8741_s27, 0 }
   0x6   : > { %s8683_s29 = smov [#allocation7]   ;;  %s8684_s9 = smov [#allocation2]  }
   0x7   : > { %p8746_p3 = pnand %p7298_p0, %p203_p1  ;;  %s251_s30 = sshll.u32 %s8683_s29, 4  ;;  %s8752_s30 = int_to_ptr.vmem [resolvable:$true] %s251_s30 }
   0x8   : > { %s216_s10 = sshll.u32 %s8684_s9, 4  ;;  %s8685_s11 = smov [#allocation6]   ;;  %s8760_s10 = int_to_ptr.vmem [resolvable:$true] %s216_s10 }
   0x9   : > { %p7656_p4 = pneg %p8746_p3  ;;  %s8762_s12 = sshll.u32 %s8685_s11, 4  ;;  %s242_s12 = int_to_ptr.vmem [resolvable:$true] %s8762_s12 }
   0xa   : > { %s8543_s14 = scalar_lea.vmem %s228_s26, 16  ;;  %s8550_s15 = scalar_lea.vmem %s228_s26, 32 }
   0xb   : > { %p8756_p5 = pnand %p7672_p2, %p7656_p4  ;;  %p8544_p7 = scmp.ne.s32.totalorder %s228_s26, %s8543_s14 }
   0xc   : > { %p8551_p10 = scmp.lt.s32.totalorder %s228_s26, %s228_s26  ;;  %p8552_p11 = scmp.lt.s32.totalorder %s8550_s15, %s8543_s14 }
   0xd   : > { %p8766_p6 = pneg %p8756_p5 }
   0xe   : > { %p8553_p12 = por %p8552_p11, %p8551_p10 }
   0xf   : > { %p8546_p8 = pnand %p8544_p7, %p8766_p6 }
  0x11   : > { %p8547_p9 = pneg %p8546_p8 }
  0x13   : > { %p8554_p13 = pnand %p8553_p12, %p8547_p9 }
  0x15   : > { %8557 = shalt.err (!%p8554_p13)
}
  0x16   : > { %7662 = dma.hbm_to_vmem [thread:$0]  (!%p8756_p5), %s15924_s2, 16, %s228_s26, [#allocation5]  }
  0x17   : > { %s8569_s18 = scalar_lea.vmem %s8752_s30, 2048  ;;  %p8577_p7 = scmp.lt.s32.totalorder %s8752_s30, %s8752_s30 }
  0x18   : > { %p8570_p0 = scmp.ne.s32.totalorder %s8752_s30, %s8569_s18  ;;  %p8578_p8 = scmp.lt.s32.totalorder %s8569_s18, %s8569_s18 }
  0x1a   : > { %p8572_p1 = pnand %p8570_p0, %p8766_p6  ;;  %p8579_p9 = por %p8578_p8, %p8577_p7 }
  0x1c   : > { %p8573_p4 = pneg %p8572_p1 }
  0x1e   : > { %p8580_p10 = pnand %p8579_p9, %p8573_p4 }
  0x20   : > { %8583 = shalt.err (!%p8580_p10)
}
  0x21   : > { %s8686_s19 = smov 64   ;;  %s8687_s20 = smov 4  }
  0x22   : > { %7668 = dma.hbm_to_vmem [thread:$0]  (!%p8756_p5), %s15927_s5, 2048, %s8752_s30, [#allocation8], %s8686_s19, %s8686_s19, %s8687_s20  }
  0x23   : > { %s8595_s23 = scalar_lea.vmem %s8760_s10, 64  ;;  %p8603_p0 = scmp.lt.s32.totalorder %s8760_s10, %s8760_s10 }
  0x24   : > { %p8596_p11 = scmp.ne.s32.totalorder %s8760_s10, %s8595_s23  ;;  %p8604_p1 = scmp.lt.s32.totalorder %s8595_s23, %s8595_s23 }
  0x26   : > { %p8598_p12 = pnand %p8596_p11, %p8766_p6  ;;  %p8605_p4 = por %p8604_p1, %p8603_p0 }
  0x28   : > { %p8599_p13 = pneg %p8598_p12 }
  0x2a   : > { %p8606_p7 = pnand %p8605_p4, %p8599_p13 }
  0x2c   : > { %8609 = shalt.err (!%p8606_p7)
}
  0x2d   : > { %7659 = dma.hbm_to_vmem [thread:$0]  (!%p8756_p5), %s15923_s1, 64, %s8760_s10, [#allocation3]  }
  0x2e   : > { %s8621_s29 = scalar_lea.vmem %s242_s12, 16  ;;  %s8628_s30 = scalar_lea.vmem %s242_s12, 32 }
  0x2f   : > { %p8622_p8 = scmp.ne.s32.totalorder %s242_s12, %s8621_s29  ;;  %p8629_p11 = scmp.lt.s32.totalorder %s242_s12, %s242_s12 }
  0x30   : > { %p8630_p12 = scmp.lt.s32.totalorder %s8628_s30, %s8621_s29 }
  0x31   : > { %p8624_p9 = pnand %p8622_p8, %p8766_p6 }
  0x32   : > { %p8631_p13 = por %p8630_p12, %p8629_p11 }
  0x33   : > { %p8625_p10 = pneg %p8624_p9 }
  0x35   : > { %p8632_p0 = pnand %p8631_p13, %p8625_p10 }
  0x37   : > { %8635 = shalt.err (!%p8632_p0)
}
  0x38   : > { %7665 = dma.hbm_to_vmem [thread:$0]  (!%p8756_p5), %s15926_s4, 16, %s242_s12, [#allocation5]  }
  0x39   : > { %s8688_s10 = smov [#allocation9]  }
  0x3a   : > { %s265_s14 = sshll.u32 %s8688_s10, 4  ;;  %s266_s14 = int_to_ptr.vmem [resolvable:$true] %s265_s14 }
  0x3b   : > { %s8647_s15 = scalar_lea.vmem %s266_s14, 16  ;;  %s8654_s16 = scalar_lea.vmem %s266_s14, 32 }
  0x3c   : > { %p8648_p1 = scmp.ne.s32.totalorder %s266_s14, %s8647_s15  ;;  %p8655_p8 = scmp.lt.s32.totalorder %s266_s14, %s266_s14 }
  0x3d   : > { %p8656_p9 = scmp.lt.s32.totalorder %s8654_s16, %s8647_s15 }
  0x3e   : > { %p8650_p4 = pnand %p8648_p1, %p8766_p6 }
  0x3f   : > { %p8657_p10 = por %p8656_p9, %p8655_p8 }
  0x40   : > { %p8651_p7 = pneg %p8650_p4 }
  0x42   : > { %p8658_p11 = pnand %p8657_p10, %p8651_p7 }
  0x44   : > { %8661 = shalt.err (!%p8658_p11)
}
  0x45   : > { %7671 = dma.hbm_to_vmem [thread:$0]  (!%p8756_p5), %s15928_s6, 16, %s266_s14, [#allocation8]  }
  0x46   : > { %286 = sbr.rel (%p8746_p3) target bundleno = 1704 (0x6a8), region = 48 }
  0x4b   : > { %8667 = dma.done.wait (%p7672_p2), [#allocation3], 64  }
  0x4c   : > { %8669 = vsyncadd (%p7672_p2), [#allocation3], 4294967232 }
  0x4d   : > { %8671 = dma.done.wait (%p7672_p2), [#allocation5], 32  }
  0x4e   : > { %8673 = vsyncadd (%p7672_p2), [#allocation5], 4294967264 }
  0x4f   : > { %8675 = dma.done.wait (%p7672_p2), [#allocation8], 2064  }
  0x50   : > { %8677 = vsyncadd (%p7672_p2), [#allocation8], 4294965232  ;;  %p334_p3 = scmp.lt.s32.totalorder %s8741_s27, 1  ;;  %v15930_v0 = vmov 0   ;;  %v914_v62 = vlaneseq  ;;  %vm1211_vm0 = vcmask 1046528   ;;  %vm1798_vm1 = vcmask 1043456  }
  0x51   : > { %7704 = vset.pattern.permute.xlu1 %v15930_v0  ;;  %7703 = vset.pattern.permute.xlu0 %v15930_v0  ;;  %vm2370_vm2 = vcmask 1042432   ;;  %s8690_s19 = smov 64   ;;  %vm3947_vm3 = vcmask 1045504   ;;  %s8691_s20 = smov 32   ;;  %vm8694_vm4 = vmmov 0   ;;  %vm4872_vm5 = vcmask 261120  }
  0x52   : > { %s17131_s27 = smov (!%p334_p3, %s8741_s27), 1  ;;  %6843 = vmatprep.subr.bf16.mxu1 %v15930_v0  ;;  %s8692_s21 = smov 96   ;;  %vm4955_vm6 = vcmask 523264   ;;  %vm5038_vm7 = vcmask 785408   ;;  %vm7117_vm8 = vcmask 1040384  }
  0x53   : > { %s7634_s28 = smul.u32 784, %s17131_s27  ;;  %vm7118_vm9 = vsmask.f32 256 }
  0x54   : > { %s7635_s12 = smul.u32 60, %s17131_s27  ;;  %vm15816_vm10 = vmand %vm7117_vm8, %vm7118_vm9 }
  0x55   : > { %s8841_s13 = scalar_lea.vmem %s15922_s0, %s7634_s28 }
  0x56   : > { %v347_v1 = vld [vmem:[%s8841_s13 + $0x10] sm:$0xff]  ;;  %v345_v2 = vld [vmem:[%s8841_s13] sm:$0xff]  ;;  %v348_v3 = vld [vmem:[%s8841_s13 + $0x18] sm:$0xff] }
  0x57   : > { %456 = vperm.xlu1 %7704, %v347_v1   ;;  %446 = vperm.xlu0 %7703, %v345_v2   ;;  %v346_v4 = vld [vmem:[%s8841_s13 + $0x8] sm:$0xff]  ;;  %v349_v6 = vld [vmem:[%s8841_s13 + $0x20] sm:$0xff]  ;;  %v352_v7 = vld [vmem:[%s8841_s13 + $0x38] sm:$0xff]  ;;  %v915_v1 = vshrl.u32 %v914_v62, 7 }
  0x58   : > { %v350_v5 = vld [vmem:[%s8841_s13 + $0x28] sm:$0xff]  ;;  %v351_v8 = vld [vmem:[%s8841_s13 + $0x30] sm:$0xff]  ;;  %v353_v10 = vld [vmem:[%s8841_s13 + $0x40] sm:$0xff] }
  0x59   : > { %v354_v9 = vld [vmem:[%s8841_s13 + $0x48] sm:$0xff]  ;;  %v356_v11 = vld [vmem:[%s8841_s13 + $0x58] sm:$0xff]  ;;  %v355_v12 = vld [vmem:[%s8841_s13 + $0x50] sm:$0xff] }
  0x5a   : > { %v358_v13 = vld [vmem:[%s8841_s13 + $0x68] sm:$0xff]  ;;  %v357_v14 = vld [vmem:[%s8841_s13 + $0x60] sm:$0xff]  ;;  %v360_v15 = vld [vmem:[%s8841_s13 + $0x78] sm:$0xff] }
  0x5b   : > { %461 = vperm.xlu1 %7704, %v348_v3   ;;  %451 = vperm.xlu0 %7703, %v346_v4   ;;  %v359_v16 = vld [vmem:[%s8841_s13 + $0x70] sm:$0xff]  ;;  %v362_v17 = vld [vmem:[%s8841_s13 + $0x88] sm:$0xff]  ;;  %v361_v18 = vld [vmem:[%s8841_s13 + $0x80] sm:$0xff]  ;;  %v1019_v4 = vsub.s32 1, %v915_v1 }
  0x5c   : > { %v364_v19 = vld [vmem:[%s8841_s13 + $0x98] sm:$0xff]  ;;  %v363_v20 = vld [vmem:[%s8841_s13 + $0x90] sm:$0xff]  ;;  %v366_v21 = vld [vmem:[%s8841_s13 + $0xa8] sm:$0xff] }
  0x5d   : > { %v365_v22 = vld [vmem:[%s8841_s13 + $0xa0] sm:$0xff]  ;;  %v368_v23 = vld [vmem:[%s8841_s13 + $0xb8] sm:$0xff]  ;;  %v367_v24 = vld [vmem:[%s8841_s13 + $0xb0] sm:$0xff] }
  0x5e   : > { %v370_v25 = vld [vmem:[%s8841_s13 + $0xc8] sm:$0xff]  ;;  %v369_v26 = vld [vmem:[%s8841_s13 + $0xc0] sm:$0xff]  ;;  %v372_v27 = vld [vmem:[%s8841_s13 + $0xd8] sm:$0xff] }
  0x5f   : > { %471 = vperm.xlu1 %7704, %v350_v5   ;;  %466 = vperm.xlu0 %7703, %v349_v6   ;;  %v371_v28 = vld [vmem:[%s8841_s13 + $0xd0] sm:$0xff]  ;;  %v374_v29 = vld [vmem:[%s8841_s13 + $0xe8] sm:$0xff]  ;;  %v373_v30 = vld [vmem:[%s8841_s13 + $0xe0] sm:$0xff] }
  0x60   : > { %v376_v31 = vld [vmem:[%s8841_s13 + $0xf8] sm:$0xff]  ;;  %v375_v32 = vld [vmem:[%s8841_s13 + $0xf0] sm:$0xff]  ;;  %v378_v33 = vld [vmem:[%s8841_s13 + $0x108] sm:$0xff] }
  0x61   : > { %v377_v34 = vld [vmem:[%s8841_s13 + $0x100] sm:$0xff]  ;;  %v380_v35 = vld [vmem:[%s8841_s13 + $0x118] sm:$0xff]  ;;  %v379_v36 = vld [vmem:[%s8841_s13 + $0x110] sm:$0xff] }
  0x62   : > { %v382_v37 = vld [vmem:[%s8841_s13 + $0x128] sm:$0xff]  ;;  %v381_v38 = vld [vmem:[%s8841_s13 + $0x120] sm:$0xff]  ;;  %v384_v39 = vld [vmem:[%s8841_s13 + $0x138] sm:$0xff] }
  0x63   : > { %481 = vperm.xlu1 %7704, %v352_v7   ;;  %476 = vperm.xlu0 %7703, %v351_v8   ;;  %v383_v40 = vld [vmem:[%s8841_s13 + $0x130] sm:$0xff]  ;;  %v386_v41 = vld [vmem:[%s8841_s13 + $0x148] sm:$0xff]  ;;  %v385_v42 = vld [vmem:[%s8841_s13 + $0x140] sm:$0xff] }
  0x64   : > { %v389_v43 = vld [vmem:[%s8841_s13 + $0x160] sm:$0xff]  ;;  %v387_v44 = vld [vmem:[%s8841_s13 + $0x150] sm:$0xff]  ;;  %v390_v45 = vld [vmem:[%s8841_s13 + $0x168] sm:$0xff] }
  0x65   : > { %v388_v46 = vld [vmem:[%s8841_s13 + $0x158] sm:$0xff]  ;;  %v393_v47 = vld [vmem:[%s8841_s13 + $0x180] sm:$0xff]  ;;  %v391_v48 = vld [vmem:[%s8841_s13 + $0x170] sm:$0xff] }
  0x66   : > { %v394_v49 = vld [vmem:[%s8841_s13 + $0x188] sm:$0xff]  ;;  %v392_v50 = vld [vmem:[%s8841_s13 + $0x178] sm:$0xff]  ;;  %v397_v51 = vld [vmem:[%s8841_s13 + $0x1a0] sm:$0xff] }
  0x67   : > { %491 = vperm.xlu1 %7704, %v354_v9   ;;  %486 = vperm.xlu0 %7703, %v353_v10   ;;  %v395_v52 = vld [vmem:[%s8841_s13 + $0x190] sm:$0xff]  ;;  %v398_v53 = vld [vmem:[%s8841_s13 + $0x1a8] sm:$0xff]  ;;  %v396_v54 = vld [vmem:[%s8841_s13 + $0x198] sm:$0xff]  ;;  %v1606_v9 = vsub.s32 2, %v915_v1 }
  0x68   : > { %v401_v55 = vld [vmem:[%s8841_s13 + $0x1c0] sm:$0xff]  ;;  %v399_v56 = vld [vmem:[%s8841_s13 + $0x1b0] sm:$0xff]  ;;  %v400_v57 = vld [vmem:[%s8841_s13 + $0x1b8] sm:$0xff] }
  0x69   : > { %v443_v5 = vld [vmem:[#allocation2] sm:$0xf] }
  0x6a   : > { %v8912_v7 = vrot.slane %v443_v5, %v1019_v4 }
  0x6b   : > { %501 = vperm.xlu1 %7704, %v356_v11   ;;  %496 = vperm.xlu0 %7703, %v355_v12   ;;  %v2178_v12 = vsub.s32 3, %v915_v1 }
  0x6c   : > { %16279 = vst [vmem:[#allocation13_spill] sm:$0xff] %v8912_v7 }
  0x6f   : > { %511 = vperm.xlu1 %7704, %v358_v13   ;;  %506 = vperm.xlu0 %7703, %v357_v14   ;;  %v916_v13 = vsub.s32 0, %v915_v1 }
  0x73   : > { %521 = vperm.xlu1 %7704, %v360_v15   ;;  %516 = vperm.xlu0 %7703, %v359_v16   ;;  %v8926_v15 = vrot.slane %v443_v5, %v1606_v9 }
  0x75   : > { %16280 = vst [vmem:[#allocation14_spill] sm:$0xff] %v8926_v15 }
  0x77   : > { %531 = vperm.xlu1 %7704, %v362_v17   ;;  %526 = vperm.xlu0 %7703, %v361_v18  }
  0x7b   : > { %541 = vperm.xlu1 %7704, %v364_v19   ;;  %536 = vperm.xlu0 %7703, %v363_v20   ;;  %v8932_v19 = vrot.slane %v443_v5, %v2178_v12 }
  0x7f   : > { %551 = vperm.xlu1 %7704, %v366_v21   ;;  %546 = vperm.xlu0 %7703, %v365_v22   ;;  %v8938_v21 = vrot.slane %v443_v5, %v916_v13 }
  0x81   : > { %16281 = vst [vmem:[#allocation15_spill] sm:$0xff] %v8938_v21 }
  0x83   : > { %561 = vperm.xlu1 %7704, %v368_v23   ;;  %556 = vperm.xlu0 %7703, %v367_v24  }
  0x87   : > { %571 = vperm.xlu1 %7704, %v370_v25   ;;  %566 = vperm.xlu0 %7703, %v369_v26  }
  0x8b   : > { %581 = vperm.xlu1 %7704, %v372_v27   ;;  %576 = vperm.xlu0 %7703, %v371_v28  }
  0x8f   : > { %591 = vperm.xlu1 %7704, %v374_v29   ;;  %586 = vperm.xlu0 %7703, %v373_v30  }
  0x93   : > { %601 = vperm.xlu1 %7704, %v376_v31   ;;  %596 = vperm.xlu0 %7703, %v375_v32  }
  0x97   : > { %611 = vperm.xlu1 %7704, %v378_v33   ;;  %606 = vperm.xlu0 %7703, %v377_v34  }
  0x9b   : > { %621 = vperm.xlu1 %7704, %v380_v35   ;;  %616 = vperm.xlu0 %7703, %v379_v36  }
  0x9f   : > { %631 = vperm.xlu1 %7704, %v382_v37   ;;  %626 = vperm.xlu0 %7703, %v381_v38  }
  0xa3   : > { %641 = vperm.xlu1 %7704, %v384_v39   ;;  %636 = vperm.xlu0 %7703, %v383_v40  }
  0xa7   : > { %651 = vperm.xlu1 %7704, %v386_v41   ;;  %646 = vperm.xlu0 %7703, %v385_v42  }
  0xab   : > { %666 = vperm.xlu1 %7704, %v389_v43   ;;  %656 = vperm.xlu0 %7703, %v387_v44  }
  0xaf   : > { %671 = vperm.xlu1 %7704, %v390_v45   ;;  %661 = vperm.xlu0 %7703, %v388_v46  }
  0xb3   : > { %686 = vperm.xlu1 %7704, %v393_v47   ;;  %676 = vperm.xlu0 %7703, %v391_v48  }
  0xb7   : > { %691 = vperm.xlu1 %7704, %v394_v49   ;;  %681 = vperm.xlu0 %7703, %v392_v50  }
  0xbb   : > { %706 = vperm.xlu1 %7704, %v397_v51   ;;  %696 = vperm.xlu0 %7703, %v395_v52  }
  0xbf   : > { %711 = vperm.xlu1 %7704, %v398_v53   ;;  %701 = vperm.xlu0 %7703, %v396_v54  }
  0xc3   : > { %726 = vperm.xlu1 %7704, %v401_v55   ;;  %716 = vperm.xlu0 %7703, %v399_v56  }
  0xc7   : > { %721 = vperm.xlu0 %7703, %v400_v57  }
  0xd2   : > { %v447_v58 = vpop.permute.xlu0 %446  ;;  %v457_v59 = vpop.permute.xlu1 %456 }
  0xd3   : > { %v1023_v36 = vmul.f32 %v8912_v7, %v457_v59  ;;  %v1021_v38 = vmul.f32 %v8912_v7, %v447_v58  ;;  %v920_v48 = vmul.f32 %v8938_v21, %v457_v59  ;;  %v918_v51 = vmul.f32 %v8938_v21, %v447_v58 }
  0xd5   : > { %v1215_v45 = vrot.slane %v1023_v36, 1  ;;  %v1212_v49 = vrot.slane %v1021_v38, 1 }
  0xd6   : > { %v8900_v60 = vpop.permute.xlu0 %451  ;;  %v8902_v61 = vpop.permute.xlu1 %461 }
  0xd7   : > { %v1024_v31 = vmul.f32 %v8912_v7, %v8902_v61  ;;  %v1022_v34 = vmul.f32 %v8912_v7, %v8900_v60  ;;  %v1608_v41 = vmul.f32 %v8926_v15, %v8902_v61  ;;  %v2180_v50 = vmul.f32 %v8932_v19, %v8902_v61 }
  0xd8   : > { %v921_v5 = vmul.f32 %v8938_v21, %v8902_v61  ;;  %v919_v12 = vmul.f32 %v8938_v21, %v8900_v60 }
  0xd9   : > { %v1217_v40 = vrot.slane %v1024_v31, 1  ;;  %v1213_v43 = vrot.slane %v1022_v34, 1  ;;  %v1799_v53 = vrot.slane %v1608_v41, 4  ;;  %v2371_v9 = vrot.slane %v2180_v50, 5 }
  0xda   : > { %v8904_v63 = vpop.permute.xlu0 %466  ;;  %v8906_v2 = vpop.permute.xlu1 %471 }
  0xdb   : > { %v1609_v42 = vmul.f32 %v8926_v15, %v8904_v63  ;;  %v1610_v44 = vmul.f32 %v8926_v15, %v8906_v2  ;;  %v1026_v46 = vmul.f32 %v8912_v7, %v8906_v2  ;;  %v1025_v47 = vmul.f32 %v8912_v7, %v8904_v63 }
  0xdc   : > { %v1218_v52 = vsel %vm1211_vm0, %v1215_v45, %v1217_v40  ;;  %v1214_v55 = vsel %vm1211_vm0, %v1212_v49, %v1213_v43  ;;  %v2182_v57 = vmul.f32 %v8932_v19, %v8906_v2  ;;  %v2181_v62 = vmul.f32 %v8932_v19, %v8904_v63 }
  0xdd   : > { %v1800_v54 = vrot.slane %v1609_v42, 4  ;;  %v1802_v56 = vrot.slane %v1610_v44, 4  ;;  %v1216_v59 = vsel %vm1211_vm0, %v1213_v43, %v1215_v45  ;;  %v1221_v1 = vrot.slane %v1026_v46, 1 }
  0xde   : > { %v8908_v3 = vpop.permute.xlu0 %476  ;;  %v8910_v6 = vpop.permute.xlu1 %481  ;;  %v1219_v4 = vrot.slane %v1025_v47, 1  ;;  %v923_v13 = vmul.f32 %v8938_v21, %v8906_v2  ;;  %v2374_v34 = vrot.slane %v2182_v57, 5  ;;  %v2372_v61 = vrot.slane %v2181_v62, 5 }
  0xdf   : > { %v8918_v10 = vmul.f32 %v8912_v7, %v8910_v6  ;;  %v8922_v11 = vmul.f32 %v8912_v7, %v8908_v3  ;;  %v924_v26 = vmul.f32 %v8938_v21, %v8908_v3  ;;  %v1611_v58 = vmul.f32 %v8926_v15, %v8908_v3 }
  0xe0   : > { %v9013_v31 = vmul.f32 %v8926_v15, %v8910_v6  ;;  %v1220_v36 = vsel %vm1211_vm0, %v1217_v40, %v1219_v4  ;;  %v1222_v60 = vsel %vm1211_vm0, %v1219_v4, %v1221_v1  ;;  %v9020_v2 = vmul.f32 %v8932_v19, %v8910_v6 }
  0xe1   : > { %v1225_v16 = vrot.slane %v8918_v10, 1  ;;  %v1223_v17 = vrot.slane %v8922_v11, 1  ;;  %v922_v41 = vmul.f32 %v8938_v21, %v8904_v63  ;;  %v2183_v43 = vmul.f32 %v8932_v19, %v8908_v3 }
  0xe2   : > { %v8914_v8 = vpop.permute.xlu0 %486  ;;  %v8924_v14 = vpop.permute.xlu1 %491  ;;  %16282 = vst [vmem:[#allocation16_spill] sm:$0xff] %v9020_v2  ;;  %v925_v40 = vmul.f32 %v8938_v21, %v8910_v6  ;;  %v15935_v46 = vrot.slane %v9013_v31, 4  ;;  %v2373_v63 = vsel %vm2370_vm2, %v2371_v9, %v2372_v61  ;;  %v2375_v50 = vsel %vm2370_vm2, %v2372_v61, %v2374_v34 }
  0xe3   : > { %v8936_v20 = vmul.f32 %v8926_v15, %v8924_v14  ;;  %v1226_v22 = vsel %vm1211_vm0, %v1223_v17, %v1225_v16  ;;  %v8947_v23 = vmul.f32 %v8932_v19, %v8924_v14  ;;  %v1029_v44 = vmul.f32 %v8912_v7, %v8914_v8 }
  0xe4   : > { %v1501_v29 = vadd.f32 %v1226_v22, %v924_v26  ;;  %v1497_v22 = vadd.f32 %v1218_v52, %v920_v48  ;;  %v1495_v26 = vadd.f32 %v1214_v55, %v918_v51  ;;  %v1030_v47 = vmul.f32 %v8912_v7, %v8924_v14 }
  0xe5   : > { %v1810_v27 = vrot.slane %v8936_v20, 4  ;;  %v2382_v32 = vrot.slane %v8947_v23, 5  ;;  %v1498_v48 = vadd.f32 %v1220_v36, %v921_v5  ;;  %v9033_v49 = vadd.f32 %v1222_v60, %v922_v41 }
  0xe6   : > { %v8930_v18 = vpop.permute.xlu0 %496  ;;  %v502_v38 = vpop.permute.xlu1 %501  ;;  %v15932_v3 = vrot.slane %v9020_v2, 5  ;;  %v9041_v52 = vmul.f32 %v8926_v15, %v8914_v8  ;;  %v2376_v55 = vrot.slane %v2183_v43, 5  ;;  %v1227_v57 = vrot.slane %v1029_v44, 1 }
  0xe7   : > { %v8951_v24 = vmul.f32 %v8926_v15, %v8930_v18  ;;  %v8955_v25 = vmul.f32 %v8932_v19, %v8930_v18  ;;  %16283 = vst [vmem:[#allocation17_spill] sm:$0xff] %v9033_v49  ;;  %v9044_v6 = vmul.f32 %v8926_v15, %v502_v38  ;;  %v1031_v4 = vmul.f32 %v8912_v7, %v8930_v18 }
  0xe8   : > { %v929_v41 = vmul.f32 %v8938_v21, %v502_v38  ;;  %v928_v10 = vmul.f32 %v8938_v21, %v8930_v18 }
  0xe9   : > { %v1812_v28 = vrot.slane %v8951_v24, 4  ;;  %v2384_v30 = vrot.slane %v8955_v25, 5  ;;  %v1231_v60 = vrot.slane %v1031_v4, 1 }
  0xea   : > { %v507_v5 = vpop.permute.xlu0 %506 }
  0xeb   : > { %v1813_v33 = vsel %vm1798_vm1, %v1810_v27, %v1812_v28  ;;  %v2385_v37 = vsel %vm2370_vm2, %v2382_v32, %v2384_v30  ;;  %v1033_v44 = vmul.f32 %v8912_v7, %v507_v5 }
  0xec   : > { %v2088_v35 = vadd.f32 %v1813_v33, %v1501_v29  ;;  %v1801_v29 = vsel %vm1798_vm1, %v1799_v53, %v1800_v54  ;;  %v1496_v33 = vadd.f32 %v1216_v59, %v919_v12  ;;  %v1229_v59 = vrot.slane %v1030_v47, 1 }
  0xed   : > { %v2082_v42 = vadd.f32 %v1801_v29, %v1495_v26  ;;  %v926_v26 = vmul.f32 %v8938_v21, %v8914_v8  ;;  %v15936_v29 = vrot.slane %v9041_v52, 4 }
  0xee   : > { %v8979_v39 = vadd.f32 %v2385_v37, %v2088_v35  ;;  %v1803_v35 = vsel %vm1798_vm1, %v1800_v54, %v1802_v56  ;;  %v1804_v37 = vrot.slane %v1611_v58, 4  ;;  %v1224_v54 = vsel %vm1211_vm0, %v1221_v1, %v1223_v17  ;;  %v512_v58 = vpop.permute.xlu1 %511  ;;  %v517_v47 = vpop.permute.xlu0 %516 }
  0xef   : > { %v2083_v45 = vadd.f32 %v1803_v35, %v1496_v33  ;;  %v9046_v53 = vadd.f32 %v2373_v63, %v2082_v42  ;;  %v927_v17 = vmul.f32 %v8938_v21, %v8924_v14  ;;  %v9065_v1 = vmul.f32 %v8932_v19, %v8914_v8 }
  0xf0   : > { %v1805_v51 = vsel %vm1798_vm1, %v1802_v56, %v1804_v37  ;;  %v9054_v56 = vmul.f32 %v8912_v7, %v502_v38  ;;  %v1807_v9 = vsel %vm1798_vm1, %v1804_v37, %v15935_v46  ;;  %v1500_v12 = vadd.f32 %v1224_v54, %v923_v13 }
  0xf1   : > { %16284 = vst [vmem:[#allocation18_spill] sm:$0xff] %v9046_v53  ;;  %v9051_v62 = vadd.f32 %v2375_v50, %v2083_v45  ;;  %v2084_v11 = vadd.f32 %v1805_v51, %v1497_v22  ;;  %16286 = vst [vmem:[#allocation20_spill] sm:$0xff] %v9065_v1  ;;  %v1814_v33 = vrot.slane %v9044_v6, 4  ;;  %v2377_v35 = vsel %vm2370_vm2, %v2374_v34, %v2376_v55 }
  0xf2   : > { %v9075_v22 = vsel %vm2370_vm2, %v2376_v55, %v15932_v3  ;;  %v1228_v14 = vsel %vm1211_vm0, %v1225_v16, %v1227_v57  ;;  %v9081_v13 = vmul.f32 %v8932_v19, %v502_v38  ;;  %v9083_v61 = vadd.f32 %v1807_v9, %v1498_v48  ;;  %v522_v45 = vpop.permute.xlu1 %521 }
  0xf3   : > { %16285 = vst [vmem:[#allocation19_spill] sm:$0xff] %v9051_v62  ;;  %16287 = vst [vmem:[#allocation21_spill] sm:$0xff] %v9075_v22  ;;  %v1230_v8 = vsel %vm1211_vm0, %v1227_v57, %v1229_v59  ;;  %v1233_v36 = vrot.slane %v9054_v56, 1  ;;  %v9087_v34 = vadd.f32 %v2377_v35, %v2084_v11  ;;  %v15933_v37 = vrot.slane %v9065_v1, 5  ;;  %v9126_v11 = vld [vmem:[#allocation4] ss:$0 sm:$0xff] }
  0xf4   : > { %16288 = vst [vmem:[#allocation22_spill] sm:$0xff] %v9083_v61  ;;  %v1502_v16 = vadd.f32 %v1228_v14, %v925_v40  ;;  %v1811_v42 = vsel %vm1798_vm1, %v15936_v29, %v1810_v27  ;;  %v1815_v43 = vsel %vm1798_vm1, %v1812_v28, %v1814_v33  ;;  %v1503_v48 = vadd.f32 %v1230_v8, %v926_v26  ;;  %v9135_v14 = vpop.permute.xlu0 %526 }
  0xf5   : > { %16289 = vst [vmem:[#allocation23_spill] sm:$0xff] %v9087_v34  ;;  %v2386_v38 = vrot.slane %v9081_v13, 5  ;;  %v1034_v18 = vmul.f32 %v8912_v7, %v512_v58  ;;  %v1617_v40 = vmul.f32 %v8926_v15, %v507_v5  ;;  %v1232_v20 = vsel %vm1211_vm0, %v1229_v59, %v1231_v60 }
  0xf6   : > { %v1234_v63 = vsel %vm1211_vm0, %v1231_v60, %v1233_v36  ;;  %v1618_v27 = vmul.f32 %v8926_v15, %v512_v58  ;;  %v9109_v24 = vmul.f32 %v8932_v19, %v512_v58  ;;  %v9111_v28 = vadd.f32 %v1811_v42, %v1500_v12  ;;  %v9133_v35 = vpop.permute.xlu1 %531 }
  0xf7   : > { %v9118_v50 = vsel %vm2370_vm2, %v15933_v37, %v2382_v32  ;;  %v2089_v51 = vadd.f32 %v1815_v43, %v1502_v16  ;;  %v9121_v6 = vmul.f32 %v8938_v21, %v512_v58  ;;  %v1235_v54 = vrot.slane %v1033_v44, 1 }
  0xf8   : > { %v2189_v55 = vmul.f32 %v8932_v19, %v507_v5  ;;  %v1620_v57 = vmul.f32 %v8926_v15, %v522_v45  ;;  %v1619_v59 = vmul.f32 %v8926_v15, %v517_v47  ;;  %v1504_v56 = vadd.f32 %v1232_v20, %v927_v17  ;;  %v9168_v0 = vpop.permute.xlu0 %536 }
  0xf9   : > { %v1505_v4 = vadd.f32 %v1234_v63, %v928_v10  ;;  %v1237_v9 = vrot.slane %v1034_v18, 1  ;;  %v1816_v23 = vrot.slane %v1617_v40, 4  ;;  %v2387_v32 = vsel %vm2370_vm2, %v2384_v30, %v2386_v38 }
  0xfa   : > { %v1818_v12 = vrot.slane %v1618_v27, 4  ;;  %v2390_v58 = vrot.slane %v9109_v24, 5  ;;  %v930_v26 = vmul.f32 %v8938_v21, %v507_v5  ;;  %v9137_v13 = vadd.f32 %v2387_v32, %v2089_v51  ;;  %v9166_v32 = vpop.permute.xlu1 %541 }
  0xfb   : > { %v9141_v17 = vadd.f32 %v9126_v11, %v8979_v39  ;;  %v9144_v8 = vmul.f32 %v8938_v21, %v522_v45  ;;  %v1035_v25 = vmul.f32 %v8912_v7, %v517_v47  ;;  %v1236_v30 = vsel %vm1211_vm0, %v1233_v36, %v1235_v54 }
  0xfc   : > { %v2388_v60 = vrot.slane %v2189_v55, 5  ;;  %v1822_v10 = vrot.slane %v1620_v57, 4  ;;  %v1820_v5 = vrot.slane %v1619_v59, 4  ;;  %v1238_v16 = vsel %vm1211_vm0, %v1235_v54, %v1237_v9 }
  0xfd   : > { %16290 = vst [vmem:[#allocation24_spill] sm:$0xff] %v9141_v17  ;;  %v1817_v42 = vsel %vm1798_vm1, %v1814_v33, %v1816_v23  ;;  %v9152_v43 = vmul.f32 %v8926_v15, %v9133_v35  ;;  %v1621_v39 = vmul.f32 %v8926_v15, %v9135_v14  ;;  %v1819_v44 = vsel %vm1798_vm1, %v1816_v23, %v1818_v12 }
  0xfe   : > { %v1036_v18 = vmul.f32 %v8912_v7, %v522_v45  ;;  %v2192_v36 = vmul.f32 %v8932_v19, %v522_v45  ;;  %v2191_v40 = vmul.f32 %v8932_v19, %v517_v47  ;;  %v15934_v20 = vmax.f32 %v9141_v17, 0.0 }
  0xff   : > { %v1506_v63 = vadd.f32 %v1236_v30, %v929_v41  ;;  %v932_v33 = vmul.f32 %v8938_v21, %v517_v47  ;;  %v1239_v27 = vrot.slane %v1035_v25, 1  ;;  %v1507_v24 = vadd.f32 %v1238_v16, %v930_v26 }
 0x100   : > { %v2090_v51 = vadd.f32 %v1817_v42, %v1503_v48  ;;  %v1821_v54 = vsel %vm1798_vm1, %v1818_v12, %v1820_v5  ;;  %v1823_v55 = vsel %vm1798_vm1, %v1820_v5, %v1822_v10  ;;  %v2091_v57 = vadd.f32 %v1819_v44, %v1504_v56 }
 0x101   : > { %v2389_v59 = vsel %vm2370_vm2, %v2386_v38, %v2388_v60  ;;  %v1826_v23 = vrot.slane %v9152_v43, 4  ;;  %v1824_v45 = vrot.slane %v1621_v39, 4  ;;  %v2394_v41 = vrot.slane %v2192_v36, 5 }
 0x102   : > { %v2392_v30 = vrot.slane %v2191_v40, 5  ;;  %v9172_v47 = vmul.f32 %v8932_v19, %v9133_v35  ;;  %v1037_v48 = vmul.f32 %v8912_v7, %v9135_v14  ;;  %v1240_v56 = vsel %vm1211_vm0, %v1237_v9, %v1239_v27 }
 0x103   : > { %v2092_v12 = vadd.f32 %v1821_v54, %v1505_v4  ;;  %v2093_v38 = vadd.f32 %v1823_v55, %v1506_v63  ;;  %v2193_v26 = vmul.f32 %v8932_v19, %v9135_v14  ;;  %v2391_v25 = vsel %vm2370_vm2, %v2388_v60, %v2390_v58 }
 0x104   : > { %v1241_v5 = vrot.slane %v1036_v18, 1  ;;  %v9182_v16 = vmul.f32 %v8926_v15, %v9166_v32  ;;  %v1623_v42 = vmul.f32 %v8926_v15, %v9168_v0  ;;  %v2663_v43 = vadd.f32 %v2391_v25, %v2091_v57 }
 0x105   : > { %v9188_v39 = vmul.f32 %v8912_v7, %v9133_v35  ;;  %v1825_v4 = vsel %vm1798_vm1, %v1822_v10, %v1824_v45  ;;  %v1827_v9 = vsel %vm1798_vm1, %v1824_v45, %v1826_v23  ;;  %v1508_v44 = vadd.f32 %v1240_v56, %v9121_v6 }
 0x106   : > { %v2393_v60 = vsel %vm2370_vm2, %v2390_v58, %v2392_v30  ;;  %v2395_v18 = vsel %vm2370_vm2, %v2392_v30, %v2394_v41  ;;  %v1243_v36 = vrot.slane %v1037_v48, 1  ;;  %v2398_v54 = vrot.slane %v9172_v47, 5 }
 0x107   : > { %v2664_v40 = vadd.f32 %v2393_v60, %v2092_v12  ;;  %v2665_v63 = vadd.f32 %v2395_v18, %v2093_v38  ;;  %v2396_v55 = vrot.slane %v2193_v26, 5  ;;  %v2094_v57 = vadd.f32 %v1825_v4, %v1507_v24  ;;  %v552_v60 = vpop.permute.xlu1 %551 }
 0x108   : > { %v2095_v25 = vadd.f32 %v1827_v9, %v1508_v44  ;;  %v1830_v3 = vrot.slane %v9182_v16, 4  ;;  %v1828_v37 = vrot.slane %v1623_v42, 4  ;;  %v9199_v10 = vrot.slane %v15934_v20, 1 }
 0x109   : > { %v9201_v6 = vadd.f32 %v2389_v59, %v2090_v51  ;;  %v9204_v58 = vadd.f32 %v9126_v11, %v2663_v43  ;;  %v1245_v45 = vrot.slane %v9188_v39, 1  ;;  %v1242_v30 = vsel %vm1211_vm0, %v1239_v27, %v1241_v5 }
 0x10a   : > { %16291 = vst [vmem:[#allocation25_spill] sm:$0xff] %v9199_v10  ;;  %v1244_v47 = vsel %vm1211_vm0, %v1241_v5, %v1243_v36  ;;  %v9211_v24 = vmul.f32 %v8932_v19, %v9166_v32  ;;  %v2195_v48 = vmul.f32 %v8932_v19, %v9168_v0  ;;  %v9216_v56 = vadd.f32 %v9126_v11, %v2664_v40 }
 0x10b   : > { %v9219_v51 = vadd.f32 %v9126_v11, %v2665_v63  ;;  %v2397_v59 = vsel %vm2370_vm2, %v2394_v41, %v2396_v55  ;;  %v2399_v12 = vsel %vm2370_vm2, %v2396_v55, %v2398_v54  ;;  %v1829_v26 = vsel %vm1798_vm1, %v1826_v23, %v1828_v37  ;;  %v562_v20 = vpop.permute.xlu1 %561 }
 0x10c   : > { %v2666_v27 = vadd.f32 %v2397_v59, %v2094_v57  ;;  %v2667_v38 = vadd.f32 %v2399_v12, %v2095_v25  ;;  %v1831_v5 = vsel %vm1798_vm1, %v1828_v37, %v1830_v3  ;;  %v1509_v42 = vadd.f32 %v1242_v30, %v932_v33  ;;  %v547_v37 = vpop.permute.xlu0 %546 }
 0x10d   : > { %v1510_v43 = vadd.f32 %v1244_v47, %v9144_v8  ;;  %v1040_v39 = vmul.f32 %v8912_v7, %v9166_v32  ;;  %v1039_v4 = vmul.f32 %v8912_v7, %v9168_v0  ;;  %v935_v41 = vmul.f32 %v8938_v21, %v9133_v35 }
 0x10e   : > { %v934_v9 = vmul.f32 %v8938_v21, %v9135_v14  ;;  %v15942_v23 = vrot.slane %v9211_v24, 5  ;;  %v2400_v44 = vrot.slane %v2195_v48, 5  ;;  %v1246_v8 = vsel %vm1211_vm0, %v1243_v36, %v1245_v45 }
 0x10f   : > { %v2096_v18 = vadd.f32 %v1829_v26, %v1509_v42  ;;  %v2097_v40 = vadd.f32 %v1831_v5, %v1510_v43  ;;  %v15938_v63 = vmax.f32 %v9216_v56, 0.0  ;;  %v15937_v55 = vmax.f32 %v9219_v51, 0.0 }
 0x110   : > { %v9242_v35 = vadd.f32 %v9126_v11, %v2666_v27  ;;  %v9245_v14 = vadd.f32 %v9126_v11, %v2667_v38  ;;  %v1249_v57 = vrot.slane %v1040_v39, 1  ;;  %v1247_v25 = vrot.slane %v1039_v4, 1 }
 0x111   : > { %v9248_v30 = vmul.f32 %v8926_v15, %v552_v60  ;;  %v1625_v47 = vmul.f32 %v8926_v15, %v547_v37  ;;  %v937_v36 = vmul.f32 %v8938_v21, %v9166_v32  ;;  %v2401_v48 = vsel %vm2370_vm2, %v2398_v54, %v2400_v44 }
 0x112   : > { %v2403_v59 = vsel %vm2370_vm2, %v2400_v44, %v15942_v23  ;;  %v1041_v12 = vmul.f32 %v8912_v7, %v547_v37  ;;  %v1511_v27 = vadd.f32 %v1246_v8, %v934_v9  ;;  %v2668_v38 = vadd.f32 %v2401_v48, %v2096_v18  ;;  %v557_v8 = vpop.permute.xlu0 %556 }
 0x113   : > { %v2669_v26 = vadd.f32 %v2403_v59, %v2097_v40  ;;  %v9259_v5 = vmul.f32 %v8912_v7, %v552_v60  ;;  %v9263_v42 = vrot.slane %v15938_v63, 1  ;;  %v9267_v32 = vrot.slane %v15937_v55, 1 }
 0x114   : > { %v15939_v54 = vmax.f32 %v9242_v35, 0.0  ;;  %v15940_v43 = vmax.f32 %v9245_v14, 0.0  ;;  %v1248_v39 = vsel %vm1211_vm0, %v1245_v45, %v1247_v25  ;;  %v1250_v4 = vsel %vm1211_vm0, %v1247_v25, %v1249_v57 }
 0x115   : > { %v15941_v9 = vrot.slane %v9248_v30, 4  ;;  %v1832_v44 = vrot.slane %v1625_v47, 4  ;;  %v936_v18 = vmul.f32 %v8938_v21, %v9168_v0  ;;  %v9277_v40 = vmul.f32 %v8932_v19, %v552_v60 }
 0x116   : > { %v1251_v48 = vrot.slane %v1041_v12, 1  ;;  %v2197_v59 = vmul.f32 %v8932_v19, %v547_v37  ;;  %v9281_v46 = vadd.f32 %v9126_v11, %v2668_v38  ;;  %v9284_v45 = vadd.f32 %v9126_v11, %v2669_v26 }
 0x117   : > { %v9287_v25 = vmul.f32 %v8938_v21, %v552_v60  ;;  %v15943_v47 = vrot.slane %v9259_v5, 1  ;;  %v3057_v0 = vrot.slane %v15939_v54, 1  ;;  %v9294_v12 = vrot.slane %v15940_v43, 1 }
 0x118   : > { %v1512_v29 = vadd.f32 %v1248_v39, %v935_v41  ;;  %v1513_v55 = vadd.f32 %v1250_v4, %v936_v18  ;;  %v1833_v38 = vsel %vm1798_vm1, %v1830_v3, %v1832_v44  ;;  %v1835_v60 = vsel %vm1798_vm1, %v1832_v44, %v15941_v9  ;;  %v9316_v44 = vpop.permute.xlu0 %566 }
 0x119   : > { %v9303_v26 = vmul.f32 %v8912_v7, %v562_v20  ;;  %v9306_v63 = vmul.f32 %v8926_v15, %v562_v20  ;;  %v938_v43 = vmul.f32 %v8938_v21, %v547_v37  ;;  %v1252_v41 = vsel %vm1211_vm0, %v1249_v57, %v1251_v48 }
 0x11a   : > { %v2404_v39 = vrot.slane %v2197_v59, 5  ;;  %v15944_v16 = vmax.f32 %v9281_v46, 0.0  ;;  %v1254_v4 = vsel %vm1211_vm0, %v1251_v48, %v15943_v47  ;;  %v2762_v18 = vadd.f32 %v9126_v11, %v9137_v13 }
 0x11b   : > { %v2098_v9 = vadd.f32 %v1833_v38, %v1511_v27  ;;  %v2099_v33 = vadd.f32 %v1835_v60, %v1512_v29  ;;  %v9321_v37 = vmul.f32 %v8938_v21, %v562_v20  ;;  %v1627_v57 = vmul.f32 %v8926_v15, %v557_v8  ;;  %v572_v27 = vpop.permute.xlu1 %571 }
 0x11c   : > { %v2763_v23 = vadd.f32 %v9126_v11, %v9201_v6  ;;  %v2856_v48 = vmax.f32 %v2762_v18, 0.0  ;;  %v1514_v47 = vadd.f32 %v1252_v41, %v937_v36  ;;  %v9328_v3 = vadd.f32 %v1254_v4, %v938_v43 }
 0x11d   : > { %v9331_v13 = vmul.f32 %v8932_v19, %v562_v20  ;;  %v1043_v29 = vmul.f32 %v8912_v7, %v557_v8  ;;  %v9336_v38 = vrot.slane %v15944_v16, 1  ;;  %v16292_v60 = vmax.f32 %v9284_v45, 0.0 }
 0x11e   : > { %v16293_v6 = vrot.slane %v9211_v24, 5  ;;  %v16294_v43 = vrot.slane %v9277_v40, 5  ;;  %v940_v18 = vmul.f32 %v8938_v21, %v557_v8  ;;  %v1836_v54 = vrot.slane %v1627_v57, 4 }
 0x11f   : > { %v9340_v59 = vrot.slane %v16292_v60, 1  ;;  %v2199_v16 = vmul.f32 %v8932_v19, %v557_v8  ;;  %v9351_v62 = vmul.f32 %v8938_v21, %v572_v27  ;;  %v9353_v60 = vpop.permute.xlu0 %576  ;;  %v2857_v53 = vmax.f32 %v2763_v23, 0.0 }
 0x120   : > { %v2405_v36 = vsel %vm2370_vm2, %v16293_v6, %v2404_v39  ;;  %v2407_v20 = vsel %vm2370_vm2, %v2404_v39, %v16294_v43  ;;  %v3047_v24 = vrot.slane %v2856_v48, 1  ;;  %v1255_v17 = vrot.slane %v1043_v29, 1 }
 0x121   : > { %v2670_v41 = vadd.f32 %v2405_v36, %v2098_v9  ;;  %v2671_v4 = vadd.f32 %v2407_v20, %v2099_v33  ;;  %v16295_v34 = vmax.f32 %v9204_v58, 0.0  ;;  %v3056_v33 = vsel %vm1211_vm0, %v9263_v42, %v9267_v32 }
 0x122   : > { %v9363_v9 = vsel %vm1211_vm0, %v9199_v10, %v3047_v24  ;;  %v3049_v8 = vrot.slane %v2857_v53, 1  ;;  %v3058_v57 = vsel %vm1211_vm0, %v9267_v32, %v3057_v0  ;;  %v3060_v23 = vsel %vm1211_vm0, %v3057_v0, %v9294_v12  ;;  %v9386_v0 = vpop.permute.xlu1 %581 }
 0x123   : > { %v3051_v39 = vrot.slane %v16295_v34, 1  ;;  %16296 = vst [vmem:[#allocation26_spill] sm:$0xff] %v9363_v9  ;;  %v9370_v29 = vadd.f32 %v9126_v11, %v2670_v41  ;;  %v16297_v34 = vrot.slane %v9248_v30, 4  ;;  %v16298_v43 = vmax.f32 %v9216_v56, 0.0 }
 0x124   : > { %v16300_v6 = vmax.f32 %v9219_v51, 0.0  ;;  %v16301_v32 = vrot.slane %v9306_v63, 4  ;;  %v3050_v41 = vsel %vm1211_vm0, %v3047_v24, %v3049_v8  ;;  %v9395_v56 = vadd.f32 %v9126_v11, %v2671_v4  ;;  %v9403_v24 = vpop.permute.xlu0 %586 }
 0x125   : > { %v1837_v36 = vsel %vm1798_vm1, %v16297_v34, %v1836_v54  ;;  %v9377_v20 = vmax.f32 %v16298_v43, %v3056_v33  ;;  %v3052_v30 = vsel %vm1211_vm0, %v3049_v8, %v3051_v39  ;;  %v16302_v34 = vmax.f32 %v9242_v35, 0.0 }
 0x126   : > { %v9381_v10 = vmax.f32 %v16300_v6, %v3058_v57  ;;  %v1839_v9 = vsel %vm1798_vm1, %v1836_v54, %v16301_v32  ;;  %v16303_v51 = vrot.slane %v9259_v5, 1  ;;  %v16304_v33 = vrot.slane %v9303_v26, 1 }
 0x127   : > { %16299 = vst [vmem:[#allocation27_spill] sm:$0xff] %v9377_v20  ;;  %v9392_v2 = vmax.f32 %v16302_v34, %v3060_v23  ;;  %v2408_v57 = vrot.slane %v2199_v16, 5  ;;  %v2100_v43 = vadd.f32 %v1837_v36, %v1513_v55  ;;  %v15948_v8 = vrot.slane %v9377_v20, 4  ;;  %v9441_v36 = vpop.permute.xlu1 %591 }
 0x128   : > { %v1256_v6 = vsel %vm1211_vm0, %v16303_v51, %v1255_v17  ;;  %v1258_v54 = vsel %vm1211_vm0, %v1255_v17, %v16304_v33  ;;  %v3518_v35 = vrot.slane %v9381_v10, 4  ;;  %v15949_v4 = vmax.f32 %v9370_v29, 0.0 }
 0x129   : > { %v3520_v23 = vrot.slane %v9392_v2, 4  ;;  %v2101_v32 = vadd.f32 %v1839_v9, %v1514_v47  ;;  %v9409_v5 = vmax.f32 %v2856_v48, %v3050_v41  ;;  %v9411_v34 = vmax.f32 %v2857_v53, %v3052_v30 }
 0x12a   : > { %v9414_v51 = vmul.f32 %v8912_v7, %v572_v27  ;;  %v9417_v17 = vmul.f32 %v8926_v15, %v572_v27  ;;  %v3519_v55 = vsel %vm1798_vm1, %v15948_v8, %v3518_v35  ;;  %v16307_v47 = vrot.slane %v9277_v40, 5 }
 0x12b   : > { %16305 = vst [vmem:[#allocation28_spill] sm:$0xff] %v9409_v5  ;;  %16306 = vst [vmem:[#allocation29_spill] sm:$0xff] %v9411_v34  ;;  %v3521_v16 = vsel %vm1798_vm1, %v3518_v35, %v3520_v23  ;;  %v9428_v53 = vmax.f32 %v9409_v5, %v3519_v55  ;;  %v9434_v41 = vadd.f32 %v1256_v6, %v9287_v25  ;;  %v16310_v33 = vrot.slane %v9331_v13, 5 }
 0x12c   : > { %v2409_v48 = vsel %vm2370_vm2, %v16307_v47, %v2408_v57  ;;  %v9431_v9 = vmax.f32 %v9411_v34, %v3521_v16  ;;  %v9436_v30 = vadd.f32 %v1258_v54, %v940_v18  ;;  %v3065_v40 = vrot.slane %v15949_v4, 1 }
 0x12d   : > { %16308 = vst [vmem:[#allocation30_spill] sm:$0xff] %v9428_v53  ;;  %v2411_v35 = vsel %vm2370_vm2, %v2408_v57, %v16310_v33  ;;  %v2672_v8 = vadd.f32 %v2409_v48, %v2100_v43  ;;  %v3062_v25 = vsel %vm1211_vm0, %v9294_v12, %v9336_v38  ;;  %v9451_v18 = vmul.f32 %v8932_v19, %v572_v27  ;;  %v9459_v57 = vpop.permute.xlu0 %596 }
 0x12e   : > { %16309 = vst [vmem:[#allocation31_spill] sm:$0xff] %v9431_v9  ;;  %v2673_v55 = vadd.f32 %v2411_v35, %v2101_v32  ;;  %v7705_v16 = vpack.i.bf16 %v9431_v9, %v9428_v53  ;;  %v9455_v6 = vmul.f32 %v8912_v7, %v9316_v44  ;;  %v1629_v54 = vmul.f32 %v8926_v15, %v9316_v44 }
 0x12f   : > { %v3064_v43 = vsel %vm1211_vm0, %v9336_v38, %v9340_v59  ;;  %v9466_v32 = vmul.f32 %v8912_v7, %v9441_v36  ;;  %v9470_v12 = vmul.f32 %v8912_v7, %v9403_v24  ;;  %v16312_v27 = vmax.f32 %v9245_v14, 0.0 }
 0x130   : > { %7706 = vrot.lane.b32.xlu0 %v7705_v16, %s8690_s19  ;;  %v16313_v48 = vmax.f32 %v9281_v46, 0.0  ;;  %v16314_v38 = vmax.f32 %v9395_v56, 0.0  ;;  %v9486_v4 = vadd.f32 %v9126_v11, %v2672_v8  ;;  %v9490_v9 = vmul.f32 %v8932_v19, %v9316_v44 }
 0x131   : > { %16311 = vst [vmem:[#allocation32_spill] sm:$0xff] %v9466_v32  ;;  %v9475_v47 = vmax.f32 %v16312_v27, %v3062_v25  ;;  %v3054_v14 = vsel %vm1211_vm0, %v3051_v39, %v9263_v42  ;;  %v9495_v16 = vadd.f32 %v9126_v11, %v2673_v55  ;;  %v16316_v46 = vmax.f32 %v9204_v58, 0.0  ;;  %v9522_v34 = vpop.permute.xlu0 %606 }
 0x132   : > { %v9479_v33 = vmax.f32 %v16313_v48, %v3064_v43  ;;  %v9483_v35 = vrot.slane %v16314_v38, 1  ;;  %v9501_v43 = vmul.f32 %v8938_v21, %v9316_v44  ;;  %v1840_v48 = vrot.slane %v1629_v54, 4  ;;  %v9505_v38 = vpop.permute.xlu1 %601  ;;  %16318 = vst [vmem:[#allocation35_spill] sm:$0xff] %v9522_v34 }
 0x133   : > { %16315 = vst [vmem:[#allocation33_spill] sm:$0xff] %v9505_v38  ;;  %v3522_v42 = vrot.slane %v9475_v47, 4  ;;  %v9512_v25 = vmax.f32 %v16316_v46, %v3054_v14  ;;  %v2412_v8 = vrot.slane %v9490_v9, 5  ;;  %v9519_v54 = vmul.f32 %v8926_v15, %v9386_v0 }
 0x134   : > { %v3524_v44 = vrot.slane %v9479_v33, 4  ;;  %v9527_v58 = vmul.f32 %v8926_v15, %v9505_v38  ;;  %v16320_v9 = vrot.slane %v9306_v63, 4  ;;  %v1631_v55 = vmul.f32 %v8926_v15, %v9353_v60 }
 0x135   : > { %16317 = vst [vmem:[#allocation34_spill] sm:$0xff] %v9512_v25  ;;  %v3523_v27 = vsel %vm1798_vm1, %v3520_v23, %v3522_v42  ;;  %v9538_v23 = vmul.f32 %v8932_v19, %v9386_v0  ;;  %v9558_v5 = vmul.f32 %v8926_v15, %v9522_v34 }
 0x136   : > { %v3525_v14 = vsel %vm1798_vm1, %v3522_v42, %v3524_v44  ;;  %v9531_v46 = vmax.f32 %v9512_v25, %v3523_v27  ;;  %v1841_v53 = vsel %vm1798_vm1, %v16320_v9, %v1840_v48  ;;  %v946_v42 = vmul.f32 %v8938_v21, %v9403_v24 }
 0x137   : > { %v9543_v39 = vmax.f32 %v9377_v20, %v3525_v14  ;;  %v16322_v27 = vrot.slane %v9466_v32, 1  ;;  %v16323_v25 = vrot.slane %v9470_v12, 1  ;;  %v9554_v9 = vmul.f32 %v8932_v19, %v9505_v38 }
 0x138   : > { %16319 = vst [vmem:[#allocation36_spill] sm:$0xff] %v9531_v46  ;;  %v9564_v20 = vmul.f32 %v8932_v19, %v9522_v34  ;;  %v3066_v32 = vsel %vm1211_vm0, %v9340_v59, %v3065_v40  ;;  %v2102_v1 = vadd.f32 %v1841_v53, %v9328_v3  ;;  %v1854_v49 = vrot.slane %v9527_v58, 4 }
 0x139   : > { %16321 = vst [vmem:[#allocation37_spill] sm:$0xff] %v9543_v39  ;;  %v1270_v63 = vsel %vm1211_vm0, %v16323_v25, %v16322_v27  ;;  %v7710_v14 = vpack.i.bf16 %v9543_v39, %v9531_v46  ;;  %v3068_v25 = vsel %vm1211_vm0, %v3065_v40, %v9483_v35  ;;  %v16324_v27 = vrot.slane %v9417_v17, 4 }
 0x13a   : > { %v15972_v39 = vrot.slane %v9558_v5, 4  ;;  %v1523_v46 = vadd.f32 %v1270_v63, %v946_v42  ;;  %v15971_v34 = vrot.slane %v9564_v20, 5  ;;  %v16325_v59 = vmax.f32 %v9284_v45, 0.0 }
 0x13b   : > { %v1843_v38 = vsel %vm1798_vm1, %v1840_v48, %v16324_v27  ;;  %7711 = vrot.lane.b32.xlu1 %v7710_v14, %s8690_s19  ;;  %v16326_v40 = vmax.f32 %v9370_v29, 0.0  ;;  %v16327_v48 = vmax.f32 %v9486_v4, 0.0  ;;  %v16328_v53 = vrot.slane %v9455_v6, 1 }
 0x13c   : > { %v9580_v22 = vmax.f32 %v16325_v59, %v3066_v32  ;;  %v16329_v27 = vrot.slane %v9303_v26, 1  ;;  %v2426_v63 = vrot.slane %v9554_v9, 5  ;;  %v1857_v45 = vsel %vm1798_vm1, %v1854_v49, %v15972_v39 }
 0x13d   : > { %v9584_v61 = vmax.f32 %v16326_v40, %v3068_v25  ;;  %v3069_v3 = vrot.slane %v16327_v48, 1  ;;  %v2103_v29 = vadd.f32 %v1843_v38, %v9434_v41  ;;  %v16330_v32 = vrot.slane %v9331_v13, 5 }
 0x13e   : > { %v1260_v42 = vsel %vm1211_vm0, %v16329_v27, %v16328_v53  ;;  %v1844_v25 = vrot.slane %v1631_v55, 4  ;;  %v2110_v59 = vadd.f32 %v1857_v45, %v1523_v46  ;;  %v9605_v26 = vmul.f32 %v8912_v7, %v9353_v60 }
 0x13f   : > { %v2413_v14 = vsel %vm2370_vm2, %v16330_v32, %v2412_v8  ;;  %v2429_v40 = vsel %vm2370_vm2, %v2426_v63, %v15971_v34  ;;  %v3526_v48 = vrot.slane %v9580_v22, 4  ;;  %v3528_v41 = vrot.slane %v9584_v61, 4 }
 0x140   : > { %v2674_v38 = vadd.f32 %v2413_v14, %v2102_v1  ;;  %v1846_v13 = vrot.slane %v9519_v54, 4  ;;  %v2203_v55 = vmul.f32 %v8932_v19, %v9353_v60  ;;  %v9617_v46 = vadd.f32 %v2429_v40, %v2110_v59 }
 0x141   : > { %v16331_v53 = vmax.f32 %v9495_v16, 0.0  ;;  %v16332_v45 = vrot.slane %v9451_v18, 5  ;;  %v3527_v34 = vsel %vm1798_vm1, %v3524_v44, %v3526_v48  ;;  %v3529_v39 = vsel %vm1798_vm1, %v3526_v48, %v3528_v41 }
 0x142   : > { %v16333_v54 = vrot.slane %v9417_v17, 4  ;;  %v9632_v59 = vmax.f32 %v9381_v10, %v3527_v34  ;;  %v9635_v40 = vmax.f32 %v9392_v2, %v3529_v39  ;;  %v9642_v44 = vmul.f32 %v8926_v15, %v9441_v36 }
 0x143   : > { %v9621_v27 = vrot.slane %v16331_v53, 1  ;;  %v2415_v32 = vsel %vm2370_vm2, %v2412_v8, %v16332_v45  ;;  %v1048_v53 = vmul.f32 %v8912_v7, %v9386_v0  ;;  %v1263_v8 = vrot.slane %v9605_v26, 1 }
 0x144   : > { %v2675_v1 = vadd.f32 %v2415_v32, %v2103_v29  ;;  %v1845_v14 = vsel %vm1798_vm1, %v16333_v54, %v1844_v25  ;;  %16334 = vst [vmem:[#allocation38_spill] sm:$0xff] %v9632_v59  ;;  %16335 = vst [vmem:[#allocation39_spill] sm:$0xff] %v9635_v40  ;;  %v1633_v17 = vmul.f32 %v8926_v15, %v9403_v24  ;;  %v2416_v34 = vrot.slane %v2203_v55, 5 }
 0x145   : > { %v9647_v29 = vadd.f32 %v9126_v11, %v2674_v38  ;;  %v1847_v10 = vsel %vm1798_vm1, %v1844_v25, %v1846_v13  ;;  %v7715_v2 = vpack.i.bf16 %v9635_v40, %v9632_v59  ;;  %v1518_v39 = vadd.f32 %v1260_v42, %v9321_v37 }
 0x146   : > { %v2104_v26 = vadd.f32 %v1845_v14, %v9436_v30  ;;  %v3070_v48 = vsel %vm1211_vm0, %v9483_v35, %v3069_v3  ;;  %v3072_v45 = vsel %vm1211_vm0, %v3069_v3, %v9621_v27  ;;  %v16336_v32 = vrot.slane %v9414_v51, 1 }
 0x147   : > { %v16337_v38 = vrot.slane %v9455_v6, 1  ;;  %v9664_v55 = vadd.f32 %v9126_v11, %v2675_v1  ;;  %v2418_v54 = vrot.slane %v9538_v23, 5  ;;  %7716 = vrot.lane.b32.xlu0 %v7715_v2, %s8690_s19  ;;  %v16338_v37 = vmax.f32 %v9395_v56, 0.0 }
 0x148   : > { %v2105_v35 = vadd.f32 %v1847_v10, %v1518_v39  ;;  %v1850_v3 = vrot.slane %v9642_v44, 4  ;;  %v1848_v42 = vrot.slane %v1633_v17, 4  ;;  %v16339_v14 = vmax.f32 %v9486_v4, 0.0 }
 0x149   : > { %v1262_v25 = vsel %vm1211_vm0, %v16337_v38, %v16336_v32  ;;  %v9670_v30 = vmax.f32 %v16338_v37, %v3070_v48  ;;  %v2869_v32 = vmax.f32 %v9647_v29, 0.0  ;;  %v16340_v1 = vrot.slane %v9414_v51, 1 }
 0x14a   : > { %v9675_v6 = vmax.f32 %v16339_v14, %v3072_v45  ;;  %v16341_v2 = vrot.slane %v9451_v18, 5  ;;  %v9686_v10 = vmul.f32 %v8932_v19, %v9441_v36  ;;  %v1519_v17 = vadd.f32 %v1262_v25, %v9501_v43 }
 0x14b   : > { %v1264_v23 = vsel %vm1211_vm0, %v16340_v1, %v1263_v8  ;;  %v1265_v39 = vrot.slane %v1048_v53, 1  ;;  %v2205_v48 = vmul.f32 %v8932_v19, %v9403_v24  ;;  %v2870_v29 = vmax.f32 %v9664_v55, 0.0 }
 0x14c   : > { %v2417_v56 = vsel %vm2370_vm2, %v16341_v2, %v2416_v34  ;;  %v2419_v51 = vsel %vm2370_vm2, %v2416_v34, %v2418_v54  ;;  %v3530_v45 = vrot.slane %v9670_v30, 4  ;;  %v3532_v18 = vrot.slane %v9675_v6, 4 }
 0x14d   : > { %v2676_v4 = vadd.f32 %v2417_v56, %v2104_v26  ;;  %v1520_v38 = vadd.f32 %v1264_v23, %v9351_v62  ;;  %v2677_v37 = vadd.f32 %v2419_v51, %v2105_v35  ;;  %v1849_v14 = vsel %vm1798_vm1, %v1846_v13, %v1848_v42 }
 0x14e   : > { %v1851_v43 = vsel %vm1798_vm1, %v1848_v42, %v1850_v3  ;;  %v3073_v53 = vrot.slane %v2869_v32, 1  ;;  %v2422_v24 = vrot.slane %v9686_v10, 5  ;;  %v3531_v26 = vsel %vm1798_vm1, %v3528_v41, %v3530_v45 }
 0x14f   : > { %v3533_v34 = vsel %vm1798_vm1, %v3530_v45, %v3532_v18  ;;  %v9704_v25 = vadd.f32 %v9126_v11, %v2676_v4  ;;  %v2420_v1 = vrot.slane %v2205_v48, 5  ;;  %v9707_v62 = vmax.f32 %v9475_v47, %v3531_v26 }
 0x150   : > { %v9710_v13 = vmax.f32 %v9479_v33, %v3533_v34  ;;  %v3075_v35 = vrot.slane %v2870_v29, 1  ;;  %v2106_v42 = vadd.f32 %v1849_v14, %v1519_v17  ;;  %v2107_v23 = vadd.f32 %v1851_v43, %v1520_v38  ;;  %v16349_v43 = vld [vmem:[#allocation21_spill] sm:$0xff] }
 0x151   : > { %16342 = vst [vmem:[#allocation40_spill] sm:$0xff] %v9707_v62  ;;  %v1635_v41 = vmul.f32 %v8926_v15, %v9459_v57  ;;  %v16344_v2 = vrot.slane %v9041_v52, 4  ;;  %v16345_v56 = vrot.slane %v9013_v31, 4  ;;  %v2659_v47 = vadd.f32 %v9118_v50, %v9111_v28 }
 0x152   : > { %16343 = vst [vmem:[#allocation41_spill] sm:$0xff] %v9710_v13  ;;  %v9724_v33 = vadd.f32 %v9126_v11, %v2677_v37  ;;  %v7720_v48 = vpack.i.bf16 %v9710_v13, %v9707_v62  ;;  %v944_v17 = vmul.f32 %v8938_v21, %v9353_v60  ;;  %v1266_v51 = vsel %vm1211_vm0, %v1263_v8, %v1265_v39 }
 0x153   : > { %v1809_v4 = vsel %vm1798_vm1, %v16345_v56, %v16344_v2  ;;  %v16346_v52 = vrot.slane %v9470_v12, 1  ;;  %v3074_v45 = vsel %vm1211_vm0, %v9621_v27, %v3073_v53  ;;  %v2871_v28 = vmax.f32 %v9704_v25, 0.0  ;;  %v16348_v27 = vld [vmem:[#allocation22_spill] sm:$0xff]  ;;  %v16351_v2 = vld [vmem:[#allocation20_spill] sm:$0xff] }
 0x154   : > { %v2421_v50 = vsel %vm2370_vm2, %v2418_v54, %v2420_v1  ;;  %v2423_v38 = vsel %vm2370_vm2, %v2420_v1, %v2422_v24  ;;  %7721 = vrot.lane.b32.xlu1 %v7720_v48, %s8690_s19  ;;  %v16347_v60 = vmax.f32 %v9495_v16, 0.0  ;;  %v3076_v14 = vsel %vm1211_vm0, %v3073_v53, %v3075_v35  ;;  %v16350_v54 = vld [vmem:[#allocation17_spill] sm:$0xff]  ;;  %v16353_v56 = vld [vmem:[#allocation16_spill] sm:$0xff] }
 0x155   : > { %v1268_v31 = vsel %vm1211_vm0, %v1265_v39, %v16346_v52  ;;  %v2678_v12 = vadd.f32 %v2421_v50, %v2106_v42  ;;  %v2679_v37 = vadd.f32 %v2423_v38, %v2107_v23  ;;  %v1852_v39 = vrot.slane %v1635_v41, 4 }
 0x156   : > { %v9744_v8 = vmax.f32 %v16347_v60, %v3074_v45  ;;  %v9749_v26 = vadd.f32 %v16349_v43, %v16348_v27  ;;  %v2086_v34 = vadd.f32 %v1809_v4, %v16350_v54  ;;  %v945_v25 = vmul.f32 %v8938_v21, %v9386_v0 }
 0x157   : > { %v2872_v1 = vmax.f32 %v9724_v33, 0.0  ;;  %v16352_v16 = vrot.slane %v16351_v2, 5  ;;  %v16354_v48 = vrot.slane %v16353_v56, 5  ;;  %v9761_v23 = vadd.f32 %v9126_v11, %v2659_v47 }
 0x158   : > { %v1521_v53 = vadd.f32 %v1266_v51, %v944_v17  ;;  %v2207_v41 = vmul.f32 %v8932_v19, %v9459_v57  ;;  %v3077_v52 = vrot.slane %v2871_v28, 1  ;;  %v1522_v4 = vadd.f32 %v1268_v31, %v945_v25  ;;  %v16355_v51 = vld [vmem:[#allocation33_spill] sm:$0xff] }
 0x159   : > { %v2381_v42 = vsel %vm2370_vm2, %v16354_v48, %v16352_v16  ;;  %v9765_v45 = vmax.f32 %v2869_v32, %v3076_v14  ;;  %v3534_v0 = vrot.slane %v9744_v8, 4  ;;  %v9769_v50 = vadd.f32 %v9126_v11, %v2678_v12 }
 0x15a   : > { %v9772_v38 = vadd.f32 %v9126_v11, %v2679_v37  ;;  %v1853_v47 = vsel %vm1798_vm1, %v1850_v3, %v1852_v39  ;;  %v1855_v17 = vsel %vm1798_vm1, %v1852_v39, %v1854_v49  ;;  %v9782_v32 = vrot.slane %v2872_v1, 1  ;;  %v612_v3 = vpop.permute.xlu1 %611 }
 0x15b   : > { %v9786_v31 = vmul.f32 %v8912_v7, %v16355_v51  ;;  %v3535_v60 = vsel %vm1798_vm1, %v3532_v18, %v3534_v0  ;;  %v3536_v12 = vrot.slane %v9765_v45, 4  ;;  %v9790_v37 = vadd.f32 %v2381_v42, %v2086_v34 }
 0x15c   : > { %v1051_v44 = vmul.f32 %v8912_v7, %v9459_v57  ;;  %v2424_v58 = vrot.slane %v2207_v41, 5  ;;  %v9795_v49 = vmax.f32 %v9580_v22, %v3535_v60  ;;  %v2108_v14 = vadd.f32 %v1853_v47, %v1521_v53  ;;  %v16359_v47 = vld [vmem:[#allocation29_spill] sm:$0xff] }
 0x15d   : > { %v2109_v27 = vadd.f32 %v1855_v17, %v1522_v4  ;;  %v3537_v43 = vsel %vm1798_vm1, %v3534_v0, %v3536_v12  ;;  %v947_v18 = vmul.f32 %v8938_v21, %v9441_v36  ;;  %v15974_v54 = vmax.f32 %v9769_v50, 0.0  ;;  %v9819_v4 = vpop.permute.xlu0 %616  ;;  %v16360_v17 = vld [vmem:[#allocation35_spill] sm:$0xff] }
 0x15e   : > { %16356 = vst [vmem:[#allocation22_spill] sm:$0xff] %v9795_v49  ;;  %v15973_v34 = vmax.f32 %v9772_v38, 0.0  ;;  %v9804_v25 = vmax.f32 %v9584_v61, %v3537_v43  ;;  %v1273_v2 = vrot.slane %v9786_v31, 1  ;;  %v1638_v22 = vmul.f32 %v8926_v15, %v612_v3  ;;  %v622_v60 = vpop.permute.xlu1 %621 }
 0x15f   : > { %v3078_v16 = vsel %vm1211_vm0, %v3075_v35, %v3077_v52  ;;  %v3080_v56 = vsel %vm1211_vm0, %v3077_v52, %v9782_v32  ;;  %v1271_v48 = vrot.slane %v1051_v44, 1  ;;  %v2425_v36 = vsel %vm2370_vm2, %v2422_v24, %v2424_v58  ;;  %v16361_v44 = vld [vmem:[#allocation32_spill] sm:$0xff] }
 0x160   : > { %16357 = vst [vmem:[#allocation21_spill] sm:$0xff] %v9804_v25  ;;  %v2427_v42 = vsel %vm2370_vm2, %v2424_v58, %v2426_v63  ;;  %v7725_v61 = vpack.i.bf16 %v9804_v25, %v9795_v49  ;;  %v2680_v53 = vadd.f32 %v2425_v36, %v2108_v14  ;;  %v9823_v35 = vmax.f32 %v2870_v29, %v3078_v16  ;;  %v16358_v63 = vld [vmem:[#allocation28_spill] sm:$0xff] }
 0x161   : > { %v2681_v41 = vadd.f32 %v2427_v42, %v2109_v27  ;;  %v9825_v52 = vmax.f32 %v2871_v28, %v3080_v56  ;;  %v3081_v10 = vrot.slane %v15974_v54, 1  ;;  %v9831_v9 = vrot.slane %v15973_v34, 1 }
 0x162   : > { %v949_v0 = vmul.f32 %v8938_v21, %v16355_v51  ;;  %7726 = vrot.lane.b32.xlu0 %v7725_v61, %s8690_s19  ;;  %v948_v29 = vmul.f32 %v8938_v21, %v9459_v57  ;;  %v1858_v28 = vrot.slane %v1638_v22, 4  ;;  %v1053_v31 = vmul.f32 %v8912_v7, %v16360_v17 }
 0x163   : > { %v16362_v58 = vrot.slane %v16361_v44, 1  ;;  %v1639_v27 = vmul.f32 %v8926_v15, %v9819_v4  ;;  %v3538_v51 = vrot.slane %v9823_v35, 4  ;;  %v3540_v43 = vrot.slane %v9825_v52, 4 }
 0x164   : > { %v1274_v16 = vsel %vm1211_vm0, %v1271_v48, %v1273_v2  ;;  %v9851_v57 = vadd.f32 %v9126_v11, %v2680_v53  ;;  %v9854_v22 = vadd.f32 %v9126_v11, %v2681_v41  ;;  %v2210_v56 = vmul.f32 %v8932_v19, %v612_v3 }
 0x165   : > { %v1272_v14 = vsel %vm1211_vm0, %v16362_v58, %v1271_v48  ;;  %v1054_v36 = vmul.f32 %v8912_v7, %v612_v3  ;;  %v9859_v42 = vmul.f32 %v8926_v15, %v622_v60  ;;  %v3539_v61 = vsel %vm1798_vm1, %v3536_v12, %v3538_v51 }
 0x166   : > { %16363 = vst [vmem:[#allocation17_spill] sm:$0xff] %v9854_v22  ;;  %v3541_v44 = vsel %vm1798_vm1, %v3538_v51, %v3540_v43  ;;  %v1275_v58 = vrot.slane %v1053_v31, 1  ;;  %v16364_v48 = vrot.slane %v9558_v5, 4  ;;  %v9867_v34 = vmax.f32 %v9670_v30, %v3539_v61 }
 0x167   : > { %v9870_v41 = vmax.f32 %v9675_v6, %v3541_v44  ;;  %v1524_v24 = vadd.f32 %v1272_v14, %v947_v18  ;;  %v1525_v55 = vadd.f32 %v1274_v16, %v948_v29  ;;  %v951_v39 = vmul.f32 %v8938_v21, %v612_v3  ;;  %v16367_v29 = vld [vmem:[#allocation34_spill] sm:$0xff] }
 0x168   : > { %v1859_v53 = vsel %vm1798_vm1, %v16364_v48, %v1858_v28  ;;  %16365 = vst [vmem:[#allocation20_spill] sm:$0xff] %v9867_v34  ;;  %v1860_v54 = vrot.slane %v1639_v27, 4  ;;  %v15975_v12 = vmax.f32 %v9851_v57, 0.0  ;;  %v15977_v51 = vmax.f32 %v9854_v22, 0.0 }
 0x169   : > { %16366 = vst [vmem:[#allocation16_spill] sm:$0xff] %v9870_v41  ;;  %v2430_v31 = vrot.slane %v2210_v56, 5  ;;  %v7730_v5 = vpack.i.bf16 %v9870_v41, %v9867_v34  ;;  %v2111_v48 = vadd.f32 %v1859_v53, %v1524_v24  ;;  %v15981_v30 = vrot.slane %v9859_v42, 4 }
 0x16a   : > { %v2211_v6 = vmul.f32 %v8932_v19, %v9819_v4  ;;  %v3082_v18 = vsel %vm1211_vm0, %v9782_v32, %v3081_v10  ;;  %v1277_v14 = vrot.slane %v1054_v36, 1  ;;  %v1276_v27 = vsel %vm1211_vm0, %v1273_v2, %v1275_v58 }
 0x16b   : > { %7731 = vrot.lane.b32.xlu1 %v7730_v5, %s8690_s19  ;;  %v9887_v16 = vmax.f32 %v2872_v1, %v3082_v18  ;;  %v9890_v24 = vmul.f32 %v8932_v19, %v622_v60  ;;  %v1055_v56 = vmul.f32 %v8912_v7, %v9819_v4  ;;  %v1861_v61 = vsel %vm1798_vm1, %v1858_v28, %v1860_v54 }
 0x16c   : > { %v3084_v32 = vsel %vm1211_vm0, %v3081_v10, %v9831_v9  ;;  %v9899_v2 = vrot.slane %v15975_v12, 1  ;;  %v950_v33 = vmul.f32 %v8938_v21, %v16360_v17  ;;  %v16369_v1 = vrot.slane %v9564_v20, 5 }
 0x16d   : > { %16368 = vst [vmem:[#allocation33_spill] sm:$0xff] %v9887_v16  ;;  %v9907_v44 = vmul.f32 %v8912_v7, %v622_v60  ;;  %v9911_v28 = vrot.slane %v15977_v51, 1  ;;  %v1863_v10 = vsel %vm1798_vm1, %v1860_v54, %v15981_v30  ;;  %v2432_v5 = vrot.slane %v2211_v6, 5  ;;  %v632_v6 = vpop.permute.xlu1 %631 }
 0x16e   : > { %v2431_v36 = vsel %vm2370_vm2, %v16369_v1, %v2430_v31  ;;  %v1526_v18 = vadd.f32 %v1276_v27, %v949_v0  ;;  %v2112_v3 = vadd.f32 %v1861_v61, %v1525_v55  ;;  %v16371_v17 = vmax.f32 %v9769_v50, 0.0 }
 0x16f   : > { %16370 = vst [vmem:[#allocation28_spill] sm:$0xff] %v9911_v28  ;;  %v2683_v53 = vadd.f32 %v2431_v36, %v2111_v48  ;;  %v3542_v1 = vrot.slane %v9887_v16, 4  ;;  %v1278_v12 = vsel %vm1211_vm0, %v1275_v58, %v1277_v14  ;;  %v9923_v22 = vmul.f32 %v8938_v21, %v622_v60 }
 0x170   : > { %v9918_v20 = vmax.f32 %v16371_v17, %v3084_v32  ;;  %v15979_v48 = vrot.slane %v9890_v24, 5  ;;  %v1279_v36 = vrot.slane %v1055_v56, 1  ;;  %v15978_v51 = vrot.slane %v9907_v44, 1 }
 0x171   : > { %v2113_v54 = vadd.f32 %v1863_v10, %v1526_v18  ;;  %v3543_v0 = vsel %vm1798_vm1, %v3540_v43, %v3542_v1  ;;  %v9931_v55 = vadd.f32 %v9126_v11, %v9617_v46  ;;  %v9934_v58 = vadd.f32 %v9126_v11, %v2683_v53  ;;  %v9967_v18 = vpop.permute.xlu0 %626 }
 0x172   : > { %16372 = vst [vmem:[#allocation29_spill] sm:$0xff] %v9918_v20  ;;  %v15980_v50 = vrot.slane %v9918_v20, 4  ;;  %v2433_v60 = vsel %vm2370_vm2, %v2430_v31, %v2432_v5  ;;  %v9938_v27 = vmax.f32 %v9744_v8, %v3543_v0  ;;  %v9940_v56 = vadd.f32 %v1278_v12, %v950_v33  ;;  %v16377_v33 = vld [vmem:[#allocation23_spill] sm:$0xff] }
 0x173   : > { %16373 = vst [vmem:[#allocation35_spill] sm:$0xff] %v9931_v55  ;;  %16374 = vst [vmem:[#allocation32_spill] sm:$0xff] %v9934_v58  ;;  %v952_v61 = vmul.f32 %v8938_v21, %v9819_v4  ;;  %v2684_v43 = vadd.f32 %v2433_v60, %v2112_v3  ;;  %v1280_v46 = vsel %vm1211_vm0, %v1277_v14, %v1279_v36 }
 0x174   : > { %16375 = vst [vmem:[#allocation34_spill] sm:$0xff] %v9938_v27  ;;  %v3545_v32 = vsel %vm1798_vm1, %v3542_v1, %v15980_v50  ;;  %v2435_v53 = vsel %vm2370_vm2, %v2432_v5, %v15979_v48  ;;  %v9952_v31 = vmul.f32 %v8912_v7, %v632_v6  ;;  %v1282_v4 = vsel %vm1211_vm0, %v1279_v36, %v15978_v51  ;;  %v16381_v5 = vld [vmem:[#allocation24_spill] sm:$0xff] }
 0x175   : > { %v9955_v8 = vmax.f32 %v9765_v45, %v3545_v32  ;;  %v2685_v12 = vadd.f32 %v2435_v53, %v2113_v54  ;;  %v9961_v3 = vmul.f32 %v8926_v15, %v632_v6  ;;  %v2757_v14 = vadd.f32 %v9126_v11, %v16377_v33 }
 0x176   : > { %v2758_v17 = vadd.f32 %v9126_v11, %v9749_v26  ;;  %v9973_v1 = vadd.f32 %v1280_v46, %v951_v39  ;;  %v9976_v36 = vadd.f32 %v9126_v11, %v2684_v43  ;;  %v2759_v54 = vadd.f32 %v9126_v11, %v9790_v37 }
 0x177   : > { %16376 = vst [vmem:[#allocation42_spill] sm:$0xff] %v9955_v8  ;;  %v7735_v45 = vpack.i.bf16 %v9955_v8, %v9938_v27  ;;  %v2851_v0 = vmax.f32 %v2757_v14, 0.0  ;;  %v9980_v60 = vadd.f32 %v1282_v4, %v952_v61  ;;  %v9983_v32 = vmul.f32 %v8938_v21, %v632_v6 }
 0x178   : > { %v9987_v33 = vmul.f32 %v8932_v19, %v632_v6  ;;  %v9991_v26 = vadd.f32 %v9126_v11, %v2685_v12  ;;  %v9996_v37 = vmul.f32 %v8912_v7, %v9967_v18  ;;  %v1641_v61 = vmul.f32 %v8926_v15, %v9967_v18  ;;  %v16380_v12 = vld [vmem:[#allocation26_spill] sm:$0xff] }
 0x179   : > { %7736 = vrot.lane.b32.xlu0 %v7735_v45, %s8690_s19  ;;  %v2852_v43 = vmax.f32 %v2758_v17, 0.0  ;;  %v2853_v46 = vmax.f32 %v2759_v54, 0.0  ;;  %v10000_v4 = vrot.slane %v2851_v0, 1  ;;  %v16379_v6 = vmax.f32 %v9761_v23, 0.0 }
 0x17a   : > { %16378 = vst [vmem:[#allocation23_spill] sm:$0xff] %v9991_v26  ;;  %v10007_v11 = vmul.f32 %v8932_v19, %v9967_v18  ;;  %v16382_v10 = vmax.f32 %v16381_v5, 0.0  ;;  %v16383_v51 = vrot.slane %v16359_v47, 4  ;;  %v16384_v17 = vrot.slane %v16358_v63, 4 }
 0x17b   : > { %v3043_v14 = vrot.slane %v16379_v6, 1  ;;  %v3039_v48 = vrot.slane %v2852_v43, 1  ;;  %v3041_v39 = vrot.slane %v2853_v46, 1  ;;  %v16385_v6 = vld [vmem:[#allocation25_spill] sm:$0xff]  ;;  %v3086_v50 = vsel %vm1211_vm0, %v9831_v9, %v9899_v2 }
 0x17c   : > { %v10012_v53 = vmax.f32 %v16382_v10, %v16380_v12  ;;  %v3513_v54 = vsel %vm1798_vm1, %v16384_v17, %v16383_v51  ;;  %v1864_v30 = vrot.slane %v1641_v61, 4  ;;  %v16386_v5 = vmax.f32 %v9761_v23, 0.0 }
 0x17d   : > { %v3046_v45 = vsel %vm1211_vm0, %v3043_v14, %v16385_v6  ;;  %v3088_v51 = vsel %vm1211_vm0, %v9899_v2, %v9911_v28  ;;  %v3040_v17 = vsel %vm1211_vm0, %v10000_v4, %v3039_v48  ;;  %v3042_v6 = vsel %vm1211_vm0, %v3039_v48, %v3041_v39 }
 0x17e   : > { %v10026_v10 = vmax.f32 %v16386_v5, %v3046_v45  ;;  %v3508_v12 = vrot.slane %v10012_v53, 4  ;;  %v3044_v16 = vsel %vm1211_vm0, %v3041_v39, %v3043_v14  ;;  %v16387_v9 = vmax.f32 %v9772_v38, 0.0 }
 0x17f   : > { %v15987_v23 = vmax.f32 %v9991_v26, 0.0  ;;  %v1283_v45 = vrot.slane %v9996_v37, 1  ;;  %v10042_v5 = vmax.f32 %v2852_v43, %v3042_v6  ;;  %v10044_v8 = vmax.f32 %v2853_v46, %v3044_v16  ;;  %v10059_v16 = vpop.permute.xlu1 %641 }
 0x180   : > { %v10038_v61 = vmax.f32 %v16387_v9, %v3086_v50  ;;  %v15988_v2 = vrot.slane %v10026_v10, 4  ;;  %v16389_v28 = vrot.slane %v16358_v63, 4  ;;  %v16390_v39 = vmax.f32 %v9851_v57, 0.0  ;;  %v637_v63 = vpop.permute.xlu0 %636 }
 0x181   : > { %v16392_v50 = vrot.slane %v9859_v42, 4  ;;  %v2436_v43 = vrot.slane %v10007_v11, 5  ;;  %v3307_v46 = vmax.f32 %v2851_v0, %v3040_v17  ;;  %v16395_v42 = vrot.slane %v9918_v20, 4 }
 0x182   : > { %16388 = vst [vmem:[#allocation26_spill] sm:$0xff] %v10038_v61  ;;  %v3511_v48 = vsel %vm1798_vm1, %v3508_v12, %v16389_v28  ;;  %v10052_v14 = vmax.f32 %v16390_v39, %v3088_v51  ;;  %v3546_v38 = vrot.slane %v10038_v61, 4  ;;  %v3509_v57 = vsel %vm1798_vm1, %v15988_v2, %v3508_v12 }
 0x183   : > { %v1865_v37 = vsel %vm1798_vm1, %v16392_v50, %v1864_v30  ;;  %v10062_v6 = vmax.f32 %v10042_v5, %v3511_v48  ;;  %v10068_v28 = vmax.f32 %v10044_v8, %v3513_v54  ;;  %v16396_v9 = vrot.slane %v9961_v3, 4 }
 0x184   : > { %16391 = vst [vmem:[#allocation24_spill] sm:$0xff] %v10052_v14  ;;  %v3547_v51 = vsel %vm1798_vm1, %v16395_v42, %v3546_v38  ;;  %v15986_v11 = vrot.slane %v10052_v14, 4  ;;  %v10077_v17 = vmax.f32 %v3307_v46, %v3509_v57  ;;  %v2114_v54 = vadd.f32 %v1865_v37, %v9940_v56 }
 0x185   : > { %16393 = vst [vmem:[#allocation25_spill] sm:$0xff] %v10062_v6  ;;  %16394 = vst [vmem:[#allocation43_spill] sm:$0xff] %v10068_v28  ;;  %v1867_v0 = vsel %vm1798_vm1, %v1864_v30, %v16396_v9  ;;  %v3953_v48 = vrot.slane %v10062_v6, 2  ;;  %v10081_v39 = vmax.f32 %v9823_v35, %v3547_v51  ;;  %v10086_v12 = vmul.f32 %v8926_v15, %v10059_v16 }
 0x186   : > { %16397 = vst [vmem:[#allocation44_spill] sm:$0xff] %v10077_v17  ;;  %v15989_v50 = vrot.slane %v10068_v28, 2  ;;  %v3549_v42 = vsel %vm1798_vm1, %v3546_v38, %v15986_v11  ;;  %v1643_v30 = vmul.f32 %v8926_v15, %v637_v63  ;;  %v15990_v46 = vrot.slane %v10077_v17, 2 }
 0x187   : > { %16398 = vst [vmem:[#allocation45_spill] sm:$0xff] %v10081_v39  ;;  %v10095_v35 = vmax.f32 %v9825_v52, %v3549_v42  ;;  %v16400_v56 = vmax.f32 %v9976_v36, 0.0  ;;  %v10103_v57 = vrot.slane %v15987_v23, 1  ;;  %v2438_v51 = vrot.slane %v9987_v33, 5 }
 0x188   : > { %v3956_v38 = vsel %vm3947_vm3, %v3953_v48, %v15989_v50  ;;  %v2115_v9 = vadd.f32 %v1867_v0, %v9973_v1  ;;  %v16403_v11 = vrot.slane %v9890_v24, 5  ;;  %v3954_v42 = vsel %vm3947_vm3, %v15990_v46, %v3953_v48 }
 0x189   : > { %16399 = vst [vmem:[#allocation46_spill] sm:$0xff] %v10095_v35  ;;  %v10099_v37 = vrot.slane %v16400_v56, 1  ;;  %16402 = vst [vmem:[#allocation48_spill] sm:$0xff] %v10103_v57  ;;  %v7740_v56 = vpack.i.bf16 %v10095_v35, %v10081_v39  ;;  %v16404_v23 = vrot.slane %v9907_v44, 1  ;;  %v16405_v2 = vrot.slane %v9952_v31, 1 }
 0x18a   : > { %v2437_v52 = vsel %vm2370_vm2, %v16403_v11, %v2436_v43  ;;  %v7755_v0 = vpack.i.bf16 %v3956_v38, %v3954_v42  ;;  %v954_v24 = vmul.f32 %v8938_v21, %v9967_v18  ;;  %v10129_v48 = vmul.f32 %v8932_v19, %v10059_v16  ;;  %v10144_v38 = vpop.permute.xlu1 %651  ;;  %v16406_v42 = vld [vmem:[#allocation36_spill] sm:$0xff] }
 0x18b   : > { %16401 = vst [vmem:[#allocation47_spill] sm:$0xff] %v10099_v37  ;;  %v1284_v33 = vsel %vm1211_vm0, %v16404_v23, %v1283_v45  ;;  %v1286_v50 = vsel %vm1211_vm0, %v1283_v45, %v16405_v2  ;;  %v2686_v1 = vadd.f32 %v2437_v52, %v2114_v54  ;;  %v1868_v46 = vrot.slane %v1643_v30, 4  ;;  %7741 = vrot.lane.b32.xlu1 %v7740_v56, %s8690_s19  ;;  %v10146_v52 = vpop.permute.xlu0 %646  ;;  %v10149_v11 = vld [vmem:[#allocation4] ss:$0 sm:$0xff] }
 0x18c   : > { %v10135_v44 = vsel %vm1211_vm0, %v10099_v37, %v10103_v57  ;;  %v2439_v23 = vsel %vm2370_vm2, %v2436_v43, %v2438_v51  ;;  %v1059_v45 = vmul.f32 %v8912_v7, %v637_v63  ;;  %v2215_v18 = vmul.f32 %v8932_v19, %v637_v63  ;;  %7756 = vrot.lane.b32.xlu0 %v7755_v0, %s8691_s20  ;;  %v16408_v0 = vld [vmem:[#allocation37_spill] sm:$0xff] }
 0x18d   : > { %v1530_v2 = vadd.f32 %v1284_v33, %v9923_v22  ;;  %v10142_v54 = vadd.f32 %v1286_v50, %v954_v24  ;;  %v2687_v30 = vadd.f32 %v2439_v23, %v2115_v9  ;;  %v10152_v43 = vadd.f32 %v10149_v11, %v2686_v1 }
 0x18e   : > { %v10156_v6 = vmul.f32 %v8912_v7, %v10059_v16  ;;  %v3967_v22 = vrot.slane %v16408_v0, 2  ;;  %v956_v33 = vmul.f32 %v8938_v21, %v637_v63  ;;  %v16409_v24 = vrot.slane %v9961_v3, 4 }
 0x18f   : > { %16407 = vst [vmem:[#allocation49_spill] sm:$0xff] %v10152_v43  ;;  %v16410_v56 = vrot.slane %v10086_v12, 4  ;;  %v1287_v61 = vrot.slane %v1059_v45, 1  ;;  %v2440_v26 = vrot.slane %v2215_v18, 5  ;;  %v10170_v20 = vmul.f32 %v8926_v15, %v10144_v38  ;;  %v16414_v18 = vld [vmem:[#allocation19_spill] sm:$0xff] }
 0x190   : > { %v1869_v23 = vsel %vm1798_vm1, %v16409_v24, %v1868_v46  ;;  %v1645_v50 = vmul.f32 %v8926_v15, %v10146_v52  ;;  %v16411_v9 = vrot.slane %v16406_v42, 2  ;;  %v16412_v3 = vrot.slane %v9632_v59, 2 }
 0x191   : > { %v1871_v1 = vsel %vm1798_vm1, %v1868_v46, %v16410_v56  ;;  %v16413_v46 = vld [vmem:[#allocation18_spill] sm:$0xff]  ;;  %v2756_v56 = vadd.f32 %v10149_v11, %v16414_v18  ;;  %v2116_v57 = vadd.f32 %v1869_v23, %v9980_v60  ;;  %v3503_v35 = vrot.slane %v10042_v5, 4  ;;  %v10206_v23 = vpop.permute.xlu0 %656 }
 0x192   : > { %v10177_v63 = vsel %vm3947_vm3, %v16411_v9, %v3967_v22  ;;  %v10182_v24 = vsel %vm3947_vm3, %v3967_v22, %v16412_v3  ;;  %v2755_v45 = vadd.f32 %v10149_v11, %v16413_v46  ;;  %v2117_v37 = vadd.f32 %v1871_v1, %v1530_v2 }
 0x193   : > { %v7760_v9 = vpack.i.bf16 %v10182_v24, %v10177_v63  ;;  %v3504_v14 = vrot.slane %v10044_v8, 4  ;;  %v2850_v3 = vmax.f32 %v2756_v56, 0.0  ;;  %v10195_v39 = vadd.f32 %v10149_v11, %v2687_v30 }
 0x194   : > { %v2849_v22 = vmax.f32 %v2755_v45, 0.0  ;;  %v16416_v46 = vrot.slane %v9952_v31, 1  ;;  %v2441_v0 = vsel %vm2370_vm2, %v2438_v51, %v2440_v26  ;;  %v16417_v60 = vrot.slane %v10129_v48, 5 }
 0x195   : > { %16415 = vst [vmem:[#allocation18_spill] sm:$0xff] %v10195_v39  ;;  %7761 = vrot.lane.b32.xlu0 %v7760_v9, %s8692_s21  ;;  %v1874_v8 = vrot.slane %v10170_v20, 4  ;;  %v1872_v5 = vrot.slane %v1645_v50, 4  ;;  %v3035_v1 = vrot.slane %v2850_v3, 1  ;;  %v16418_v31 = vrot.slane %v10156_v6, 1 }
 0x196   : > { %v1288_v18 = vsel %vm1211_vm0, %v16416_v46, %v1287_v61  ;;  %v2443_v2 = vsel %vm2370_vm2, %v2440_v26, %v16417_v60  ;;  %v3034_v30 = vrot.slane %v2849_v22, 1  ;;  %v2688_v56 = vadd.f32 %v2441_v0, %v2116_v57 }
 0x197   : > { %v1290_v45 = vsel %vm1211_vm0, %v1287_v61, %v16418_v31  ;;  %v2689_v51 = vadd.f32 %v2443_v2, %v2117_v37  ;;  %v10213_v46 = vmul.f32 %v8932_v19, %v10144_v38  ;;  %v2217_v26 = vmul.f32 %v8932_v19, %v10146_v52 }
 0x198   : > { %v3036_v20 = vsel %vm1211_vm0, %v3034_v30, %v3035_v1  ;;  %v3038_v50 = vsel %vm1211_vm0, %v3035_v1, %v10000_v4  ;;  %v3505_v9 = vsel %vm1798_vm1, %v3503_v35, %v3504_v14  ;;  %v1532_v60 = vadd.f32 %v1288_v18, %v9983_v32 }
 0x199   : > { %v10224_v61 = vmul.f32 %v8926_v15, %v10206_v23  ;;  %v3305_v37 = vmax.f32 %v2849_v22, %v3036_v20  ;;  %v16419_v57 = vrot.slane %v10026_v10, 4  ;;  %v1533_v2 = vadd.f32 %v1290_v45, %v956_v33  ;;  %v16422_v22 = vld [vmem:[#allocation27_spill] sm:$0xff] }
 0x19a   : > { %v16420_v31 = vrot.slane %v10086_v12, 4  ;;  %v1875_v4 = vsel %vm1798_vm1, %v1872_v5, %v1874_v8  ;;  %v3306_v1 = vmax.f32 %v2850_v3, %v3038_v50  ;;  %v10234_v35 = vadd.f32 %v10149_v11, %v2688_v56 }
 0x19b   : > { %v3507_v0 = vsel %vm1798_vm1, %v3504_v14, %v16419_v57  ;;  %v10237_v32 = vadd.f32 %v10149_v11, %v2689_v51  ;;  %v10239_v18 = vmax.f32 %v3305_v37, %v3505_v9  ;;  %v16423_v20 = vrot.slane %v16422_v22, 4  ;;  %v16427_v22 = vld [vmem:[#allocation30_spill] sm:$0xff] }
 0x19c   : > { %v1873_v30 = vsel %vm1798_vm1, %v16420_v31, %v1872_v5  ;;  %v16424_v14 = vrot.slane %v16367_v29, 4  ;;  %v10248_v12 = vmul.f32 %v8912_v7, %v10144_v38  ;;  %v2446_v3 = vrot.slane %v10213_v46, 5 }
 0x19d   : > { %16421 = vst [vmem:[#allocation19_spill] sm:$0xff] %v10239_v18  ;;  %v2444_v5 = vrot.slane %v2217_v26, 5  ;;  %v10251_v45 = vmax.f32 %v3306_v1, %v3507_v0  ;;  %v1061_v56 = vmul.f32 %v8912_v7, %v10146_v52  ;;  %v2118_v51 = vadd.f32 %v1873_v30, %v10142_v54  ;;  %v16428_v54 = vld [vmem:[#allocation31_spill] sm:$0xff]  ;;  %v667_v26 = vpop.permute.xlu1 %666 }
 0x19e   : > { %v3517_v33 = vsel %vm1798_vm1, %v16424_v14, %v16423_v20  ;;  %v2119_v50 = vadd.f32 %v1875_v4, %v1532_v60  ;;  %v16010_v9 = vrot.slane %v10224_v61, 4  ;;  %v3948_v37 = vrot.slane %v10239_v18, 2 }
 0x19f   : > { %16425 = vst [vmem:[#allocation27_spill] sm:$0xff] %v10251_v45  ;;  %v3949_v57 = vrot.slane %v10251_v45, 2  ;;  %v10260_v31 = vmax.f32 %v10012_v53, %v3517_v33  ;;  %v3961_v46 = vrot.slane %v16427_v22, 2  ;;  %v10267_v1 = vmul.f32 %v8932_v19, %v10206_v23 }
 0x1a0   : > { %v3963_v60 = vrot.slane %v16428_v54, 2  ;;  %v16429_v30 = vrot.slane %v10129_v48, 5  ;;  %v2447_v20 = vsel %vm2370_vm2, %v2444_v5, %v2446_v3  ;;  %v16430_v14 = vrot.slane %v10077_v17, 2 }
 0x1a1   : > { %16426 = vst [vmem:[#allocation50_spill] sm:$0xff] %v10260_v31  ;;  %v3950_v53 = vsel %vm3947_vm3, %v3948_v37, %v3949_v57  ;;  %v1877_v0 = vsel %vm1798_vm1, %v1874_v8, %v16010_v9  ;;  %v16006_v54 = vrot.slane %v10260_v31, 2  ;;  %v1291_v18 = vrot.slane %v1061_v56, 1 }
 0x1a2   : > { %v2445_v4 = vsel %vm2370_vm2, %v16429_v30, %v2444_v5  ;;  %v3952_v33 = vsel %vm3947_vm3, %v3949_v57, %v16430_v14  ;;  %v3964_v48 = vsel %vm3947_vm3, %v3961_v46, %v3963_v60  ;;  %v2691_v45 = vadd.f32 %v2447_v20, %v2119_v50 }
 0x1a3   : > { %v7745_v22 = vpack.i.bf16 %v3952_v33, %v3950_v53  ;;  %v2690_v30 = vadd.f32 %v2445_v4, %v2118_v51  ;;  %v16431_v5 = vrot.slane %v16406_v42, 2  ;;  %v16007_v57 = vmax.f32 %v10152_v43, 0.0 }
 0x1a4   : > { %v1293_v14 = vrot.slane %v10248_v12, 1  ;;  %v16009_v17 = vrot.slane %v10267_v1, 5  ;;  %v3962_v8 = vsel %vm3947_vm3, %v16006_v54, %v3961_v46  ;;  %v16432_v56 = vmax.f32 %v9931_v55, 0.0 }
 0x1a5   : > { %v10286_v37 = vsel %vm3947_vm3, %v3963_v60, %v16431_v5  ;;  %7746 = vrot.lane.b32.xlu1 %v7745_v22, %s8691_s20  ;;  %v16008_v50 = vmax.f32 %v10195_v39, 0.0  ;;  %v2120_v60 = vadd.f32 %v1877_v0, %v1533_v2  ;;  %v7775_v4 = vpack.i.bf16 %v3964_v48, %v3962_v8 }
 0x1a6   : > { %v10297_v51 = vrot.slane %v16432_v56, 1  ;;  %v16433_v20 = vmax.f32 %v9934_v58, 0.0  ;;  %v16435_v12 = vmax.f32 %v10234_v35, 0.0  ;;  %v16437_v22 = vmax.f32 %v10237_v32, 0.0 }
 0x1a7   : > { %v7750_v46 = vpack.i.bf16 %v10286_v37, %v3964_v48  ;;  %v16438_v56 = vmax.f32 %v9976_v36, 0.0  ;;  %v16440_v2 = vrot.slane %v10156_v6, 1  ;;  %v10320_v8 = vadd.f32 %v10149_v11, %v2690_v30  ;;  %7776 = vrot.lane.b32.xlu0 %v7775_v4, %s8691_s20  ;;  %v10336_v30 = vpop.permute.xlu1 %671 }
 0x1a8   : > { %v10302_v53 = vrot.slane %v16433_v20, 1  ;;  %v10306_v33 = vrot.slane %v16435_v12, 1  ;;  %v3103_v5 = vrot.slane %v16437_v22, 1  ;;  %v10323_v20 = vadd.f32 %v10149_v11, %v2691_v45 }
 0x1a9   : > { %v10314_v54 = vmax.f32 %v16438_v56, %v10135_v44  ;;  %v1292_v0 = vsel %vm1211_vm0, %v16440_v2, %v1291_v18  ;;  %v10328_v48 = vrot.slane %v16007_v57, 1  ;;  %v957_v36 = vmul.f32 %v8938_v21, %v10059_v16  ;;  %7751 = vrot.lane.b32.xlu1 %v7750_v46, %s8692_s21 }
 0x1aa   : > { %16434 = vst [vmem:[#allocation51_spill] sm:$0xff] %v10302_v53  ;;  %16436 = vst [vmem:[#allocation52_spill] sm:$0xff] %v10306_v33  ;;  %v1294_v44 = vsel %vm1211_vm0, %v1291_v18, %v1293_v14  ;;  %v2449_v6 = vsel %vm2370_vm2, %v2446_v3, %v16009_v17  ;;  %v10341_v45 = vrot.slane %v16008_v50, 1  ;;  %v959_v4 = vmul.f32 %v8938_v21, %v10144_v38  ;;  %v10347_v18 = vpop.permute.xlu0 %661 }
 0x1ab   : > { %16439 = vst [vmem:[#allocation53_spill] sm:$0xff] %v10314_v54  ;;  %16441 = vst [vmem:[#allocation54_spill] sm:$0xff] %v10328_v48  ;;  %v958_v16 = vmul.f32 %v8938_v21, %v10146_v52  ;;  %v2692_v12 = vadd.f32 %v2449_v6, %v2120_v60  ;;  %v3104_v3 = vsel %vm1211_vm0, %v10306_v33, %v3103_v5  ;;  %v3973_v56 = vrot.slane %v9707_v62, 2 }
 0x1ac   : > { %16442 = vst [vmem:[#allocation55_spill] sm:$0xff] %v10341_v45  ;;  %v1534_v22 = vadd.f32 %v1292_v0, %v957_v36  ;;  %v10353_v46 = vmul.f32 %v8912_v7, %v10206_v23  ;;  %v2885_v38 = vmax.f32 %v10320_v8, 0.0  ;;  %v10362_v52 = vmul.f32 %v8926_v15, %v10336_v30 }
 0x1ad   : > { %v10356_v2 = vadd.f32 %v1294_v44, %v958_v16  ;;  %v10365_v60 = vmul.f32 %v8912_v7, %v667_v26  ;;  %v1648_v0 = vmul.f32 %v8926_v15, %v10347_v18  ;;  %v3975_v36 = vrot.slane %v9710_v13, 2 }
 0x1ae   : > { %v1649_v44 = vmul.f32 %v8926_v15, %v667_v26  ;;  %v10373_v8 = vmul.f32 %v8932_v19, %v667_v26  ;;  %v10376_v16 = vadd.f32 %v10149_v11, %v2692_v12  ;;  %v16443_v50 = vrot.slane %v16367_v29, 4 }
 0x1af   : > { %v16444_v17 = vrot.slane %v16359_v47, 4  ;;  %v16445_v57 = vmax.f32 %v10234_v35, 0.0  ;;  %v1295_v6 = vrot.slane %v10353_v46, 1  ;;  %v10389_v13 = vsel %vm3947_vm3, %v3973_v56, %v3975_v36 }
 0x1b0   : > { %v16446_v42 = vrot.slane %v9795_v49, 2  ;;  %v3105_v43 = vrot.slane %v2885_v38, 1  ;;  %v16447_v29 = vmax.f32 %v10323_v20, 0.0  ;;  %v16449_v39 = vrot.slane %v10224_v61, 4  ;;  %v10447_v61 = vpop.permute.xlu0 %676 }
 0x1b1   : > { %v3515_v9 = vsel %vm1798_vm1, %v16444_v17, %v16443_v50  ;;  %v10385_v62 = vmax.f32 %v16445_v57, %v3104_v3  ;;  %v16020_v17 = vrot.slane %v10362_v52, 4  ;;  %v10402_v57 = vmul.f32 %v8938_v21, %v667_v26 }
 0x1b2   : > { %v10394_v12 = vsel %vm3947_vm3, %v3975_v36, %v16446_v42  ;;  %v3107_v47 = vrot.slane %v16447_v29, 1  ;;  %v1299_v50 = vrot.slane %v10365_v60, 1  ;;  %v1878_v3 = vrot.slane %v1648_v0, 4 }
 0x1b3   : > { %v7780_v35 = vpack.i.bf16 %v10394_v12, %v10389_v13  ;;  %v10406_v46 = vmax.f32 %v10026_v10, %v3515_v9  ;;  %v1880_v42 = vrot.slane %v1649_v44, 4  ;;  %v2452_v36 = vrot.slane %v10373_v8, 5 }
 0x1b4   : > { %v10412_v29 = vmul.f32 %v8912_v7, %v10336_v30  ;;  %v1296_v26 = vsel %vm1211_vm0, %v1293_v14, %v1295_v6  ;;  %v10418_v60 = vmul.f32 %v8932_v19, %v10336_v30  ;;  %v2220_v10 = vmul.f32 %v8932_v19, %v10347_v18 }
 0x1b5   : > { %16448 = vst [vmem:[#allocation56_spill] sm:$0xff] %v10406_v46  ;;  %7781 = vrot.lane.b32.xlu0 %v7780_v35, %s8692_s21  ;;  %v3957_v9 = vrot.slane %v10406_v46, 2  ;;  %v3106_v0 = vsel %vm1211_vm0, %v3103_v5, %v3105_v43  ;;  %v3108_v44 = vsel %vm1211_vm0, %v3105_v43, %v3107_v47  ;;  %v1883_v8 = vsel %vm1798_vm1, %v1880_v42, %v16020_v17  ;;  %v10430_v35 = vpop.permute.xlu1 %686 }
 0x1b6   : > { %v1064_v14 = vmul.f32 %v8912_v7, %v10347_v18  ;;  %v1879_v45 = vsel %vm1798_vm1, %v16449_v39, %v1878_v3  ;;  %v16450_v33 = vrot.slane %v10068_v28, 2  ;;  %v16451_v5 = vrot.slane %v10260_v31, 2 }
 0x1b7   : > { %v3971_v54 = vrot.slane %v9635_v40, 2  ;;  %v1536_v17 = vadd.f32 %v1296_v26, %v959_v4  ;;  %v16452_v48 = vmax.f32 %v10376_v16, 0.0  ;;  %v1301_v55 = vrot.slane %v10412_v29, 1 }
 0x1b8   : > { %v3958_v46 = vsel %vm3947_vm3, %v16450_v33, %v3957_v9  ;;  %v3960_v43 = vsel %vm3947_vm3, %v3957_v9, %v16451_v5  ;;  %v2454_v28 = vrot.slane %v10418_v60, 5  ;;  %v2450_v53 = vrot.slane %v2220_v10, 5 }
 0x1b9   : > { %v10444_v58 = vrot.slane %v16452_v48, 1  ;;  %v7765_v39 = vpack.i.bf16 %v3960_v43, %v3958_v46  ;;  %v16453_v33 = vrot.slane %v9632_v59, 2  ;;  %v10454_v9 = vsel %vm3947_vm3, %v3971_v54, %v3973_v56 }
 0x1ba   : > { %v2123_v4 = vadd.f32 %v1883_v8, %v1536_v17  ;;  %v1297_v26 = vrot.slane %v1064_v14, 1  ;;  %v1881_v48 = vsel %vm1798_vm1, %v1878_v3, %v1880_v42  ;;  %v2121_v5 = vadd.f32 %v1879_v45, %v1534_v22  ;;  %v10476_v22 = vpop.permute.xlu1 %691 }
 0x1bb   : > { %v3972_v31 = vsel %vm3947_vm3, %v16453_v33, %v3971_v54  ;;  %7766 = vrot.lane.b32.xlu1 %v7765_v39, %s8691_s20  ;;  %v16454_v29 = vmax.f32 %v10237_v32, 0.0  ;;  %v960_v10 = vmul.f32 %v8938_v21, %v10206_v23  ;;  %v10466_v43 = vmul.f32 %v8912_v7, %v10447_v61 }
 0x1bc   : > { %v10470_v54 = vmul.f32 %v8926_v15, %v10447_v61  ;;  %v10472_v56 = vmax.f32 %v2885_v38, %v3108_v44  ;;  %v3110_v45 = vsel %vm1211_vm0, %v3107_v47, %v10444_v58  ;;  %v7795_v32 = vpack.i.bf16 %v3972_v31, %v10182_v24 }
 0x1bd   : > { %v10460_v46 = vmax.f32 %v16454_v29, %v3106_v0  ;;  %v7770_v17 = vpack.i.bf16 %v10454_v9, %v3972_v31  ;;  %v1302_v23 = vsel %vm1211_vm0, %v1299_v50, %v1301_v55  ;;  %v2455_v3 = vsel %vm2370_vm2, %v2452_v36, %v2454_v28 }
 0x1be   : > { %16455 = vst [vmem:[#allocation57_spill] sm:$0xff] %v10472_v56  ;;  %v2122_v42 = vadd.f32 %v1881_v48, %v10356_v2  ;;  %v16456_v38 = vrot.slane %v10267_v1, 5  ;;  %v2695_v44 = vadd.f32 %v2455_v3, %v2123_v4  ;;  %v1298_v8 = vsel %vm1211_vm0, %v1295_v6, %v1297_v26  ;;  %7796 = vrot.lane.b32.xlu0 %v7795_v32, %s8691_s20 }
 0x1bf   : > { %7771 = vrot.lane.b32.xlu1 %v7770_v17, %s8692_s21  ;;  %v1300_v31 = vsel %vm1211_vm0, %v1297_v26, %v1299_v50  ;;  %v1303_v14 = vrot.slane %v10466_v43, 1  ;;  %v16027_v2 = vrot.slane %v10470_v54, 4  ;;  %v10497_v1 = vmul.f32 %v8926_v15, %v10476_v22  ;;  %v682_v26 = vpop.permute.xlu0 %681 }
 0x1c0   : > { %v2451_v0 = vsel %vm2370_vm2, %v16456_v38, %v2450_v53  ;;  %v16457_v39 = vmax.f32 %v10323_v20, 0.0  ;;  %v963_v6 = vmul.f32 %v8938_v21, %v10336_v30  ;;  %v961_v4 = vmul.f32 %v8938_v21, %v10347_v18 }
 0x1c1   : > { %v2693_v24 = vadd.f32 %v2451_v0, %v2121_v5  ;;  %v2453_v50 = vsel %vm2370_vm2, %v2450_v53, %v2452_v36  ;;  %v10509_v48 = vadd.f32 %v1302_v23, %v10402_v57  ;;  %v1537_v5 = vadd.f32 %v1298_v8, %v960_v10 }
 0x1c2   : > { %v10501_v33 = vmax.f32 %v16457_v39, %v3110_v45  ;;  %v2694_v29 = vadd.f32 %v2453_v50, %v2122_v42  ;;  %v1653_v43 = vmul.f32 %v8926_v15, %v10430_v35  ;;  %v10514_v20 = vadd.f32 %v10149_v11, %v2695_v44 }
 0x1c3   : > { %v10516_v45 = vadd.f32 %v1300_v31, %v961_v4  ;;  %v10519_v30 = vadd.f32 %v10149_v11, %v2693_v24  ;;  %v966_v53 = vmul.f32 %v8938_v21, %v10430_v35  ;;  %v1304_v18 = vsel %vm1211_vm0, %v1301_v55, %v1303_v14  ;;  %v10555_v24 = vpop.permute.xlu0 %696 }
 0x1c4   : > { %16458 = vst [vmem:[#allocation58_spill] sm:$0xff] %v10501_v33  ;;  %16459 = vst [vmem:[#allocation59_spill] sm:$0xff] %v10514_v20  ;;  %v16461_v57 = vrot.slane %v10362_v52, 4  ;;  %v10531_v10 = vmul.f32 %v8932_v19, %v10447_v61  ;;  %v1890_v32 = vrot.slane %v10497_v1, 4  ;;  %v10536_v17 = vmul.f32 %v8912_v7, %v10476_v22  ;;  %v16491_v20 = vld [vmem:[#allocation29_spill] sm:$0xff]  ;;  %v16502_v33 = vld [vmem:[#allocation52_spill] sm:$0xff] }
 0x1c5   : > { %16460 = vst [vmem:[#allocation60_spill] sm:$0xff] %v10519_v30  ;;  %v10540_v23 = vmul.f32 %v8932_v19, %v10476_v22  ;;  %v3981_v55 = vrot.slane %v9867_v34, 2  ;;  %v3983_v52 = vrot.slane %v9870_v41, 2  ;;  %v10545_v3 = vadd.f32 %v10149_v11, %v2694_v29  ;;  %v16471_v41 = vld [vmem:[#allocation45_spill] sm:$0xff]  ;;  %v16472_v34 = vld [vmem:[#allocation42_spill] sm:$0xff] }
 0x1c6   : > { %v1885_v36 = vsel %vm1798_vm1, %v16461_v57, %v16027_v2  ;;  %v1069_v42 = vmul.f32 %v8912_v7, %v10430_v35  ;;  %v1888_v38 = vrot.slane %v1653_v43, 4  ;;  %v1068_v0 = vmul.f32 %v8912_v7, %v682_v26 }
 0x1c7   : > { %v10552_v44 = vmul.f32 %v8932_v19, %v10430_v35  ;;  %v1652_v8 = vmul.f32 %v8926_v15, %v682_v26  ;;  %v16028_v31 = vrot.slane %v9938_v27, 2  ;;  %v7785_v1 = vpack.i.bf16 %v10177_v63, %v10286_v37  ;;  %v10588_v63 = vpop.permute.xlu1 %706 }
 0x1c8   : > { %v1540_v39 = vadd.f32 %v1304_v18, %v963_v6  ;;  %v2124_v4 = vadd.f32 %v1885_v36, %v1537_v5  ;;  %v2456_v50 = vrot.slane %v10531_v10, 5  ;;  %v1891_v29 = vsel %vm1798_vm1, %v1888_v38, %v1890_v32  ;;  %16462 = vst [vmem:[#allocation61_spill] sm:$0xff] %v10588_v63 }
 0x1c9   : > { %v1309_v43 = vrot.slane %v10536_v17, 1  ;;  %v16029_v35 = vrot.slane %v10540_v23, 5  ;;  %v10565_v57 = vsel %vm3947_vm3, %v3981_v55, %v3983_v52  ;;  %v10570_v47 = vsel %vm3947_vm3, %v3983_v52, %v16028_v31  ;;  %7786 = vrot.lane.b32.xlu1 %v7785_v1, %s8691_s20 }
 0x1ca   : > { %v1305_v37 = vrot.slane %v1068_v0, 1  ;;  %v10576_v6 = vmul.f32 %v8926_v15, %v10555_v24  ;;  %v7800_v5 = vpack.i.bf16 %v10570_v47, %v10565_v57  ;;  %v1307_v18 = vrot.slane %v1069_v42, 1 }
 0x1cb   : > { %v2460_v36 = vrot.slane %v10552_v44, 5  ;;  %v2127_v10 = vadd.f32 %v1891_v29, %v1540_v39  ;;  %v1886_v2 = vrot.slane %v1652_v8, 4  ;;  %v964_v1 = vmul.f32 %v8938_v21, %v10447_v61 }
 0x1cc   : > { %v2457_v0 = vsel %vm2370_vm2, %v2454_v28, %v2456_v50  ;;  %v2224_v31 = vmul.f32 %v8932_v19, %v682_v26  ;;  %7801 = vrot.lane.b32.xlu0 %v7800_v5, %s8692_s21  ;;  %v1310_v44 = vsel %vm1211_vm0, %v1307_v18, %v1309_v43  ;;  %v965_v61 = vmul.f32 %v8938_v21, %v682_v26 }
 0x1cd   : > { %v2696_v42 = vadd.f32 %v2457_v0, %v2124_v4  ;;  %v2463_v8 = vsel %vm2370_vm2, %v2460_v36, %v16029_v35  ;;  %v1306_v60 = vsel %vm1211_vm0, %v1303_v14, %v1305_v37  ;;  %v1308_v28 = vsel %vm1211_vm0, %v1305_v37, %v1307_v18 }
 0x1ce   : > { %v16030_v39 = vrot.slane %v10576_v6, 4  ;;  %v3979_v29 = vrot.slane %v9804_v25, 2  ;;  %v2699_v5 = vadd.f32 %v2463_v8, %v2127_v10  ;;  %v16463_v4 = vrot.slane %v10470_v54, 4 }
 0x1cf   : > { %v1889_v52 = vsel %vm1798_vm1, %v1886_v2, %v1888_v38  ;;  %v10608_v35 = vmul.f32 %v8912_v7, %v10555_v24  ;;  %v2458_v26 = vrot.slane %v2224_v31, 5  ;;  %v10612_v14 = vmul.f32 %v8932_v19, %v10555_v24 }
 0x1d0   : > { %v1887_v0 = vsel %vm1798_vm1, %v16463_v4, %v1886_v2  ;;  %v16464_v37 = vrot.slane %v9795_v49, 2  ;;  %v10618_v10 = vsel %vm3947_vm3, %v3979_v29, %v3981_v55  ;;  %v10621_v54 = vadd.f32 %v10149_v11, %v2696_v42  ;;  %v10639_v42 = vpop.permute.xlu1 %711 }
 0x1d1   : > { %v967_v2 = vmul.f32 %v8938_v21, %v10476_v22  ;;  %v10625_v38 = vadd.f32 %v1310_v44, %v966_v53  ;;  %v1541_v31 = vadd.f32 %v1306_v60, %v964_v1  ;;  %v10627_v8 = vadd.f32 %v1308_v28, %v965_v61  ;;  %16465 = vst [vmem:[#allocation62_spill] sm:$0xff] %v10639_v42  ;;  %v702_v1 = vpop.permute.xlu0 %701 }
 0x1d2   : > { %v3980_v18 = vsel %vm3947_vm3, %v16464_v37, %v3979_v29  ;;  %v10630_v4 = vadd.f32 %v1887_v0, %v10516_v45  ;;  %v10634_v37 = vmul.f32 %v8912_v7, %v10588_v63  ;;  %v1893_v55 = vsel %vm1798_vm1, %v1890_v32, %v16030_v39 }
 0x1d3   : > { %v10642_v22 = vadd.f32 %v1889_v52, %v10509_v48  ;;  %v16036_v53 = vrot.slane %v10608_v35, 1  ;;  %v7815_v44 = vpack.i.bf16 %v3980_v18, %v10394_v12  ;;  %v7790_v45 = vpack.i.bf16 %v10618_v10, %v3980_v18 }
 0x1d4   : > { %v10648_v61 = vadd.f32 %v10149_v11, %v2699_v5  ;;  %v10651_v60 = vsel %vm2370_vm2, %v2456_v50, %v2458_v26  ;;  %v1657_v32 = vmul.f32 %v8926_v15, %v10588_v63  ;;  %v16035_v28 = vrot.slane %v10612_v14, 5 }
 0x1d5   : > { %v16466_v48 = vmax.f32 %v10519_v30, 0.0  ;;  %v10661_v29 = vsel %vm2370_vm2, %v2458_v26, %v2460_v36  ;;  %v2128_v12 = vadd.f32 %v1893_v55, %v1541_v31  ;;  %v10665_v5 = vmul.f32 %v8926_v15, %v10639_v42  ;;  %7816 = vrot.lane.b32.xlu0 %v7815_v44, %s8691_s20  ;;  %7791 = vrot.lane.b32.xlu1 %v7790_v45, %s8692_s21  ;;  %v16467_v36 = vld [vmem:[#allocation28_spill] sm:$0xff]  ;;  %v16468_v45 = vld [vmem:[#allocation17_spill] sm:$0xff] }
 0x1d6   : > { %v10672_v0 = vmul.f32 %v8932_v19, %v10588_v63  ;;  %v1656_v18 = vmul.f32 %v8926_v15, %v702_v1  ;;  %v3090_v26 = vsel %vm1211_vm0, %v16467_v36, %v10297_v51  ;;  %v10680_v31 = vmul.f32 %v8938_v21, %v10555_v24 }
 0x1d7   : > { %v10658_v52 = vrot.slane %v16466_v48, 1  ;;  %v1312_v55 = vsel %vm1211_vm0, %v1309_v43, %v16036_v53  ;;  %v7805_v44 = vpack.i.bf16 %v10389_v13, %v10454_v9  ;;  %v16469_v48 = vmax.f32 %v16468_v45, 0.0  ;;  %v16473_v9 = vld [vmem:[#allocation51_spill] sm:$0xff] }
 0x1d8   : > { %v1896_v39 = vrot.slane %v1657_v32, 4  ;;  %v16470_v36 = vrot.slane %v10540_v23, 5  ;;  %v3989_v25 = vrot.slane %v16471_v41, 2  ;;  %v3987_v17 = vrot.slane %v16472_v34, 2  ;;  %v16481_v41 = vld [vmem:[#allocation35_spill] sm:$0xff] }
 0x1d9   : > { %v10691_v50 = vmax.f32 %v16469_v48, %v3090_v26  ;;  %7806 = vrot.lane.b32.xlu1 %v7805_v44, %s8691_s20  ;;  %v3092_v32 = vsel %vm1211_vm0, %v10297_v51, %v16473_v9  ;;  %v10707_v23 = vadd.f32 %v1312_v55, %v967_v2  ;;  %v1072_v45 = vmul.f32 %v8912_v7, %v702_v1  ;;  %v10715_v44 = vpop.permute.xlu0 %716  ;;  %v16477_v51 = vld [vmem:[#allocation46_spill] sm:$0xff]  ;;  %v16478_v26 = vld [vmem:[#allocation33_spill] sm:$0xff] }
 0x1da   : > { %v2465_v24 = vsel %vm2370_vm2, %v16470_v36, %v16035_v28  ;;  %v1894_v48 = vrot.slane %v1656_v18, 4  ;;  %v2228_v36 = vmul.f32 %v8932_v19, %v702_v1  ;;  %16474 = vst [vmem:[#allocation28_spill] sm:$0xff] %v10715_v44  ;;  %v3991_v43 = vrot.slane %v16477_v51, 2 }
 0x1db   : > { %v2700_v49 = vadd.f32 %v2465_v24, %v2128_v12  ;;  %v3550_v13 = vrot.slane %v10691_v50, 4  ;;  %v10712_v12 = vmul.f32 %v8932_v19, %v10639_v42  ;;  %v16475_v24 = vld [vmem:[#allocation24_spill] sm:$0xff]  ;;  %v16480_v55 = vrot.slane %v9938_v27, 2 }
 0x1dc   : > { %v16476_v28 = vrot.slane %v16475_v24, 4  ;;  %v10730_v34 = vsel %vm3947_vm3, %v3987_v17, %v3989_v25  ;;  %v16482_v40 = vmax.f32 %v16481_v41, 0.0  ;;  %v1313_v51 = vrot.slane %v1072_v45, 1 }
 0x1dd   : > { %v10727_v18 = vsel %vm3947_vm3, %v16480_v55, %v3987_v17  ;;  %v10737_v63 = vadd.f32 %v10149_v11, %v2700_v49  ;;  %v16484_v17 = vrot.slane %v10576_v6, 4  ;;  %v2466_v27 = vrot.slane %v2228_v36, 5  ;;  %v10771_v36 = vpop.permute.xlu0 %721 }
 0x1de   : > { %v3551_v53 = vsel %vm1798_vm1, %v16476_v28, %v3550_v13  ;;  %v10734_v59 = vmax.f32 %v16482_v40, %v3092_v32  ;;  %v16483_v28 = vrot.slane %v10665_v5, 4  ;;  %v7810_v55 = vpack.i.bf16 %v10730_v34, %v10727_v18  ;;  %16490 = vst [vmem:[#allocation51_spill] sm:$0xff] %v10771_v36 }
 0x1df   : > { %v10722_v2 = vmax.f32 %v16478_v26, %v3551_v53  ;;  %v10743_v26 = vmul.f32 %v8938_v21, %v702_v1  ;;  %v1895_v41 = vsel %vm1798_vm1, %v16484_v17, %v1894_v48  ;;  %v1897_v32 = vsel %vm1798_vm1, %v1894_v48, %v1896_v39  ;;  %v16485_v1 = vld [vmem:[#allocation47_spill] sm:$0xff]  ;;  %v16486_v21 = vld [vmem:[#allocation32_spill] sm:$0xff] }
 0x1e0   : > { %v1899_v53 = vsel %vm1798_vm1, %v1896_v39, %v16483_v28  ;;  %v3552_v49 = vrot.slane %v10734_v59, 4  ;;  %v10754_v28 = vsel %vm3947_vm3, %v3989_v25, %v3991_v43  ;;  %7811 = vrot.lane.b32.xlu1 %v7810_v55, %s8692_s21  ;;  %v3094_v45 = vsel %vm1211_vm0, %v16473_v9, %v16485_v1  ;;  %v16488_v39 = vld [vmem:[#allocation54_spill] sm:$0xff]  ;;  %v16489_v48 = vld [vmem:[#allocation48_spill] sm:$0xff] }
 0x1e1   : > { %16479 = vst [vmem:[#allocation17_spill] sm:$0xff] %v10722_v2  ;;  %v3993_v40 = vrot.slane %v10722_v2, 2  ;;  %v16487_v7 = vmax.f32 %v16486_v21, 0.0  ;;  %v3098_v25 = vsel %vm1211_vm0, %v16489_v48, %v16488_v39  ;;  %v2130_v21 = vadd.f32 %v1897_v32, %v10625_v38  ;;  %v16494_v48 = vld [vmem:[#allocation23_spill] sm:$0xff]  ;;  %v16499_v32 = vld [vmem:[#allocation26_spill] sm:$0xff] }
 0x1e2   : > { %v3553_v17 = vsel %vm1798_vm1, %v3550_v13, %v3552_v49  ;;  %v16493_v13 = vld [vmem:[#allocation53_spill] sm:$0xff]  ;;  %v16495_v30 = vmax.f32 %v16494_v48, 0.0 }
 0x1e3   : > { %v10761_v6 = vsel %vm3947_vm3, %v3991_v43, %v3993_v40  ;;  %v10766_v42 = vmax.f32 %v16487_v7, %v3094_v45  ;;  %v10776_v9 = vmax.f32 %v16491_v20, %v3553_v17  ;;  %v7830_v43 = vpack.i.bf16 %v10565_v57, %v10618_v10 }
 0x1e4   : > { %v7820_v55 = vpack.i.bf16 %v10761_v6, %v10754_v28  ;;  %v3556_v1 = vrot.slane %v16493_v13, 4  ;;  %v2129_v7 = vadd.f32 %v1895_v41, %v10627_v8  ;;  %v10786_v56 = vmax.f32 %v16495_v30, %v3098_v25 }
 0x1e5   : > { %16492 = vst [vmem:[#allocation24_spill] sm:$0xff] %v10776_v9  ;;  %v3554_v45 = vrot.slane %v10766_v42, 4  ;;  %v16496_v20 = vrot.slane %v10608_v35, 1  ;;  %v16497_v57 = vrot.slane %v10612_v14, 5  ;;  %v1659_v8 = vmul.f32 %v8926_v15, %v10715_v44  ;;  %7831 = vrot.lane.b32.xlu1 %v7830_v43, %s8691_s20 }
 0x1e6   : > { %7821 = vrot.lane.b32.xlu0 %v7820_v55, %s8692_s21  ;;  %v16498_v30 = vrot.slane %v10672_v0, 5  ;;  %v10804_v35 = vmul.f32 %v8926_v15, %v10771_v36  ;;  %v7825_v14 = vpack.i.bf16 %v10776_v9, %v10722_v2  ;;  %v3995_v55 = vrot.slane %v10776_v9, 2  ;;  %v16503_v15 = vld [vmem:[#allocation55_spill] sm:$0xff] }
 0x1e7   : > { %v1314_v17 = vsel %vm1211_vm0, %v16496_v20, %v1313_v51  ;;  %v2467_v10 = vsel %vm2370_vm2, %v16497_v57, %v2466_v27  ;;  %v3555_v41 = vsel %vm1798_vm1, %v3552_v49, %v3554_v45  ;;  %v3557_v43 = vsel %vm1798_vm1, %v3554_v45, %v3556_v1 }
 0x1e8   : > { %v2469_v38 = vsel %vm2370_vm2, %v2466_v27, %v16498_v30  ;;  %v10810_v25 = vmax.f32 %v16499_v32, %v3555_v41  ;;  %v3558_v48 = vrot.slane %v10786_v56, 4  ;;  %v16501_v27 = vrot.slane %v10634_v37, 1 }
 0x1e9   : > { %v2701_v57 = vadd.f32 %v2467_v10, %v2129_v7  ;;  %v2702_v30 = vadd.f32 %v2469_v38, %v2130_v21  ;;  %v3102_v2 = vsel %vm1211_vm0, %v16503_v15, %v16502_v33  ;;  %v1900_v49 = vrot.slane %v1659_v8, 4  ;;  %v16506_v33 = vld [vmem:[#allocation18_spill] sm:$0xff]  ;;  %v16508_v38 = vld [vmem:[#allocation49_spill] sm:$0xff] }
 0x1ea   : > { %16500 = vst [vmem:[#allocation33_spill] sm:$0xff] %v10810_v25  ;;  %v1316_v20 = vsel %vm1211_vm0, %v1313_v51, %v16501_v27  ;;  %7826 = vrot.lane.b32.xlu0 %v7825_v14, %s8690_s19  ;;  %v3997_v41 = vrot.slane %v10810_v25, 2  ;;  %v3559_v32 = vsel %vm1798_vm1, %v3556_v1, %v3558_v48  ;;  %v3100_v45 = vsel %vm1211_vm0, %v16488_v39, %v16503_v15 }
 0x1eb   : > { %v16056_v9 = vrot.slane %v10804_v35, 4  ;;  %v10829_v51 = vmax.f32 %v16475_v24, %v3557_v43  ;;  %v10832_v7 = vmax.f32 %v10691_v50, %v3559_v32  ;;  %v16507_v21 = vmax.f32 %v16506_v33, 0.0  ;;  %v403_v33 = vld [vmem:[%s8841_s13 + $0x1d0] sm:$0xff] }
 0x1ec   : > { %v2231_v1 = vmul.f32 %v8932_v19, %v10715_v44  ;;  %v7840_v8 = vpack.i.bf16 %v10727_v18, %v10570_v47  ;;  %v10843_v15 = vsel %vm3947_vm3, %v3993_v40, %v3995_v55  ;;  %v10846_v24 = vsel %vm3947_vm3, %v3995_v55, %v3997_v41 }
 0x1ed   : > { %16504 = vst [vmem:[#allocation35_spill] sm:$0xff] %v10829_v51  ;;  %16505 = vst [vmem:[#allocation47_spill] sm:$0xff] %v10832_v7  ;;  %v10836_v10 = vmax.f32 %v16507_v21, %v3102_v2  ;;  %v10850_v50 = vmul.f32 %v8932_v19, %v10771_v36  ;;  %v7835_v2 = vpack.i.bf16 %v10846_v24, %v10843_v15  ;;  %v4001_v39 = vrot.slane %v10832_v7, 2  ;;  %v16563_v36 = vld [vmem:[#allocation15_spill] sm:$0xff] }
 0x1ee   : > { %v16509_v14 = vmax.f32 %v16508_v38, 0.0  ;;  %v2131_v47 = vadd.f32 %v1899_v53, %v10707_v23  ;;  %v1545_v18 = vadd.f32 %v1314_v17, %v10680_v31  ;;  %v10862_v40 = vadd.f32 %v10149_v11, %v2701_v57  ;;  %7841 = vrot.lane.b32.xlu0 %v7840_v8, %s8691_s20 }
 0x1ef   : > { %v16510_v55 = vrot.slane %v10665_v5, 4  ;;  %v10869_v32 = vadd.f32 %v10149_v11, %v2702_v30  ;;  %7836 = vrot.lane.b32.xlu1 %v7835_v2, %s8692_s21  ;;  %v3999_v31 = vrot.slane %v10829_v51, 2  ;;  %v3562_v23 = vrot.slane %v10836_v10, 4 }
 0x1f0   : > { %v10857_v43 = vmax.f32 %v16509_v14, %v3100_v45  ;;  %v1903_v45 = vsel %vm1798_vm1, %v1900_v49, %v16056_v9  ;;  %v2697_v5 = vadd.f32 %v10651_v60, %v10630_v4  ;;  %v16511_v53 = vrot.slane %v10712_v12, 5 }
 0x1f1   : > { %v1901_v27 = vsel %vm1798_vm1, %v16510_v55, %v1900_v49  ;;  %v16512_v17 = vrot.slane %v10672_v0, 5  ;;  %v1546_v30 = vadd.f32 %v1316_v20, %v10743_v26  ;;  %v2472_v21 = vrot.slane %v2231_v1, 5  ;;  %v402_v49 = vld [vmem:[%s8841_s13 + $0x1c8] sm:$0xff] }
 0x1f2   : > { %v2132_v8 = vadd.f32 %v1901_v27, %v1545_v18  ;;  %v16055_v2 = vrot.slane %v10850_v50, 5  ;;  %v10891_v38 = vsel %vm3947_vm3, %v3999_v31, %v4001_v39  ;;  %v3560_v4 = vrot.slane %v10857_v43, 4  ;;  %736 = vperm.xlu0 %7703, %v403_v33  }
 0x1f3   : > { %v2471_v57 = vsel %vm2370_vm2, %v16512_v17, %v16511_v53  ;;  %v2698_v60 = vadd.f32 %v10661_v29, %v10642_v22  ;;  %v2895_v0 = vmax.f32 %v10737_v63, 0.0  ;;  %v2133_v55 = vadd.f32 %v1903_v45, %v1546_v30  ;;  %731 = vperm.xlu1 %7704, %v402_v49  }
 0x1f4   : > { %v2703_v14 = vadd.f32 %v2471_v57, %v2131_v47  ;;  %v2896_v26 = vmax.f32 %v10862_v40, 0.0  ;;  %v16058_v20 = vmax.f32 %v10869_v32, 0.0  ;;  %v10900_v1 = vsel %vm3947_vm3, %v3997_v41, %v3999_v31 }
 0x1f5   : > { %v3563_v18 = vsel %vm1798_vm1, %v3560_v4, %v3562_v23  ;;  %v2894_v27 = vmax.f32 %v10648_v61, 0.0  ;;  %v10907_v22 = vadd.f32 %v10149_v11, %v2697_v5  ;;  %v16513_v29 = vmov %v16511_v53 }
 0x1f6   : > { %v2473_v47 = vsel %vm2370_vm2, %v16513_v29, %v2472_v21  ;;  %v7850_v40 = vpack.i.bf16 %v10891_v38, %v10900_v1  ;;  %v2475_v41 = vsel %vm2370_vm2, %v2472_v21, %v16055_v2  ;;  %v7845_v33 = vpack.i.bf16 %v10829_v51, %v10810_v25  ;;  %v404_v21 = vld [vmem:[%s8841_s13 + $0x1d8] sm:$0xff] }
 0x1f7   : > { %v2704_v45 = vadd.f32 %v2473_v47, %v2132_v8  ;;  %v3561_v61 = vsel %vm1798_vm1, %v3558_v48, %v3560_v4  ;;  %v10921_v31 = vadd.f32 %v10149_v11, %v2698_v60  ;;  %v2705_v12 = vadd.f32 %v2475_v41, %v2133_v55 }
 0x1f8   : > { %7851 = vrot.lane.b32.xlu0 %v7850_v40, %s8692_s21  ;;  %v10925_v5 = vmax.f32 %v10766_v42, %v3563_v18  ;;  %v16057_v53 = vrot.slane %v10460_v46, 4  ;;  %v3125_v17 = vrot.slane %v2895_v0, 1  ;;  %v10931_v57 = vadd.f32 %v10149_v11, %v2703_v14  ;;  %7846 = vrot.lane.b32.xlu1 %v7845_v33, %s8690_s19  ;;  %v8500_v14 = vld [vmem:[%s15925_s3 + $0x38] sm:$0xff]  }
 0x1f9   : > { %v3127_v30 = vrot.slane %v2896_v26, 1  ;;  %v10935_v48 = vrot.slane %v16058_v20, 1  ;;  %v3112_v42 = vsel %vm1211_vm0, %v10444_v58, %v10658_v52  ;;  %v16515_v49 = vmax.f32 %v10545_v3, 0.0 }
 0x1fa   : > { %16514 = vst [vmem:[#allocation32_spill] sm:$0xff] %v10925_v5  ;;  %v2891_v4 = vmax.f32 %v10621_v54, 0.0  ;;  %v10948_v60 = vmax.f32 %v10734_v59, %v3561_v61  ;;  %v3123_v55 = vrot.slane %v2894_v27, 1  ;;  %v16062_v18 = vmax.f32 %v10907_v22, 0.0 }
 0x1fb   : > { %v10944_v8 = vrot.slane %v16515_v49, 1  ;;  %v10955_v29 = vadd.f32 %v10149_v11, %v2704_v45  ;;  %v7855_v58 = vpack.i.bf16 %v10754_v28, %v10730_v34  ;;  %v10960_v47 = vadd.f32 %v10149_v11, %v2705_v12 }
 0x1fc   : > { %16516 = vst [vmem:[#allocation54_spill] sm:$0xff] %v10948_v60  ;;  %741 = vperm.xlu0 %7703, %v404_v21   ;;  %v16061_v59 = vrot.slane %v10925_v5, 2  ;;  %v16517_v40 = vrot.slane %v10385_v62, 4  ;;  %v16059_v33 = vmax.f32 %v10921_v31, 0.0  ;;  %v3126_v45 = vsel %vm1211_vm0, %v3123_v55, %v3125_v17  ;;  %v405_v21 = vld [vmem:[%s8841_s13 + $0x1e0] sm:$0xff] }
 0x1fd   : > { %v16060_v61 = vmax.f32 %v10931_v57, 0.0  ;;  %v3130_v34 = vsel %vm1211_vm0, %v3127_v30, %v10935_v48  ;;  %7856 = vrot.lane.b32.xlu1 %v7855_v58, %s8691_s20  ;;  %v16064_v11 = vmov 0.0   ;;  %v3128_v28 = vsel %vm1211_vm0, %v3125_v17, %v3127_v30  ;;  %v8501_v58 = vld [vmem:[%s15925_s3 + $0x30] sm:$0xff]  }
 0x1fe   : > { %v3567_v41 = vsel %vm1798_vm1, %v16517_v40, %v16057_v53  ;;  %7454 = vmatprep.subr.bf16.mxu0 %v16064_v11  ;;  %v7860_v12 = vpack.i.bf16 %v10948_v60, %v10832_v7  ;;  %v4003_v49 = vrot.slane %v10948_v60, 2  ;;  %v3565_v2 = vsel %vm1798_vm1, %v3562_v23, %v16517_v40 }
 0x1ff   : > { %7455 = vmatpush3.bf16.msra.mxu0 %v8500_v14  ;;  %v3114_v17 = vsel %vm1211_vm0, %v10658_v52, %v10944_v8  ;;  %v16518_v30 = vmax.f32 %v10376_v16, 0.0  ;;  %v3119_v53 = vrot.slane %v16062_v18, 1  ;;  %v10998_v20 = vmax.f32 %v10786_v56, %v3567_v41 }
 0x200   : > { %7456 = vmatprep.subr.bf16.mxu0 %v16064_v11  ;;  %v11001_v23 = vmax.f32 %v2896_v26, %v3130_v34  ;;  %v2899_v14 = vmax.f32 %v10955_v29, 0.0  ;;  %v16063_v40 = vmax.f32 %v10960_v47, 0.0  ;;  %7861 = vrot.lane.b32.xlu0 %v7860_v12, %s8690_s19  ;;  %v11009_v16 = vsel %vm3947_vm3, %v4003_v49, %v16061_v59  ;;  %v16522_v12 = vld [vmem:[#allocation57_spill] sm:$0xff] }
 0x201   : > { %v10993_v9 = vmax.f32 %v16518_v30, %v3112_v42  ;;  %16519 = vst [vmem:[#allocation48_spill] sm:$0xff] %v10998_v20  ;;  %v11013_v52 = vrot.slane %v2891_v4, 1  ;;  %v11015_v56 = vmax.f32 %v2894_v27, %v3126_v45  ;;  %v11019_v26 = vmax.f32 %v2895_v0, %v3128_v28  ;;  %746 = vperm.xlu1 %7704, %v405_v21   ;;  %v16521_v45 = vld [vmem:[#allocation58_spill] sm:$0xff] }
 0x202   : > { %v11022_v42 = vmax.f32 %v16493_v13, %v3565_v2  ;;  %v3121_v29 = vrot.slane %v16059_v33, 1  ;;  %v3131_v41 = vrot.slane %v16060_v61, 1  ;;  %v7870_v34 = vpack.i.bf16 %v10843_v15, %v10761_v6  ;;  %v8502_v13 = vld [vmem:[%s15925_s3 + $0x28] sm:$0xff]  }
 0x203   : > { %v11033_v63 = vsel %vm3947_vm3, %v4001_v39, %v4003_v49  ;;  %7457 = vmatpush3.bf16.msra.mxu0 %v8501_v58  ;;  %v3120_v2 = vsel %vm1211_vm0, %v11013_v52, %v3119_v53  ;;  %v16066_v27 = vrot.slane %v10998_v20, 2  ;;  %v3570_v6 = vrot.slane %v16521_v45, 4  ;;  %v407_v49 = vld [vmem:[%s8841_s13 + $0x1f0] sm:$0xff]  ;;  %v16523_v61 = vld [vmem:[#allocation60_spill] sm:$0xff] }
 0x204   : > { %16520 = vst [vmem:[#allocation29_spill] sm:$0xff] %v11022_v42  ;;  %v7865_v0 = vpack.i.bf16 %v11009_v16, %v11033_v63  ;;  %7458 = vmatprep.subr.bf16.mxu0 %v16064_v11  ;;  %v3133_v39 = vrot.slane %v2899_v14, 1  ;;  %v11048_v28 = vrot.slane %v16063_v40, 1  ;;  %7871 = vrot.lane.b32.xlu0 %v7870_v34, %s8691_s20  ;;  %v3568_v21 = vrot.slane %v16522_v12, 4  ;;  %v406_v11 = vld [vmem:[%s8841_s13 + $0x1e8] sm:$0xff] }
 0x205   : > { %v4007_v58 = vrot.slane %v11022_v42, 2  ;;  %v3588_v33 = vrot.slane %v11019_v26, 4  ;;  %v16524_v59 = vmax.f32 %v16523_v61, 0.0  ;;  %v3122_v40 = vsel %vm1211_vm0, %v3119_v53, %v3121_v29 }
 0x206   : > { %7866 = vrot.lane.b32.xlu1 %v7865_v0, %s8692_s21  ;;  %v3124_v15 = vsel %vm1211_vm0, %v3121_v29, %v3123_v55  ;;  %v3132_v34 = vsel %vm1211_vm0, %v10935_v48, %v3131_v41  ;;  %v8503_v0 = vld [vmem:[%s15925_s3 + $0x20] sm:$0xff]   ;;  %v11071_v30 = vmax.f32 %v2891_v4, %v3120_v2  ;;  %v3571_v53 = vsel %vm1798_vm1, %v3568_v21, %v3570_v6 }
 0x207   : > { %v11059_v18 = vmax.f32 %v16524_v59, %v3114_v17  ;;  %7459 = vmatpush3.bf16.msra.mxu0 %v8502_v13  ;;  %v11076_v59 = vsel %vm3947_vm3, %v4007_v58, %v16066_v27  ;;  %v16525_v55 = vmov 0.0   ;;  %v16526_v48 = vrot.slane %v11015_v56, 4  ;;  %v16527_v17 = vld [vmem:[#allocation59_spill] sm:$0xff] }
 0x208   : > { %7460 = vmatprep.subr.bf16.mxu0 %v16525_v55  ;;  %v3134_v13 = vsel %vm1211_vm0, %v3131_v41, %v3133_v39  ;;  %v3136_v54 = vsel %vm1211_vm0, %v3133_v39, %v11048_v28  ;;  %756 = vperm.xlu0 %7703, %v407_v49   ;;  %v16528_v4 = vrot.slane %v11001_v23, 4  ;;  %v16529_v27 = vmax.f32 %v10907_v22, 0.0  ;;  %v11100_v41 = vpop.permute.xlu1 %726 }
 0x209   : > { %v3589_v61 = vsel %vm1798_vm1, %v16526_v48, %v3588_v33  ;;  %7470 = vmatprep.mubr.msk.bf16.mxu0 %vm8694_vm4, %v16525_v55  ;;  %v16530_v48 = vmax.f32 %v10869_v32, 0.0  ;;  %v16532_v39 = vrot.slane %v10925_v5, 2  ;;  %v3572_v32 = vrot.slane %v10993_v9, 4 }
 0x20a   : > { %v3591_v2 = vsel %vm1798_vm1, %v3588_v33, %v16528_v4  ;;  %v11094_v60 = vmax.f32 %v16529_v27, %v3122_v40  ;;  %751 = vperm.xlu1 %7704, %v406_v11   ;;  %v16533_v33 = vrot.slane %v10460_v46, 4  ;;  %v11113_v40 = vmax.f32 %v10836_v10, %v3571_v53  ;;  %v8504_v27 = vld [vmem:[%s15925_s3 + $0x18] sm:$0xff]  }
 0x20b   : > { %v11098_v29 = vmax.f32 %v16530_v48, %v3132_v34  ;;  %v11105_v49 = vsel %vm3947_vm3, %v16532_v39, %v4007_v58  ;;  %7461 = vmatpush3.bf16.msra.mxu0 %v8503_v0  ;;  %v11120_v11 = vmax.f32 %v11071_v30, %v3589_v61  ;;  %v16536_v58 = vmax.f32 %v10931_v57, 0.0  ;;  %v408_v48 = vld [vmem:[%s8841_s13 + $0x1f8] sm:$0xff]  ;;  %v11147_v39 = vpop.permute.xlu0 %7706 }
 0x20c   : > { %v3569_v4 = vsel %vm1798_vm1, %v16533_v33, %v3568_v21  ;;  %v7880_v22 = vpack.i.bf16 %v11076_v59, %v11105_v49  ;;  %16534 = vst [vmem:[#allocation23_spill] sm:$0xff] %v11113_v40  ;;  %v11126_v34 = vmax.f32 %v2899_v14, %v3136_v54  ;;  %v7875_v10 = vpack.i.bf16 %v11022_v42, %v10925_v5 }
 0x20d   : > { %16531 = vst [vmem:[#allocation53_spill] sm:$0xff] %v11098_v29  ;;  %16535 = vst [vmem:[#allocation26_spill] sm:$0xff] %v11120_v11  ;;  %v11124_v21 = vmax.f32 %v16536_v58, %v3134_v13  ;;  %7462 = vmatprep.subr.bf16.mxu0 %v16525_v55  ;;  %v11132_v0 = vmax.f32 %v11094_v60, %v3591_v2  ;;  %v16069_v53 = vrot.slane %v11059_v18, 4  ;;  %v16540_v57 = vmax.f32 %v16527_v17, 0.0  ;;  %v11149_v2 = vpop.permute.xlu1 %7711 }
 0x20e   : > { %7881 = vrot.lane.b32.xlu0 %v7880_v22, %s8692_s21  ;;  %v11137_v61 = vmax.f32 %v10857_v43, %v3569_v4  ;;  %v16541_v14 = vmax.f32 %v10921_v31, 0.0  ;;  %7876 = vrot.lane.b32.xlu1 %v7875_v10, %s8690_s19  ;;  %v3592_v33 = vrot.slane %v11098_v29, 4  ;;  %v7885_v43 = vpack.i.bf16 %v10900_v1, %v10846_v24  ;;  %v8505_v31 = vld [vmem:[%s15925_s3 + $0x10] sm:$0xff]  }
 0x20f   : > { %16537 = vst [vmem:[#allocation52_spill] sm:$0xff] %v11124_v21  ;;  %16538 = vst [vmem:[#allocation55_spill] sm:$0xff] %v11132_v0  ;;  %v3115_v13 = vrot.slane %v16540_v57, 1  ;;  %v3573_v22 = vsel %vm1798_vm1, %v3570_v6, %v3572_v32  ;;  %7463 = vmatpush3.bf16.msra.mxu0 %v8504_v27  ;;  %v4033_v58 = vrot.slane %v11132_v0, 2  ;;  %v16542_v10 = vrot.slane %v11001_v23, 4  ;;  %v11179_v4 = vpop.permute.xlu0 %7716 }
 0x210   : > { %16539 = vst [vmem:[#allocation18_spill] sm:$0xff] %v11137_v61  ;;  %v11143_v54 = vmax.f32 %v16541_v14, %v3124_v15  ;;  %7464 = vmatprep.subr.bf16.mxu0 %v16525_v55  ;;  %v3594_v1 = vrot.slane %v11124_v21, 4  ;;  %v4011_v27 = vrot.slane %v11137_v61, 2  ;;  %v3575_v57 = vsel %vm1798_vm1, %v3572_v32, %v16069_v53  ;;  %v409_v53 = vld [vmem:[%s8841_s13 + $0x200] sm:$0xff] }
 0x211   : > { %v3593_v24 = vsel %vm1798_vm1, %v16542_v10, %v3592_v33  ;;  %v3116_v15 = vsel %vm1211_vm0, %v10944_v8, %v3115_v13  ;;  %v3118_v10 = vsel %vm1211_vm0, %v3115_v13, %v11013_v52  ;;  %v16544_v42 = vrot.slane %v11126_v34, 4 }
 0x212   : > { %761 = vperm.xlu0 %7703, %v408_v48   ;;  %v11172_v14 = vmax.f32 %v11143_v54, %v3593_v24  ;;  %7886 = vrot.lane.b32.xlu1 %v7885_v43, %s8691_s20  ;;  %v11181_v48 = vpop.permute.xlu1 %7721  ;;  %v3595_v6 = vsel %vm1798_vm1, %v3592_v33, %v3594_v1  ;;  %v7890_v24 = vpack.i.bf16 %v11137_v61, %v10998_v20  ;;  %v16545_v8 = vrot.slane %v11113_v40, 2  ;;  %v8506_v33 = vld [vmem:[%s15925_s3 + $0x8] sm:$0xff]  }
 0x213   : > { %v3597_v32 = vsel %vm1798_vm1, %v3594_v1, %v16544_v42  ;;  %v11196_v13 = vmax.f32 %v10385_v62, %v3573_v22  ;;  %7465 = vmatpush3.bf16.msra.mxu0 %v8505_v31  ;;  %v11202_v43 = vmax.f32 %v11015_v56, %v3595_v6  ;;  %v11205_v42 = vmax.f32 %v10460_v46, %v3575_v57 }
 0x214   : > { %16543 = vst [vmem:[#allocation49_spill] sm:$0xff] %v11172_v14  ;;  %v11193_v52 = vsel %vm3947_vm3, %v4011_v27, %v16545_v8  ;;  %7466 = vmatprep.subr.bf16.mxu0 %v16525_v55  ;;  %v16549_v1 = vrot.slane %v11120_v11, 2  ;;  %v4035_v62 = vrot.slane %v11172_v14, 2  ;;  %v11215_v22 = vmax.f32 %v11019_v26, %v3597_v32 }
 0x215   : > { %16546 = vst [vmem:[#allocation58_spill] sm:$0xff] %v11196_v13  ;;  %16547 = vst [vmem:[#allocation57_spill] sm:$0xff] %v11202_v43  ;;  %v16551_v31 = vmax.f32 %v16527_v17, 0.0  ;;  %v4037_v46 = vrot.slane %v11202_v43, 2  ;;  %v16552_v6 = vrot.slane %v10998_v20, 2  ;;  %v16558_v51 = vrot.slane %v11113_v40, 2 }
 0x216   : > { %16548 = vst [vmem:[#allocation60_spill] sm:$0xff] %v11205_v42  ;;  %v11211_v8 = vsel %vm3947_vm3, %v16549_v1, %v4033_v58  ;;  %16550 = vst [vmem:[#allocation59_spill] sm:$0xff] %v11215_v22  ;;  %7891 = vrot.lane.b32.xlu0 %v7890_v24, %s8690_s19  ;;  %766 = vperm.xlu1 %7704, %v409_v53   ;;  %v11228_v1 = vpop.permute.xlu0 %7726  ;;  %v11230_v5 = vpop.permute.xlu1 %7731  ;;  %v11233_v26 = vsel %vm3947_vm3, %v4033_v58, %v4035_v62  ;;  %v16073_v17 = vrot.slane %v11215_v22, 2  ;;  %v8507_v58 = vld [vmem:[%s15925_s3] sm:$0xff]  }
 0x217   : > { %v11219_v61 = vmax.f32 %v16551_v31, %v3118_v10  ;;  %v11226_v57 = vsel %vm3947_vm3, %v16552_v6, %v4011_v27  ;;  %v16553_v10 = vmax.f32 %v10545_v3, 0.0  ;;  %v7900_v53 = vpack.i.bf16 %v11033_v63, %v10891_v38  ;;  %7467 = vmatpush3.bf16.msra.mxu0 %v8506_v33  ;;  %v16554_v33 = vld [vmem:[#allocation62_spill] sm:$0xff]  ;;  %v16555_v31 = vld [vmem:[#allocation13_spill] sm:$0xff] }
 0x218   : > { %v7895_v27 = vpack.i.bf16 %v11193_v52, %v11226_v57  ;;  %v4015_v3 = vrot.slane %v11196_v13, 2  ;;  %7468 = vmatprep.subr.bf16.mxu0 %v16525_v55  ;;  %v11253_v38 = vsel %vm3947_vm3, %v4035_v62, %v4037_v46  ;;  %v11258_v63 = vsel %vm3947_vm3, %v4037_v46, %v16073_v17  ;;  %v410_v46 = vld [vmem:[%s8841_s13 + $0x208] sm:$0xff] }
 0x219   : > { %v11238_v32 = vmax.f32 %v16553_v10, %v3116_v15  ;;  %v11262_v6 = vmul.f32 %v16555_v31, %v16554_v33  ;;  %v3578_v10 = vrot.slane %v11219_v61, 4  ;;  %v411_v15 = vld [vmem:[%s8841_s13 + $0x210] sm:$0xff]  ;;  %v16559_v7 = vrot.slane %v11205_v42, 2 }
 0x21a   : > { %7901 = vrot.lane.b32.xlu0 %v7900_v53, %s8691_s20  ;;  %7896 = vrot.lane.b32.xlu1 %v7895_v27, %s8692_s21  ;;  %v11270_v62 = vpop.permute.xlu0 %7736  ;;  %v11272_v20 = vpop.permute.xlu1 %7741  ;;  %v11279_v53 = vsel %vm3947_vm3, %v16558_v51, %v4015_v3  ;;  %v16562_v33 = vld [vmem:[#allocation61_spill] sm:$0xff] }
 0x21b   : > { %16556 = vst [vmem:[#allocation63_spill] sm:$0xff] %v11262_v6  ;;  %16557 = vst [vmem:[#allocation64_spill] sm:$0xff] %v11272_v20  ;;  %v3576_v17 = vrot.slane %v11238_v32, 4  ;;  %7469 = vmatpush3.bf16.msra.mxu0 %v8507_v58  ;;  %v11284_v24 = vsel %vm3947_vm3, %v4015_v3, %v16559_v7  ;;  %v16560_v58 = vrot.slane %v11059_v18, 4  ;;  %v7905_v7 = vpack.i.bf16 %v11196_v13, %v11113_v40  ;;  %v412_v13 = vld [vmem:[%s8841_s13 + $0x218] sm:$0xff] }
 0x21c   : > { %v7910_v29 = vpack.i.bf16 %v11284_v24, %v11279_v53  ;;  %v970_v31 = vmul.f32 %v16563_v36, %v16562_v33  ;;  %v16564_v44 = vrot.slane %v11262_v6, 1  ;;  %v16565_v20 = vrot.slane %v10634_v37, 1 }
 0x21d   : > { %v3579_v21 = vsel %vm1798_vm1, %v3576_v17, %v3578_v10  ;;  %v3577_v51 = vsel %vm1798_vm1, %v16560_v58, %v3576_v17  ;;  %v7915_v37 = vpack.i.bf16 %v11105_v49, %v11009_v16  ;;  %v16570_v36 = vrot.slane %v11094_v60, 4 }
 0x21e   : > { %776 = vperm.xlu0 %7703, %v411_v15   ;;  %771 = vperm.xlu1 %7704, %v410_v46   ;;  %v11297_v3 = vmax.f32 %v16521_v45, %v3579_v21  ;;  %v3580_v15 = vrot.slane %v11071_v30, 4  ;;  %v7757_v27 = vpop.permute.xlu0 %7756  ;;  %v7747_v46 = vpop.permute.xlu1 %7746  ;;  %v1318_v17 = vsel %vm1211_vm0, %v16565_v20, %v16564_v44  ;;  %v16566_v45 = vld [vmem:[#allocation14_spill] sm:$0xff]  ;;  %v7709_v30 = vunpack.i.h.bf16 %v11147_v39  ;;  %v16568_v20 = vld [vmem:[#allocation27_spill] sm:$0xff] }
 0x21f   : > { %v7749_v58 = vunpack.i.h.bf16 %v7747_v46  ;;  %v7748_v25 = vunpack.i.l.bf16 %v7747_v46  ;;  %v11310_v21 = vmul.f32 %v16566_v45, %v11100_v41  ;;  %v11316_v33 = vmax.f32 %v16522_v12, %v3577_v51  ;;  %v16569_v46 = vld [vmem:[#allocation19_spill] sm:$0xff] }
 0x220   : > { %16561 = vst [vmem:[#allocation65_spill] sm:$0xff] %v11297_v3  ;;  %v7708_v44 = vunpack.i.l.bf16 %v11147_v39  ;;  %v4021_v45 = vrot.slane %v11297_v3, 2  ;;  %v3583_v12 = vsel %vm1798_vm1, %v3580_v15, %v16570_v36  ;;  %v7759_v16 = vunpack.i.h.bf16 %v7757_v27 }
 0x221   : > { %16567 = vst [vmem:[#allocation61_spill] sm:$0xff] %v11316_v33  ;;  %v4873_v40 = vsel %vm4872_vm5, %v16569_v46, %v7748_v25  ;;  %v7758_v49 = vunpack.i.l.bf16 %v7757_v27  ;;  %v4019_v25 = vrot.slane %v11316_v33, 2  ;;  %v7920_v36 = vpack.i.bf16 %v11316_v33, %v11205_v42 }
 0x222   : > { %7911 = vrot.lane.b32.xlu0 %v7910_v29, %s8692_s21  ;;  %7906 = vrot.lane.b32.xlu1 %v7905_v7, %s8690_s19  ;;  %v4874_v29 = vsel %vm4872_vm5, %v16568_v20, %v7749_v58  ;;  %v3581_v7 = vsel %vm1798_vm1, %v3578_v10, %v3580_v15  ;;  %v7752_v51 = vpop.permute.xlu1 %7751  ;;  %v7762_v58 = vpop.permute.xlu0 %7761  ;;  %v4956_v20 = vsel %vm4955_vm6, %v4873_v40, %v7708_v44  ;;  %v413_v15 = vld [vmem:[%s8841_s13 + $0x220] sm:$0xff]  ;;  %v16573_v44 = vld [vmem:[#allocation25_spill] sm:$0xff] }
 0x223   : > { %v7754_v39 = vunpack.i.h.bf16 %v7752_v51  ;;  %v7753_v6 = vunpack.i.l.bf16 %v7752_v51  ;;  %v4957_v10 = vsel %vm4955_vm6, %v4874_v29, %v7709_v30  ;;  %v11344_v51 = vsel %vm3947_vm3, %v4019_v25, %v4021_v45 }
 0x224   : > { %v11347_v40 = vmax.f32 %v11059_v18, %v3583_v12  ;;  %v4876_v29 = vsel %vm4872_vm5, %v16573_v44, %v7759_v16  ;;  %v7713_v18 = vunpack.i.l.bf16 %v11149_v2  ;;  %v16575_v12 = vrot.slane %v11310_v21, 4  ;;  %v414_v44 = vld [vmem:[%s8841_s13 + $0x228] sm:$0xff] }
 0x225   : > { %v5039_v27 = vsel %vm5038_vm7, %v4956_v20, %v7753_v6  ;;  %v5040_v46 = vsel %vm5038_vm7, %v4957_v10, %v7754_v39  ;;  %v7764_v6 = vunpack.i.h.bf16 %v7762_v58  ;;  %v7763_v20 = vunpack.i.l.bf16 %v7762_v58 }
 0x226   : > { %781 = vperm.xlu0 %7703, %v412_v13   ;;  %7916 = vrot.lane.b32.xlu1 %v7915_v37, %s8691_s20  ;;  %v11338_v13 = vmax.f32 %v10993_v9, %v3581_v7  ;;  %16572 = vst [vmem:[#allocation19_spill] sm:$0xff] %v11347_v40  ;;  %v5121_v30 = vpack.c.bf16 %v5040_v46, %v5039_v27  ;;  %v16574_v9 = vld [vmem:[#allocation44_spill] sm:$0xff]  ;;  %v7714_v37 = vunpack.i.h.bf16 %v11149_v2  ;;  %v16576_v16 = vrot.slane %v10804_v35, 4  ;;  %v415_v46 = vld [vmem:[%s8841_s13 + $0x230] sm:$0xff] }
 0x227   : > { %v4875_v7 = vsel %vm4872_vm5, %v16574_v9, %v7758_v49  ;;  %v1547_v39 = vadd.f32 %v1318_v17, %v970_v31  ;;  %v11356_v10 = vmul.f32 %v8932_v19, %v11100_v41  ;;  %v7930_v31 = vpack.i.bf16 %v11226_v57, %v11076_v59 }
 0x228   : > { %16571 = vst [vmem:[#allocation27_spill] sm:$0xff] %v11338_v13  ;;  %7471 = vmatmul.mubr.bf16.vlgmr.msra.gmra.mxu0 %v5121_v30  ;;  %v1905_v49 = vsel %vm1798_vm1, %v16576_v16, %v16575_v12  ;;  %v16577_v17 = vrot.slane %v11205_v42, 2  ;;  %v4023_v2 = vrot.slane %v11338_v13, 2  ;;  %v4025_v35 = vrot.slane %v11347_v40, 2 }
 0x229   : > { %7474 = vmatprep.mubr.msk.bf16.mxu0 %vm8694_vm4, %v16525_v55  ;;  %v4959_v27 = vsel %vm4955_vm6, %v4876_v29, %v7714_v37  ;;  %v2476_v30 = vrot.slane %v11356_v10, 5  ;;  %v3584_v29 = vrot.slane %v11143_v54, 4  ;;  %v7777_v54 = vpop.permute.xlu0 %7776 }
 0x22a   : > { %7921 = vrot.lane.b32.xlu0 %v7920_v36, %s8690_s19  ;;  %786 = vperm.xlu1 %7704, %v413_v15   ;;  %v11370_v58 = vsel %vm3947_vm3, %v16577_v17, %v4019_v25  ;;  %v4958_v15 = vsel %vm4955_vm6, %v4875_v7, %v7713_v18  ;;  %v5042_v57 = vsel %vm5038_vm7, %v4959_v27, %v7764_v6  ;;  %v16578_v6 = vrot.slane %v10850_v50, 5  ;;  %v416_v27 = vld [vmem:[%s8841_s13 + $0x238] sm:$0xff] }
 0x22b   : > { %v7925_v36 = vpack.i.bf16 %v11344_v51, %v11370_v58  ;;  %v5041_v59 = vsel %vm5038_vm7, %v4958_v15, %v7763_v20  ;;  %v2134_v25 = vadd.f32 %v1905_v49, %v1547_v39  ;;  %v11388_v9 = vsel %vm3947_vm3, %v4021_v45, %v4023_v2 }
 0x22c   : > { %v11393_v37 = vsel %vm3947_vm3, %v4023_v2, %v4025_v35  ;;  %v5122_v7 = vpack.c.bf16 %v5042_v57, %v5041_v59  ;;  %v2477_v20 = vsel %vm2370_vm2, %v16578_v6, %v2476_v30  ;;  %v16579_v45 = vrot.slane %v11015_v56, 4  ;;  %v16582_v59 = vld [vmem:[#allocation56_spill] sm:$0xff]  ;;  %v16583_v57 = vld [vmem:[#allocation43_spill] sm:$0xff] }
 0x22d   : > { %v2706_v39 = vadd.f32 %v2477_v20, %v2134_v25  ;;  %v7940_v12 = vpack.i.bf16 %v11393_v37, %v11388_v9  ;;  %v7767_v16 = vpop.permute.xlu1 %7766  ;;  %v7935_v50 = vpack.i.bf16 %v11338_v13, %v11297_v3  ;;  %v16580_v49 = vrot.slane %v11094_v60, 4 }
 0x22e   : > { %7931 = vrot.lane.b32.xlu0 %v7930_v31, %s8691_s20  ;;  %7926 = vrot.lane.b32.xlu1 %v7925_v36, %s8692_s21  ;;  %v3587_v18 = vsel %vm1798_vm1, %v3584_v29, %v16579_v45  ;;  %v7769_v56 = vunpack.i.h.bf16 %v7767_v16  ;;  %v7768_v17 = vunpack.i.l.bf16 %v7767_v16  ;;  %v11417_v36 = vld [vmem:[#allocation4] ss:$0 sm:$0xff]  ;;  %v7779_v6 = vunpack.i.h.bf16 %v7777_v54 }
 0x22f   : > { %v3585_v31 = vsel %vm1798_vm1, %v16580_v49, %v3584_v29  ;;  %v11415_v2 = vmax.f32 %v11219_v61, %v3587_v18  ;;  %v11420_v15 = vadd.f32 %v11417_v36, %v2706_v39  ;;  %v7945_v61 = vpack.i.bf16 %v11279_v53, %v11193_v52 }
 0x230   : > { %7475 = vmatmul.mubr.bf16.gmra.mxu0 %v5122_v7  ;;  %v4878_v60 = vsel %vm4872_vm5, %v16582_v59, %v7769_v56  ;;  %v4877_v25 = vsel %vm4872_vm5, %v16583_v57, %v7768_v17  ;;  %v11433_v29 = vmax.f32 %v11238_v32, %v3585_v31  ;;  %v7778_v20 = vunpack.i.l.bf16 %v7777_v54  ;;  %v417_v54 = vld [vmem:[%s8841_s13 + $0x240] sm:$0xff]  ;;  %v16585_v56 = vld [vmem:[#allocation30_spill] sm:$0xff] }
 0x231   : > { %7478 = vmatprep.mubr.msk.bf16.mxu0 %vm8694_vm4, %v16525_v55  ;;  %16581 = vst [vmem:[#allocation25_spill] sm:$0xff] %v11415_v2  ;;  %v7772_v7 = vpop.permute.xlu1 %7771  ;;  %v4029_v18 = vrot.slane %v11415_v2, 2  ;;  %v4880_v17 = vsel %vm4872_vm5, %v16585_v56, %v7779_v6 }
 0x232   : > { %796 = vperm.xlu0 %7703, %v415_v46   ;;  %791 = vperm.xlu1 %7704, %v414_v44   ;;  %v7719_v46 = vunpack.i.h.bf16 %v11179_v4  ;;  %v7718_v44 = vunpack.i.l.bf16 %v11179_v4  ;;  %16584 = vst [vmem:[#allocation44_spill] sm:$0xff] %v11433_v29  ;;  %v7774_v39 = vunpack.i.h.bf16 %v7772_v7  ;;  %v7773_v45 = vunpack.i.l.bf16 %v7772_v7 }
 0x233   : > { %v7950_v53 = vpack.i.bf16 %v11433_v29, %v11347_v40  ;;  %v4027_v49 = vrot.slane %v11433_v29, 2  ;;  %v7960_v7 = vpack.i.bf16 %v11370_v58, %v11284_v24  ;;  %v419_v58 = vld [vmem:[%s8841_s13 + $0x250] sm:$0xff] }
 0x234   : > { %v4960_v16 = vsel %vm4955_vm6, %v4877_v25, %v7718_v44  ;;  %v4961_v4 = vsel %vm4955_vm6, %v4878_v60, %v7719_v46  ;;  %v7724_v25 = vunpack.i.h.bf16 %v11181_v48  ;;  %v7723_v46 = vunpack.i.l.bf16 %v11181_v48 }
 0x235   : > { %v5043_v52 = vsel %vm5038_vm7, %v4960_v16, %v7773_v45  ;;  %v5044_v32 = vsel %vm5038_vm7, %v4961_v4, %v7774_v39  ;;  %v11454_v44 = vsel %vm3947_vm3, %v4027_v49, %v4029_v18  ;;  %v11467_v48 = vsel %vm3947_vm3, %v4025_v35, %v4027_v49  ;;  %v418_v35 = vld [vmem:[%s8841_s13 + $0x248] sm:$0xff] }
 0x236   : > { %7941 = vrot.lane.b32.xlu0 %v7940_v12, %s8692_s21  ;;  %7936 = vrot.lane.b32.xlu1 %v7935_v50, %s8690_s19  ;;  %v7782_v12 = vpop.permute.xlu0 %7781  ;;  %v16090_v50 = vmax.f32 %v11420_v15, 0.0  ;;  %v5123_v31 = vpack.c.bf16 %v5044_v32, %v5043_v52  ;;  %v7955_v39 = vpack.i.bf16 %v11454_v44, %v11467_v48  ;;  %v16587_v4 = vrot.slane %v11120_v11, 2 }
 0x237   : > { %v7784_v60 = vunpack.i.h.bf16 %v7782_v12  ;;  %v7783_v57 = vunpack.i.l.bf16 %v7782_v12  ;;  %v16588_v32 = vmax.f32 %v10960_v47, 0.0  ;;  %v7965_v49 = vpack.i.bf16 %v11120_v11, %v11415_v2 }
 0x238   : > { %7479 = vmatmul.mubr.bf16.gmra.mxu0 %v5123_v31  ;;  %v11485_v52 = vsel %vm3947_vm3, %v4029_v18, %v16587_v4 }
 0x239   : > { %7482 = vmatprep.mubr.msk.bf16.mxu0 %vm8694_vm4, %v16525_v55 }
 0x23a   : > { %801 = vperm.xlu0 %7703, %v416_v27   ;;  %7946 = vrot.lane.b32.xlu1 %v7945_v61, %s8691_s20  ;;  %v16586_v27 = vld [vmem:[#allocation50_spill] sm:$0xff]  ;;  %v11458_v61 = vrot.slane %v16090_v50, 1  ;;  %v7797_v47 = vpop.permute.xlu0 %7796 }
 0x23b   : > { %v4879_v59 = vsel %vm4872_vm5, %v16586_v27, %v7778_v20  ;;  %v4963_v20 = vsel %vm4955_vm6, %v4880_v17, %v7724_v25  ;;  %v420_v17 = vld [vmem:[%s8841_s13 + $0x258] sm:$0xff]  ;;  %v7975_v27 = vpack.i.bf16 %v11388_v9, %v11344_v51  ;;  %v7798_v51 = vunpack.i.l.bf16 %v7797_v47 }
 0x23c   : > { %v4962_v6 = vsel %vm4955_vm6, %v4879_v59, %v7723_v46  ;;  %v5046_v12 = vsel %vm5038_vm7, %v4963_v20, %v7784_v60  ;;  %v3138_v24 = vsel %vm1211_vm0, %v11048_v28, %v11458_v61  ;;  %v7970_v28 = vpack.i.bf16 %v11211_v8, %v11485_v52  ;;  %v16589_v59 = vld [vmem:[#allocation36_spill] sm:$0xff] }
 0x23d   : > { %v5045_v45 = vsel %vm5038_vm7, %v4962_v6, %v7783_v57  ;;  %v16590_v57 = vld [vmem:[#allocation31_spill] sm:$0xff]  ;;  %v7729_v46 = vunpack.i.h.bf16 %v11228_v1  ;;  %v16591_v20 = vrot.slane %v11126_v34, 4 }
 0x23e   : > { %7951 = vrot.lane.b32.xlu0 %v7950_v53, %s8690_s19  ;;  %806 = vperm.xlu1 %7704, %v417_v54   ;;  %v5124_v16 = vpack.c.bf16 %v5046_v12, %v5045_v45  ;;  %v11489_v53 = vmax.f32 %v16588_v32, %v3138_v24  ;;  %v7787_v54 = vpop.permute.xlu1 %7786  ;;  %v7799_v45 = vunpack.i.h.bf16 %v7797_v47  ;;  %v7980_v24 = vpack.i.bf16 %v11172_v14, %v11132_v0  ;;  %v16594_v47 = vld [vmem:[#allocation37_spill] sm:$0xff] }
 0x23f   : > { %v7789_v31 = vunpack.i.h.bf16 %v7787_v54  ;;  %v7788_v18 = vunpack.i.l.bf16 %v7787_v54 }
 0x240   : > { %7483 = vmatmul.mubr.bf16.gmra.mxu0 %v5124_v16  ;;  %v16089_v56 = vrot.slane %v11489_v53, 4 }
 0x241   : > { %7486 = vmatprep.mubr.msk.bf16.mxu0 %vm8694_vm4, %v16525_v55  ;;  %v4882_v60 = vsel %vm4872_vm5, %v16589_v59, %v7789_v31  ;;  %v4881_v25 = vsel %vm4872_vm5, %v16590_v57, %v7788_v18  ;;  %v16593_v31 = vld [vmem:[#allocation38_spill] sm:$0xff]  ;;  %v7990_v57 = vpack.i.bf16 %v11467_v48, %v11393_v37 }
 0x242   : > { %7961 = vrot.lane.b32.xlu0 %v7960_v7, %s8691_s20  ;;  %7956 = vrot.lane.b32.xlu1 %v7955_v39, %s8692_s21  ;;  %v7728_v7 = vunpack.i.l.bf16 %v11228_v1  ;;  %v3599_v39 = vsel %vm1798_vm1, %v16591_v20, %v16089_v56  ;;  %v4965_v16 = vsel %vm4955_vm6, %v4882_v60, %v7729_v46  ;;  %v4884_v18 = vsel %vm4872_vm5, %v16593_v31, %v7799_v45  ;;  %v423_v20 = vld [vmem:[%s8841_s13 + $0x270] sm:$0xff]  ;;  %v422_v45 = vld [vmem:[%s8841_s13 + $0x268] sm:$0xff] }
 0x243   : > { %v11521_v4 = vmax.f32 %v11001_v23, %v3599_v39  ;;  %v7734_v23 = vunpack.i.h.bf16 %v11230_v5  ;;  %v7733_v60 = vunpack.i.l.bf16 %v11230_v5  ;;  %v7738_v31 = vunpack.i.l.bf16 %v11270_v62 }
 0x244   : > { %v4964_v1 = vsel %vm4955_vm6, %v4881_v25, %v7728_v7  ;;  %v7985_v25 = vpack.i.bf16 %v11253_v38, %v11233_v26 }
 0x245   : > { %16592 = vst [vmem:[#allocation56_spill] sm:$0xff] %v11521_v4  ;;  %v16088_v46 = vrot.slane %v11521_v4, 2 }
 0x246   : > { %816 = vperm.xlu0 %7703, %v419_v58   ;;  %811 = vperm.xlu1 %7704, %v418_v35   ;;  %v7802_v58 = vpop.permute.xlu0 %7801  ;;  %v421_v35 = vld [vmem:[%s8841_s13 + $0x260] sm:$0xff] }
 0x247   : > { %v7792_v6 = vpop.permute.xlu1 %7791  ;;  %v7803_v59 = vunpack.i.l.bf16 %v7802_v58 }
 0x248   : > { %v7794_v9 = vunpack.i.h.bf16 %v7792_v6  ;;  %v7793_v12 = vunpack.i.l.bf16 %v7792_v6  ;;  %v4967_v6 = vsel %vm4955_vm6, %v4884_v18, %v7734_v23 }
 0x24a   : > { %7971 = vrot.lane.b32.xlu0 %v7970_v28, %s8692_s21  ;;  %7966 = vrot.lane.b32.xlu1 %v7965_v49, %s8690_s19  ;;  %v5047_v32 = vsel %vm5038_vm7, %v4964_v1, %v7793_v12  ;;  %v5048_v54 = vsel %vm5038_vm7, %v4965_v16, %v7794_v9  ;;  %v16595_v9 = vrot.slane %v11215_v22, 2  ;;  %v16597_v16 = vld [vmem:[#allocation39_spill] sm:$0xff] }
 0x24b   : > { %v7807_v28 = vpop.permute.xlu1 %7806  ;;  %v5125_v49 = vpack.c.bf16 %v5048_v54, %v5047_v32 }
 0x24c   : > { %v7809_v5 = vunpack.i.h.bf16 %v7807_v28  ;;  %v7808_v37 = vunpack.i.l.bf16 %v7807_v28  ;;  %v11552_v12 = vsel %vm3947_vm3, %v16595_v9, %v16088_v46  ;;  %v16600_v9 = vld [vmem:[#allocation64_spill] sm:$0xff] }
 0x24d   : > { %7487 = vmatmul.mubr.bf16.gmra.mxu0 %v5125_v49  ;;  %v7739_v49 = vunpack.i.h.bf16 %v11270_v62  ;;  %v8000_v18 = vpack.i.bf16 %v11552_v12, %v11258_v63  ;;  %v424_v62 = vld [vmem:[%s8841_s13 + $0x278] sm:$0xff] }
 0x24e   : > { %821 = vperm.xlu0 %7703, %v420_v17   ;;  %7976 = vrot.lane.b32.xlu1 %v7975_v27, %s8691_s20  ;;  %v4883_v17 = vsel %vm4872_vm5, %v16594_v47, %v7798_v51  ;;  %v7804_v27 = vunpack.i.h.bf16 %v7802_v58  ;;  %v4885_v32 = vsel %vm4872_vm5, %v16597_v16, %v7808_v37  ;;  %v7995_v47 = vpack.i.bf16 %v11215_v22, %v11202_v43  ;;  %v16603_v16 = vld [vmem:[#allocation51_spill] sm:$0xff]  ;;  %v16616_v22 = vld [vmem:[#allocation17_spill] sm:$0xff] }
 0x24f   : > { %7490 = vmatprep.mubr.msk.bf16.mxu0 %vm8694_vm4, %v16525_v55  ;;  %v4966_v7 = vsel %vm4955_vm6, %v4883_v17, %v7733_v60  ;;  %v4968_v17 = vsel %vm4955_vm6, %v4885_v32, %v7738_v31 }
 0x250   : > { %v5049_v48 = vsel %vm5038_vm7, %v4966_v7, %v7803_v59  ;;  %v5050_v39 = vsel %vm5038_vm7, %v4967_v6, %v7804_v27  ;;  %v8005_v7 = vpack.i.bf16 %v11485_v52, %v11454_v44  ;;  %v16601_v44 = vld [vmem:[#allocation28_spill] sm:$0xff]  ;;  %v16602_v52 = vld [vmem:[#allocation13_spill] sm:$0xff] }
 0x251   : > { %v5126_v58 = vpack.c.bf16 %v5050_v39, %v5049_v48  ;;  %v16599_v48 = vld [vmem:[#allocation41_spill] sm:$0xff]  ;;  %v1076_v32 = vmul.f32 %v16602_v52, %v16603_v16 }
 0x252   : > { %7981 = vrot.lane.b32.xlu0 %v7980_v24, %s8690_s19  ;;  %826 = vperm.xlu1 %7704, %v421_v35   ;;  %v7812_v51 = vpop.permute.xlu1 %7811  ;;  %v7817_v24 = vpop.permute.xlu0 %7816  ;;  %v16596_v35 = vld [vmem:[#allocation40_spill] sm:$0xff] }
 0x253   : > { %v4886_v1 = vsel %vm4872_vm5, %v16596_v35, %v7809_v5  ;;  %v7814_v54 = vunpack.i.h.bf16 %v7812_v51  ;;  %v7813_v28 = vunpack.i.l.bf16 %v7812_v51  ;;  %v7819_v59 = vunpack.i.h.bf16 %v7817_v24  ;;  %v16598_v5 = vld [vmem:[#allocation22_spill] sm:$0xff]  ;;  %v425_v35 = vld [vmem:[%s8841_s13 + $0x280] sm:$0xff] }
 0x254   : > { %v4969_v27 = vsel %vm4955_vm6, %v4886_v1, %v7739_v49  ;;  %v7818_v23 = vunpack.i.l.bf16 %v7817_v24  ;;  %v7744_v24 = vunpack.i.h.bf16 %v16600_v9  ;;  %v1075_v1 = vmul.f32 %v16602_v52, %v16601_v44 }
 0x255   : > { %7491 = vmatmul.mubr.bf16.gmra.mxu0 %v5126_v58  ;;  %v5051_v60 = vsel %vm5038_vm7, %v4968_v17, %v7813_v28  ;;  %v4888_v37 = vsel %vm4872_vm5, %v16598_v5, %v7819_v59  ;;  %v7743_v58 = vunpack.i.l.bf16 %v16600_v9  ;;  %v1077_v59 = vmul.f32 %v16602_v52, %v11100_v41 }
 0x256   : > { %7991 = vrot.lane.b32.xlu0 %v7990_v57, %s8691_s20  ;;  %7986 = vrot.lane.b32.xlu1 %v7985_v25, %s8692_s21  ;;  %v5052_v57 = vsel %vm5038_vm7, %v4969_v27, %v7814_v54  ;;  %v4887_v39 = vsel %vm4872_vm5, %v16599_v48, %v7818_v23  ;;  %v4971_v28 = vsel %vm4955_vm6, %v4888_v37, %v7744_v24  ;;  %v1319_v23 = vrot.slane %v1075_v1, 1 }
 0x257   : > { %7494 = vmatprep.mubr.msk.bf16.mxu0 %vm8694_vm4, %v16525_v55  ;;  %v7832_v6 = vpop.permute.xlu1 %7831  ;;  %v4970_v54 = vsel %vm4955_vm6, %v4887_v39, %v7743_v58  ;;  %v1323_v39 = vrot.slane %v1077_v59, 1 }
 0x258   : > { %v7822_v25 = vpop.permute.xlu0 %7821  ;;  %v7834_v31 = vunpack.i.h.bf16 %v7832_v6 }
 0x259   : > { %v7823_v51 = vunpack.i.l.bf16 %v7822_v25 }
 0x25a   : > { %836 = vperm.xlu0 %7703, %v423_v20   ;;  %831 = vperm.xlu1 %7704, %v422_v45   ;;  %v5127_v20 = vpack.c.bf16 %v5052_v57, %v5051_v60  ;;  %v7824_v45 = vunpack.i.h.bf16 %v7822_v25  ;;  %v16604_v57 = vld [vmem:[#allocation20_spill] sm:$0xff] }
 0x25b   : > { %v4890_v25 = vsel %vm4872_vm5, %v16604_v57, %v7834_v31 }
 0x25c   : > { %v7827_v49 = vpop.permute.xlu0 %7826  ;;  %v5054_v17 = vsel %vm5038_vm7, %v4971_v28, %v7824_v45 }
 0x25d   : > { %7495 = vmatmul.mubr.bf16.gmra.mxu0 %v5127_v20  ;;  %v7829_v37 = vunpack.i.h.bf16 %v7827_v49  ;;  %v7828_v48 = vunpack.i.l.bf16 %v7827_v49 }
 0x25e   : > { %8001 = vrot.lane.b32.xlu0 %v8000_v18, %s8692_s21  ;;  %7996 = vrot.lane.b32.xlu1 %v7995_v47, %s8690_s19  ;;  %v7833_v18 = vunpack.i.l.bf16 %v7832_v6  ;;  %v5053_v47 = vsel %vm5038_vm7, %v4970_v54, %v7823_v51  ;;  %v16606_v51 = vld [vmem:[#allocation63_spill] sm:$0xff] }
 0x25f   : > { %7498 = vmatprep.mubr.msk.bf16.mxu0 %vm8694_vm4, %v16525_v55  ;;  %v5128_v60 = vpack.c.bf16 %v5054_v17, %v5053_v47  ;;  %v16607_v9 = vrot.slane %v16606_v51, 1  ;;  %v4973_v1 = vsel %vm4955_vm6, %v4890_v25, %v7829_v37  ;;  %v16609_v54 = vld [vmem:[#allocation15_spill] sm:$0xff] }
 0x260   : > { %v7842_v45 = vpop.permute.xlu0 %7841  ;;  %v972_v49 = vmul.f32 %v16609_v54, %v16601_v44  ;;  %v974_v59 = vmul.f32 %v16609_v54, %v11100_v41  ;;  %v16610_v44 = vld [vmem:[#allocation14_spill] sm:$0xff] }
 0x261   : > { %v7837_v27 = vpop.permute.xlu1 %7836  ;;  %v1320_v24 = vsel %vm1211_vm0, %v16607_v9, %v1319_v23  ;;  %v7844_v17 = vunpack.i.h.bf16 %v7842_v45  ;;  %v16612_v9 = vld [vmem:[#allocation16_spill] sm:$0xff] }
 0x262   : > { %841 = vperm.xlu0 %7703, %v424_v62   ;;  %8006 = vrot.lane.b32.xlu1 %v8005_v7, %s8691_s20  ;;  %v1321_v62 = vrot.slane %v1076_v32, 1  ;;  %v16605_v7 = vld [vmem:[#allocation21_spill] sm:$0xff]  ;;  %v7839_v5 = vunpack.i.h.bf16 %v7837_v27  ;;  %v7838_v6 = vunpack.i.l.bf16 %v7837_v27  ;;  %v16608_v32 = vld [vmem:[#allocation62_spill] sm:$0xff]  ;;  %v7843_v27 = vunpack.i.l.bf16 %v7842_v45 }
 0x263   : > { %v4889_v20 = vsel %vm4872_vm5, %v16605_v7, %v7833_v18  ;;  %v971_v28 = vmul.f32 %v16609_v54, %v16608_v32 }
 0x264   : > { %v1322_v58 = vsel %vm1211_vm0, %v1319_v23, %v1321_v62  ;;  %v5056_v18 = vsel %vm5038_vm7, %v4973_v1, %v7839_v5  ;;  %v1324_v47 = vsel %vm1211_vm0, %v1321_v62, %v1323_v39 }
 0x265   : > { %7499 = vmatmul.mubr.bf16.gmra.mxu0 %v5128_v60  ;;  %v1548_v23 = vadd.f32 %v1320_v24, %v971_v28  ;;  %v973_v60 = vmul.f32 %v16609_v54, %v16603_v16  ;;  %v1549_v57 = vadd.f32 %v1322_v58, %v972_v49  ;;  %v16611_v16 = vld [vmem:[#allocation34_spill] sm:$0xff]  ;;  %v4891_v24 = vsel %vm4872_vm5, %v16612_v9, %v7843_v27 }
 0x266   : > { %846 = vperm.xlu1 %7704, %v425_v35   ;;  %7502 = vmatprep.mubr.msk.bf16.mxu0 %vm8694_vm4, %v16525_v55  ;;  %v4972_v35 = vsel %vm4955_vm6, %v4889_v20, %v7828_v48  ;;  %v11630_v51 = vsel %vm4872_vm5, %v16611_v16, %v7844_v17 }
 0x267   : > { %v5055_v31 = vsel %vm5038_vm7, %v4972_v35, %v7838_v6  ;;  %v1550_v37 = vadd.f32 %v1324_v47, %v973_v60 }
 0x268   : > { %v5129_v6 = vpack.c.bf16 %v5056_v18, %v5055_v31 }
 0x26d   : > { %v737_v25 = vpop.permute.xlu0 %736  ;;  %7503 = vmatmul.mubr.bf16.gmra.mxu0 %v5129_v6 }
 0x26e   : > { %v1079_v7 = vmul.f32 %v16602_v52, %v737_v25  ;;  %v11620_v20 = vmul.f32 %v16610_v44, %v737_v25  ;;  %v11623_v5 = vmul.f32 %v8932_v19, %v737_v25  ;;  %v732_v62 = vpop.permute.xlu1 %731  ;;  %v976_v58 = vmul.f32 %v16609_v54, %v737_v25  ;;  %7506 = vmatprep.mubr.msk.bf16.mxu0 %vm8694_vm4, %v16525_v55 }
 0x26f   : > { %v1078_v48 = vmul.f32 %v16602_v52, %v732_v62  ;;  %v1662_v41 = vmul.f32 %v16610_v44, %v732_v62  ;;  %v2234_v45 = vmul.f32 %v8932_v19, %v732_v62  ;;  %v975_v47 = vmul.f32 %v16609_v54, %v732_v62 }
 0x270   : > { %v1327_v35 = vrot.slane %v1079_v7, 1  ;;  %v1908_v1 = vrot.slane %v11620_v20, 4  ;;  %v2480_v18 = vrot.slane %v11623_v5, 5  ;;  %v16613_v20 = vrot.slane %v11310_v21, 4 }
 0x271   : > { %v1325_v32 = vrot.slane %v1078_v48, 1  ;;  %v1906_v28 = vrot.slane %v1662_v41, 4  ;;  %v2478_v49 = vrot.slane %v2234_v45, 5  ;;  %v11636_v31 = vpop.permute.xlu0 %7851 }
 0x272   : > { %v7847_v60 = vpop.permute.xlu1 %7846 }
 0x273   : > { %v1326_v25 = vsel %vm1211_vm0, %v1323_v39, %v1325_v32  ;;  %v1328_v7 = vsel %vm1211_vm0, %v1325_v32, %v1327_v35  ;;  %v1907_v6 = vsel %vm1798_vm1, %v16613_v20, %v1906_v28  ;;  %v1909_v48 = vsel %vm1798_vm1, %v1906_v28, %v1908_v1 }
 0x274   : > { %v11650_v41 = vadd.f32 %v1326_v25, %v974_v59  ;;  %v11652_v5 = vadd.f32 %v1328_v7, %v975_v47  ;;  %v2135_v62 = vadd.f32 %v1907_v6, %v1548_v23  ;;  %v2136_v45 = vadd.f32 %v1909_v48, %v1549_v57  ;;  %v16614_v48 = vld [vmem:[#allocation45_spill] sm:$0xff] }
 0x275   : > { %v2479_v16 = vsel %vm2370_vm2, %v2476_v30, %v2478_v49  ;;  %v2481_v39 = vsel %vm2370_vm2, %v2478_v49, %v2480_v18  ;;  %v7849_v9 = vunpack.i.h.bf16 %v7847_v60  ;;  %v7848_v32 = vunpack.i.l.bf16 %v7847_v60 }
 0x276   : > { %v2707_v21 = vadd.f32 %v2479_v16, %v2135_v62  ;;  %v2708_v27 = vadd.f32 %v2481_v39, %v2136_v45  ;;  %v7857_v28 = vpop.permute.xlu1 %7856  ;;  %v16615_v45 = vld [vmem:[#allocation42_spill] sm:$0xff] }
 0x277   : > { %v742_v17 = vpop.permute.xlu0 %741  ;;  %v7859_v57 = vunpack.i.h.bf16 %v7857_v28  ;;  %v7858_v10 = vunpack.i.l.bf16 %v7857_v28  ;;  %v11667_v25 = vsel %vm4955_vm6, %v4891_v24, %v7848_v32 }
 0x278   : > { %v977_v20 = vmul.f32 %v16609_v54, %v742_v17  ;;  %v1080_v59 = vmul.f32 %v16602_v52, %v742_v17  ;;  %v1664_v47 = vmul.f32 %v16610_v44, %v742_v17  ;;  %v2236_v23 = vmul.f32 %v8932_v19, %v742_v17 }
 0x279   : > { %v2808_v30 = vadd.f32 %v11417_v36, %v2707_v21  ;;  %v11664_v49 = vadd.f32 %v11417_v36, %v2708_v27  ;;  %v11671_v62 = vsel %vm4872_vm5, %v16614_v48, %v7859_v57  ;;  %v11675_v17 = vsel %vm4872_vm5, %v16615_v45, %v7858_v10 }
 0x27a   : > { %v1329_v60 = vrot.slane %v1080_v59, 1  ;;  %v1910_v7 = vrot.slane %v1664_v47, 4  ;;  %v2482_v6 = vrot.slane %v2236_v23, 5 }
 0x27b   : > { %v11677_v16 = vpop.permute.xlu0 %7861  ;;  %v2902_v39 = vmax.f32 %v2808_v30, 0.0  ;;  %v16087_v27 = vmax.f32 %v11664_v49, 0.0 }
 0x27c   : > { %v1330_v21 = vsel %vm1211_vm0, %v1327_v35, %v1329_v60  ;;  %v747_v32 = vpop.permute.xlu1 %746  ;;  %v1911_v28 = vsel %vm1798_vm1, %v1908_v1, %v1910_v7  ;;  %v2483_v47 = vsel %vm2370_vm2, %v2480_v18, %v2482_v6  ;;  %v11699_v18 = vsel %vm4955_vm6, %v11630_v51, %v7849_v9  ;;  %v16617_v9 = vld [vmem:[#allocation46_spill] sm:$0xff] }
 0x27d   : > { %v11682_v59 = vadd.f32 %v1330_v21, %v976_v58  ;;  %v11687_v57 = vrot.slane %v2902_v39, 1  ;;  %v11691_v10 = vrot.slane %v16087_v27, 1  ;;  %v2137_v30 = vadd.f32 %v1911_v28, %v1550_v37 }
 0x27e   : > { %v978_v35 = vmul.f32 %v16609_v54, %v747_v32  ;;  %v1081_v48 = vmul.f32 %v16602_v52, %v747_v32  ;;  %v1665_v58 = vmul.f32 %v16610_v44, %v747_v32  ;;  %v2237_v45 = vmul.f32 %v8932_v19, %v747_v32 }
 0x27f   : > { %v7872_v1 = vpop.permute.xlu0 %7871  ;;  %v3142_v21 = vsel %vm1211_vm0, %v11687_v57, %v11691_v10  ;;  %v2709_v24 = vadd.f32 %v2483_v47, %v2137_v30 }
 0x280   : > { %v7874_v23 = vunpack.i.h.bf16 %v7872_v1  ;;  %v7873_v37 = vunpack.i.l.bf16 %v7872_v1  ;;  %v11704_v28 = vpop.permute.xlu1 %7866  ;;  %v11706_v27 = vmax.f32 %v2902_v39, %v3142_v21  ;;  %v1331_v46 = vrot.slane %v1081_v48, 1 }
 0x281   : > { %v1912_v56 = vrot.slane %v1665_v58, 4  ;;  %v2484_v50 = vrot.slane %v2237_v45, 5  ;;  %v2810_v32 = vadd.f32 %v11417_v36, %v2709_v24 }
 0x282   : > { %v11711_v51 = vsel %vm4872_vm5, %v16616_v22, %v7874_v23  ;;  %v11715_v14 = vsel %vm4872_vm5, %v16617_v9, %v7873_v37  ;;  %v1332_v39 = vsel %vm1211_vm0, %v1329_v60, %v1331_v46 }
 0x283   : > { %v1913_v48 = vsel %vm1798_vm1, %v1910_v7, %v1912_v56  ;;  %v2485_v58 = vsel %vm2370_vm2, %v2482_v6, %v2484_v50  ;;  %v757_v45 = vpop.permute.xlu0 %756  ;;  %v2904_v24 = vmax.f32 %v2810_v32, 0.0  ;;  %v11722_v1 = vadd.f32 %v1332_v39, %v977_v20 }
 0x284   : > { %v2138_v22 = vadd.f32 %v1913_v48, %v11650_v41  ;;  %v980_v37 = vmul.f32 %v16609_v54, %v757_v45  ;;  %v1083_v9 = vmul.f32 %v16602_v52, %v757_v45  ;;  %v1667_v47 = vmul.f32 %v16610_v44, %v757_v45 }
 0x285   : > { %v752_v21 = vpop.permute.xlu1 %751  ;;  %v2239_v60 = vmul.f32 %v8932_v19, %v757_v45  ;;  %v11730_v7 = vrot.slane %v2904_v24, 1 }
 0x286   : > { %v2710_v6 = vadd.f32 %v2485_v58, %v2138_v22  ;;  %v979_v32 = vmul.f32 %v16609_v54, %v752_v21  ;;  %v1082_v20 = vmul.f32 %v16602_v52, %v752_v21  ;;  %v1335_v39 = vrot.slane %v1083_v9, 1 }
 0x287   : > { %v1916_v41 = vrot.slane %v1667_v47, 4  ;;  %v2488_v48 = vrot.slane %v2239_v60, 5  ;;  %v1666_v23 = vmul.f32 %v16610_v44, %v752_v21  ;;  %v11735_v30 = vpop.permute.xlu0 %7881  ;;  %v2238_v45 = vmul.f32 %v8932_v19, %v752_v21 }
 0x288   : > { %v11738_v43 = vadd.f32 %v11417_v36, %v2710_v6  ;;  %v1333_v11 = vrot.slane %v1082_v20, 1 }
 0x289   : > { %v11742_v58 = vpop.permute.xlu1 %7876  ;;  %v1914_v22 = vrot.slane %v1666_v23, 4  ;;  %v2486_v20 = vrot.slane %v2238_v45, 5 }
 0x28a   : > { %v16099_v60 = vmax.f32 %v11738_v43, 0.0  ;;  %v1334_v2 = vsel %vm1211_vm0, %v1331_v46, %v1333_v11  ;;  %v1336_v6 = vsel %vm1211_vm0, %v1333_v11, %v1335_v39 }
 0x28b   : > { %v11750_v13 = vadd.f32 %v1334_v2, %v978_v35  ;;  %v11752_v21 = vadd.f32 %v1336_v6, %v979_v32  ;;  %v1915_v0 = vsel %vm1798_vm1, %v1912_v56, %v1914_v22  ;;  %v1917_v23 = vsel %vm1798_vm1, %v1914_v22, %v1916_v41 }
 0x28c   : > { %v11758_v47 = vrot.slane %v16099_v60, 1  ;;  %v2139_v9 = vadd.f32 %v1915_v0, %v11652_v5  ;;  %v2140_v46 = vadd.f32 %v1917_v23, %v11682_v59  ;;  %v2487_v11 = vsel %vm2370_vm2, %v2484_v50, %v2486_v20 }
 0x28d   : > { %v762_v29 = vpop.permute.xlu0 %761  ;;  %v7887_v45 = vpop.permute.xlu1 %7886  ;;  %v2489_v2 = vsel %vm2370_vm2, %v2486_v20, %v2488_v48  ;;  %v3140_v23 = vsel %vm1211_vm0, %v11458_v61, %v11687_v57 }
 0x28e   : > { %v11765_v35 = vmul.f32 %v16609_v54, %v762_v29  ;;  %v11768_v56 = vmul.f32 %v16602_v52, %v762_v29  ;;  %v11771_v32 = vmul.f32 %v16610_v44, %v762_v29  ;;  %v3146_v0 = vsel %vm1211_vm0, %v11730_v7, %v11758_v47 }
 0x28f   : > { %v2711_v5 = vadd.f32 %v2487_v11, %v2139_v9  ;;  %v2712_v59 = vadd.f32 %v2489_v2, %v2140_v46  ;;  %v2240_v50 = vmul.f32 %v8932_v19, %v762_v29  ;;  %v11777_v22 = vmax.f32 %v2904_v24, %v3146_v0 }
 0x290   : > { %v1337_v6 = vrot.slane %v11768_v56, 1  ;;  %v1918_v20 = vrot.slane %v11771_v32, 4  ;;  %v16620_v29 = vmax.f32 %v11420_v15, 0.0  ;;  %v7889_v2 = vunpack.i.h.bf16 %v7887_v45 }
 0x291   : > { %v11784_v60 = vpop.permute.xlu0 %7891  ;;  %v2812_v40 = vadd.f32 %v11417_v36, %v2711_v5  ;;  %v11788_v33 = vadd.f32 %v11417_v36, %v2712_v59  ;;  %v2490_v9 = vrot.slane %v2240_v50, 5  ;;  %v7888_v56 = vunpack.i.l.bf16 %v7887_v45  ;;  %v767_v32 = vpop.permute.xlu1 %766  ;;  %v16621_v50 = vld [vmem:[#allocation33_spill] sm:$0xff] }
 0x292   : > { %16618 = vst [vmem:[#allocation43_spill] sm:$0xff] %v11784_v60  ;;  %v11792_v24 = vmax.f32 %v16620_v29, %v3140_v23  ;;  %v1338_v46 = vsel %vm1211_vm0, %v1335_v39, %v1337_v6  ;;  %v1919_v11 = vsel %vm1798_vm1, %v1916_v41, %v1918_v20  ;;  %v11804_v23 = vsel %vm4872_vm5, %v16621_v50, %v7889_v2  ;;  %v16623_v39 = vld [vmem:[#allocation24_spill] sm:$0xff] }
 0x293   : > { %16619 = vst [vmem:[#allocation30_spill] sm:$0xff] %v11788_v33  ;;  %v2906_v61 = vmax.f32 %v2812_v40, 0.0  ;;  %v16102_v57 = vmax.f32 %v11788_v33, 0.0  ;;  %v11797_v0 = vadd.f32 %v1338_v46, %v980_v37  ;;  %v2141_v5 = vadd.f32 %v1919_v11, %v11722_v1  ;;  %16622 = vst [vmem:[#allocation50_spill] sm:$0xff] %v11804_v23 }
 0x294   : > { %v2491_v59 = vsel %vm2370_vm2, %v2488_v48, %v2490_v9  ;;  %v3600_v15 = vrot.slane %v11792_v24, 4  ;;  %v11808_v41 = vsel %vm4872_vm5, %v16623_v39, %v7888_v56  ;;  %v16626_v29 = vrot.slane %v11489_v53, 4  ;;  %v16628_v39 = vld [vmem:[#allocation53_spill] sm:$0xff] }
 0x295   : > { %16624 = vst [vmem:[#allocation36_spill] sm:$0xff] %v11808_v41  ;;  %v11810_v45 = vrot.slane %v2906_v61, 1  ;;  %v11814_v40 = vrot.slane %v16102_v57, 1  ;;  %v2713_v37 = vadd.f32 %v2491_v59, %v2141_v5  ;;  %v7902_v48 = vpop.permute.xlu0 %7901  ;;  %v16627_v2 = vrot.slane %v11706_v27, 4  ;;  %v11850_v42 = vpop.permute.xlu1 %7896 }
 0x296   : > { %v3601_v46 = vsel %vm1798_vm1, %v16626_v29, %v3600_v15  ;;  %v11825_v50 = vmul.f32 %v16609_v54, %v767_v32  ;;  %v16630_v29 = vld [vmem:[#allocation52_spill] sm:$0xff]  ;;  %v11848_v3 = vmul.f32 %v8932_v19, %v767_v32  ;;  %v16632_v33 = vrot.slane %v11521_v4, 2 }
 0x297   : > { %16625 = vst [vmem:[#allocation31_spill] sm:$0xff] %v11814_v40  ;;  %v3603_v56 = vsel %vm1798_vm1, %v3600_v15, %v16627_v2  ;;  %v3150_v5 = vsel %vm1211_vm0, %v11810_v45, %v11814_v40  ;;  %v11831_v59 = vadd.f32 %v11417_v36, %v2713_v37  ;;  %v11834_v1 = vmax.f32 %v16628_v39, %v3601_v46 }
 0x298   : > { %v11837_v57 = vmax.f32 %v16630_v29, %v3603_v56  ;;  %v11839_v11 = vmax.f32 %v2906_v61, %v3150_v5  ;;  %v11842_v15 = vmul.f32 %v16602_v52, %v767_v32  ;;  %v11845_v2 = vmul.f32 %v16610_v44, %v767_v32 }
 0x299   : > { %16629 = vst [vmem:[#allocation38_spill] sm:$0xff] %v11834_v1  ;;  %v16107_v37 = vmax.f32 %v11831_v59, 0.0  ;;  %v8010_v46 = vpack.i.bf16 %v11834_v1, %v11521_v4  ;;  %v4043_v56 = vrot.slane %v11834_v1, 2  ;;  %v777_v29 = vpop.permute.xlu0 %776  ;;  %v16637_v40 = vunpack.i.l.bf16 %v11636_v31 }
 0x29a   : > { %16631 = vst [vmem:[#allocation37_spill] sm:$0xff] %v11837_v57  ;;  %v16111_v61 = vrot.slane %v11837_v57, 2  ;;  %v1339_v39 = vrot.slane %v11842_v15, 1  ;;  %v7904_v15 = vunpack.i.h.bf16 %v7902_v48  ;;  %v16634_v41 = vrot.slane %v11845_v2, 4 }
 0x29b   : > { %v11863_v23 = vrot.slane %v16107_v37, 1  ;;  %8011 = vrot.lane.b32.xlu0 %v8010_v46, %s8690_s19  ;;  %v11869_v1 = vsel %vm3947_vm3, %v16632_v33, %v4043_v56  ;;  %v16635_v33 = vrot.slane %v11848_v3, 5 }
 0x29c   : > { %v11874_v5 = vsel %vm3947_vm3, %v4043_v56, %v16111_v61  ;;  %v1340_v37 = vsel %vm1211_vm0, %v1337_v6, %v1339_v39  ;;  %v1921_v46 = vsel %vm1798_vm1, %v1918_v20, %v16634_v41  ;;  %v16636_v61 = vld [vmem:[#allocation47_spill] sm:$0xff]  ;;  %v7903_v6 = vunpack.i.l.bf16 %v7902_v48 }
 0x29d   : > { %16633 = vst [vmem:[#allocation40_spill] sm:$0xff] %v11874_v5  ;;  %v8015_v32 = vpack.i.bf16 %v11874_v5, %v11869_v1  ;;  %v2493_v4 = vsel %vm2370_vm2, %v2490_v9, %v16635_v33  ;;  %v11886_v60 = vadd.f32 %v1340_v37, %v11765_v35  ;;  %v2142_v56 = vadd.f32 %v1921_v46, %v11750_v13  ;;  %v772_v37 = vpop.permute.xlu1 %771 }
 0x29e   : > { %v11891_v5 = vsel %vm4872_vm5, %v16636_v61, %v7904_v15  ;;  %v5057_v20 = vsel %vm5038_vm7, %v11667_v25, %v16637_v40  ;;  %v16638_v9 = vunpack.i.h.bf16 %v11636_v31  ;;  %v16639_v48 = vpack.i.bf16 %v11233_v26, %v11211_v8  ;;  %v426_v25 = vld [vmem:[%s8841_s13 + $0x288] sm:$0xff] }
 0x29f   : > { %8016 = vrot.lane.b32.xlu1 %v8015_v32, %s8692_s21  ;;  %v2714_v61 = vadd.f32 %v2493_v4, %v2142_v56  ;;  %v16640_v32 = vld [vmem:[#allocation35_spill] sm:$0xff]  ;;  %v11914_v40 = vmul.f32 %v16609_v54, %v777_v29  ;;  %v11918_v46 = vmul.f32 %v16602_v52, %v777_v29  ;;  %v11921_v33 = vmul.f32 %v16610_v44, %v777_v29 }
 0x2a0   : > { %v5058_v35 = vsel %vm5038_vm7, %v11699_v18, %v16638_v9  ;;  %8021 = vrot.lane.b32.xlu0 %v16639_v48, %s8691_s20  ;;  %v11910_v15 = vsel %vm4872_vm5, %v16640_v32, %v7903_v6  ;;  %v427_v18 = vld [vmem:[%s8841_s13 + $0x290] sm:$0xff]  ;;  %v11924_v8 = vmul.f32 %v8932_v19, %v777_v29  ;;  %v3144_v26 = vsel %vm1211_vm0, %v11691_v10, %v11730_v7 }
 0x2a1   : > { %v5130_v31 = vpack.c.bf16 %v5058_v35, %v5057_v20  ;;  %v11930_v4 = vadd.f32 %v11417_v36, %v2714_v61  ;;  %v16642_v56 = vmax.f32 %v11664_v49, 0.0  ;;  %v983_v20 = vmul.f32 %v16609_v54, %v772_v37  ;;  %v11938_v35 = vpop.permute.xlu0 %7911 }
 0x2a2   : > { %v1086_v9 = vmul.f32 %v16602_v52, %v772_v37  ;;  %v16115_v29 = vrot.slane %v11918_v46, 1  ;;  %v1670_v7 = vmul.f32 %v16610_v44, %v772_v37  ;;  %v16643_v10 = vrot.slane %v11706_v27, 4 }
 0x2a3   : > { %16641 = vst [vmem:[#allocation39_spill] sm:$0xff] %v11930_v4  ;;  %7507 = vmatmul.mubr.bf16.gmra.mxu0 %v5130_v31  ;;  %v11934_v6 = vmax.f32 %v16642_v56, %v3144_v26  ;;  %851 = vperm.xlu1 %7704, %v426_v25   ;;  %v16114_v49 = vmax.f32 %v11930_v4, 0.0  ;;  %v2242_v31 = vmul.f32 %v8932_v19, %v772_v37  ;;  %v16645_v56 = vmov %v16634_v41 }
 0x2a4   : > { %7510 = vmatprep.mubr.msk.bf16.mxu0 %vm8694_vm4, %v16525_v55  ;;  %856 = vperm.xlu0 %7703, %v427_v18   ;;  %v1341_v32 = vrot.slane %v1086_v9, 1  ;;  %v1922_v25 = vrot.slane %v1670_v7, 4  ;;  %v11963_v9 = vpop.permute.xlu1 %7906  ;;  %v16649_v4 = vrot.slane %v11848_v3, 5 }
 0x2a5   : > { %v3604_v61 = vrot.slane %v11934_v6, 4  ;;  %v11954_v13 = vrot.slane %v16114_v49, 1  ;;  %v782_v41 = vpop.permute.xlu0 %781 }
 0x2a6   : > { %v1342_v48 = vsel %vm1211_vm0, %v1339_v39, %v1341_v32  ;;  %v1344_v37 = vsel %vm1211_vm0, %v1341_v32, %v16115_v29  ;;  %v16646_v32 = vrot.slane %v11921_v33, 4 }
 0x2a7   : > { %v3605_v18 = vsel %vm1798_vm1, %v16643_v10, %v3604_v61  ;;  %v11969_v26 = vadd.f32 %v1342_v48, %v11825_v50  ;;  %v11971_v49 = vadd.f32 %v1344_v37, %v983_v20  ;;  %v1923_v10 = vsel %vm1798_vm1, %v16645_v56, %v1922_v25 }
 0x2a8   : > { %v11966_v7 = vmax.f32 %v11126_v34, %v3605_v18  ;;  %v3154_v39 = vsel %vm1211_vm0, %v11863_v23, %v11954_v13  ;;  %v1925_v29 = vsel %vm1798_vm1, %v1922_v25, %v16646_v32  ;;  %v2143_v34 = vadd.f32 %v1923_v10, %v11752_v21 }
 0x2a9   : > { %v2494_v18 = vrot.slane %v2242_v31, 5  ;;  %v16647_v50 = vmax.f32 %v11831_v59, 0.0  ;;  %v2144_v48 = vadd.f32 %v1925_v29, %v11797_v0  ;;  %v16648_v56 = vrot.slane %v11777_v22, 4 }
 0x2aa   : > { %16644 = vst [vmem:[#allocation22_spill] sm:$0xff] %v11966_v7  ;;  %v8025_v2 = vpack.i.bf16 %v11966_v7, %v11837_v57  ;;  %v16650_v21 = vrot.slane %v11924_v8, 5  ;;  %v4047_v10 = vrot.slane %v11966_v7, 2  ;;  %v16654_v32 = vrot.slane %v11837_v57, 2 }
 0x2ab   : > { %v11985_v20 = vmax.f32 %v16647_v50, %v3154_v39  ;;  %v3607_v37 = vsel %vm1798_vm1, %v3604_v61, %v16648_v56  ;;  %v2495_v25 = vsel %vm2370_vm2, %v16649_v4, %v2494_v18  ;;  %v16652_v39 = vunpack.i.l.bf16 %v11677_v16 }
 0x2ac   : > { %v2497_v31 = vsel %vm2370_vm2, %v2494_v18, %v16650_v21  ;;  %v12000_v59 = vmax.f32 %v11489_v53, %v3607_v37  ;;  %8026 = vrot.lane.b32.xlu1 %v8025_v2, %s8690_s19  ;;  %v2715_v0 = vadd.f32 %v2495_v25, %v2143_v34  ;;  %v16653_v4 = vunpack.i.h.bf16 %v11677_v16  ;;  %v16660_v37 = vld [vmem:[#allocation54_spill] sm:$0xff] }
 0x2ad   : > { %v2716_v29 = vadd.f32 %v2497_v31, %v2144_v48  ;;  %v4976_v3 = vsel %vm4955_vm6, %v11675_v17, %v16652_v39  ;;  %v12015_v53 = vsel %vm3947_vm3, %v16654_v32, %v4047_v10  ;;  %v16655_v34 = vunpack.i.l.bf16 %v11704_v28  ;;  %v7917_v48 = vpop.permute.xlu1 %7916  ;;  %v429_v32 = vld [vmem:[%s8841_s13 + $0x2a0] sm:$0xff] }
 0x2ae   : > { %16651 = vst [vmem:[#allocation41_spill] sm:$0xff] %v12000_v59  ;;  %v4977_v61 = vsel %vm4955_vm6, %v11671_v62, %v16653_v4  ;;  %v4049_v18 = vrot.slane %v12000_v59, 2  ;;  %v16656_v2 = vunpack.i.h.bf16 %v11704_v28  ;;  %v2816_v16 = vadd.f32 %v11417_v36, %v2715_v0  ;;  %v12041_v0 = vpop.permute.xlu0 %7921 }
 0x2af   : > { %v5059_v50 = vsel %vm5038_vm7, %v4976_v3, %v16655_v34  ;;  %v12026_v62 = vadd.f32 %v11417_v36, %v2716_v29  ;;  %v12036_v28 = vmul.f32 %v16609_v54, %v782_v41  ;;  %v12039_v31 = vmul.f32 %v16602_v52, %v782_v41 }
 0x2b0   : > { %v5060_v17 = vsel %vm5038_vm7, %v4977_v61, %v16656_v2  ;;  %v12032_v25 = vsel %vm3947_vm3, %v4047_v10, %v4049_v18  ;;  %v2910_v36 = vmax.f32 %v2816_v16, 0.0  ;;  %v16657_v39 = vpack.i.bf16 %v11258_v63, %v11253_v38 }
 0x2b1   : > { %v5131_v56 = vpack.c.bf16 %v5060_v17, %v5059_v50  ;;  %v16117_v29 = vmax.f32 %v12026_v62, 0.0  ;;  %v8030_v10 = vpack.i.bf16 %v12032_v25, %v12015_v53  ;;  %v1672_v3 = vmul.f32 %v16610_v44, %v782_v41  ;;  %v787_v21 = vpop.permute.xlu1 %786 }
 0x2b2   : > { %8036 = vrot.lane.b32.xlu1 %v16657_v39, %s8691_s20  ;;  %v1345_v4 = vrot.slane %v12039_v31, 1  ;;  %v12053_v61 = vmul.f32 %v8932_v19, %v782_v41  ;;  %v7919_v34 = vunpack.i.h.bf16 %v7917_v48  ;;  %v7918_v50 = vunpack.i.l.bf16 %v7917_v48  ;;  %v16659_v31 = vld [vmem:[#allocation32_spill] sm:$0xff] }
 0x2b3   : > { %7511 = vmatmul.mubr.bf16.gmra.mxu0 %v5131_v56  ;;  %v12058_v38 = vrot.slane %v2910_v36, 1  ;;  %v12062_v63 = vrot.slane %v16117_v29, 1  ;;  %8031 = vrot.lane.b32.xlu0 %v8030_v10, %s8692_s21  ;;  %v1926_v2 = vrot.slane %v1672_v3, 4  ;;  %v16658_v41 = vrot.slane %v11918_v46, 1  ;;  %v428_v56 = vld [vmem:[%s8841_s13 + $0x298] sm:$0xff] }
 0x2b4   : > { %7514 = vmatprep.mubr.msk.bf16.mxu0 %vm8694_vm4, %v16525_v55  ;;  %v2498_v48 = vrot.slane %v12053_v61, 5  ;;  %v12073_v39 = vsel %vm4872_vm5, %v16659_v31, %v7919_v34  ;;  %v12077_v29 = vsel %vm4872_vm5, %v16660_v37, %v7918_v50  ;;  %v16661_v3 = vrot.slane %v11921_v33, 4 }
 0x2b5   : > { %v1346_v16 = vsel %vm1211_vm0, %v16658_v41, %v1345_v4  ;;  %v3158_v10 = vsel %vm1211_vm0, %v12058_v38, %v12062_v63  ;;  %v16662_v50 = vrot.slane %v11924_v8, 5  ;;  %v16663_v33 = vmax.f32 %v11738_v43, 0.0 }
 0x2b6   : > { %v12083_v46 = vadd.f32 %v1346_v16, %v11914_v40  ;;  %v1927_v61 = vsel %vm1798_vm1, %v16661_v3, %v1926_v2  ;;  %866 = vperm.xlu1 %7704, %v429_v32   ;;  %v12089_v41 = vmax.f32 %v2910_v36, %v3158_v10  ;;  %v3148_v40 = vsel %vm1211_vm0, %v11758_v47, %v11810_v45  ;;  %v7932_v3 = vpop.permute.xlu0 %7931 }
 0x2b7   : > { %v2145_v37 = vadd.f32 %v1927_v61, %v11886_v60  ;;  %v2499_v31 = vsel %vm2370_vm2, %v16662_v50, %v2498_v48  ;;  %861 = vperm.xlu0 %7703, %v428_v56   ;;  %v12100_v16 = vmax.f32 %v16663_v33, %v3148_v40  ;;  %v16664_v32 = vunpack.i.l.bf16 %v11742_v58  ;;  %v12127_v33 = vld [vmem:[#allocation4] ss:$0 sm:$0xff] }
 0x2b8   : > { %v16665_v60 = vunpack.i.h.bf16 %v11742_v58  ;;  %v12111_v10 = vmul.f32 %v16609_v54, %v787_v21  ;;  %v16666_v43 = vunpack.i.l.bf16 %v11735_v30  ;;  %v16667_v61 = vunpack.i.h.bf16 %v11735_v30 }
 0x2b9   : > { %v4978_v36 = vsel %vm4955_vm6, %v11715_v14, %v16664_v32  ;;  %v2717_v45 = vadd.f32 %v2499_v31, %v2145_v37  ;;  %v3608_v58 = vrot.slane %v12100_v16, 4  ;;  %v12125_v40 = vmul.f32 %v16610_v44, %v787_v21 }
 0x2ba   : > { %v4979_v8 = vsel %vm4955_vm6, %v11711_v51, %v16665_v60  ;;  %v5061_v56 = vsel %vm5038_vm7, %v4978_v36, %v16666_v43  ;;  %v12122_v51 = vmul.f32 %v16602_v52, %v787_v21  ;;  %v12133_v31 = vmul.f32 %v8932_v19, %v787_v21  ;;  %v12135_v36 = vpop.permute.xlu1 %7926 }
 0x2bb   : > { %v5062_v14 = vsel %vm5038_vm7, %v4979_v8, %v16667_v61  ;;  %v12130_v37 = vadd.f32 %v12127_v33, %v2717_v45  ;;  %v7934_v30 = vunpack.i.h.bf16 %v7932_v3  ;;  %v7933_v32 = vunpack.i.l.bf16 %v7932_v3 }
 0x2bc   : > { %v5132_v50 = vpack.c.bf16 %v5062_v14, %v5061_v56  ;;  %v16668_v60 = vrot.slane %v11777_v22, 4  ;;  %v16669_v43 = vrot.slane %v11839_v11, 4  ;;  %v16121_v61 = vrot.slane %v12122_v51, 1 }
 0x2bd   : > { %v16120_v45 = vrot.slane %v12125_v40, 4  ;;  %v16122_v21 = vmax.f32 %v12130_v37, 0.0  ;;  %v16119_v17 = vrot.slane %v12133_v31, 5 }
 0x2be   : > { %v3609_v8 = vsel %vm1798_vm1, %v16668_v60, %v3608_v58  ;;  %v3611_v56 = vsel %vm1798_vm1, %v3608_v58, %v16669_v43  ;;  %7515 = vmatmul.mubr.bf16.gmra.mxu0 %v5132_v50  ;;  %v1348_v58 = vsel %vm1211_vm0, %v1345_v4, %v16121_v61  ;;  %v16672_v60 = vld [vmem:[#allocation48_spill] sm:$0xff]  ;;  %v797_v43 = vpop.permute.xlu0 %796 }
 0x2bf   : > { %v12147_v14 = vmax.f32 %v11792_v24, %v3609_v8  ;;  %v12150_v3 = vmax.f32 %v11706_v27, %v3611_v56  ;;  %7518 = vmatprep.mubr.msk.bf16.mxu0 %vm8694_vm4, %v16525_v55  ;;  %v1929_v50 = vsel %vm1798_vm1, %v1926_v2, %v16120_v45  ;;  %v12163_v24 = vsel %vm4872_vm5, %v16672_v60, %v7934_v30  ;;  %v16674_v8 = vld [vmem:[#allocation29_spill] sm:$0xff] }
 0x2c0   : > { %16673 = vst [vmem:[#allocation13_spill] sm:$0xff] %v12163_v24  ;;  %v12167_v27 = vsel %vm4872_vm5, %v16674_v8, %v7933_v32  ;;  %v12171_v56 = vrot.slane %v16122_v21, 1  ;;  %v12178_v47 = vadd.f32 %v1348_v58, %v12036_v28  ;;  %v2146_v30 = vadd.f32 %v1929_v50, %v11969_v26  ;;  %v16676_v26 = vld [vmem:[#allocation31_spill] sm:$0xff]  ;;  %v16681_v21 = vld [vmem:[#allocation30_spill] sm:$0xff] }
 0x2c1   : > { %16670 = vst [vmem:[#allocation64_spill] sm:$0xff] %v12147_v14  ;;  %16671 = vst [vmem:[#allocation28_spill] sm:$0xff] %v12150_v3  ;;  %v8040_v4 = vpack.i.bf16 %v12147_v14, %v12000_v59  ;;  %v4051_v34 = vrot.slane %v12147_v14, 2  ;;  %v16118_v2 = vrot.slane %v12150_v3, 2  ;;  %v2501_v32 = vsel %vm2370_vm2, %v2498_v48, %v16119_v17  ;;  %v792_v48 = vpop.permute.xlu1 %791  ;;  %v16684_v59 = vld [vmem:[#allocation50_spill] sm:$0xff] }
 0x2c2   : > { %16675 = vst [vmem:[#allocation51_spill] sm:$0xff] %v12167_v27  ;;  %v8050_v60 = vpack.i.bf16 %v11869_v1, %v11552_v12  ;;  %v2718_v1 = vadd.f32 %v2501_v32, %v2146_v30  ;;  %v12202_v50 = vmul.f32 %v16609_v54, %v797_v43  ;;  %v3152_v58 = vsel %vm1211_vm0, %v16676_v26, %v11863_v23  ;;  %v16679_v30 = vld [vmem:[#allocation36_spill] sm:$0xff]  ;;  %v12233_v26 = vpop.permute.xlu0 %7941 }
 0x2c3   : > { %8041 = vrot.lane.b32.xlu0 %v8040_v4, %s8690_s19  ;;  %v12190_v8 = vsel %vm3947_vm3, %v4049_v18, %v4051_v34  ;;  %v12195_v28 = vsel %vm3947_vm3, %v4051_v34, %v16118_v2  ;;  %v12205_v18 = vmul.f32 %v16602_v52, %v797_v43  ;;  %v12208_v4 = vmul.f32 %v16610_v44, %v797_v43  ;;  %v16677_v2 = vld [vmem:[#allocation43_spill] sm:$0xff] }
 0x2c4   : > { %v8045_v12 = vpack.i.bf16 %v12195_v28, %v12190_v8  ;;  %v12211_v34 = vmul.f32 %v8932_v19, %v797_v43  ;;  %v16678_v17 = vunpack.i.l.bf16 %v16677_v2  ;;  %v12222_v45 = vadd.f32 %v12127_v33, %v2718_v1 }
 0x2c5   : > { %v16682_v43 = vmax.f32 %v16681_v21, 0.0  ;;  %v16683_v7 = vunpack.i.h.bf16 %v16677_v2  ;;  %v1674_v1 = vmul.f32 %v16610_v44, %v792_v48  ;;  %v2246_v57 = vmul.f32 %v8932_v19, %v792_v48 }
 0x2c6   : > { %v4980_v32 = vsel %vm4955_vm6, %v16679_v30, %v16678_v17  ;;  %8046 = vrot.lane.b32.xlu1 %v8045_v12, %s8692_s21  ;;  %16680 = vst [vmem:[#allocation20_spill] sm:$0xff] %v12222_v45  ;;  %v430_v17 = vld [vmem:[%s8841_s13 + $0x2a8] sm:$0xff]  ;;  %v16685_v30 = vunpack.i.l.bf16 %v11850_v42  ;;  %v1090_v12 = vmul.f32 %v16602_v52, %v792_v48 }
 0x2c7   : > { %v12227_v14 = vmax.f32 %v16682_v43, %v3152_v58  ;;  %v4981_v23 = vsel %vm4955_vm6, %v16684_v59, %v16683_v7  ;;  %8051 = vrot.lane.b32.xlu0 %v8050_v60, %s8691_s20  ;;  %v16686_v58 = vunpack.i.h.bf16 %v11850_v42  ;;  %v16128_v43 = vmax.f32 %v12222_v45, 0.0  ;;  %v431_v7 = vld [vmem:[%s8841_s13 + $0x2b0] sm:$0xff] }
 0x2c8   : > { %v5063_v21 = vsel %vm5038_vm7, %v4980_v32, %v16685_v30  ;;  %v987_v60 = vmul.f32 %v16609_v54, %v792_v48  ;;  %v12253_v30 = vpop.permute.xlu1 %7936  ;;  %v1349_v32 = vrot.slane %v1090_v12, 1  ;;  %v1930_v27 = vrot.slane %v1674_v1, 4 }
 0x2c9   : > { %v5064_v2 = vsel %vm5038_vm7, %v4981_v23, %v16686_v58  ;;  %v3612_v59 = vrot.slane %v12227_v14, 4  ;;  %v12257_v42 = vrot.slane %v16128_v43, 1  ;;  %v16687_v23 = vrot.slane %v11839_v11, 4  ;;  %v802_v43 = vpop.permute.xlu0 %801 }
 0x2ca   : > { %v5133_v61 = vpack.c.bf16 %v5064_v2, %v5063_v21  ;;  %871 = vperm.xlu1 %7704, %v430_v17   ;;  %v16688_v2 = vld [vmem:[#allocation40_spill] sm:$0xff]  ;;  %v2502_v45 = vrot.slane %v2246_v57, 5  ;;  %v16691_v12 = vrot.slane %v12122_v51, 1 }
 0x2cb   : > { %v3613_v21 = vsel %vm1798_vm1, %v16687_v23, %v3612_v59  ;;  %v8065_v24 = vpack.i.bf16 %v12015_v53, %v16688_v2  ;;  %876 = vperm.xlu0 %7703, %v431_v7   ;;  %v3162_v17 = vsel %vm1211_vm0, %v12171_v56, %v12257_v42  ;;  %v16690_v7 = vmax.f32 %v12130_v37, 0.0 }
 0x2cc   : > { %7519 = vmatmul.mubr.bf16.gmra.mxu0 %v5133_v61  ;;  %v12266_v48 = vmax.f32 %v11934_v6, %v3613_v21  ;;  %v16129_v61 = vrot.slane %v11985_v20, 4  ;;  %v1350_v1 = vsel %vm1211_vm0, %v16691_v12, %v1349_v32  ;;  %v16692_v21 = vrot.slane %v12205_v18, 1 }
 0x2cd   : > { %7522 = vmatprep.mubr.msk.bf16.mxu0 %vm8694_vm4, %v16525_v55  ;;  %v12278_v6 = vmax.f32 %v16690_v7, %v3162_v17  ;;  %v12289_v58 = vadd.f32 %v1350_v1, %v12111_v10  ;;  %v16693_v37 = vrot.slane %v12125_v40, 4  ;;  %v16694_v7 = vrot.slane %v12208_v4, 4 }
 0x2ce   : > { %16689 = vst [vmem:[#allocation21_spill] sm:$0xff] %v12266_v48  ;;  %v8055_v57 = vpack.i.bf16 %v12266_v48, %v12150_v3  ;;  %v1352_v2 = vsel %vm1211_vm0, %v1349_v32, %v16692_v21  ;;  %v16695_v21 = vrot.slane %v12133_v31, 5  ;;  %v3615_v1 = vsel %vm1798_vm1, %v3612_v59, %v16129_v61 }
 0x2cf   : > { %v12291_v23 = vadd.f32 %v1352_v2, %v987_v60  ;;  %v1931_v17 = vsel %vm1798_vm1, %v16693_v37, %v1930_v27  ;;  %v1933_v51 = vsel %vm1798_vm1, %v1930_v27, %v16694_v7  ;;  %v16696_v60 = vrot.slane %v12211_v34, 5 }
 0x2d0   : > { %8056 = vrot.lane.b32.xlu1 %v8055_v57, %s8690_s19  ;;  %v2147_v12 = vadd.f32 %v1931_v17, %v11971_v49  ;;  %v2148_v32 = vadd.f32 %v1933_v51, %v12083_v46  ;;  %v2503_v10 = vsel %vm2370_vm2, %v16695_v21, %v2502_v45  ;;  %v4055_v27 = vrot.slane %v12266_v48, 2  ;;  %v7947_v46 = vpop.permute.xlu1 %7946 }
 0x2d1   : > { %v2505_v40 = vsel %vm2370_vm2, %v2502_v45, %v16696_v60  ;;  %v12313_v57 = vmul.f32 %v16609_v54, %v802_v43  ;;  %v12316_v49 = vmul.f32 %v16602_v52, %v802_v43  ;;  %v12319_v37 = vmax.f32 %v11777_v22, %v3615_v1 }
 0x2d2   : > { %v2719_v31 = vadd.f32 %v2503_v10, %v2147_v12  ;;  %v2720_v2 = vadd.f32 %v2505_v40, %v2148_v32  ;;  %v12322_v45 = vmul.f32 %v16610_v44, %v802_v43  ;;  %v16698_v59 = vrot.slane %v12150_v3, 2  ;;  %v12344_v40 = vpop.permute.xlu0 %7951 }
 0x2d3   : > { %16697 = vst [vmem:[#allocation63_spill] sm:$0xff] %v12319_v37  ;;  %v16133_v7 = vrot.slane %v12316_v49, 1  ;;  %v12331_v51 = vmul.f32 %v8932_v19, %v802_v43  ;;  %v16699_v12 = vunpack.i.l.bf16 %v11963_v9  ;;  %v16130_v10 = vrot.slane %v12319_v37, 2 }
 0x2d4   : > { %v12327_v17 = vsel %vm3947_vm3, %v16698_v59, %v4055_v27  ;;  %v2820_v22 = vadd.f32 %v12127_v33, %v2719_v31  ;;  %v12339_v21 = vadd.f32 %v12127_v33, %v2720_v2  ;;  %8066 = vrot.lane.b32.xlu1 %v8065_v24, %s8691_s20  ;;  %v16131_v60 = vrot.slane %v12322_v45, 4  ;;  %v433_v31 = vld [vmem:[%s8841_s13 + $0x2c0] sm:$0xff] }
 0x2d5   : > { %v4982_v32 = vsel %vm4955_vm6, %v11910_v15, %v16699_v12  ;;  %v16700_v43 = vrot.slane %v12205_v18, 1  ;;  %v2506_v15 = vrot.slane %v12331_v51, 5  ;;  %v16701_v2 = vunpack.i.h.bf16 %v11963_v9 }
 0x2d6   : > { %v16702_v59 = vunpack.i.l.bf16 %v11938_v35  ;;  %v2914_v53 = vmax.f32 %v2820_v22, 0.0  ;;  %v16132_v61 = vmax.f32 %v12339_v21, 0.0  ;;  %v12364_v18 = vsel %vm3947_vm3, %v4055_v27, %v16130_v10 }
 0x2d7   : > { %v1354_v1 = vsel %vm1211_vm0, %v16700_v43, %v16133_v7  ;;  %v4983_v24 = vsel %vm4955_vm6, %v11891_v5, %v16701_v2  ;;  %v8060_v9 = vpack.i.bf16 %v12364_v18, %v12327_v17  ;;  %v16703_v5 = vrot.slane %v12208_v4, 4  ;;  %v16712_v7 = vld [vmem:[#allocation60_spill] sm:$0xff] }
 0x2d8   : > { %v5065_v12 = vsel %vm5038_vm7, %v4982_v32, %v16702_v59  ;;  %v12367_v51 = vadd.f32 %v1354_v1, %v12202_v50  ;;  %v16704_v22 = vrot.slane %v12211_v34, 5  ;;  %v16705_v27 = vunpack.i.h.bf16 %v11938_v35  ;;  %v807_v50 = vpop.permute.xlu1 %806  ;;  %886 = vperm.xlu1 %7704, %v433_v31  }
 0x2d9   : > { %v1935_v32 = vsel %vm1798_vm1, %v16703_v5, %v16131_v60  ;;  %v12382_v1 = vrot.slane %v2914_v53, 1  ;;  %v12386_v59 = vrot.slane %v16132_v61, 1  ;;  %8061 = vrot.lane.b32.xlu0 %v8060_v9, %s8692_s21  ;;  %v7949_v34 = vunpack.i.h.bf16 %v7947_v46  ;;  %v432_v60 = vld [vmem:[%s8841_s13 + $0x2b8] sm:$0xff] }
 0x2da   : > { %v2507_v43 = vsel %vm2370_vm2, %v16704_v22, %v2506_v15  ;;  %v5066_v2 = vsel %vm5038_vm7, %v4983_v24, %v16705_v27  ;;  %v2149_v4 = vadd.f32 %v1935_v32, %v12178_v47  ;;  %v7948_v10 = vunpack.i.l.bf16 %v7947_v46  ;;  %v16706_v9 = vld [vmem:[#allocation23_spill] sm:$0xff] }
 0x2db   : > { %v5134_v5 = vpack.c.bf16 %v5066_v2, %v5065_v12  ;;  %v3166_v24 = vsel %vm1211_vm0, %v12382_v1, %v12386_v59  ;;  %v3156_v47 = vsel %vm1211_vm0, %v11954_v13, %v12058_v38  ;;  %v12400_v31 = vmul.f32 %v16609_v54, %v807_v50  ;;  %v7962_v12 = vpop.permute.xlu0 %7961  ;;  %v16707_v2 = vld [vmem:[#allocation18_spill] sm:$0xff] }
 0x2dc   : > { %v2721_v27 = vadd.f32 %v2507_v43, %v2149_v4  ;;  %v12402_v46 = vmax.f32 %v2914_v53, %v3166_v24  ;;  %v12406_v32 = vsel %vm4872_vm5, %v16706_v9, %v7949_v34  ;;  %v12410_v61 = vsel %vm4872_vm5, %v16707_v2, %v7948_v10  ;;  %v16708_v43 = vld [vmem:[#allocation39_spill] sm:$0xff]  ;;  %v12436_v22 = vpop.permute.xlu1 %7956  ;;  %v16713_v2 = vld [vmem:[#allocation58_spill] sm:$0xff] }
 0x2dd   : > { %7523 = vmatmul.mubr.bf16.gmra.mxu0 %v5134_v5  ;;  %v16709_v4 = vmax.f32 %v16708_v43, 0.0  ;;  %v12422_v38 = vmul.f32 %v16602_v52, %v807_v50  ;;  %v12425_v53 = vmul.f32 %v16610_v44, %v807_v50  ;;  %v12428_v34 = vmul.f32 %v8932_v19, %v807_v50  ;;  %881 = vperm.xlu0 %7703, %v432_v60  }
 0x2de   : > { %7526 = vmatprep.mubr.msk.bf16.mxu0 %vm8694_vm4, %v16525_v55  ;;  %v12419_v13 = vadd.f32 %v12127_v33, %v2721_v27  ;;  %v7963_v9 = vunpack.i.l.bf16 %v7962_v12  ;;  %v16710_v50 = vrot.slane %v11985_v20, 4  ;;  %v16711_v60 = vrot.slane %v12089_v41, 4 }
 0x2df   : > { %v12414_v5 = vmax.f32 %v16709_v4, %v3156_v47  ;;  %v7964_v47 = vunpack.i.h.bf16 %v7962_v12 }
 0x2e0   : > { %v12450_v27 = vsel %vm4872_vm5, %v16713_v2, %v7963_v9  ;;  %v16714_v4 = vmax.f32 %v12419_v13, 0.0  ;;  %v16719_v2 = vrot.slane %v12425_v53, 4 }
 0x2e1   : > { %v3616_v24 = vrot.slane %v12414_v5, 4  ;;  %v12446_v12 = vsel %vm4872_vm5, %v16712_v7, %v7964_v47  ;;  %v817_v47 = vpop.permute.xlu0 %816 }
 0x2e2   : > { %v12454_v43 = vrot.slane %v16714_v4, 1  ;;  %v16720_v4 = vrot.slane %v12322_v45, 4  ;;  %v16722_v45 = vunpack.i.l.bf16 %v12041_v0 }
 0x2e3   : > { %v3617_v35 = vsel %vm1798_vm1, %v16710_v50, %v3616_v24  ;;  %v3619_v10 = vsel %vm1798_vm1, %v3616_v24, %v16711_v60  ;;  %v16717_v24 = vrot.slane %v12422_v38, 1  ;;  %v16718_v60 = vrot.slane %v12316_v49, 1 }
 0x2e4   : > { %v12457_v48 = vmax.f32 %v12100_v16, %v3617_v35  ;;  %v12460_v50 = vmax.f32 %v11839_v11, %v3619_v10  ;;  %v1937_v16 = vsel %vm1798_vm1, %v16720_v4, %v16719_v2  ;;  %v16721_v35 = vrot.slane %v12428_v34, 5 }
 0x2e5   : > { %v1356_v7 = vsel %vm1211_vm0, %v16718_v60, %v16717_v24  ;;  %v8080_v10 = vpack.i.bf16 %v12190_v8, %v12032_v25  ;;  %v2150_v60 = vadd.f32 %v1937_v16, %v12289_v58  ;;  %v16723_v2 = vunpack.i.h.bf16 %v12041_v0 }
 0x2e6   : > { %16715 = vst [vmem:[#allocation62_spill] sm:$0xff] %v12457_v48  ;;  %16716 = vst [vmem:[#allocation15_spill] sm:$0xff] %v12460_v50  ;;  %v12468_v9 = vadd.f32 %v1356_v7, %v12313_v57  ;;  %v2509_v11 = vsel %vm2370_vm2, %v2506_v15, %v16721_v35  ;;  %v8070_v49 = vpack.i.bf16 %v12457_v48, %v12319_v37  ;;  %v4059_v24 = vrot.slane %v12457_v48, 2  ;;  %v812_v35 = vpop.permute.xlu1 %811 }
 0x2e7   : > { %v16135_v57 = vrot.slane %v12460_v50, 2  ;;  %v4984_v7 = vsel %vm4955_vm6, %v12077_v29, %v16722_v45  ;;  %v4985_v15 = vsel %vm4955_vm6, %v12073_v39, %v16723_v2  ;;  %v16724_v4 = vrot.slane %v12319_v37, 2 }
 0x2e8   : > { %8071 = vrot.lane.b32.xlu0 %v8070_v49, %s8690_s19  ;;  %v2722_v0 = vadd.f32 %v2509_v11, %v2150_v60  ;;  %v16725_v16 = vunpack.i.l.bf16 %v12135_v36  ;;  %v16726_v49 = vunpack.i.h.bf16 %v12135_v36  ;;  %v12529_v36 = vpop.permute.xlu0 %7971  ;;  %v16727_v8 = vmax.f32 %v12026_v62, 0.0 }
 0x2e9   : > { %v12499_v58 = vsel %vm3947_vm3, %v16724_v4, %v4059_v24  ;;  %v12504_v29 = vsel %vm3947_vm3, %v4059_v24, %v16135_v57  ;;  %v12515_v4 = vmul.f32 %v16609_v54, %v817_v47  ;;  %v12518_v24 = vmul.f32 %v16602_v52, %v817_v47 }
 0x2ea   : > { %v5067_v39 = vsel %vm5038_vm7, %v4984_v7, %v16725_v16  ;;  %v8075_v45 = vpack.i.bf16 %v12504_v29, %v12499_v58  ;;  %v5068_v2 = vsel %vm5038_vm7, %v4985_v15, %v16726_v49  ;;  %v12521_v11 = vadd.f32 %v12127_v33, %v2722_v0  ;;  %v435_v15 = vld [vmem:[%s8841_s13 + $0x2d0] sm:$0xff] }
 0x2eb   : > { %v5135_v60 = vpack.c.bf16 %v5068_v2, %v5067_v39  ;;  %v12524_v7 = vmul.f32 %v16610_v44, %v817_v47  ;;  %v12527_v16 = vmul.f32 %v8932_v19, %v817_v47  ;;  %v3160_v49 = vsel %vm1211_vm0, %v12062_v63, %v12171_v56  ;;  %v434_v47 = vld [vmem:[%s8841_s13 + $0x2c8] sm:$0xff] }
 0x2ec   : > { %8076 = vrot.lane.b32.xlu1 %v8075_v45, %s8692_s21  ;;  %v991_v0 = vmul.f32 %v16609_v54, %v812_v35  ;;  %v1094_v39 = vmul.f32 %v16602_v52, %v812_v35  ;;  %8081 = vrot.lane.b32.xlu0 %v8080_v10, %s8691_s20  ;;  %v12545_v57 = vmax.f32 %v16727_v8, %v3160_v49  ;;  %v16728_v10 = vmax.f32 %v12521_v11, 0.0 }
 0x2ed   : > { %7527 = vmatmul.mubr.bf16.gmra.mxu0 %v5135_v60  ;;  %v1678_v56 = vmul.f32 %v16610_v44, %v812_v35  ;;  %v2250_v48 = vmul.f32 %v8932_v19, %v812_v35  ;;  %v8095_v8 = vpack.i.bf16 %v12327_v17, %v12195_v28  ;;  %v16729_v49 = vrot.slane %v12422_v38, 1 }
 0x2ee   : > { %v1357_v63 = vrot.slane %v1094_v39, 1  ;;  %7530 = vmatprep.mubr.msk.bf16.mxu0 %vm8694_vm4, %v16525_v55  ;;  %v12555_v60 = vrot.slane %v16728_v10, 1  ;;  %v3620_v45 = vrot.slane %v12545_v57, 4  ;;  %v16730_v39 = vrot.slane %v12518_v24, 1  ;;  %v12567_v10 = vpop.permute.xlu1 %7966 }
 0x2ef   : > { %v1938_v25 = vrot.slane %v1678_v56, 4  ;;  %v2510_v37 = vrot.slane %v2250_v48, 5  ;;  %v16731_v28 = vrot.slane %v12089_v41, 4 }
 0x2f0   : > { %891 = vperm.xlu1 %7704, %v434_v47   ;;  %v1358_v35 = vsel %vm1211_vm0, %v16729_v49, %v1357_v63  ;;  %v1360_v2 = vsel %vm1211_vm0, %v1357_v63, %v16730_v39  ;;  %v3170_v62 = vsel %vm1211_vm0, %v12454_v43, %v12555_v60  ;;  %896 = vperm.xlu0 %7703, %v435_v15   ;;  %v16732_v63 = vmax.f32 %v12419_v13, 0.0 }
 0x2f1   : > { %v3621_v17 = vsel %vm1798_vm1, %v16731_v28, %v3620_v45  ;;  %v12576_v38 = vadd.f32 %v1358_v35, %v12400_v31  ;;  %v12578_v47 = vadd.f32 %v1360_v2, %v991_v0  ;;  %v16734_v49 = vrot.slane %v12425_v53, 4  ;;  %v822_v35 = vpop.permute.xlu0 %821 }
 0x2f2   : > { %v12582_v56 = vmax.f32 %v16732_v63, %v3170_v62  ;;  %v12585_v48 = vmax.f32 %v12227_v14, %v3621_v17  ;;  %v16735_v39 = vrot.slane %v12524_v7, 4  ;;  %v16736_v2 = vrot.slane %v12428_v34, 5  ;;  %v16739_v63 = vld [vmem:[#allocation51_spill] sm:$0xff] }
 0x2f3   : > { %v1939_v15 = vsel %vm1798_vm1, %v16734_v49, %v1938_v25  ;;  %v16737_v62 = vrot.slane %v12527_v16, 5  ;;  %v16139_v17 = vrot.slane %v12278_v6, 4 }
 0x2f4   : > { %16733 = vst [vmem:[#allocation14_spill] sm:$0xff] %v12585_v48  ;;  %v1941_v28 = vsel %vm1798_vm1, %v1938_v25, %v16735_v39  ;;  %v2151_v31 = vadd.f32 %v1939_v15, %v12291_v23  ;;  %v2511_v13 = vsel %vm2370_vm2, %v16736_v2, %v2510_v37  ;;  %v8085_v53 = vpack.i.bf16 %v12585_v48, %v12460_v50  ;;  %v16741_v39 = vld [vmem:[#allocation13_spill] sm:$0xff] }
 0x2f5   : > { %v2152_v0 = vadd.f32 %v1941_v28, %v12367_v51  ;;  %v2513_v14 = vsel %vm2370_vm2, %v2510_v37, %v16737_v62  ;;  %v4063_v25 = vrot.slane %v12585_v48, 2  ;;  %v16738_v23 = vunpack.i.l.bf16 %v12253_v30 }
 0x2f6   : > { %v2723_v34 = vadd.f32 %v2511_v13, %v2151_v31  ;;  %v16740_v15 = vunpack.i.h.bf16 %v12253_v30  ;;  %v16742_v28 = vunpack.i.l.bf16 %v12233_v26  ;;  %8086 = vrot.lane.b32.xlu1 %v8085_v53, %s8690_s19  ;;  %v3623_v62 = vsel %vm1798_vm1, %v3620_v45, %v16139_v17 }
 0x2f7   : > { %v4986_v51 = vsel %vm4955_vm6, %v16739_v63, %v16738_v23  ;;  %v2724_v49 = vadd.f32 %v2513_v14, %v2152_v0  ;;  %v16743_v48 = vrot.slane %v12460_v50, 2  ;;  %v16744_v30 = vunpack.i.h.bf16 %v12233_v26  ;;  %v7977_v14 = vpop.permute.xlu1 %7976  ;;  %v12629_v23 = vpop.f32.mrf.mxu0 }
 0x2f8   : > { %v4987_v37 = vsel %vm4955_vm6, %v16741_v39, %v16740_v15  ;;  %v5069_v2 = vsel %vm5038_vm7, %v4986_v51, %v16742_v28  ;;  %16745 = vst [vmem:[#allocation34_spill] sm:$0xff] %v12629_v23  ;;  %v2824_v53 = vadd.f32 %v12127_v33, %v2723_v34  ;;  %v12636_v45 = vmax.f32 %v11985_v20, %v3623_v62 }
 0x2f9   : > { %v12623_v31 = vsel %vm3947_vm3, %v16743_v48, %v4063_v25  ;;  %v5070_v0 = vsel %vm5038_vm7, %v4987_v37, %v16744_v30  ;;  %v12633_v63 = vadd.f32 %v12127_v33, %v2724_v49  ;;  %v12640_v26 = vmul.f32 %v16609_v54, %v822_v35  ;;  %v7472_v37 = vpop.f32.mrf.mxu0  ;;  %v437_v48 = vld [vmem:[%s8841_s13 + $0x2e0] sm:$0xff] }
 0x2fa   : > { %16746 = vst [vmem:[#allocation16_spill] sm:$0xff] %v12636_v45  ;;  %v5136_v51 = vpack.c.bf16 %v5070_v0, %v5069_v2  ;;  %v12643_v15 = vmul.f32 %v16602_v52, %v822_v35  ;;  %v12646_v39 = vmul.f32 %v16610_v44, %v822_v35  ;;  %v2918_v34 = vmax.f32 %v2824_v53, 0.0  ;;  %v12653_v2 = vpop.permute.xlu0 %7981  ;;  %8096 = vrot.lane.b32.xlu1 %v8095_v8, %s8691_s20 }
 0x2fb   : > { %v16140_v49 = vmax.f32 %v12633_v63, 0.0  ;;  %v16143_v20 = vrot.slane %v12636_v45, 2  ;;  %v12651_v28 = vmul.f32 %v8932_v19, %v822_v35  ;;  %v7979_v0 = vunpack.i.h.bf16 %v7977_v14  ;;  %v12660_v53 = vpop.f32.mrf.mxu0 }
 0x2fc   : > { %7531 = vmatmul.mubr.bf16.gmra.mxu0 %v5136_v51  ;;  %v16144_v62 = vrot.slane %v12643_v15, 1  ;;  %v7978_v37 = vunpack.i.l.bf16 %v7977_v14  ;;  %16747 = vst [vmem:[#allocation45_spill] sm:$0xff] %v12660_v53  ;;  %v12662_v13 = vrot.slane %v2918_v34, 1  ;;  %v16748_v17 = vrot.slane %v12518_v24, 1 }
 0x2fd   : > { %7534 = vmatprep.mubr.msk.bf16.mxu0 %vm8694_vm4, %v16525_v55  ;;  %v12666_v35 = vrot.slane %v16140_v49, 1  ;;  %v12671_v8 = vsel %vm3947_vm3, %v4063_v25, %v16143_v20  ;;  %v2514_v51 = vrot.slane %v12651_v28, 5  ;;  %v16749_v49 = vrot.slane %v12646_v39, 4  ;;  %v16751_v25 = vld [vmem:[#allocation65_spill] sm:$0xff]  ;;  %v827_v20 = vpop.permute.xlu1 %826  ;;  %v7473_v53 = vpop.f32.mrf.mxu0 }
 0x2fe   : > { %v8090_v14 = vpack.i.bf16 %v12671_v8, %v12623_v31  ;;  %v1362_v30 = vsel %vm1211_vm0, %v16748_v17, %v16144_v62  ;;  %v16750_v50 = vrot.slane %v12524_v7, 4  ;;  %v12689_v28 = vsel %vm4872_vm5, %v16751_v25, %v7979_v0  ;;  %906 = vperm.xlu1 %7704, %v437_v48   ;;  %v16753_v0 = vld [vmem:[#allocation61_spill] sm:$0xff] }
 0x2ff   : > { %v3174_v23 = vsel %vm1211_vm0, %v12662_v13, %v12666_v35  ;;  %v12695_v24 = vadd.f32 %v1362_v30, %v12515_v4  ;;  %v16752_v7 = vrot.slane %v12527_v16, 5  ;;  %v12706_v53 = vsel %vm4872_vm5, %v16753_v0, %v7978_v37  ;;  %v12710_v30 = vpop.f32.mrf.mxu0  ;;  %v16757_v0 = vld [vmem:[#allocation20_spill] sm:$0xff] }
 0x300   : > { %v1943_v3 = vsel %vm1798_vm1, %v16750_v50, %v16749_v49  ;;  %v12701_v49 = vmax.f32 %v2918_v34, %v3174_v23  ;;  %8091 = vrot.lane.b32.xlu0 %v8090_v14, %s8692_s21  ;;  %16754 = vst [vmem:[#allocation42_spill] sm:$0xff] %v12710_v30  ;;  %v3164_v16 = vsel %vm1211_vm0, %v12257_v42, %v12382_v1  ;;  %v16755_v23 = vunpack.i.l.bf16 %v12344_v40  ;;  %v7992_v14 = vpop.permute.xlu0 %7991 }
 0x301   : > { %v2153_v17 = vadd.f32 %v1943_v3, %v12468_v9  ;;  %v2515_v50 = vsel %vm2370_vm2, %v16752_v7, %v2514_v51  ;;  %v436_v9 = vld [vmem:[%s8841_s13 + $0x2d8] sm:$0xff]  ;;  %v16756_v34 = vunpack.i.h.bf16 %v12344_v40  ;;  %v16759_v25 = vunpack.i.l.bf16 %v12436_v22 }
 0x302   : > { %v4988_v48 = vsel %vm4955_vm6, %v12410_v61, %v16755_v23  ;;  %v16760_v1 = vunpack.i.h.bf16 %v12436_v22  ;;  %v7476_v23 = vpop.f32.mrf.mxu0  ;;  %v12749_v22 = vmul.f32 %v8932_v19, %v827_v20 }
 0x303   : > { %v2725_v3 = vadd.f32 %v2515_v50, %v2153_v17  ;;  %v4989_v37 = vsel %vm4955_vm6, %v12406_v32, %v16756_v34  ;;  %v16758_v17 = vmax.f32 %v16757_v0, 0.0  ;;  %v5071_v42 = vsel %vm5038_vm7, %v4988_v48, %v16759_v25 }
 0x304   : > { %v5072_v61 = vsel %vm5038_vm7, %v4989_v37, %v16760_v1  ;;  %v12739_v34 = vmul.f32 %v16609_v54, %v827_v20  ;;  %v12742_v0 = vmul.f32 %v16602_v52, %v827_v20  ;;  %901 = vperm.xlu0 %7703, %v436_v9   ;;  %v12746_v25 = vmul.f32 %v16610_v44, %v827_v20  ;;  %v12751_v37 = vpop.permute.xlu1 %7986 }
 0x305   : > { %v12727_v50 = vmax.f32 %v16758_v17, %v3164_v16  ;;  %v12736_v40 = vadd.f32 %v12127_v33, %v2725_v3  ;;  %v5137_v32 = vpack.c.bf16 %v5072_v61, %v5071_v42  ;;  %v7994_v48 = vunpack.i.h.bf16 %v7992_v14  ;;  %v12753_v3 = vpop.f32.mrf.mxu0 }
 0x306   : > { %16761 = vst [vmem:[#allocation17_spill] sm:$0xff] %v12753_v3  ;;  %v16147_v42 = vrot.slane %v12742_v0, 1  ;;  %v7993_v1 = vunpack.i.l.bf16 %v7992_v14  ;;  %v8110_v9 = vpack.i.bf16 %v12499_v58, %v12364_v18  ;;  %v16762_v61 = vrot.slane %v12278_v6, 4 }
 0x307   : > { %v3624_v16 = vrot.slane %v12727_v50, 4  ;;  %v16145_v17 = vmax.f32 %v12736_v40, 0.0  ;;  %7535 = vmatmul.mubr.bf16.gmra.mxu0 %v5137_v32  ;;  %v16763_v20 = vrot.slane %v12402_v46, 4  ;;  %v16146_v4 = vrot.slane %v12746_v25, 4  ;;  %v7477_v32 = vpop.f32.mrf.mxu0 }
 0x308   : > { %7538 = vmatprep.mubr.msk.bf16.mxu0 %vm8694_vm4, %v16525_v55  ;;  %v16767_v32 = vrot.slane %v12646_v39, 4  ;;  %v16770_v39 = vld [vmem:[#allocation27_spill] sm:$0xff] }
 0x309   : > { %v3625_v23 = vsel %vm1798_vm1, %v16762_v61, %v3624_v16  ;;  %v3627_v7 = vsel %vm1798_vm1, %v3624_v16, %v16763_v20  ;;  %v12771_v14 = vrot.slane %v16145_v17, 1  ;;  %v16766_v16 = vrot.slane %v12643_v15, 1  ;;  %v837_v20 = vpop.permute.xlu0 %836 }
 0x30a   : > { %v12774_v18 = vmax.f32 %v12414_v5, %v3625_v23  ;;  %v12777_v58 = vmax.f32 %v12089_v41, %v3627_v7  ;;  %v1945_v5 = vsel %vm1798_vm1, %v16767_v32, %v16146_v4  ;;  %v16768_v23 = vrot.slane %v12749_v22, 5  ;;  %v16769_v7 = vld [vmem:[#allocation19_spill] sm:$0xff] }
 0x30b   : > { %v1364_v61 = vsel %vm1211_vm0, %v16766_v16, %v16147_v42  ;;  %v12797_v17 = vsel %vm4872_vm5, %v16769_v7, %v7994_v48  ;;  %v12806_v32 = vsel %vm4872_vm5, %v16770_v39, %v7993_v1  ;;  %v12811_v48 = vmul.f32 %v16609_v54, %v837_v20  ;;  %v12827_v39 = vpop.f32.mrf.mxu0 }
 0x30c   : > { %16764 = vst [vmem:[#allocation46_spill] sm:$0xff] %v12774_v18  ;;  %16765 = vst [vmem:[#allocation33_spill] sm:$0xff] %v12777_v58  ;;  %v12785_v62 = vadd.f32 %v1364_v61, %v12640_v26  ;;  %v2517_v41 = vsel %vm2370_vm2, %v2514_v51, %v16768_v23  ;;  %v8100_v15 = vpack.i.bf16 %v12774_v18, %v12636_v45  ;;  %v4067_v26 = vrot.slane %v12774_v18, 2  ;;  %v832_v23 = vpop.permute.xlu1 %831 }
 0x30d   : > { %v16148_v16 = vrot.slane %v12777_v58, 2  ;;  %v2154_v61 = vadd.f32 %v1945_v5, %v12576_v38  ;;  %v16771_v7 = vrot.slane %v12636_v45, 2  ;;  %v12825_v5 = vmul.f32 %v16602_v52, %v837_v20  ;;  %16772 = vst [vmem:[#allocation24_spill] sm:$0xff] %v12827_v39  ;;  %v7480_v45 = vpop.f32.mrf.mxu0 }
 0x30e   : > { %8101 = vrot.lane.b32.xlu0 %v8100_v15, %s8690_s19  ;;  %v12832_v15 = vmul.f32 %v16610_v44, %v837_v20  ;;  %v16773_v51 = vmax.f32 %v12339_v21, 0.0  ;;  %v16775_v18 = vunpack.i.l.bf16 %v12567_v10  ;;  %v438_v45 = vld [vmem:[%s8841_s13 + $0x2e8] sm:$0xff] }
 0x30f   : > { %v12817_v42 = vsel %vm3947_vm3, %v16771_v7, %v4067_v26  ;;  %v12822_v38 = vsel %vm3947_vm3, %v4067_v26, %v16148_v16  ;;  %v2726_v1 = vadd.f32 %v2517_v41, %v2154_v61  ;;  %v12835_v7 = vmul.f32 %v8932_v19, %v837_v20  ;;  %v12862_v61 = vpop.permute.xlu0 %8001 }
 0x310   : > { %v8105_v4 = vpack.i.bf16 %v12822_v38, %v12817_v42  ;;  %v3168_v26 = vsel %vm1211_vm0, %v12386_v59, %v12454_v43  ;;  %v4990_v20 = vsel %vm4955_vm6, %v12450_v27, %v16775_v18  ;;  %v16778_v18 = vunpack.i.h.bf16 %v12529_v36 }
 0x311   : > { %v12841_v41 = vadd.f32 %v12127_v33, %v2726_v1  ;;  %v12846_v16 = vmax.f32 %v16773_v51, %v3168_v26  ;;  %v16776_v1 = vunpack.i.h.bf16 %v12567_v10  ;;  %v16777_v51 = vunpack.i.l.bf16 %v12529_v36 }
 0x312   : > { %8106 = vrot.lane.b32.xlu1 %v8105_v4, %s8692_s21  ;;  %8111 = vrot.lane.b32.xlu0 %v8110_v9, %s8691_s20  ;;  %v995_v43 = vmul.f32 %v16609_v54, %v832_v23  ;;  %v2254_v27 = vmul.f32 %v8932_v19, %v832_v23  ;;  %v12878_v9 = vpop.permute.xlu1 %7996  ;;  %v16781_v36 = vrot.slane %v12402_v46, 4 }
 0x313   : > { %16774 = vst [vmem:[#allocation53_spill] sm:$0xff] %v12846_v16  ;;  %v4991_v21 = vsel %vm4955_vm6, %v12446_v12, %v16776_v1  ;;  %v5073_v26 = vsel %vm5038_vm7, %v4990_v20, %v16777_v51  ;;  %v3628_v4 = vrot.slane %v12846_v16, 4  ;;  %v12872_v12 = vpop.f32.mrf.mxu0  ;;  %v439_v1 = vld [vmem:[%s8841_s13 + $0x2f0] sm:$0xff]  ;;  %v1098_v20 = vmul.f32 %v16602_v52, %v832_v23 }
 0x314   : > { %v5074_v10 = vsel %vm5038_vm7, %v4991_v21, %v16778_v18  ;;  %16779 = vst [vmem:[#allocation52_spill] sm:$0xff] %v12872_v12  ;;  %v1682_v51 = vmul.f32 %v16610_v44, %v832_v23  ;;  %v16780_v39 = vmax.f32 %v12841_v41, 0.0  ;;  %v2518_v16 = vrot.slane %v2254_v27, 5 }
 0x315   : > { %v5138_v59 = vpack.c.bf16 %v5074_v10, %v5073_v26  ;;  %v3629_v21 = vsel %vm1798_vm1, %v16781_v36, %v3628_v4  ;;  %v7481_v10 = vpop.f32.mrf.mxu0  ;;  %v1365_v23 = vrot.slane %v1098_v20, 1  ;;  %v8125_v36 = vpack.i.bf16 %v12623_v31, %v12504_v29 }
 0x316   : > { %v12882_v3 = vrot.slane %v16780_v39, 1  ;;  %911 = vperm.xlu1 %7704, %v438_v45   ;;  %v12890_v12 = vmax.f32 %v12545_v57, %v3629_v21  ;;  %v1946_v30 = vrot.slane %v1682_v51, 4  ;;  %1014 = vperm.xlu0 %7703, %v439_v1   ;;  %v16152_v18 = vrot.slane %v12582_v56, 4  ;;  %v842_v51 = vpop.permute.xlu0 %841 }
 0x317   : > { %7539 = vmatmul.mubr.bf16.gmra.mxu0 %v5138_v59  ;;  %v12901_v57 = vpop.f32.mrf.mxu0  ;;  %v16783_v59 = vmax.f32 %v12736_v40, 0.0  ;;  %v16784_v1 = vrot.slane %v12742_v0, 1  ;;  %v16785_v31 = vrot.slane %v12825_v5, 1  ;;  %v16786_v40 = vrot.slane %v12746_v25, 4 }
 0x318   : > { %16782 = vst [vmem:[#allocation47_spill] sm:$0xff] %v12890_v12  ;;  %v3178_v39 = vsel %vm1211_vm0, %v12771_v14, %v12882_v3  ;;  %7542 = vmatprep.mubr.msk.bf16.mxu0 %vm8694_vm4, %v16525_v55  ;;  %v8115_v45 = vpack.i.bf16 %v12890_v12, %v12777_v58 }
 0x319   : > { %v12905_v27 = vmax.f32 %v16783_v59, %v3178_v39  ;;  %v1366_v29 = vsel %vm1211_vm0, %v16784_v1, %v1365_v23  ;;  %v1368_v20 = vsel %vm1211_vm0, %v1365_v23, %v16785_v31  ;;  %v1947_v39 = vsel %vm1798_vm1, %v16786_v40, %v1946_v30  ;;  %v7484_v10 = vpop.f32.mrf.mxu0 }
 0x31a   : > { %v12916_v21 = vadd.f32 %v1366_v29, %v12739_v34  ;;  %v12918_v26 = vadd.f32 %v1368_v20, %v995_v43  ;;  %v16787_v59 = vrot.slane %v12832_v15, 4  ;;  %8116 = vrot.lane.b32.xlu1 %v8115_v45, %s8690_s19  ;;  %v2155_v1 = vadd.f32 %v1947_v39, %v12578_v47 }
 0x31b   : > { %v16788_v34 = vrot.slane %v12749_v22, 5  ;;  %v16789_v29 = vrot.slane %v12835_v7, 5  ;;  %v3631_v31 = vsel %vm1798_vm1, %v3628_v4, %v16152_v18  ;;  %v7998_v10 = vunpack.i.l.bf16 %v12878_v9  ;;  %v12943_v45 = vpop.f32.mrf.mxu0 }
 0x31c   : > { %v1949_v0 = vsel %vm1798_vm1, %v1946_v30, %v16787_v59  ;;  %v4071_v30 = vrot.slane %v12890_v12, 2  ;;  %v12941_v47 = vmul.f32 %v16609_v54, %v842_v51  ;;  %v12946_v40 = vmax.f32 %v12278_v6, %v3631_v31 }
 0x31d   : > { %v2156_v23 = vadd.f32 %v1949_v0, %v12695_v24  ;;  %v2519_v43 = vsel %vm2370_vm2, %v16788_v34, %v2518_v16  ;;  %v2521_v25 = vsel %vm2370_vm2, %v2518_v16, %v16789_v29  ;;  %v8007_v24 = vpop.permute.xlu1 %8006  ;;  %v12949_v16 = vmul.f32 %v16602_v52, %v842_v51 }
 0x31e   : > { %v2727_v22 = vadd.f32 %v2519_v43, %v2155_v1  ;;  %16790 = vst [vmem:[#allocation35_spill] sm:$0xff] %v12946_v40  ;;  %v16791_v4 = vrot.slane %v12777_v58, 2  ;;  %v12957_v59 = vmul.f32 %v16610_v44, %v842_v51  ;;  %v12960_v0 = vmul.f32 %v8932_v19, %v842_v51  ;;  %8126 = vrot.lane.b32.xlu1 %v8125_v36, %s8691_s20 }
 0x31f   : > { %v2728_v20 = vadd.f32 %v2521_v25, %v2156_v23  ;;  %v16792_v1 = vunpack.i.l.bf16 %v12653_v2  ;;  %v7485_v23 = vpop.f32.mrf.mxu0  ;;  %v16153_v29 = vrot.slane %v12946_v40, 2  ;;  %v1369_v25 = vrot.slane %v12949_v16, 1 }
 0x320   : > { %v12954_v39 = vsel %vm3947_vm3, %v16791_v4, %v4071_v30  ;;  %v2828_v34 = vadd.f32 %v12127_v33, %v2727_v22  ;;  %v1950_v51 = vrot.slane %v12957_v59, 4  ;;  %v16155_v31 = vrot.slane %v12960_v0, 5  ;;  %v441_v4 = vld [vmem:[%s8841_s13 + $0x300] sm:$0xff] }
 0x321   : > { %v4992_v6 = vsel %vm4955_vm6, %v12706_v53, %v16792_v1  ;;  %v12968_v43 = vadd.f32 %v12127_v33, %v2728_v20  ;;  %v16793_v18 = vunpack.i.h.bf16 %v12653_v2  ;;  %v16794_v22 = vunpack.i.l.bf16 %v12751_v37 }
 0x322   : > { %v2922_v1 = vmax.f32 %v2828_v34, 0.0  ;;  %v12987_v16 = vsel %vm3947_vm3, %v4071_v30, %v16153_v29  ;;  %v16795_v59 = vrot.slane %v12825_v5, 1  ;;  %v16797_v30 = vrot.slane %v12835_v7, 5  ;;  %v847_v5 = vpop.permute.xlu1 %846  ;;  %1596 = vperm.xlu1 %7704, %v441_v4  }
 0x323   : > { %v4993_v53 = vsel %vm4955_vm6, %v12689_v28, %v16793_v18  ;;  %v5075_v20 = vsel %vm5038_vm7, %v4992_v6, %v16794_v22  ;;  %v16154_v36 = vmax.f32 %v12968_v43, 0.0  ;;  %v8120_v2 = vpack.i.bf16 %v12987_v16, %v12954_v39 }
 0x324   : > { %v1370_v23 = vsel %vm1211_vm0, %v16795_v59, %v1369_v25  ;;  %v16796_v18 = vrot.slane %v12832_v15, 4  ;;  %v2523_v34 = vsel %vm2370_vm2, %v16797_v30, %v16155_v31  ;;  %v13005_v22 = vrot.slane %v2922_v1, 1 }
 0x325   : > { %v12995_v28 = vadd.f32 %v1370_v23, %v12811_v48  ;;  %v13009_v59 = vrot.slane %v16154_v36, 1  ;;  %v16798_v15 = vunpack.i.h.bf16 %v12751_v37  ;;  %8121 = vrot.lane.b32.xlu0 %v8120_v2, %s8692_s21  ;;  %v8009_v7 = vunpack.i.h.bf16 %v8007_v24 }
 0x326   : > { %v1951_v6 = vsel %vm1798_vm1, %v16796_v18, %v1950_v51  ;;  %v8008_v29 = vunpack.i.l.bf16 %v8007_v24  ;;  %v3172_v30 = vsel %vm1211_vm0, %v12555_v60, %v12662_v13  ;;  %v16799_v4 = vmax.f32 %v12521_v11, 0.0  ;;  %v16800_v24 = vld [vmem:[#allocation25_spill] sm:$0xff]  ;;  %v16801_v60 = vld [vmem:[#allocation44_spill] sm:$0xff]  ;;  %v13043_v11 = vpop.f32.mrf.mxu0 }
 0x327   : > { %v2157_v48 = vadd.f32 %v1951_v6, %v12785_v62  ;;  %v5076_v23 = vsel %vm5038_vm7, %v4993_v53, %v16798_v15  ;;  %v3182_v36 = vsel %vm1211_vm0, %v13005_v22, %v13009_v59  ;;  %v440_v62 = vld [vmem:[%s8841_s13 + $0x2f8] sm:$0xff]  ;;  %v13028_v53 = vmul.f32 %v16609_v54, %v847_v5 }
 0x328   : > { %v5139_v18 = vpack.c.bf16 %v5076_v23, %v5075_v20  ;;  %v13025_v37 = vmax.f32 %v16799_v4, %v3172_v30  ;;  %v13030_v20 = vmax.f32 %v2922_v1, %v3182_v36  ;;  %v13034_v2 = vsel %vm4872_vm5, %v16800_v24, %v8009_v7  ;;  %v7488_v23 = vpop.f32.mrf.mxu0 }
 0x329   : > { %v2729_v31 = vadd.f32 %v2523_v34, %v2157_v48  ;;  %v13038_v13 = vsel %vm4872_vm5, %v16801_v60, %v8008_v29  ;;  %v13041_v6 = vmul.f32 %v16602_v52, %v847_v5  ;;  %v13050_v36 = vmul.f32 %v16610_v44, %v847_v5  ;;  %1591 = vperm.xlu0 %7703, %v440_v62  }
 0x32a   : > { %7543 = vmatmul.mubr.bf16.gmra.mxu0 %v5139_v18  ;;  %v3632_v1 = vrot.slane %v13025_v37, 4  ;;  %v13053_v48 = vmul.f32 %v8932_v19, %v847_v5  ;;  %v3642_v29 = vrot.slane %v13030_v20, 4  ;;  %v16802_v18 = vrot.slane %v12582_v56, 4  ;;  %v13083_v24 = vpop.f32.mrf.mxu0 }
 0x32b   : > { %v13046_v34 = vadd.f32 %v12127_v33, %v2729_v31  ;;  %7546 = vmatprep.mubr.msk.bf16.mxu0 %vm8694_vm4, %v16525_v55  ;;  %v16157_v15 = vrot.slane %v13041_v6, 1  ;;  %v8140_v33 = vpack.i.bf16 %v12817_v42, %v12671_v8  ;;  %v4994_v31 = vsel %vm4955_vm6, %v12806_v32, %v7998_v10 }
 0x32c   : > { %v3633_v7 = vsel %vm1798_vm1, %v16802_v18, %v3632_v1  ;;  %v16803_v30 = vrot.slane %v12701_v49, 4  ;;  %v16156_v4 = vrot.slane %v13050_v36, 4  ;;  %v16158_v10 = vrot.slane %v13053_v48, 5 }
 0x32d   : > { %v16161_v5 = vmax.f32 %v13046_v34, 0.0  ;;  %v13074_v8 = vmax.f32 %v12727_v50, %v3633_v7  ;;  %v1372_v32 = vsel %vm1211_vm0, %v1369_v25, %v16157_v15  ;;  %v13097_v25 = vpop.permute.xlu0 %8011  ;;  %v3176_v15 = vsel %vm1211_vm0, %v12666_v35, %v12771_v14 }
 0x32e   : > { %v3635_v62 = vsel %vm1798_vm1, %v3632_v1, %v16803_v30  ;;  %v13088_v1 = vadd.f32 %v1372_v32, %v12941_v47  ;;  %v1953_v50 = vsel %vm1798_vm1, %v1950_v51, %v16156_v4  ;;  %v16807_v51 = vrot.slane %v12960_v0, 5 }
 0x32f   : > { %16804 = vst [vmem:[#allocation32_spill] sm:$0xff] %v13074_v8  ;;  %v13077_v42 = vmax.f32 %v12402_v46, %v3635_v62  ;;  %v3183_v60 = vrot.slane %v16161_v5, 1  ;;  %v16806_v46 = vunpack.i.h.bf16 %v12878_v9  ;;  %v8130_v18 = vpack.i.bf16 %v13074_v8, %v12946_v40  ;;  %v7489_v62 = vpop.f32.mrf.mxu0 }
 0x330   : > { %v4075_v7 = vrot.slane %v13074_v8, 2  ;;  %v2158_v47 = vadd.f32 %v1953_v50, %v12916_v21  ;;  %v2525_v9 = vsel %vm2370_vm2, %v16807_v51, %v16158_v10  ;;  %v16810_v21 = vrot.slane %v12946_v40, 2 }
 0x331   : > { %16805 = vst [vmem:[#allocation54_spill] sm:$0xff] %v13077_v42  ;;  %v4995_v23 = vsel %vm4955_vm6, %v12797_v17, %v16806_v46  ;;  %v16159_v30 = vrot.slane %v13077_v42, 2  ;;  %v16808_v17 = vunpack.i.l.bf16 %v12862_v61  ;;  %v16809_v46 = vunpack.i.h.bf16 %v12862_v61  ;;  %8131 = vrot.lane.b32.xlu0 %v8130_v18, %s8690_s19  ;;  %v13129_v62 = vpop.f32.mrf.mxu0 }
 0x332   : > { %v13122_v0 = vsel %vm3947_vm3, %v16810_v21, %v4075_v7  ;;  %v16811_v35 = vmax.f32 %v12633_v63, 0.0  ;;  %v3638_v51 = vrot.slane %v12905_v27, 4 }
 0x333   : > { %v5077_v32 = vsel %vm5038_vm7, %v4994_v31, %v16808_v17  ;;  %v5078_v4 = vsel %vm5038_vm7, %v4995_v23, %v16809_v46  ;;  %v13127_v50 = vsel %vm3947_vm3, %v4075_v7, %v16159_v30  ;;  %v2730_v31 = vadd.f32 %v2525_v9, %v2158_v47  ;;  %v13138_v17 = vpop.permute.xlu1 %8016  ;;  %v13140_v46 = vld [vmem:[#allocation4] ss:$0 sm:$0xff]  ;;  %v7492_v47 = vpop.f32.mrf.mxu0 }
 0x334   : > { %v5140_v61 = vpack.c.bf16 %v5078_v4, %v5077_v32  ;;  %v8135_v23 = vpack.i.bf16 %v13127_v50, %v13122_v0  ;;  %v3375_v14 = vmax.f32 %v16811_v35, %v3176_v15  ;;  %v3180_v7 = vsel %vm1211_vm0, %v12882_v3, %v13005_v22  ;;  %v8022_v22 = vpop.permute.xlu0 %8021 }
 0x335   : > { %v13143_v4 = vadd.f32 %v13140_v46, %v2730_v31  ;;  %v3184_v15 = vsel %vm1211_vm0, %v13009_v59, %v3183_v60  ;;  %v16812_v32 = vmax.f32 %v12841_v41, 0.0  ;;  %v16813_v31 = vmax.f32 %v12968_v43, 0.0  ;;  %8141 = vrot.lane.b32.xlu0 %v8140_v33, %s8691_s20  ;;  %v13170_v43 = vpop.f32.mrf.mxu0 }
 0x336   : > { %7547 = vmatmul.mubr.bf16.gmra.mxu0 %v5140_v61  ;;  %8136 = vrot.lane.b32.xlu1 %v8135_v23, %s8692_s21  ;;  %v3636_v9 = vrot.slane %v3375_v14, 4  ;;  %v8014_v3 = vunpack.i.h.bf16 %v13097_v25  ;;  %v442_v23 = vld [vmem:[%s8841_s13 + $0x308] sm:$0xff]  ;;  %v8013_v35 = vunpack.i.l.bf16 %v13097_v25  ;;  %v8019_v41 = vunpack.i.h.bf16 %v13138_v17  ;;  %16815 = vst [vmem:[#allocation29_spill] sm:$0xff] %v13170_v43 }
 0x337   : > { %v13155_v21 = vmax.f32 %v16812_v32, %v3180_v7  ;;  %v13159_v61 = vmax.f32 %v16813_v31, %v3184_v15  ;;  %7550 = vmatprep.mubr.msk.bf16.mxu0 %vm8694_vm4, %v16525_v55  ;;  %v16160_v59 = vmax.f32 %v13143_v4, 0.0  ;;  %v8018_v7 = vunpack.i.l.bf16 %v13138_v17  ;;  %v16817_v25 = vld [vmem:[#allocation53_spill] sm:$0xff]  ;;  %v7493_v30 = vpop.f32.mrf.mxu0 }
 0x338   : > { %v16816_v15 = vrot.slane %v12701_v49, 4  ;;  %v3639_v32 = vsel %vm1798_vm1, %v3636_v9, %v3638_v51  ;;  %v8024_v18 = vunpack.i.h.bf16 %v8022_v22  ;;  %v8023_v5 = vunpack.i.l.bf16 %v8022_v22 }
 0x339   : > { %16814 = vst [vmem:[#allocation48_spill] sm:$0xff] %v13159_v61  ;;  %v3640_v31 = vrot.slane %v13155_v21, 4  ;;  %v3644_v63 = vrot.slane %v13159_v61, 4  ;;  %v13180_v33 = vrot.slane %v16160_v59, 1  ;;  %v13186_v17 = vmax.f32 %v12582_v56, %v3639_v32  ;;  %v13201_v32 = vpop.f32.mrf.mxu0 }
 0x33a   : > { %v3637_v47 = vsel %vm1798_vm1, %v16816_v15, %v3636_v9  ;;  %1601 = vperm.xlu1 %7704, %v442_v23   ;;  %16820 = vst [vmem:[#allocation36_spill] sm:$0xff] %v13201_v32  ;;  %v16841_v58 = vpack.i.bf16 %v13122_v0, %v12987_v16 }
 0x33b   : > { %v13183_v10 = vmax.f32 %v16817_v25, %v3637_v47  ;;  %16819 = vst [vmem:[#allocation43_spill] sm:$0xff] %v13186_v17  ;;  %v3641_v15 = vsel %vm1798_vm1, %v3638_v51, %v3640_v31  ;;  %v3643_v9 = vsel %vm1798_vm1, %v3640_v31, %v3642_v29  ;;  %v3645_v59 = vsel %vm1798_vm1, %v3642_v29, %v3644_v63  ;;  %v852_v51 = vpop.permute.xlu1 %851 }
 0x33c   : > { %v3186_v47 = vsel %vm1211_vm0, %v3183_v60, %v13180_v33  ;;  %v4081_v23 = vrot.slane %v13186_v17, 2  ;;  %v16821_v31 = vmax.f32 %v13046_v34, 0.0  ;;  %v13208_v29 = vmax.f32 %v13025_v37, %v3641_v15  ;;  %v16826_v34 = vld [vmem:[#allocation55_spill] sm:$0xff]  ;;  %v16827_v37 = vld [vmem:[#allocation26_spill] sm:$0xff] }
 0x33d   : > { %16818 = vst [vmem:[#allocation31_spill] sm:$0xff] %v13183_v10  ;;  %v8145_v56 = vpack.i.bf16 %v13183_v10, %v13077_v42  ;;  %v4079_v30 = vrot.slane %v13183_v10, 2  ;;  %v13211_v22 = vmax.f32 %v12701_v49, %v3643_v9  ;;  %v13213_v60 = vmax.f32 %v3375_v14, %v3645_v59  ;;  %v7496_v14 = vpop.f32.mrf.mxu0 }
 0x33e   : > { %v13205_v25 = vmax.f32 %v16821_v31, %v3186_v47  ;;  %16822 = vst [vmem:[#allocation30_spill] sm:$0xff] %v13208_v29  ;;  %v16825_v10 = vrot.slane %v13077_v42, 2  ;;  %v13226_v47 = vsel %vm4872_vm5, %v16826_v34, %v8024_v18  ;;  %v13230_v49 = vsel %vm4872_vm5, %v16827_v37, %v8023_v5  ;;  %v13244_v31 = vld [vmem:[#allocation6] ss:$0 sm:$0xff]  ;;  %v857_v5 = vpop.permute.xlu0 %856 }
 0x33f   : > { %16823 = vst [vmem:[#allocation50_spill] sm:$0xff] %v13211_v22  ;;  %16824 = vst [vmem:[#allocation40_spill] sm:$0xff] %v13213_v60  ;;  %8146 = vrot.lane.b32.xlu0 %v8145_v56, %s8690_s19  ;;  %v13222_v12 = vsel %vm3947_vm3, %v4079_v30, %v4081_v23  ;;  %v8160_v15 = vpack.i.bf16 %v13208_v29, %v13186_v17  ;;  %v4085_v9 = vrot.slane %v13211_v22, 2  ;;  %v13246_v34 = vpop.f32.mrf.mxu0 }
 0x340   : > { %v13219_v8 = vsel %vm3947_vm3, %v16825_v10, %v4079_v30  ;;  %v4083_v10 = vrot.slane %v13208_v29, 2  ;;  %v8175_v56 = vpack.i.bf16 %v13213_v60, %v13211_v22  ;;  %v4087_v30 = vrot.slane %v13213_v60, 2  ;;  %16828 = vst [vmem:[#allocation23_spill] sm:$0xff] %v13246_v34 }
 0x341   : > { %v8150_v59 = vpack.i.bf16 %v13222_v12, %v13219_v8  ;;  %v4996_v29 = vsel %vm4955_vm6, %v13038_v13, %v8013_v35  ;;  %v4997_v18 = vsel %vm4955_vm6, %v13034_v2, %v8014_v3  ;;  %v16830_v60 = vpack.i.bf16 %v12954_v39, %v12822_v38  ;;  %v13272_v35 = vpop.permute.xlu1 %8026  ;;  %v7497_v2 = vpop.f32.mrf.mxu0  ;;  %v16834_v39 = vld [vmem:[#allocation34_spill] sm:$0xff] }
 0x342   : > { %v13250_v37 = vsel %vm3947_vm3, %v4081_v23, %v4083_v10  ;;  %v13253_v14 = vsel %vm3947_vm3, %v4083_v10, %v4085_v9  ;;  %v16831_v23 = vrot.slane %v13205_v25, 4  ;;  %v13269_v22 = vsel %vm3947_vm3, %v4085_v9, %v4087_v30 }
 0x343   : > { %8151 = vrot.lane.b32.xlu1 %v8150_v59, %s8692_s21  ;;  %16829 = vst [vmem:[#allocation18_spill] sm:$0xff] %v13253_v14  ;;  %8156 = vrot.lane.b32.xlu0 %v16830_v60, %s8691_s20  ;;  %v8165_v59 = vpack.i.bf16 %v13253_v14, %v13250_v37  ;;  %16832 = vst [vmem:[#allocation39_spill] sm:$0xff] %v13269_v22  ;;  %v5079_v13 = vsel %vm5038_vm7, %v4996_v29, %v8018_v7  ;;  %v13286_v29 = vpop.f32.mrf.mxu0  ;;  %v8029_v16 = vunpack.i.h.bf16 %v13272_v35  ;;  %v16854_v14 = vld [vmem:[#allocation52_spill] sm:$0xff] }
 0x344   : > { %v3647_v10 = vsel %vm1798_vm1, %v3644_v63, %v16831_v23  ;;  %v5080_v38 = vsel %vm5038_vm7, %v4997_v18, %v8019_v41  ;;  %v13280_v60 = vadd.f32 %v13244_v31, %v16834_v39  ;;  %v999_v17 = vmul.f32 %v16609_v54, %v852_v51  ;;  %16835 = vst [vmem:[#allocation58_spill] sm:$0xff] %v13286_v29  ;;  %v16843_v29 = vld [vmem:[#allocation45_spill] sm:$0xff] }
 0x345   : > { %v13275_v3 = vmax.f32 %v12905_v27, %v3647_v10  ;;  %v5141_v63 = vpack.c.bf16 %v5080_v38, %v5079_v13  ;;  %v1102_v9 = vmul.f32 %v16602_v52, %v852_v51  ;;  %v1686_v23 = vmul.f32 %v16610_v44, %v852_v51 }
 0x346   : > { %v2258_v7 = vmul.f32 %v8932_v19, %v852_v51  ;;  %v16172_v41 = vmax.f32 %v13280_v60, 0.0  ;;  %v13292_v18 = vmul.f32 %v16609_v54, %v857_v5  ;;  %v13295_v10 = vmul.f32 %v16602_v52, %v857_v5 }
 0x347   : > { %16833 = vst [vmem:[#allocation60_spill] sm:$0xff] %v13275_v3  ;;  %8161 = vrot.lane.b32.xlu1 %v8160_v15, %s8690_s19  ;;  %v16171_v27 = vrot.slane %v13275_v3, 2  ;;  %8166 = vrot.lane.b32.xlu0 %v8165_v59, %s8692_s21  ;;  %v1373_v13 = vrot.slane %v1102_v9, 1  ;;  %v1954_v2 = vrot.slane %v1686_v23, 4  ;;  %v13299_v38 = vmul.f32 %v16610_v44, %v857_v5  ;;  %v7500_v15 = vpop.f32.mrf.mxu0 }
 0x348   : > { %7551 = vmatmul.mubr.bf16.gmra.mxu0 %v5141_v63  ;;  %v2526_v51 = vrot.slane %v2258_v7, 5  ;;  %v5751_v42 = vrot.slane %v16172_v41, 2  ;;  %v13310_v59 = vmul.f32 %v8932_v19, %v857_v5  ;;  %v8032_v63 = vpop.permute.xlu0 %8031  ;;  %v16837_v23 = vrot.slane %v13041_v6, 1  ;;  %v8037_v41 = vpop.permute.xlu1 %8036 }
 0x349   : > { %v13304_v39 = vsel %vm3947_vm3, %v4087_v30, %v16171_v27  ;;  %7554 = vmatprep.mubr.msk.bf16.mxu0 %vm8694_vm4, %v16525_v55  ;;  %v16838_v7 = vrot.slane %v13050_v36, 4  ;;  %v16839_v27 = vrot.slane %v13053_v48, 5  ;;  %v13325_v40 = vpop.f32.mrf.mxu0  ;;  %v16842_v36 = vrot.slane %v13295_v10, 1 }
 0x34a   : > { %16836 = vst [vmem:[#allocation51_spill] sm:$0xff] %v13304_v39  ;;  %v8180_v9 = vpack.i.bf16 %v13304_v39, %v13269_v22  ;;  %v1374_v30 = vsel %vm1211_vm0, %v16837_v23, %v1373_v13  ;;  %16840 = vst [vmem:[#allocation13_spill] sm:$0xff] %v13325_v40  ;;  %v16175_v48 = vrot.slane %v13299_v38, 4  ;;  %v16174_v40 = vrot.slane %v13310_v59, 5 }
 0x34b   : > { %v1955_v15 = vsel %vm1798_vm1, %v16838_v7, %v1954_v2  ;;  %v2527_v5 = vsel %vm2370_vm2, %v16839_v27, %v2526_v51  ;;  %8171 = vrot.lane.b32.xlu1 %v16841_v58, %s8691_s20  ;;  %v13332_v6 = vadd.f32 %v1374_v30, %v13028_v53  ;;  %v1376_v7 = vsel %vm1211_vm0, %v1373_v13, %v16842_v36  ;;  %v7501_v53 = vpop.f32.mrf.mxu0 }
 0x34c   : > { %v2159_v23 = vadd.f32 %v1955_v15, %v12918_v26  ;;  %8176 = vrot.lane.b32.xlu0 %v8175_v56, %s8690_s19  ;;  %v13340_v27 = vadd.f32 %v1376_v7, %v999_v17  ;;  %v5271_v58 = vadd.f32 %v13244_v31, %v16843_v29  ;;  %v1957_v26 = vsel %vm1798_vm1, %v1954_v2, %v16175_v48  ;;  %v16848_v48 = vld [vmem:[#allocation57_spill] sm:$0xff] }
 0x34d   : > { %v8028_v13 = vunpack.i.l.bf16 %v13272_v35  ;;  %v8034_v30 = vunpack.i.h.bf16 %v8032_v63  ;;  %v2160_v56 = vadd.f32 %v1957_v26, %v12995_v28  ;;  %v2529_v17 = vsel %vm2370_vm2, %v2526_v51, %v16174_v40  ;;  %v13354_v29 = vpop.f32.mrf.mxu0 }
 0x34e   : > { %v2731_v0 = vadd.f32 %v2527_v5, %v2159_v23  ;;  %v5595_v15 = vmax.f32 %v5271_v58, 0.0  ;;  %v8033_v36 = vunpack.i.l.bf16 %v8032_v63  ;;  %16844 = vst [vmem:[#allocation65_spill] sm:$0xff] %v13354_v29  ;;  %v16845_v23 = vld [vmem:[#allocation42_spill] sm:$0xff]  ;;  %v8039_v7 = vunpack.i.h.bf16 %v8037_v41  ;;  %v16847_v58 = vld [vmem:[#allocation17_spill] sm:$0xff] }
 0x34f   : > { %8181 = vrot.lane.b32.xlu1 %v8180_v9, %s8692_s21  ;;  %v5276_v2 = vadd.f32 %v13244_v31, %v16845_v23  ;;  %v8038_v35 = vunpack.i.l.bf16 %v8037_v41  ;;  %v16846_v28 = vpack.i.bf16 %v13219_v8, %v13127_v50  ;;  %v2732_v53 = vadd.f32 %v2529_v17, %v2160_v56  ;;  %v7504_v26 = vpop.f32.mrf.mxu0  ;;  %v16849_v29 = vld [vmem:[#allocation49_spill] sm:$0xff]  ;;  %v862_v50 = vpop.permute.xlu0 %861 }
 0x350   : > { %v2832_v5 = vadd.f32 %v13140_v46, %v2731_v0  ;;  %v5752_v51 = vrot.slane %v5595_v15, 2  ;;  %v13366_v63 = vadd.f32 %v13244_v31, %v16847_v58  ;;  %v4998_v9 = vsel %vm4955_vm6, %v13230_v49, %v8028_v13  ;;  %v867_v0 = vpop.permute.xlu1 %866 }
 0x351   : > { %8186 = vrot.lane.b32.xlu0 %v16846_v28, %s8691_s20  ;;  %v5596_v23 = vmax.f32 %v5276_v2, 0.0  ;;  %v13372_v41 = vsel %vm4872_vm5, %v16848_v48, %v8039_v7  ;;  %v13376_v8 = vsel %vm4872_vm5, %v16849_v29, %v8038_v35  ;;  %v13379_v56 = vadd.f32 %v13140_v46, %v2732_v53 }
 0x352   : > { %v2926_v40 = vmax.f32 %v2832_v5, 0.0  ;;  %v5753_v17 = vsel %vm3947_vm3, %v5751_v42, %v5752_v51  ;;  %v16177_v49 = vmax.f32 %v13366_v63, 0.0  ;;  %v4999_v13 = vsel %vm4955_vm6, %v13226_v47, %v8029_v16  ;;  %v13385_v5 = vpop.f32.mrf.mxu0 }
 0x353   : > { %16850 = vst [vmem:[#allocation61_spill] sm:$0xff] %v13385_v5  ;;  %v16851_v48 = vmax.f32 %v13280_v60, 0.0  ;;  %v5754_v29 = vrot.slane %v5596_v23, 2  ;;  %v5081_v35 = vsel %vm5038_vm7, %v4998_v9, %v8033_v36  ;;  %v16176_v28 = vmax.f32 %v13379_v56, 0.0 }
 0x354   : > { %v13387_v2 = vrot.slane %v2926_v40, 1  ;;  %v5756_v42 = vrot.slane %v16177_v49, 2  ;;  %v5082_v53 = vsel %vm5038_vm7, %v4999_v13, %v8034_v30  ;;  %v13399_v47 = vmul.f32 %v16609_v54, %v867_v0  ;;  %v7505_v16 = vpop.f32.mrf.mxu0 }
 0x355   : > { %v13391_v7 = vmax.f32 %v16851_v48, %v5753_v17  ;;  %v5755_v58 = vsel %vm3947_vm3, %v5752_v51, %v5754_v29  ;;  %v5142_v26 = vpack.c.bf16 %v5082_v53, %v5081_v35  ;;  %v13403_v60 = vmul.f32 %v16602_v52, %v867_v0  ;;  %v13418_v48 = vpop.permute.xlu1 %8046 }
 0x356   : > { %v13406_v17 = vmul.f32 %v16610_v44, %v867_v0  ;;  %v13410_v36 = vrot.slane %v16176_v28, 1  ;;  %v13412_v9 = vmax.f32 %v5595_v15, %v5755_v58  ;;  %v5757_v30 = vsel %vm3947_vm3, %v5754_v29, %v5756_v42  ;;  %v13425_v28 = vpop.permute.xlu0 %8041 }
 0x357   : > { %v13416_v13 = vmul.f32 %v8932_v19, %v867_v0  ;;  %v13420_v51 = vmax.f32 %v5596_v23, %v5757_v30  ;;  %7555 = vmatmul.mubr.bf16.gmra.mxu0 %v5142_v26  ;;  %v1379_v35 = vrot.slane %v13403_v60, 1  ;;  %v1001_v16 = vmul.f32 %v16609_v54, %v862_v50  ;;  %v16853_v60 = vld [vmem:[#allocation24_spill] sm:$0xff] }
 0x358   : > { %v1960_v53 = vrot.slane %v13406_v17, 4  ;;  %v3190_v15 = vsel %vm1211_vm0, %v13387_v2, %v13410_v36  ;;  %v1104_v29 = vmul.f32 %v16602_v52, %v862_v50  ;;  %v1688_v23 = vmul.f32 %v16610_v44, %v862_v50  ;;  %7558 = vmatprep.mubr.msk.bf16.mxu0 %vm8694_vm4, %v16525_v55 }
 0x359   : > { %16852 = vst [vmem:[#allocation20_spill] sm:$0xff] %v13420_v51  ;;  %v2532_v0 = vrot.slane %v13416_v13, 5  ;;  %v13435_v58 = vmax.f32 %v2926_v40, %v3190_v15  ;;  %v2260_v26 = vmul.f32 %v8932_v19, %v862_v50  ;;  %v5284_v17 = vadd.f32 %v13244_v31, %v16853_v60 }
 0x35a   : > { %v1377_v49 = vrot.slane %v1104_v29, 1  ;;  %v1958_v5 = vrot.slane %v1688_v23, 4  ;;  %v8048_v13 = vunpack.i.l.bf16 %v13418_v48  ;;  %v8044_v39 = vunpack.i.h.bf16 %v13425_v28 }
 0x35b   : > { %v2530_v34 = vrot.slane %v2260_v26, 5  ;;  %v5598_v32 = vmax.f32 %v5284_v17, 0.0  ;;  %v8043_v22 = vunpack.i.l.bf16 %v13425_v28  ;;  %v13446_v40 = vadd.f32 %v13244_v31, %v16854_v14  ;;  %v872_v26 = vpop.permute.xlu1 %871 }
 0x35c   : > { %v16855_v50 = vrot.slane %v13295_v10, 1  ;;  %v1380_v60 = vsel %vm1211_vm0, %v1377_v49, %v1379_v35  ;;  %v16856_v29 = vrot.slane %v13299_v38, 4  ;;  %v1961_v30 = vsel %vm1798_vm1, %v1958_v5, %v1960_v53 }
 0x35d   : > { %v13459_v28 = vadd.f32 %v1380_v60, %v1001_v16  ;;  %v2162_v10 = vadd.f32 %v1961_v30, %v13332_v6  ;;  %v2533_v38 = vsel %vm2370_vm2, %v2530_v34, %v2532_v0  ;;  %v5758_v43 = vrot.slane %v5598_v32, 2 }
 0x35e   : > { %v1378_v15 = vsel %vm1211_vm0, %v16855_v50, %v1377_v49  ;;  %v1959_v23 = vsel %vm1798_vm1, %v16856_v29, %v1958_v5  ;;  %v16857_v50 = vrot.slane %v13310_v59, 5  ;;  %v5599_v29 = vmax.f32 %v13446_v40, 0.0 }
 0x35f   : > { %v13457_v17 = vadd.f32 %v1378_v15, %v13292_v18  ;;  %v2161_v14 = vadd.f32 %v1959_v23, %v13088_v1  ;;  %v2734_v51 = vadd.f32 %v2533_v38, %v2162_v10  ;;  %v13469_v18 = vmul.f32 %v16609_v54, %v872_v26  ;;  %v8052_v1 = vpop.permute.xlu0 %8051 }
 0x360   : > { %v2531_v49 = vsel %vm2370_vm2, %v16857_v50, %v2530_v34  ;;  %v13472_v16 = vmul.f32 %v16602_v52, %v872_v26  ;;  %v5759_v6 = vsel %vm3947_vm3, %v5756_v42, %v5758_v43  ;;  %v5760_v30 = vrot.slane %v5599_v29, 2 }
 0x361   : > { %v2733_v5 = vadd.f32 %v2531_v49, %v2161_v14  ;;  %v1690_v59 = vmul.f32 %v16610_v44, %v872_v26  ;;  %v2262_v15 = vmul.f32 %v8932_v19, %v872_v26  ;;  %v13479_v40 = vadd.f32 %v13140_v46, %v2734_v51  ;;  %v13493_v51 = vpop.permute.xlu1 %8056 }
 0x362   : > { %v16858_v60 = vmax.f32 %v13366_v63, 0.0  ;;  %v1381_v14 = vrot.slane %v13472_v16, 1  ;;  %v5761_v10 = vsel %vm3947_vm3, %v5758_v43, %v5760_v30  ;;  %v8054_v49 = vunpack.i.h.bf16 %v8052_v1  ;;  %v16859_v16 = vld [vmem:[#allocation56_spill] sm:$0xff] }
 0x363   : > { %v2834_v34 = vadd.f32 %v13140_v46, %v2733_v5  ;;  %v1962_v50 = vrot.slane %v1690_v59, 4  ;;  %v2534_v42 = vrot.slane %v2262_v15, 5  ;;  %v16182_v61 = vmax.f32 %v13479_v40, 0.0 }
 0x364   : > { %v13483_v23 = vmax.f32 %v16858_v60, %v5759_v6  ;;  %v13488_v26 = vmax.f32 %v5598_v32, %v5761_v10  ;;  %v13491_v5 = vsel %vm1211_vm0, %v1379_v35, %v1381_v14  ;;  %v13499_v43 = vsel %vm4872_vm5, %v16859_v16, %v8054_v49  ;;  %v877_v60 = vpop.permute.xlu0 %876 }
 0x365   : > { %v2928_v38 = vmax.f32 %v2834_v34, 0.0  ;;  %v1963_v63 = vsel %vm1798_vm1, %v1960_v53, %v1962_v50  ;;  %v2535_v6 = vsel %vm2370_vm2, %v2532_v0, %v2534_v42  ;;  %v8053_v59 = vunpack.i.l.bf16 %v8052_v1  ;;  %v16860_v53 = vld [vmem:[#allocation59_spill] sm:$0xff] }
 0x366   : > { %v13505_v32 = vrot.slane %v16182_v61, 1  ;;  %v2163_v35 = vadd.f32 %v1963_v63, %v13340_v27  ;;  %v5292_v34 = vadd.f32 %v13244_v31, %v12901_v57  ;;  %v5000_v10 = vsel %vm4955_vm6, %v13376_v8, %v8043_v22 }
 0x367   : > { %v13501_v15 = vrot.slane %v2928_v38, 1  ;;  %v13512_v0 = vsel %vm4872_vm5, %v16860_v53, %v8053_v59  ;;  %v5001_v1 = vsel %vm4955_vm6, %v13372_v41, %v8044_v39  ;;  %v5083_v57 = vsel %vm5038_vm7, %v5000_v10, %v8048_v13  ;;  %v8067_v13 = vpop.permute.xlu1 %8066 }
 0x368   : > { %v2735_v63 = vadd.f32 %v2535_v6, %v2163_v35  ;;  %v5600_v16 = vmax.f32 %v5292_v34, 0.0  ;;  %v16861_v59 = vunpack.i.h.bf16 %v13418_v48  ;;  %v13530_v39 = vmul.f32 %v16609_v54, %v877_v60 }
 0x369   : > { %v3194_v27 = vsel %vm1211_vm0, %v13501_v15, %v13505_v32  ;;  %v13536_v6 = vmul.f32 %v16602_v52, %v877_v60  ;;  %v13540_v48 = vmul.f32 %v16610_v44, %v877_v60  ;;  %v13543_v35 = vmul.f32 %v8932_v19, %v877_v60 }
 0x36a   : > { %v13523_v61 = vmax.f32 %v2928_v38, %v3194_v27  ;;  %v5084_v53 = vsel %vm5038_vm7, %v5001_v1, %v16861_v59  ;;  %v13533_v41 = vadd.f32 %v13140_v46, %v2735_v63  ;;  %v5762_v8 = vrot.slane %v5600_v16, 2  ;;  %v13557_v38 = vpop.permute.xlu0 %8061 }
 0x36b   : > { %v5143_v49 = vpack.c.bf16 %v5084_v53, %v5083_v57  ;;  %v5295_v34 = vadd.f32 %v13244_v31, %v12943_v45  ;;  %v16184_v27 = vrot.slane %v13536_v6, 1  ;;  %v3188_v63 = vsel %vm1211_vm0, %v13180_v33, %v13387_v2 }
 0x36c   : > { %v16183_v10 = vmax.f32 %v13533_v41, 0.0  ;;  %v5763_v1 = vsel %vm3947_vm3, %v5760_v30, %v5762_v8  ;;  %v16185_v59 = vrot.slane %v13540_v48, 4  ;;  %v16186_v60 = vrot.slane %v13543_v35, 5 }
 0x36d   : > { %7559 = vmatmul.mubr.bf16.gmra.mxu0 %v5143_v49  ;;  %v13553_v57 = vmax.f32 %v5599_v29, %v5763_v1  ;;  %v5601_v53 = vmax.f32 %v5295_v34, 0.0  ;;  %v13568_v33 = vsel %vm1211_vm0, %v1381_v14, %v16184_v27  ;;  %v16863_v2 = vmax.f32 %v13143_v4, 0.0  ;;  %v16864_v27 = vld [vmem:[#allocation37_spill] sm:$0xff] }
 0x36e   : > { %7562 = vmatprep.mubr.msk.bf16.mxu0 %vm8694_vm4, %v16525_v55  ;;  %v13563_v45 = vrot.slane %v16183_v10, 1  ;;  %v8069_v30 = vunpack.i.h.bf16 %v8067_v13  ;;  %v1965_v49 = vsel %vm1798_vm1, %v1962_v50, %v16185_v59  ;;  %v2537_v34 = vsel %vm2370_vm2, %v2534_v42, %v16186_v60  ;;  %v16865_v50 = vld [vmem:[#allocation38_spill] sm:$0xff] }
 0x36f   : > { %16862 = vst [vmem:[#allocation19_spill] sm:$0xff] %v13553_v57  ;;  %v13572_v29 = vmax.f32 %v16863_v2, %v3188_v63  ;;  %v5764_v1 = vrot.slane %v5601_v53, 2  ;;  %v8068_v10 = vunpack.i.l.bf16 %v8067_v13  ;;  %v2164_v22 = vadd.f32 %v1965_v49, %v13457_v17  ;;  %v887_v2 = vpop.permute.xlu1 %886 }
 0x370   : > { %v13584_v4 = vsel %vm4872_vm5, %v16864_v27, %v8069_v30  ;;  %v13595_v17 = vadd.f32 %v13244_v31, %v13043_v11  ;;  %v16867_v27 = vrot.slane %v13205_v25, 4  ;;  %v13610_v11 = vmul.f32 %v16609_v54, %v887_v2 }
 0x371   : > { %v3648_v14 = vrot.slane %v13572_v29, 4  ;;  %v5765_v57 = vsel %vm3947_vm3, %v5762_v8, %v5764_v1  ;;  %v13590_v59 = vsel %vm4872_vm5, %v16865_v50, %v8068_v10  ;;  %v2736_v13 = vadd.f32 %v2537_v34, %v2164_v22 }
 0x372   : > { %v13597_v49 = vmax.f32 %v5600_v16, %v5765_v57  ;;  %v8200_v8 = vpack.i.bf16 %v13250_v37, %v13222_v12  ;;  %v16187_v10 = vmax.f32 %v13595_v17, 0.0  ;;  %v16188_v50 = vrot.slane %v13435_v58, 4 }
 0x373   : > { %v3649_v30 = vsel %vm1798_vm1, %v16867_v27, %v3648_v14  ;;  %v13613_v16 = vadd.f32 %v13140_v46, %v2736_v13  ;;  %v13616_v22 = vmul.f32 %v16602_v52, %v887_v2  ;;  %v13619_v57 = vmul.f32 %v16610_v44, %v887_v2  ;;  %v882_v27 = vpop.permute.xlu0 %881 }
 0x374   : > { %16866 = vst [vmem:[#allocation27_spill] sm:$0xff] %v13597_v49  ;;  %v13605_v63 = vmax.f32 %v13155_v21, %v3649_v30  ;;  %v13622_v12 = vmul.f32 %v8932_v19, %v887_v2  ;;  %v5766_v37 = vrot.slane %v16187_v10, 2  ;;  %v3651_v34 = vsel %vm1798_vm1, %v3648_v14, %v16188_v50 }
 0x375   : > { %16869 = vst [vmem:[#allocation44_spill] sm:$0xff] %v13613_v16  ;;  %v13634_v42 = vmax.f32 %v13030_v20, %v3651_v34  ;;  %v16871_v49 = vrot.slane %v13275_v3, 2  ;;  %v1579_v30 = vadd.f32 %v13491_v5, %v13399_v47  ;;  %v16872_v20 = vmax.f32 %v13613_v16, 0.0 }
 0x376   : > { %16868 = vst [vmem:[#allocation25_spill] sm:$0xff] %v13605_v63  ;;  %v8190_v21 = vpack.i.bf16 %v13605_v63, %v13275_v3  ;;  %v4091_v13 = vrot.slane %v13605_v63, 2  ;;  %v5767_v10 = vsel %vm3947_vm3, %v5764_v1, %v5766_v37  ;;  %v1005_v1 = vmul.f32 %v16609_v54, %v882_v27 }
 0x377   : > { %16870 = vst [vmem:[#allocation53_spill] sm:$0xff] %v13634_v42  ;;  %v13650_v34 = vrot.slane %v16872_v20, 1  ;;  %v13652_v2 = vmax.f32 %v5601_v53, %v5767_v10  ;;  %v1108_v60 = vmul.f32 %v16602_v52, %v882_v27  ;;  %v2264_v63 = vmul.f32 %v8932_v19, %v882_v27 }
 0x378   : > { %8191 = vrot.lane.b32.xlu1 %v8190_v21, %s8690_s19  ;;  %v13643_v14 = vsel %vm3947_vm3, %v16871_v49, %v4091_v13  ;;  %v16193_v21 = vrot.slane %v13634_v42, 2  ;;  %v1692_v49 = vmul.f32 %v16610_v44, %v882_v27  ;;  %v13661_v50 = vadd.f32 %v13244_v31, %v13083_v24  ;;  %v13679_v24 = vpop.permute.xlu1 %8076 }
 0x379   : > { %16873 = vst [vmem:[#allocation55_spill] sm:$0xff] %v13650_v34  ;;  %16874 = vst [vmem:[#allocation26_spill] sm:$0xff] %v13652_v2  ;;  %v3198_v47 = vsel %vm1211_vm0, %v13563_v45, %v13650_v34  ;;  %v13668_v5 = vmax.f32 %v13391_v7, %v13652_v2  ;;  %v16876_v10 = vunpack.i.l.bf16 %v13493_v51  ;;  %v16877_v20 = vmax.f32 %v13533_v41, 0.0 }
 0x37a   : > { %v13673_v53 = vsel %vm3947_vm3, %v4091_v13, %v16193_v21  ;;  %v1385_v2 = vrot.slane %v1108_v60, 1  ;;  %v1966_v16 = vrot.slane %v1692_v49, 4  ;;  %v2538_v21 = vrot.slane %v2264_v63, 5  ;;  %v13707_v13 = vpop.f32.mrf.mxu0 }
 0x37b   : > { %16875 = vst [vmem:[#allocation34_spill] sm:$0xff] %v13668_v5  ;;  %v5002_v27 = vsel %vm4955_vm6, %v13512_v0, %v16876_v10  ;;  %v13683_v3 = vmax.f32 %v16877_v20, %v3198_v47  ;;  %v8195_v7 = vpack.i.bf16 %v13673_v53, %v13643_v14  ;;  %v16195_v34 = vmax.f32 %v13661_v50, 0.0 }
 0x37c   : > { %8201 = vrot.lane.b32.xlu1 %v8200_v8, %s8691_s20  ;;  %v16878_v0 = vunpack.i.h.bf16 %v13493_v51  ;;  %v16879_v41 = vrot.slane %v13536_v6, 1  ;;  %v16880_v47 = vrot.slane %v13616_v22, 1  ;;  %v16881_v49 = vrot.slane %v13540_v48, 4 }
 0x37d   : > { %8196 = vrot.lane.b32.xlu0 %v8195_v7, %s8692_s21  ;;  %v16882_v20 = vrot.slane %v13619_v57, 4 }
 0x37e   : > { %v5003_v10 = vsel %vm4955_vm6, %v13499_v43, %v16878_v0  ;;  %v1386_v8 = vsel %vm1211_vm0, %v16879_v41, %v1385_v2  ;;  %v1388_v60 = vsel %vm1211_vm0, %v1385_v2, %v16880_v47  ;;  %v1967_v63 = vsel %vm1798_vm1, %v16881_v49, %v1966_v16  ;;  %v8072_v41 = vpop.permute.xlu0 %8071 }
 0x37f   : > { %v1969_v51 = vsel %vm1798_vm1, %v1966_v16, %v16882_v20  ;;  %v13710_v43 = vadd.f32 %v1386_v8, %v13530_v39  ;;  %v13712_v6 = vadd.f32 %v1388_v60, %v1005_v1  ;;  %v2165_v7 = vadd.f32 %v1967_v63, %v13459_v28  ;;  %v7508_v8 = vpop.f32.mrf.mxu0  ;;  %v892_v20 = vpop.permute.xlu1 %891 }
 0x380   : > { %v2166_v0 = vadd.f32 %v1969_v51, %v1579_v30  ;;  %v16883_v2 = vrot.slane %v13543_v35, 5  ;;  %v16884_v47 = vrot.slane %v13622_v12, 5  ;;  %v5768_v16 = vrot.slane %v16195_v34, 2 }
 0x381   : > { %v16885_v39 = vunpack.i.l.bf16 %v13557_v38  ;;  %v16886_v30 = vunpack.i.h.bf16 %v13557_v38  ;;  %v13732_v34 = vpop.f32.mrf.mxu0  ;;  %v16888_v38 = vmax.f32 %v13595_v17, 0.0 }
 0x382   : > { %v2539_v48 = vsel %vm2370_vm2, %v16883_v2, %v2538_v21  ;;  %v2541_v49 = vsel %vm2370_vm2, %v2538_v21, %v16884_v47  ;;  %v5769_v51 = vsel %vm3947_vm3, %v5766_v37, %v5768_v16  ;;  %v8074_v47 = vunpack.i.h.bf16 %v8072_v41  ;;  %16887 = vst [vmem:[#allocation45_spill] sm:$0xff] %v13732_v34  ;;  %v16894_v2 = vld [vmem:[#allocation48_spill] sm:$0xff] }
 0x383   : > { %v5085_v1 = vsel %vm5038_vm7, %v5002_v27, %v16885_v39  ;;  %v2737_v60 = vadd.f32 %v2539_v48, %v2165_v7  ;;  %v2738_v28 = vadd.f32 %v2541_v49, %v2166_v0  ;;  %v5086_v35 = vsel %vm5038_vm7, %v5003_v10, %v16886_v30 }
 0x384   : > { %v5144_v21 = vpack.c.bf16 %v5086_v35, %v5085_v1  ;;  %v13740_v0 = vmax.f32 %v16888_v38, %v5769_v51  ;;  %v8073_v10 = vunpack.i.l.bf16 %v8072_v41  ;;  %v5005_v37 = vsel %vm4955_vm6, %v13584_v4, %v8074_v47  ;;  %v7509_v1 = vpop.f32.mrf.mxu0 }
 0x385   : > { %v2838_v27 = vadd.f32 %v13140_v46, %v2737_v60  ;;  %v13736_v7 = vadd.f32 %v13140_v46, %v2738_v28  ;;  %v13746_v48 = vadd.f32 %v13244_v31, %v13129_v62  ;;  %v3192_v49 = vsel %vm1211_vm0, %v13410_v36, %v13501_v15 }
 0x386   : > { %7563 = vmatmul.mubr.bf16.gmra.mxu0 %v5144_v21  ;;  %v13752_v39 = vmul.f32 %v16609_v54, %v892_v20  ;;  %v13757_v41 = vmax.f32 %v13412_v9, %v13740_v0  ;;  %v5004_v4 = vsel %vm4955_vm6, %v13590_v59, %v8073_v10  ;;  %v16890_v36 = vmax.f32 %v13379_v56, 0.0  ;;  %v8082_v9 = vpop.permute.xlu0 %8081 }
 0x387   : > { %v2932_v17 = vmax.f32 %v2838_v27, 0.0  ;;  %v16196_v8 = vmax.f32 %v13736_v7, 0.0  ;;  %7566 = vmatprep.mubr.msk.bf16.mxu0 %vm8694_vm4, %v16525_v55  ;;  %v16197_v62 = vmax.f32 %v13746_v48, 0.0  ;;  %v13769_v60 = vmul.f32 %v16602_v52, %v892_v20 }
 0x388   : > { %16889 = vst [vmem:[#allocation42_spill] sm:$0xff] %v13757_v41  ;;  %v13766_v15 = vmax.f32 %v16890_v36, %v3192_v49  ;;  %v1580_v28 = vadd.f32 %v13568_v33, %v13469_v18  ;;  %v13781_v51 = vmul.f32 %v16610_v44, %v892_v20  ;;  %v13788_v18 = vmul.f32 %v8932_v19, %v892_v20 }
 0x389   : > { %v13773_v30 = vrot.slane %v2932_v17, 1  ;;  %v13777_v59 = vrot.slane %v16196_v8, 1  ;;  %v5770_v56 = vrot.slane %v16197_v62, 2  ;;  %v16199_v47 = vrot.slane %v13769_v60, 1 }
 0x38a   : > { %v3652_v21 = vrot.slane %v13766_v15, 4  ;;  %v16198_v27 = vrot.slane %v13781_v51, 4  ;;  %v8084_v38 = vunpack.i.h.bf16 %v8082_v9  ;;  %v8083_v10 = vunpack.i.l.bf16 %v8082_v9 }
 0x38b   : > { %v3202_v33 = vsel %vm1211_vm0, %v13773_v30, %v13777_v59  ;;  %v5771_v1 = vsel %vm3947_vm3, %v5768_v16, %v5770_v56  ;;  %v16891_v36 = vrot.slane %v13435_v58, 4  ;;  %v16892_v20 = vrot.slane %v13616_v22, 1 }
 0x38c   : > { %v13794_v49 = vmax.f32 %v2932_v17, %v3202_v33  ;;  %v16893_v62 = vmax.f32 %v13661_v50, 0.0  ;;  %v16896_v16 = vrot.slane %v13619_v57, 4  ;;  %v2542_v50 = vrot.slane %v13788_v18, 5  ;;  %v16901_v57 = vld [vmem:[#allocation22_spill] sm:$0xff] }
 0x38d   : > { %v3653_v35 = vsel %vm1798_vm1, %v16891_v36, %v3652_v21  ;;  %v1390_v8 = vsel %vm1211_vm0, %v16892_v20, %v16199_v47  ;;  %v13820_v36 = vpop.f32.mrf.mxu0  ;;  %v16903_v18 = vrot.slane %v13622_v12, 5  ;;  %v16908_v12 = vunpack.i.l.bf16 %v13679_v24 }
 0x38e   : > { %v13807_v63 = vmax.f32 %v16893_v62, %v5771_v1  ;;  %v13810_v9 = vmax.f32 %v16894_v2, %v3653_v35  ;;  %v13813_v17 = vadd.f32 %v1390_v8, %v13610_v11  ;;  %v1971_v33 = vsel %vm1798_vm1, %v16896_v16, %v16198_v27  ;;  %16897 = vst [vmem:[#allocation57_spill] sm:$0xff] %v13820_v36  ;;  %v16898_v62 = vld [vmem:[#allocation41_spill] sm:$0xff]  ;;  %v16899_v35 = vld [vmem:[#allocation20_spill] sm:$0xff] }
 0x38f   : > { %v2167_v20 = vadd.f32 %v1971_v33, %v1580_v28  ;;  %v4924_v2 = vsel %vm4872_vm5, %v16898_v62, %v8084_v38  ;;  %v4923_v1 = vsel %vm4872_vm5, %v16901_v57, %v8083_v10  ;;  %v16902_v16 = vrot.slane %v13523_v61, 4  ;;  %v8087_v28 = vpop.permute.xlu1 %8086  ;;  %v7512_v33 = vpop.f32.mrf.mxu0  ;;  %v16905_v27 = vld [vmem:[#allocation29_spill] sm:$0xff]  ;;  %v16906_v57 = vld [vmem:[#allocation18_spill] sm:$0xff] }
 0x390   : > { %16895 = vst [vmem:[#allocation17_spill] sm:$0xff] %v13810_v9  ;;  %v13828_v11 = vmax.f32 %v16899_v35, %v13807_v63  ;;  %v8205_v8 = vpack.i.bf16 %v13810_v9, %v13634_v42  ;;  %v2543_v38 = vsel %vm2370_vm2, %v16903_v18, %v2542_v50  ;;  %v4095_v35 = vrot.slane %v13810_v9, 2 }
 0x391   : > { %v3655_v22 = vsel %vm1798_vm1, %v3652_v21, %v16902_v16  ;;  %v13846_v47 = vadd.f32 %v13244_v31, %v16905_v27  ;;  %v2739_v21 = vadd.f32 %v2543_v38, %v2167_v20  ;;  %v16907_v16 = vld [vmem:[#allocation39_spill] sm:$0xff]  ;;  %v5087_v18 = vsel %vm5038_vm7, %v5004_v4, %v16908_v12 }
 0x392   : > { %16900 = vst [vmem:[#allocation49_spill] sm:$0xff] %v13828_v11  ;;  %v13841_v62 = vmax.f32 %v13205_v25, %v3655_v22  ;;  %8206 = vrot.lane.b32.xlu0 %v8205_v8, %s8690_s19  ;;  %v8215_v33 = vpack.i.bf16 %v16907_v16, %v16906_v57  ;;  %v897_v25 = vpop.permute.xlu0 %896  ;;  %v13855_v22 = vpop.f32.mrf.mxu0  ;;  %v16910_v9 = vrot.slane %v13634_v42, 2  ;;  %v16911_v20 = vunpack.i.h.bf16 %v13679_v24 }
 0x393   : > { %16909 = vst [vmem:[#allocation52_spill] sm:$0xff] %v13855_v22  ;;  %v5605_v8 = vmax.f32 %v13846_v47, 0.0  ;;  %v13868_v57 = vadd.f32 %v13140_v46, %v2739_v21  ;;  %v8089_v16 = vunpack.i.h.bf16 %v8087_v28  ;;  %v8088_v12 = vunpack.i.l.bf16 %v8087_v28 }
 0x394   : > { %16904 = vst [vmem:[#allocation24_spill] sm:$0xff] %v13841_v62  ;;  %v13860_v27 = vsel %vm3947_vm3, %v16910_v9, %v4095_v35  ;;  %v16206_v10 = vrot.slane %v13841_v62, 2  ;;  %v5088_v38 = vsel %vm5038_vm7, %v5005_v37, %v16911_v20  ;;  %v7513_v11 = vpop.f32.mrf.mxu0  ;;  %v13876_v5 = vmul.f32 %v16609_v54, %v897_v25 }
 0x395   : > { %v5145_v4 = vpack.c.bf16 %v5088_v38, %v5087_v18  ;;  %v5772_v42 = vrot.slane %v5605_v8, 2  ;;  %v13879_v24 = vmul.f32 %v16602_v52, %v897_v25  ;;  %v16207_v37 = vmax.f32 %v13868_v57, 0.0 }
 0x396   : > { %v13873_v9 = vsel %vm3947_vm3, %v4095_v35, %v16206_v10  ;;  %8216 = vrot.lane.b32.xlu0 %v8215_v33, %s8691_s20  ;;  %v13886_v11 = vsel %vm4955_vm6, %v4923_v1, %v8088_v12  ;;  %v13889_v28 = vsel %vm4955_vm6, %v4924_v2, %v8089_v16  ;;  %v8097_v35 = vpop.permute.xlu1 %8096  ;;  %v13894_v20 = vmul.f32 %v16610_v44, %v897_v25  ;;  %v16914_v33 = vld [vmem:[#allocation36_spill] sm:$0xff]  ;;  %v13915_v16 = vpop.permute.xlu0 %8091 }
 0x397   : > { %v8210_v47 = vpack.i.bf16 %v13873_v9, %v13860_v27  ;;  %7567 = vmatmul.mubr.bf16.gmra.mxu0 %v5145_v4  ;;  %v5773_v21 = vsel %vm3947_vm3, %v5770_v56, %v5772_v42  ;;  %v16210_v18 = vrot.slane %v13879_v24, 1  ;;  %v13897_v38 = vmul.f32 %v8932_v19, %v897_v25  ;;  %v13917_v12 = vpop.f32.mrf.mxu0 }
 0x398   : > { %7570 = vmatprep.mubr.msk.bf16.mxu0 %vm8694_vm4, %v16525_v55  ;;  %v13903_v1 = vrot.slane %v16207_v37, 1  ;;  %v16912_v2 = vmax.f32 %v13746_v48, 0.0  ;;  %v5316_v4 = vadd.f32 %v13244_v31, %v16914_v33  ;;  %v3196_v25 = vsel %vm1211_vm0, %v13505_v32, %v13563_v45  ;;  %16915 = vst [vmem:[#allocation59_spill] sm:$0xff] %v13917_v12 }
 0x399   : > { %8211 = vrot.lane.b32.xlu1 %v8210_v47, %s8692_s21  ;;  %v16916_v10 = vrot.slane %v13769_v60, 1  ;;  %v16211_v48 = vrot.slane %v13894_v20, 4  ;;  %v8099_v41 = vunpack.i.h.bf16 %v8097_v35  ;;  %v7516_v60 = vpop.f32.mrf.mxu0 }
 0x39a   : > { %v13908_v56 = vmax.f32 %v16912_v2, %v5773_v21  ;;  %v16212_v21 = vrot.slane %v13897_v38, 5  ;;  %v16917_v2 = vmax.f32 %v13479_v40, 0.0  ;;  %v5606_v37 = vmax.f32 %v5316_v4, 0.0  ;;  %v907_v12 = vpop.permute.xlu1 %906 }
 0x39b   : > { %v1392_v47 = vsel %vm1211_vm0, %v16916_v10, %v16210_v18  ;;  %v16919_v10 = vrot.slane %v13781_v51, 4  ;;  %v13952_v51 = vpop.f32.mrf.mxu0 }
 0x39c   : > { %16913 = vst [vmem:[#allocation56_spill] sm:$0xff] %v13908_v56  ;;  %v13928_v33 = vmax.f32 %v16917_v2, %v3196_v25  ;;  %v13932_v32 = vmax.f32 %v13483_v23, %v13908_v56  ;;  %v13935_v45 = vadd.f32 %v1392_v47, %v13752_v39  ;;  %v2545_v40 = vsel %vm2370_vm2, %v2542_v50, %v16212_v21  ;;  %v16920_v47 = vld [vmem:[#allocation28_spill] sm:$0xff] }
 0x39d   : > { %v1973_v18 = vsel %vm1798_vm1, %v16919_v10, %v16211_v48  ;;  %v8098_v23 = vunpack.i.l.bf16 %v8097_v35  ;;  %v5774_v4 = vrot.slane %v5606_v37, 2  ;;  %v13950_v60 = vsel %vm4872_vm5, %v16920_v47, %v8099_v41  ;;  %16921 = vst [vmem:[#allocation38_spill] sm:$0xff] %v13952_v51  ;;  %v16923_v50 = vld [vmem:[#allocation64_spill] sm:$0xff]  ;;  %v16925_v47 = vld [vmem:[#allocation23_spill] sm:$0xff]  ;;  %v902_v51 = vpop.permute.xlu0 %901 }
 0x39e   : > { %16918 = vst [vmem:[#allocation37_spill] sm:$0xff] %v13932_v32  ;;  %v3656_v25 = vrot.slane %v13928_v33, 4  ;;  %v2168_v39 = vadd.f32 %v1973_v18, %v13710_v43  ;;  %v16922_v10 = vrot.slane %v13523_v61, 4  ;;  %v8093_v43 = vunpack.i.l.bf16 %v13915_v16 }
 0x39f   : > { %v13959_v21 = vsel %vm4872_vm5, %v16923_v50, %v8098_v23  ;;  %v5775_v2 = vsel %vm3947_vm3, %v5772_v42, %v5774_v4  ;;  %v13969_v32 = vadd.f32 %v13244_v31, %v16925_v47  ;;  %v16927_v23 = vld [vmem:[#allocation51_spill] sm:$0xff]  ;;  %v13976_v35 = vmul.f32 %v16609_v54, %v907_v12 }
 0x3a0   : > { %v3657_v48 = vsel %vm1798_vm1, %v16922_v10, %v3656_v25  ;;  %v2740_v18 = vadd.f32 %v2545_v40, %v2168_v39  ;;  %v7517_v10 = vpop.f32.mrf.mxu0  ;;  %v13971_v22 = vmax.f32 %v5605_v8, %v5775_v2  ;;  %v8230_v50 = vpack.i.bf16 %v13643_v14, %v16927_v23 }
 0x3a1   : > { %v13965_v41 = vmax.f32 %v13572_v29, %v3657_v48  ;;  %v13979_v40 = vmul.f32 %v16602_v52, %v907_v12  ;;  %v16216_v48 = vmax.f32 %v13969_v32, 0.0  ;;  %v13988_v8 = vmul.f32 %v16610_v44, %v907_v12 }
 0x3a2   : > { %16926 = vst [vmem:[#allocation41_spill] sm:$0xff] %v13971_v22  ;;  %v13982_v29 = vadd.f32 %v13140_v46, %v2740_v18  ;;  %v13992_v14 = vmax.f32 %v13488_v26, %v13971_v22  ;;  %v13996_v39 = vmul.f32 %v8932_v19, %v907_v12  ;;  %v1009_v46 = vmul.f32 %v16609_v54, %v902_v51  ;;  %v14018_v34 = vpop.f32.mrf.mxu0 }
 0x3a3   : > { %16924 = vst [vmem:[#allocation48_spill] sm:$0xff] %v13965_v41  ;;  %v8220_v42 = vpack.i.bf16 %v13965_v41, %v13841_v62  ;;  %v14003_v47 = vrot.slane %v16216_v48, 2  ;;  %v1112_v26 = vmul.f32 %v16602_v52, %v902_v51  ;;  %v1696_v12 = vmul.f32 %v16610_v44, %v902_v51  ;;  %16930 = vst [vmem:[#allocation29_spill] sm:$0xff] %v14018_v34 }
 0x3a4   : > { %16928 = vst [vmem:[#allocation20_spill] sm:$0xff] %v13982_v29  ;;  %16929 = vst [vmem:[#allocation22_spill] sm:$0xff] %v13992_v14  ;;  %v16220_v18 = vmax.f32 %v13982_v29, 0.0  ;;  %v2268_v22 = vmul.f32 %v8932_v19, %v902_v51  ;;  %v16223_v10 = vrot.slane %v13683_v3, 4  ;;  %v4099_v14 = vrot.slane %v13965_v41, 2 }
 0x3a5   : > { %8221 = vrot.lane.b32.xlu1 %v8220_v42, %s8690_s19  ;;  %v5777_v42 = vsel %vm3947_vm3, %v5774_v4, %v14003_v47  ;;  %v1393_v48 = vrot.slane %v1112_v26, 1  ;;  %v1974_v23 = vrot.slane %v1696_v12, 4  ;;  %v16932_v26 = vrot.slane %v13979_v40, 1  ;;  %v7520_v12 = vpop.f32.mrf.mxu0 }
 0x3a6   : > { %v14013_v36 = vrot.slane %v16220_v18, 1  ;;  %v14020_v56 = vmax.f32 %v5606_v37, %v5777_v42  ;;  %v2546_v2 = vrot.slane %v2268_v22, 5  ;;  %v16931_v18 = vrot.slane %v13879_v24, 1 }
 0x3a7   : > { %v1396_v37 = vsel %vm1211_vm0, %v1393_v48, %v16932_v26  ;;  %v3659_v22 = vsel %vm1798_vm1, %v3656_v25, %v16223_v10  ;;  %v16933_v42 = vmax.f32 %v13868_v57, 0.0  ;;  %v16937_v26 = vrot.slane %v13988_v8, 4  ;;  %v14085_v10 = vld [vmem:[#allocation4] ss:$0 sm:$0xff] }
 0x3a8   : > { %v3206_v51 = vsel %vm1211_vm0, %v13903_v1, %v14013_v36  ;;  %v14030_v4 = vsel %vm1211_vm0, %v16931_v18, %v1393_v48  ;;  %v14046_v24 = vadd.f32 %v1396_v37, %v1009_v46  ;;  %v16936_v18 = vrot.slane %v13894_v20, 4  ;;  %v14051_v48 = vpop.permute.xlu1 %8106  ;;  %v14063_v37 = vpop.f32.mrf.mxu0 }
 0x3a9   : > { %8231 = vrot.lane.b32.xlu1 %v8230_v50, %s8691_s20  ;;  %v14040_v41 = vmax.f32 %v16933_v42, %v3206_v51  ;;  %v16934_v50 = vld [vmem:[#allocation19_spill] sm:$0xff]  ;;  %v1977_v25 = vsel %vm1798_vm1, %v1974_v23, %v16937_v26  ;;  %v16938_v51 = vrot.slane %v13897_v38, 5  ;;  %v16939_v42 = vrot.slane %v13996_v39, 5  ;;  %16940 = vst [vmem:[#allocation39_spill] sm:$0xff] %v14063_v37  ;;  %v8102_v38 = vpop.permute.xlu0 %8101  ;;  %v16943_v26 = vld [vmem:[#allocation58_spill] sm:$0xff] }
 0x3aa   : > { %v14044_v34 = vmax.f32 %v16934_v50, %v14020_v56  ;;  %v1975_v29 = vsel %vm1798_vm1, %v16936_v18, %v1974_v23  ;;  %v2170_v50 = vadd.f32 %v1977_v25, %v13813_v17  ;;  %v14068_v18 = vmax.f32 %v13435_v58, %v3659_v22  ;;  %v7521_v58 = vpop.f32.mrf.mxu0 }
 0x3ab   : > { %v2169_v57 = vadd.f32 %v1975_v29, %v13712_v6  ;;  %v2547_v12 = vsel %vm2370_vm2, %v16938_v51, %v2546_v2  ;;  %v2549_v46 = vsel %vm2370_vm2, %v2546_v2, %v16939_v42  ;;  %v16942_v23 = vrot.slane %v13841_v62, 2 }
 0x3ac   : > { %16935 = vst [vmem:[#allocation18_spill] sm:$0xff] %v14044_v34  ;;  %16941 = vst [vmem:[#allocation36_spill] sm:$0xff] %v14068_v18  ;;  %v5324_v51 = vadd.f32 %v13244_v31, %v16943_v26  ;;  %v5089_v2 = vsel %vm5038_vm7, %v13886_v11, %v8093_v43  ;;  %v16944_v42 = vunpack.i.h.bf16 %v13915_v16  ;;  %v2742_v22 = vadd.f32 %v2549_v46, %v2170_v50  ;;  %v16946_v46 = vld [vmem:[#allocation13_spill] sm:$0xff]  ;;  %v14161_v62 = vpop.f32.mrf.mxu0 }
 0x3ad   : > { %v14073_v6 = vsel %vm3947_vm3, %v16942_v23, %v4099_v14  ;;  %v2741_v29 = vadd.f32 %v2547_v12, %v2169_v57  ;;  %v16224_v25 = vrot.slane %v14068_v18, 2  ;;  %v8104_v11 = vunpack.i.h.bf16 %v8102_v38  ;;  %16955 = vst [vmem:[#allocation51_spill] sm:$0xff] %v14161_v62 }
 0x3ae   : > { %v5090_v17 = vsel %vm5038_vm7, %v13889_v28, %v16944_v42  ;;  %v5608_v12 = vmax.f32 %v5324_v51, 0.0  ;;  %v14090_v16 = vadd.f32 %v14085_v10, %v2742_v22  ;;  %v8103_v43 = vunpack.i.l.bf16 %v8102_v38  ;;  %v16947_v38 = vld [vmem:[#allocation55_spill] sm:$0xff] }
 0x3af   : > { %v5146_v20 = vpack.c.bf16 %v5090_v17, %v5089_v2  ;;  %v2842_v57 = vadd.f32 %v14085_v10, %v2741_v29  ;;  %v14095_v28 = vsel %vm3947_vm3, %v4099_v14, %v16224_v25  ;;  %v14099_v50 = vadd.f32 %v13244_v31, %v16946_v46  ;;  %v912_v2 = vpop.permute.xlu1 %911  ;;  %v8508_v29 = vld [vmem:[#allocation7 + $0x38] sm:$0xff]   ;;  %v8509_v46 = vld [vmem:[#allocation7 + $0x30] sm:$0xff]  }
 0x3b0   : > { %16945 = vst [vmem:[#allocation28_spill] sm:$0xff] %v14090_v16  ;;  %v8225_v42 = vpack.i.bf16 %v14095_v28, %v14073_v6  ;;  %v5778_v17 = vrot.slane %v5608_v12, 2  ;;  %v14105_v58 = vsel %vm4955_vm6, %v13950_v60, %v8104_v11  ;;  %v16225_v14 = vmax.f32 %v14090_v16, 0.0  ;;  %6844 = vmatpush1.bf16.msra.mxu1 %v8508_v29  ;;  %v16948_v11 = vld [vmem:[#allocation44_spill] sm:$0xff] }
 0x3b1   : > { %7571 = vmatmul.mubr.bf16.gmra.mxu0 %v5146_v20  ;;  %v2936_v51 = vmax.f32 %v2842_v57, 0.0  ;;  %v5008_v31 = vsel %vm4955_vm6, %v13959_v21, %v8103_v43  ;;  %v16226_v20 = vmax.f32 %v14099_v50, 0.0  ;;  %v3200_v22 = vsel %vm1211_vm0, %v16947_v38, %v13773_v30  ;;  %v8112_v57 = vpop.permute.xlu0 %8111 }
 0x3b2   : > { %7574 = vmatprep.mubr.msk.bf16.mxu0 %vm8694_vm4, %v16525_v55  ;;  %8226 = vrot.lane.b32.xlu0 %v8225_v42, %s8692_s21  ;;  %v5779_v60 = vsel %vm3947_vm3, %v14003_v47, %v5778_v17  ;;  %v16949_v25 = vmax.f32 %v16948_v11, 0.0  ;;  %v14126_v21 = vmul.f32 %v16609_v54, %v912_v2  ;;  %v16950_v43 = vmov 0  }
 0x3b3   : > { %v14116_v23 = vrot.slane %v2936_v51, 1  ;;  %6845 = vmatprep.subr.bf16.mxu1 %v16950_v43  ;;  %v14131_v30 = vrot.slane %v16225_v14, 1  ;;  %v16952_v29 = vmax.f32 %v13969_v32, 0.0  ;;  %v14139_v47 = vrot.slane %v16226_v20, 2 }
 0x3b4   : > { %v14123_v26 = vmax.f32 %v16949_v25, %v3200_v22  ;;  %v14142_v25 = vmul.f32 %v16602_v52, %v912_v2  ;;  %v14146_v42 = vmul.f32 %v16610_v44, %v912_v2  ;;  %v14149_v22 = vmul.f32 %v8932_v19, %v912_v2  ;;  %6846 = vmatpush1.bf16.msra.mxu1 %v8509_v46  ;;  %v16959_v46 = vld [vmem:[#allocation63_spill] sm:$0xff] }
 0x3b5   : > { %16951 = vst [vmem:[#allocation64_spill] sm:$0xff] %v14131_v30  ;;  %v14135_v38 = vmax.f32 %v16952_v29, %v5779_v60  ;;  %v8114_v11 = vunpack.i.h.bf16 %v8112_v57  ;;  %v3210_v32 = vsel %vm1211_vm0, %v14116_v23, %v14131_v30  ;;  %v16953_v60 = vld [vmem:[#allocation27_spill] sm:$0xff]  ;;  %v5781_v14 = vsel %vm3947_vm3, %v5778_v17, %v14139_v47  ;;  %6847 = vmatprep.subr.bf16.mxu1 %v16950_v43 }
 0x3b6   : > { %v3660_v54 = vrot.slane %v14123_v26, 4  ;;  %v14163_v34 = vmax.f32 %v2936_v51, %v3210_v32  ;;  %v14165_v2 = vmax.f32 %v5608_v12, %v5781_v14  ;;  %v16957_v37 = vrot.slane %v13683_v3, 4  ;;  %v7524_v12 = vpop.f32.mrf.mxu0  ;;  %v8510_v14 = vld [vmem:[#allocation7 + $0x28] sm:$0xff]  }
 0x3b7   : > { %v14156_v29 = vmax.f32 %v16953_v60, %v14135_v38  ;;  %v16235_v30 = vrot.slane %v14146_v42, 4  ;;  %v4928_v51 = vsel %vm4872_vm5, %v16959_v46, %v8114_v11  ;;  %v16962_v60 = vrot.slane %v13988_v8, 4 }
 0x3b8   : > { %16956 = vst [vmem:[#allocation19_spill] sm:$0xff] %v14165_v2  ;;  %v3661_v16 = vsel %vm1798_vm1, %v16957_v37, %v3660_v54  ;;  %v16960_v37 = vld [vmem:[#allocation26_spill] sm:$0xff]  ;;  %v16963_v46 = vrot.slane %v14149_v22, 5  ;;  %v16964_v12 = vrot.slane %v13996_v39, 5  ;;  %v16965_v32 = vrot.slane %v13794_v49, 4  ;;  %v14200_v8 = vpop.f32.mrf.mxu0  ;;  %6848 = vmatpush1.bf16.msra.mxu1 %v8510_v14  ;;  %v1015_v39 = vpop.permute.xlu0 %1014 }
 0x3b9   : > { %16954 = vst [vmem:[#allocation23_spill] sm:$0xff] %v14156_v29  ;;  %v14174_v17 = vmax.f32 %v13766_v15, %v3661_v16  ;;  %v14182_v62 = vmax.f32 %v16960_v37, %v14165_v2  ;;  %v1979_v15 = vsel %vm1798_vm1, %v16962_v60, %v16235_v30  ;;  %v8113_v16 = vunpack.i.l.bf16 %v8112_v57  ;;  %v8117_v29 = vpop.permute.xlu1 %8116  ;;  %v16966_v60 = vld [vmem:[#allocation21_spill] sm:$0xff]  ;;  %6849 = vmatprep.subr.bf16.mxu1 %v16950_v43 }
 0x3ba   : > { %v2171_v11 = vadd.f32 %v1979_v15, %v13935_v45  ;;  %v2551_v37 = vsel %vm2370_vm2, %v16964_v12, %v16963_v46  ;;  %v3663_v2 = vsel %vm1798_vm1, %v3660_v54, %v16965_v32  ;;  %v14211_v54 = vld [vmem:[#allocation6] ss:$0 sm:$0xff]  ;;  %v16968_v32 = vld [vmem:[#allocation65_spill] sm:$0xff]  ;;  %v7525_v12 = vpop.f32.mrf.mxu0 }
 0x3bb   : > { %16958 = vst [vmem:[#allocation58_spill] sm:$0xff] %v14174_v17  ;;  %16961 = vst [vmem:[#allocation13_spill] sm:$0xff] %v14182_v62  ;;  %v8235_v20 = vpack.i.bf16 %v14174_v17, %v14068_v18  ;;  %v4927_v30 = vsel %vm4872_vm5, %v16966_v60, %v8113_v16  ;;  %v14206_v45 = vmax.f32 %v13523_v61, %v3663_v2  ;;  %v4103_v15 = vrot.slane %v14174_v17, 2 }
 0x3bc   : > { %v2743_v46 = vadd.f32 %v2551_v37, %v2171_v11  ;;  %v14215_v14 = vadd.f32 %v14211_v54, %v16968_v32  ;;  %v8245_v16 = vpack.i.bf16 %v13860_v27, %v13673_v53  ;;  %v16969_v61 = vunpack.i.l.bf16 %v14051_v48 }
 0x3bd   : > { %16967 = vst [vmem:[#allocation55_spill] sm:$0xff] %v14206_v45  ;;  %8236 = vrot.lane.b32.xlu0 %v8235_v20, %s8690_s19  ;;  %v16970_v60 = vrot.slane %v14068_v18, 2  ;;  %v16236_v20 = vrot.slane %v14206_v45, 2  ;;  %v16971_v11 = vunpack.i.h.bf16 %v14051_v48  ;;  %v8119_v32 = vunpack.i.h.bf16 %v8117_v29 }
 0x3be   : > { %v5091_v2 = vsel %vm5038_vm7, %v5008_v31, %v16969_v61  ;;  %v14233_v53 = vadd.f32 %v14085_v10, %v2743_v46  ;;  %v5610_v27 = vmax.f32 %v14215_v14, 0.0  ;;  %v8118_v61 = vunpack.i.l.bf16 %v8117_v29 }
 0x3bf   : > { %v14225_v57 = vsel %vm3947_vm3, %v16970_v60, %v4103_v15  ;;  %v5092_v37 = vsel %vm5038_vm7, %v14105_v58, %v16971_v11  ;;  %v14239_v12 = vsel %vm3947_vm3, %v4103_v15, %v16236_v20  ;;  %v14242_v60 = vsel %vm4955_vm6, %v4928_v51, %v8119_v32  ;;  %v8127_v11 = vpop.permute.xlu1 %8126 }
 0x3c0   : > { %v5147_v31 = vpack.c.bf16 %v5092_v37, %v5091_v2  ;;  %v1585_v48 = vadd.f32 %v14030_v4, %v13876_v5  ;;  %v1115_v58 = vmul.f32 %v16602_v52, %v1015_v39  ;;  %v16237_v46 = vmax.f32 %v14233_v53, 0.0  ;;  %v16972_v52 = vld [vmem:[#allocation61_spill] sm:$0xff]  ;;  %v14264_v37 = vpop.permute.xlu0 %8121 }
 0x3c1   : > { %v8240_v14 = vpack.i.bf16 %v14239_v12, %v14225_v57  ;;  %v5782_v29 = vrot.slane %v5610_v27, 2  ;;  %8246 = vrot.lane.b32.xlu0 %v8245_v16, %s8691_s20  ;;  %v14252_v15 = vsel %vm4955_vm6, %v4927_v30, %v8118_v61  ;;  %v14255_v2 = vmul.f32 %v16610_v44, %v1015_v39 }
 0x3c2   : > { %7575 = vmatmul.mubr.bf16.gmra.mxu0 %v5147_v31  ;;  %v1399_v51 = vrot.slane %v1115_v58, 1  ;;  %v14258_v5 = vmul.f32 %v8932_v19, %v1015_v39  ;;  %v14262_v4 = vadd.f32 %v14211_v54, %v16972_v52  ;;  %v14270_v30 = vrot.slane %v16237_v46, 1  ;;  %v8511_v31 = vld [vmem:[#allocation7 + $0x20] sm:$0xff]  }
 0x3c3   : > { %7578 = vmatprep.mubr.msk.bf16.mxu0 %vm8694_vm4, %v16525_v55  ;;  %8241 = vrot.lane.b32.xlu1 %v8240_v14, %s8692_s21  ;;  %v5783_v16 = vsel %vm3947_vm3, %v14139_v47, %v5782_v29  ;;  %v3204_v39 = vsel %vm1211_vm0, %v13777_v59, %v13903_v1  ;;  %v8129_v32 = vunpack.i.h.bf16 %v8127_v11  ;;  %v16973_v61 = vmax.f32 %v14099_v50, 0.0  ;;  %v16976_v50 = vld [vmem:[#allocation15_spill] sm:$0xff] }
 0x3c4   : > { %v16974_v52 = vrot.slane %v14142_v25, 1  ;;  %v1980_v46 = vrot.slane %v14255_v2, 4  ;;  %v16240_v14 = vrot.slane %v14258_v5, 5  ;;  %v5611_v17 = vmax.f32 %v14262_v4, 0.0  ;;  %6850 = vmatpush1.bf16.msra.mxu1 %v8511_v31 }
 0x3c5   : > { %v14280_v58 = vmax.f32 %v16973_v61, %v5783_v16  ;;  %v16975_v59 = vmax.f32 %v13736_v7, 0.0  ;;  %v14297_v16 = vsel %vm4872_vm5, %v16976_v50, %v8129_v32  ;;  %v14299_v61 = vpop.f32.mrf.mxu0  ;;  %v16979_v7 = vrot.slane %v14149_v22, 5  ;;  %6851 = vmatprep.subr.bf16.mxu1 %v16950_v43 }
 0x3c6   : > { %v1400_v20 = vsel %vm1211_vm0, %v16974_v52, %v1399_v51  ;;  %v8128_v4 = vunpack.i.l.bf16 %v8127_v11  ;;  %v5784_v32 = vrot.slane %v5611_v17, 2  ;;  %v1597_v52 = vpop.permute.xlu1 %1596  ;;  %v14324_v11 = vadd.f32 %v14211_v54, %v13707_v13 }
 0x3c7   : > { %v14288_v47 = vadd.f32 %v1400_v20, %v14126_v21  ;;  %v14293_v1 = vmax.f32 %v16975_v59, %v3204_v39  ;;  %v14303_v51 = vmax.f32 %v13740_v0, %v14280_v58  ;;  %v16978_v21 = vrot.slane %v14146_v42, 4  ;;  %v7528_v59 = vpop.f32.mrf.mxu0  ;;  %v8512_v42 = vld [vmem:[#allocation7 + $0x18] sm:$0xff]  }
 0x3c8   : > { %v2553_v2 = vsel %vm2370_vm2, %v16979_v7, %v16240_v14  ;;  %v5785_v7 = vsel %vm3947_vm3, %v5782_v29, %v5784_v32  ;;  %v16981_v0 = vrot.slane %v13794_v49, 4  ;;  %v8260_v50 = vpack.i.bf16 %v14073_v6, %v13873_v9  ;;  %6852 = vmatpush1.bf16.msra.mxu1 %v8512_v42 }
 0x3c9   : > { %16977 = vst [vmem:[#allocation44_spill] sm:$0xff] %v14303_v51  ;;  %v1981_v20 = vsel %vm1798_vm1, %v16978_v21, %v1980_v46  ;;  %v3664_v31 = vrot.slane %v14293_v1, 4  ;;  %v16980_v21 = vld [vmem:[#allocation62_spill] sm:$0xff]  ;;  %v14332_v14 = vpop.f32.mrf.mxu0  ;;  %v16241_v13 = vmax.f32 %v14324_v11, 0.0  ;;  %6853 = vmatprep.subr.bf16.mxu1 %v16950_v43  ;;  %v14348_v9 = vmul.f32 %v8932_v19, %v1597_v52 }
 0x3ca   : > { %v2172_v39 = vadd.f32 %v1981_v20, %v1585_v48  ;;  %v14319_v18 = vsel %vm4872_vm5, %v16980_v21, %v8128_v4  ;;  %v1592_v48 = vpop.permute.xlu0 %1591  ;;  %v14334_v4 = vmax.f32 %v5610_v27, %v5785_v7  ;;  %v16983_v6 = vrot.slane %v14142_v25, 1 }
 0x3cb   : > { %v3665_v59 = vsel %vm1798_vm1, %v16981_v0, %v3664_v31  ;;  %v16984_v27 = vrot.slane %v13979_v40, 1  ;;  %v7529_v0 = vpop.f32.mrf.mxu0  ;;  %v16245_v22 = vrot.slane %v14040_v41, 4 }
 0x3cc   : > { %v2744_v20 = vadd.f32 %v2553_v2, %v2172_v39  ;;  %v14337_v21 = vmax.f32 %v13928_v33, %v3665_v59  ;;  %v14341_v2 = vmul.f32 %v16610_v44, %v1597_v52  ;;  %v1700_v39 = vmul.f32 %v16610_v44, %v1592_v48 }
 0x3cd   : > { %v1398_v33 = vsel %vm1211_vm0, %v16984_v27, %v16983_v6  ;;  %v14358_v42 = vmax.f32 %v13807_v63, %v14334_v4  ;;  %v5786_v52 = vrot.slane %v16241_v13, 2  ;;  %v2272_v0 = vmul.f32 %v8932_v19, %v1592_v48 }
 0x3ce   : > { %16982 = vst [vmem:[#allocation27_spill] sm:$0xff] %v14337_v21  ;;  %v14345_v29 = vadd.f32 %v14085_v10, %v2744_v20  ;;  %v8250_v20 = vpack.i.bf16 %v14337_v21, %v14206_v45  ;;  %v1587_v59 = vadd.f32 %v1398_v33, %v13976_v35  ;;  %v1982_v6 = vrot.slane %v1700_v39, 4  ;;  %v8513_v39 = vld [vmem:[#allocation7 + $0x10] sm:$0xff]  }
 0x3cf   : > { %16985 = vst [vmem:[#allocation63_spill] sm:$0xff] %v14358_v42  ;;  %v5787_v63 = vsel %vm3947_vm3, %v5784_v32, %v5786_v52  ;;  %v16986_v35 = vrot.slane %v14341_v2, 4  ;;  %v2554_v27 = vrot.slane %v2272_v0, 5  ;;  %v3667_v48 = vsel %vm1798_vm1, %v3664_v31, %v16245_v22  ;;  %v8132_v42 = vpop.permute.xlu0 %8131  ;;  %6854 = vmatpush1.bf16.msra.mxu1 %v8513_v39 }
 0x3d0   : > { %v16244_v25 = vmax.f32 %v14345_v29, 0.0  ;;  %8251 = vrot.lane.b32.xlu1 %v8250_v20, %s8690_s19  ;;  %v14377_v7 = vmax.f32 %v5611_v17, %v5787_v63  ;;  %v1983_v40 = vsel %vm1798_vm1, %v1980_v46, %v1982_v6  ;;  %v16987_v46 = vld [vmem:[#allocation56_spill] sm:$0xff]  ;;  %v16990_v31 = vmax.f32 %v14233_v53, 0.0  ;;  %6855 = vmatprep.subr.bf16.mxu1 %v16950_v43 }
 0x3d1   : > { %v1985_v33 = vsel %vm1798_vm1, %v1982_v6, %v16986_v35  ;;  %v2173_v20 = vadd.f32 %v1983_v40, %v14046_v24  ;;  %v14395_v6 = vmax.f32 %v13683_v3, %v3667_v48  ;;  %v4107_v24 = vrot.slane %v14337_v21, 2  ;;  %v14398_v40 = vpop.permute.xlu1 %8136 }
 0x3d2   : > { %v14375_v13 = vrot.slane %v16244_v25, 1  ;;  %v2174_v32 = vadd.f32 %v1985_v33, %v1587_v59  ;;  %v14392_v63 = vmax.f32 %v16987_v46, %v14377_v7  ;;  %v14400_v59 = vpop.f32.mrf.mxu0  ;;  %v16991_v35 = vrot.slane %v14258_v5, 5  ;;  %v16993_v46 = vld [vmem:[#allocation45_spill] sm:$0xff] }
 0x3d3   : > { %16989 = vst [vmem:[#allocation21_spill] sm:$0xff] %v14395_v6  ;;  %v16992_v3 = vrot.slane %v14348_v9, 5  ;;  %v14415_v25 = vadd.f32 %v14211_v54, %v16993_v46 }
 0x3d4   : > { %v3214_v17 = vsel %vm1211_vm0, %v14270_v30, %v14375_v13  ;;  %16988 = vst [vmem:[#allocation26_spill] sm:$0xff] %v14392_v63  ;;  %8261 = vrot.lane.b32.xlu1 %v8260_v50, %s8691_s20  ;;  %v2555_v33 = vsel %vm2370_vm2, %v16991_v35, %v2554_v27  ;;  %v7532_v5 = vpop.f32.mrf.mxu0  ;;  %v16995_v35 = vunpack.i.l.bf16 %v14264_v37 }
 0x3d5   : > { %v14404_v0 = vmax.f32 %v16990_v31, %v3214_v17  ;;  %v2557_v48 = vsel %vm2370_vm2, %v2554_v27, %v16992_v3  ;;  %v2745_v22 = vadd.f32 %v2555_v33, %v2173_v20  ;;  %v16994_v17 = vrot.slane %v14206_v45, 2 }
 0x3d6   : > { %v2746_v53 = vadd.f32 %v2557_v48, %v2174_v32  ;;  %v16246_v31 = vrot.slane %v14395_v6, 2  ;;  %v5613_v27 = vmax.f32 %v14415_v25, 0.0  ;;  %v5093_v3 = vsel %vm5038_vm7, %v14252_v15, %v16995_v35  ;;  %v14439_v5 = vpop.f32.mrf.mxu0 }
 0x3d7   : > { %v14421_v50 = vsel %vm3947_vm3, %v16994_v17, %v4107_v24  ;;  %v16996_v20 = vunpack.i.h.bf16 %v14264_v37  ;;  %v2846_v33 = vadd.f32 %v14085_v10, %v2745_v22  ;;  %16997 = vst [vmem:[#allocation65_spill] sm:$0xff] %v14439_v5  ;;  %v8138_v37 = vunpack.i.l.bf16 %v14398_v40 }
 0x3d8   : > { %v14436_v48 = vadd.f32 %v14085_v10, %v2746_v53  ;;  %v14444_v25 = vsel %vm3947_vm3, %v4107_v24, %v16246_v31  ;;  %v5788_v15 = vrot.slane %v5613_v27, 2  ;;  %v8134_v35 = vunpack.i.h.bf16 %v8132_v42  ;;  %v7533_v39 = vpop.f32.mrf.mxu0  ;;  %v16998_v31 = vld [vmem:[#allocation57_spill] sm:$0xff] }
 0x3d9   : > { %v5094_v32 = vsel %vm5038_vm7, %v14242_v60, %v16996_v20  ;;  %v8142_v60 = vpop.permute.xlu0 %8141  ;;  %v2940_v20 = vmax.f32 %v2846_v33, 0.0  ;;  %v8255_v53 = vpack.i.bf16 %v14444_v25, %v14421_v50  ;;  %v14455_v21 = vadd.f32 %v14211_v54, %v16998_v31 }
 0x3da   : > { %v5148_v46 = vpack.c.bf16 %v5094_v32, %v5093_v3  ;;  %v16251_v22 = vmax.f32 %v14436_v48, 0.0  ;;  %v8133_v3 = vunpack.i.l.bf16 %v8132_v42  ;;  %v1602_v32 = vpop.permute.xlu1 %1601  ;;  %v5789_v17 = vsel %vm3947_vm3, %v5786_v52, %v5788_v15 }
 0x3db   : > { %v5013_v24 = vsel %vm4955_vm6, %v14297_v16, %v8134_v35  ;;  %v3208_v33 = vsel %vm1211_vm0, %v14013_v36, %v14116_v23  ;;  %v14462_v42 = vrot.slane %v2940_v20, 1  ;;  %8256 = vrot.lane.b32.xlu0 %v8255_v53, %s8692_s21  ;;  %v16999_v16 = vmax.f32 %v14324_v11, 0.0  ;;  %v17000_v23 = vld [vmem:[#allocation20_spill] sm:$0xff] }
 0x3dc   : > { %7579 = vmatmul.mubr.bf16.gmra.mxu0 %v5148_v46  ;;  %v8514_v46 = vld [vmem:[#allocation7 + $0x8] sm:$0xff]   ;;  %v14466_v52 = vrot.slane %v16251_v22, 1  ;;  %v5012_v31 = vsel %vm4955_vm6, %v14319_v18, %v8133_v3  ;;  %v16256_v36 = vmax.f32 %v14455_v21, 0.0  ;;  %v17001_v35 = vmax.f32 %v17000_v23, 0.0 }
 0x3dd   : > { %7582 = vmatprep.mubr.msk.bf16.mxu0 %vm8694_vm4, %v16525_v55  ;;  %v14471_v39 = vmax.f32 %v16999_v16, %v5789_v17  ;;  %v1702_v63 = vmul.f32 %v16610_v44, %v1602_v32  ;;  %v2274_v22 = vmul.f32 %v8932_v19, %v1602_v32  ;;  %6856 = vmatpush1.bf16.msra.mxu1 %v8514_v46  ;;  %v17002_v17 = vld [vmem:[#allocation41_spill] sm:$0xff]  ;;  %v8144_v18 = vunpack.i.h.bf16 %v8142_v60  ;;  %v14489_v16 = vpop.f32.mrf.mxu0  ;;  %v8147_v46 = vpop.permute.xlu0 %8146 }
 0x3de   : > { %v14478_v45 = vmax.f32 %v17001_v35, %v3208_v33  ;;  %v3401_v11 = vsel %vm1211_vm0, %v14462_v42, %v14466_v52  ;;  %v8143_v3 = vunpack.i.l.bf16 %v8142_v60  ;;  %17004 = vst [vmem:[#allocation15_spill] sm:$0xff] %v14489_v16  ;;  %6857 = vmatprep.subr.bf16.mxu1 %v16950_v43  ;;  %v5790_v19 = vrot.slane %v16256_v36, 2  ;;  %v17006_v60 = vld [vmem:[#allocation14_spill] sm:$0xff] }
 0x3df   : > { %v14487_v53 = vmax.f32 %v17002_v17, %v14471_v39  ;;  %v14492_v33 = vmax.f32 %v2940_v20, %v3401_v11  ;;  %v1986_v32 = vrot.slane %v1702_v63, 4  ;;  %v2558_v35 = vrot.slane %v2274_v22, 5  ;;  %v17005_v17 = vld [vmem:[#allocation16_spill] sm:$0xff]  ;;  %v7536_v62 = vpop.f32.mrf.mxu0 }
 0x3e0   : > { %v3668_v44 = vrot.slane %v14478_v45, 4  ;;  %v4932_v51 = vsel %vm4872_vm5, %v17005_v17, %v8144_v18  ;;  %v4931_v16 = vsel %vm4872_vm5, %v17006_v60, %v8143_v3  ;;  %v5791_v11 = vsel %vm3947_vm3, %v5788_v15, %v5790_v19  ;;  %v14517_v60 = vpop.permute.xlu1 %8151  ;;  %v8515_v20 = vld [vmem:[#allocation7] sm:$0xff]  }
 0x3e1   : > { %17003 = vst [vmem:[#allocation61_spill] sm:$0xff] %v14487_v53  ;;  %v17007_v36 = vrot.slane %v14040_v41, 4  ;;  %v17008_v63 = vrot.slane %v14341_v2, 4  ;;  %v14510_v22 = vmax.f32 %v5613_v27, %v5791_v11  ;;  %v17009_v62 = vrot.slane %v14348_v9, 5  ;;  %v14519_v15 = vpop.f32.mrf.mxu0  ;;  %6858 = vmatpush1.bf16.msra.mxu1 %v8515_v20 }
 0x3e2   : > { %6859 = vmatprep.subr.bf16.mxu1 %v16950_v43 }
 0x3e3   : > { %v3669_v5 = vsel %vm1798_vm1, %v17007_v36, %v3668_v44  ;;  %v1987_v23 = vsel %vm1798_vm1, %v17008_v63, %v1986_v32  ;;  %v2559_v3 = vsel %vm2370_vm2, %v17009_v62, %v2558_v35  ;;  %v17010_v36 = vrot.slane %v14163_v34, 4  ;;  %v17011_v32 = vld [vmem:[#allocation52_spill] sm:$0xff]  ;;  %v7537_v11 = vpop.f32.mrf.mxu0 }
 0x3e4   : > { %v3856_v18 = vmax.f32 %v14123_v26, %v3669_v5  ;;  %v2175_v17 = vadd.f32 %v1987_v23, %v14288_v47  ;;  %v14526_v27 = vadd.f32 %v14211_v54, %v17011_v32  ;;  %v8275_v26 = vpack.i.bf16 %v14225_v57, %v14095_v28  ;;  %v14562_v11 = vpop.permute.xlu1 %8161 }
 0x3e5   : > { %v3671_v2 = vsel %vm1798_vm1, %v3668_v44, %v17010_v36  ;;  %v5095_v47 = vsel %vm5038_vm7, %v5012_v31, %v8138_v37  ;;  %v14533_v9 = vmax.f32 %v14020_v56, %v14510_v22  ;;  %v17013_v62 = vunpack.i.h.bf16 %v14398_v40  ;;  %v8157_v37 = vpop.permute.xlu0 %8156  ;;  %v8516_v36 = vld [vmem:[#allocation7 + $0x78] sm:$0xff]  }
 0x3e6   : > { %v8265_v5 = vpack.i.bf16 %v3856_v18, %v14395_v6  ;;  %v4111_v23 = vrot.slane %v3856_v18, 2  ;;  %v2747_v35 = vadd.f32 %v2559_v3, %v2175_v17  ;;  %v14537_v44 = vmax.f32 %v13794_v49, %v3671_v2  ;;  %6860 = vmatpush2.bf16.msra.mxu1 %v8516_v36 }
 0x3e7   : > { %17012 = vst [vmem:[#allocation62_spill] sm:$0xff] %v14533_v9  ;;  %v5615_v63 = vmax.f32 %v14526_v27, 0.0  ;;  %v5096_v28 = vsel %vm5038_vm7, %v5013_v24, %v17013_v62  ;;  %v17014_v49 = vrot.slane %v14395_v6, 2  ;;  %v8153_v17 = vunpack.i.l.bf16 %v14517_v60  ;;  %v17015_v27 = vld [vmem:[#allocation59_spill] sm:$0xff]  ;;  %6861 = vmatprep.subr.bf16.mxu1 %v16950_v43 }
 0x3e8   : > { %8266 = vrot.lane.b32.xlu0 %v8265_v5, %s8690_s19  ;;  %v2848_v31 = vadd.f32 %v14085_v10, %v2747_v35  ;;  %v5149_v18 = vpack.c.bf16 %v5096_v28, %v5095_v47  ;;  %v16257_v40 = vrot.slane %v14537_v44, 2  ;;  %v8149_v3 = vunpack.i.h.bf16 %v8147_v46  ;;  %v17016_v10 = vld [vmem:[#allocation64_spill] sm:$0xff]  ;;  %v8172_v6 = vpop.permute.xlu1 %8171 }
 0x3e9   : > { %v14551_v20 = vsel %vm3947_vm3, %v17014_v49, %v4111_v23  ;;  %v5792_v24 = vrot.slane %v5615_v63, 2  ;;  %v8148_v32 = vunpack.i.l.bf16 %v8147_v46  ;;  %v14557_v5 = vadd.f32 %v14211_v54, %v17015_v27 }
 0x3ea   : > { %v2942_v2 = vmax.f32 %v2848_v31, 0.0  ;;  %7583 = vmatmul.mubr.bf16.gmra.mxu0 %v5149_v18  ;;  %v3212_v35 = vsel %vm1211_vm0, %v17016_v10, %v14270_v30  ;;  %v4613_v47 = vsel %vm3947_vm3, %v4111_v23, %v16257_v40  ;;  %v5015_v28 = vsel %vm4955_vm6, %v4932_v51, %v8149_v3  ;;  %v17017_v31 = vld [vmem:[#allocation28_spill] sm:$0xff]  ;;  %v17023_v40 = vld [vmem:[#allocation33_spill] sm:$0xff] }
 0x3eb   : > { %v5793_v62 = vsel %vm3947_vm3, %v5790_v19, %v5792_v24  ;;  %v17018_v46 = vmax.f32 %v17017_v31, 0.0  ;;  %7586 = vmatprep.mubr.msk.bf16.mxu0 %vm8694_vm4, %v16525_v55  ;;  %v8270_v30 = vpack.i.bf16 %v4613_v47, %v14551_v20  ;;  %v17019_v27 = vmax.f32 %v14455_v21, 0.0  ;;  %v8167_v31 = vpop.permute.xlu0 %8166  ;;  %v8517_v21 = vld [vmem:[#allocation7 + $0x70] sm:$0xff]  }
 0x3ec   : > { %v14575_v18 = vrot.slane %v2942_v2, 1  ;;  %8276 = vrot.lane.b32.xlu0 %v8275_v26, %s8691_s20  ;;  %v5014_v19 = vsel %vm4955_vm6, %v4931_v16, %v8148_v32  ;;  %v5616_v51 = vmax.f32 %v14557_v5, 0.0  ;;  %v8164_v3 = vunpack.i.h.bf16 %v14562_v11  ;;  %6862 = vmatpush2.bf16.msra.mxu1 %v8517_v21 }
 0x3ed   : > { %v14571_v49 = vmax.f32 %v17018_v46, %v3212_v35  ;;  %v14580_v10 = vmax.f32 %v17019_v27, %v5793_v62  ;;  %v8163_v35 = vunpack.i.l.bf16 %v14562_v11  ;;  %v14588_v46 = vpop.f32.mrf.mxu0  ;;  %8271 = vrot.lane.b32.xlu1 %v8270_v30, %s8692_s21  ;;  %v8159_v26 = vunpack.i.h.bf16 %v8157_v37  ;;  %v17022_v62 = vld [vmem:[#allocation38_spill] sm:$0xff]  ;;  %6863 = vmatprep.subr.bf16.mxu1 %v16950_v43 }
 0x3ee   : > { %v14592_v47 = vmax.f32 %v2942_v2, %v14575_v18  ;;  %v8158_v36 = vunpack.i.l.bf16 %v8157_v37  ;;  %v5794_v32 = vrot.slane %v5616_v51, 2  ;;  %v17021_v5 = vrot.slane %v14163_v34, 4 }
 0x3ef   : > { %v16259_v23 = vrot.slane %v14571_v49, 4  ;;  %v14597_v16 = vmax.f32 %v14135_v38, %v14580_v10  ;;  %v14606_v27 = vadd.f32 %v14211_v54, %v17022_v62  ;;  %v8290_v2 = vpack.i.bf16 %v14421_v50, %v14239_v12  ;;  %v7540_v30 = vpop.f32.mrf.mxu0  ;;  %v17024_v62 = vld [vmem:[#allocation46_spill] sm:$0xff] }
 0x3f0   : > { %v4934_v57 = vsel %vm4872_vm5, %v17023_v40, %v8159_v26  ;;  %v5097_v50 = vsel %vm5038_vm7, %v5014_v19, %v8153_v17  ;;  %v8174_v17 = vunpack.i.h.bf16 %v8172_v6  ;;  %v8173_v19 = vunpack.i.l.bf16 %v8172_v6 }
 0x3f1   : > { %17020 = vst [vmem:[#allocation56_spill] sm:$0xff] %v14597_v16  ;;  %v3673_v11 = vsel %vm1798_vm1, %v17021_v5, %v16259_v23  ;;  %v5795_v5 = vsel %vm3947_vm3, %v5792_v24, %v5794_v32  ;;  %v4933_v23 = vsel %vm4872_vm5, %v17024_v62, %v8158_v36  ;;  %v16260_v12 = vmax.f32 %v14606_v27, 0.0  ;;  %v14622_v30 = vpop.f32.mrf.mxu0  ;;  %v8177_v62 = vpop.permute.xlu0 %8176 }
 0x3f2   : > { %v14613_v37 = vmax.f32 %v14293_v1, %v3673_v11  ;;  %17025 = vst [vmem:[#allocation45_spill] sm:$0xff] %v14622_v30  ;;  %v14625_v1 = vmax.f32 %v5615_v63, %v5795_v5  ;;  %v17026_v24 = vunpack.i.h.bf16 %v14517_v60  ;;  %v17027_v63 = vld [vmem:[#allocation19_spill] sm:$0xff]  ;;  %v8169_v38 = vunpack.i.h.bf16 %v8167_v31 }
 0x3f3   : > { %v5796_v26 = vrot.slane %v16260_v12, 2  ;;  %v7541_v56 = vpop.f32.mrf.mxu0  ;;  %v8168_v11 = vunpack.i.l.bf16 %v8167_v31  ;;  %v5016_v60 = vsel %vm4955_vm6, %v4933_v23, %v8163_v35  ;;  %v8182_v23 = vpop.permute.xlu1 %8181 }
 0x3f4   : > { %v8280_v40 = vpack.i.bf16 %v14613_v37, %v14537_v44  ;;  %v5098_v21 = vsel %vm5038_vm7, %v5015_v28, %v17026_v24  ;;  %v14637_v5 = vmax.f32 %v17027_v63, %v14625_v1  ;;  %v17028_v24 = vld [vmem:[#allocation35_spill] sm:$0xff]  ;;  %v5017_v56 = vsel %vm4955_vm6, %v4934_v57, %v8164_v3  ;;  %v17032_v3 = vld [vmem:[#allocation29_spill] sm:$0xff] }
 0x3f5   : > { %v5150_v36 = vpack.c.bf16 %v5098_v21, %v5097_v50  ;;  %v5797_v28 = vsel %vm3947_vm3, %v5794_v32, %v5796_v26  ;;  %v4936_v50 = vsel %vm4872_vm5, %v17028_v24, %v8174_v17  ;;  %v17029_v21 = vld [vmem:[#allocation47_spill] sm:$0xff]  ;;  %v5100_v31 = vsel %vm5038_vm7, %v5017_v56, %v8169_v38 }
 0x3f6   : > { %8281 = vrot.lane.b32.xlu1 %v8280_v40, %s8690_s19  ;;  %v4935_v6 = vsel %vm4872_vm5, %v17029_v21, %v8173_v19  ;;  %v14648_v12 = vmax.f32 %v5616_v51, %v5797_v28  ;;  %v5099_v40 = vsel %vm5038_vm7, %v5016_v60, %v8168_v11  ;;  %v3674_v32 = vrot.slane %v14404_v0, 4  ;;  %v8518_v19 = vld [vmem:[#allocation7 + $0x68] sm:$0xff]   ;;  %v17033_v28 = vld [vmem:[#allocation39_spill] sm:$0xff] }
 0x3f7   : > { %7587 = vmatmul.mubr.bf16.gmra.mxu0 %v5150_v36  ;;  %v5151_v35 = vpack.c.bf16 %v5100_v31, %v5099_v40  ;;  %v17030_v36 = vrot.slane %v14613_v37, 2  ;;  %v17031_v17 = vrot.slane %v14537_v44, 2  ;;  %v5364_v51 = vadd.f32 %v14211_v54, %v17032_v3  ;;  %6864 = vmatpush2.bf16.msra.mxu1 %v8518_v19  ;;  %v8519_v3 = vld [vmem:[#allocation7 + $0x60] sm:$0xff]  }
 0x3f8   : > { %7590 = vmatprep.mubr.msk.bf16.mxu0 %vm8694_vm4, %v16525_v55  ;;  %v14664_v38 = vmax.f32 %v14280_v58, %v14648_v12  ;;  %v8179_v11 = vunpack.i.h.bf16 %v8177_v62  ;;  %v8178_v60 = vunpack.i.l.bf16 %v8177_v62  ;;  %v14669_v24 = vadd.f32 %v14211_v54, %v17033_v28  ;;  %v8187_v58 = vpop.permute.xlu0 %8186  ;;  %6865 = vmatprep.subr.bf16.mxu1 %v16950_v43 }
 0x3f9   : > { %v4615_v57 = vsel %vm3947_vm3, %v17031_v17, %v17030_v36  ;;  %v17034_v44 = vrot.slane %v14571_v49, 4  ;;  %v5618_v56 = vmax.f32 %v5364_v51, 0.0  ;;  %v3399_v40 = vsel %vm1211_vm0, %v14375_v13, %v14462_v42 }
 0x3fa   : > { %8291 = vrot.lane.b32.xlu1 %v8290_v2, %s8691_s20  ;;  %v8184_v31 = vunpack.i.h.bf16 %v8182_v23  ;;  %v5019_v36 = vsel %vm4955_vm6, %v4936_v50, %v8179_v11  ;;  %v5018_v17 = vsel %vm4955_vm6, %v4935_v6, %v8178_v60  ;;  %v5619_v51 = vmax.f32 %v14669_v24, 0.0 }
 0x3fb   : > { %v3675_v21 = vsel %vm1798_vm1, %v17034_v44, %v3674_v32  ;;  %v5798_v28 = vrot.slane %v5618_v56, 2  ;;  %v17035_v44 = vmax.f32 %v14345_v29, 0.0  ;;  %v8183_v42 = vunpack.i.l.bf16 %v8182_v23  ;;  %6866 = vmatpush2.bf16.msra.mxu1 %v8519_v3 }
 0x3fc   : > { %v3859_v62 = vmax.f32 %v14040_v41, %v3675_v21  ;;  %v5102_v19 = vsel %vm5038_vm7, %v5019_v36, %v8184_v31  ;;  %v8189_v2 = vunpack.i.h.bf16 %v8187_v58  ;;  %v8188_v30 = vunpack.i.l.bf16 %v8187_v58  ;;  %v14686_v41 = vpop.f32.mrf.mxu0  ;;  %v17038_v58 = vld [vmem:[#allocation54_spill] sm:$0xff]  ;;  %6867 = vmatprep.subr.bf16.mxu1 %v16950_v43 }
 0x3fd   : > { %v3408_v13 = vmax.f32 %v17035_v44, %v3399_v40  ;;  %v5799_v50 = vsel %vm3947_vm3, %v5796_v26, %v5798_v28  ;;  %v5800_v6 = vrot.slane %v5619_v51, 2  ;;  %v5101_v60 = vsel %vm5038_vm7, %v5018_v17, %v8183_v42  ;;  %v8520_v17 = vld [vmem:[#allocation7 + $0x58] sm:$0xff]  }
 0x3fe   : > { %v4616_v63 = vrot.slane %v3859_v62, 2  ;;  %v17036_v29 = vrot.slane %v14613_v37, 2  ;;  %v17037_v21 = vmax.f32 %v14606_v27, 0.0  ;;  %v5152_v31 = vpack.c.bf16 %v5102_v19, %v5101_v60  ;;  %v7544_v36 = vpop.f32.mrf.mxu0  ;;  %v17039_v44 = vld [vmem:[#allocation32_spill] sm:$0xff] }
 0x3ff   : > { %v3676_v11 = vrot.slane %v3408_v13, 4  ;;  %7591 = vmatmul.mubr.bf16.gmra.mxu0 %v5151_v35  ;;  %v14701_v26 = vsel %vm4872_vm5, %v17038_v58, %v8189_v2  ;;  %v5801_v3 = vsel %vm3947_vm3, %v5798_v28, %v5800_v6  ;;  %v14709_v27 = vsel %vm4872_vm5, %v17039_v44, %v8188_v30  ;;  %6868 = vmatpush2.bf16.msra.mxu1 %v8520_v17 }
 0x400   : > { %v4617_v23 = vsel %vm3947_vm3, %v17036_v29, %v4616_v63  ;;  %v14697_v40 = vmax.f32 %v17037_v21, %v5799_v50  ;;  %7594 = vmatprep.mubr.msk.bf16.mxu0 %vm8694_vm4, %v16525_v55  ;;  %v14716_v13 = vmax.f32 %v5618_v56, %v5801_v3  ;;  %v14722_v19 = vpop.f32.mrf.mxu0  ;;  %6869 = vmatprep.subr.bf16.mxu1 %v16950_v43 }
 0x401   : > { %v8285_v35 = vpack.i.bf16 %v4617_v23, %v4615_v57  ;;  %v3677_v37 = vsel %vm1798_vm1, %v3674_v32, %v3676_v11  ;;  %v17040_v57 = vrot.slane %v14492_v33, 4  ;;  %v17041_v32 = vld [vmem:[#allocation51_spill] sm:$0xff]  ;;  %v14750_v17 = vadd.f32 %v14211_v54, %v14299_v61 }
 0x402   : > { %v14714_v2 = vmax.f32 %v14334_v4, %v14697_v40  ;;  %v3860_v42 = vmax.f32 %v14478_v45, %v3677_v37  ;;  %v5372_v50 = vadd.f32 %v14211_v54, %v17041_v32  ;;  %v8305_v4 = vpack.i.bf16 %v14551_v20, %v14444_v25  ;;  %v7545_v23 = vpop.f32.mrf.mxu0 }
 0x403   : > { %v3679_v28 = vsel %vm1798_vm1, %v3676_v11, %v17040_v57  ;;  %8286 = vrot.lane.b32.xlu0 %v8285_v35, %s8692_s21  ;;  %v5375_v45 = vadd.f32 %v14211_v54, %v14200_v8  ;;  %v14737_v11 = vmax.f32 %v14377_v7, %v14716_v13  ;;  %v3403_v25 = vsel %vm1211_vm0, %v14466_v52, %v14575_v18  ;;  %v17048_v23 = vld [vmem:[#allocation34_spill] sm:$0xff] }
 0x404   : > { %v14726_v30 = vmax.f32 %v14163_v34, %v3679_v28  ;;  %v6248_v56 = vrot.slane %v14714_v2, 4  ;;  %v8295_v60 = vpack.i.bf16 %v3860_v42, %v3859_v62  ;;  %v4618_v29 = vrot.slane %v3860_v42, 2  ;;  %v8521_v34 = vld [vmem:[#allocation7 + $0x50] sm:$0xff]   ;;  %v14765_v28 = vpop.f32.mrf.mxu0 }
 0x405   : > { %v5620_v58 = vmax.f32 %v5372_v50, 0.0  ;;  %v5621_v36 = vmax.f32 %v5375_v45, 0.0  ;;  %v6250_v8 = vrot.slane %v14737_v11, 4  ;;  %v17042_v20 = vmax.f32 %v14436_v48, 0.0  ;;  %6870 = vmatpush2.bf16.msra.mxu1 %v8521_v34 }
 0x406   : > { %v4620_v21 = vrot.slane %v14726_v30, 2  ;;  %v4619_v7 = vsel %vm3947_vm3, %v4616_v63, %v4618_v29  ;;  %v17043_v52 = vrot.slane %v14664_v38, 4  ;;  %v17044_v18 = vrot.slane %v14637_v5, 4  ;;  %6871 = vmatprep.subr.bf16.mxu1 %v16950_v43 }
 0x407   : > { %v3410_v62 = vmax.f32 %v17042_v20, %v3403_v25  ;;  %8296 = vrot.lane.b32.xlu0 %v8295_v60, %s8690_s19  ;;  %v5802_v3 = vrot.slane %v5620_v58, 2  ;;  %v5804_v37 = vrot.slane %v5621_v36, 2  ;;  %7595 = vmatmul.mubr.bf16.gmra.mxu0 %v5152_v31  ;;  %v5622_v42 = vmax.f32 %v14750_v17, 0.0  ;;  %v8522_v31 = vld [vmem:[#allocation7 + $0x48] sm:$0xff]  }
 0x408   : > { %v4621_v35 = vsel %vm3947_vm3, %v4618_v29, %v4620_v21  ;;  %v6247_v63 = vsel %vm1798_vm1, %v17044_v18, %v17043_v52  ;;  %v17045_v61 = vmov %v17043_v52  ;;  %7598 = vmatprep.mubr.msk.bf16.mxu0 %vm8694_vm4, %v16525_v55  ;;  %v17046_v60 = vld [vmem:[#allocation42_spill] sm:$0xff]  ;;  %v17049_v25 = vrot.slane %v17048_v23, 4 }
 0x409   : > { %v8300_v44 = vpack.i.bf16 %v4621_v35, %v4619_v7  ;;  %v3680_v48 = vrot.slane %v3410_v62, 4  ;;  %v6249_v57 = vsel %vm1798_vm1, %v17045_v61, %v6248_v56  ;;  %v5803_v32 = vsel %vm3947_vm3, %v5800_v6, %v5802_v3  ;;  %6872 = vmatpush2.bf16.msra.mxu1 %v8522_v31 }
 0x40a   : > { %v5805_v50 = vsel %vm3947_vm3, %v5802_v3, %v5804_v37  ;;  %v8320_v45 = vpack.i.bf16 %v6249_v57, %v6247_v63  ;;  %v17047_v29 = vrot.slane %v17046_v60, 4  ;;  %v14780_v20 = vmax.f32 %v5619_v51, %v5803_v32  ;;  %v7548_v3 = vpop.f32.mrf.mxu0  ;;  %v17052_v51 = vld [vmem:[#allocation49_spill] sm:$0xff]  ;;  %6873 = vmatprep.subr.bf16.mxu1 %v16950_v43 }
 0x40b   : > { %8301 = vrot.lane.b32.xlu1 %v8300_v44, %s8692_s21  ;;  %v14782_v34 = vmax.f32 %v5620_v58, %v5805_v50  ;;  %v17050_v6 = vrot.slane %v14492_v33, 4  ;;  %v17051_v17 = vrot.slane %v14592_v47, 4  ;;  %8306 = vrot.lane.b32.xlu0 %v8305_v4, %s8691_s20  ;;  %v5806_v24 = vrot.slane %v5622_v42, 2  ;;  %s15808_s20 = scalar_lea.vmem %s15929_s7, %s7635_s12 }
 0x40c   : > { %v6219_v7 = vsel %vm1798_vm1, %v17049_v25, %v17047_v29  ;;  %v17053_v63 = vrot.slane %v17052_v51, 4  ;;  %v17054_v58 = vmov %v17047_v29  ;;  %v14800_v44 = vmax.f32 %v14471_v39, %v14780_v20 }
 0x40d   : > { %v3681_v62 = vsel %vm1798_vm1, %v17050_v6, %v3680_v48  ;;  %v3683_v35 = vsel %vm1798_vm1, %v3680_v48, %v17051_v17  ;;  %v14804_v47 = vmax.f32 %v14510_v22, %v14782_v34  ;;  %v8523_v48 = vld [vmem:[#allocation7 + $0x40] sm:$0xff]   ;;  %v5807_v50 = vsel %vm3947_vm3, %v5804_v37, %v5806_v24 }
 0x40e   : > { %v3862_v52 = vmax.f32 %v14571_v49, %v3681_v62  ;;  %v3863_v18 = vmax.f32 %v14404_v0, %v3683_v35  ;;  %v6221_v33 = vsel %vm1798_vm1, %v17054_v58, %v17053_v63  ;;  %v5383_v49 = vadd.f32 %v14211_v54, %v14332_v14  ;;  %v14808_v0 = vpop.f32.mrf.mxu0  ;;  %v17058_v62 = vld [vmem:[#allocation22_spill] sm:$0xff]  ;;  %6874 = vmatpush2.bf16.msra.mxu1 %v8523_v48 }
 0x40f   : > { %v8325_v4 = vpack.i.bf16 %v6221_v33, %v6219_v7  ;;  %v6252_v39 = vrot.slane %v14800_v44, 4  ;;  %v6254_v22 = vrot.slane %v14804_v47, 4  ;;  %v14815_v29 = vmax.f32 %v5621_v36, %v5807_v50  ;;  %v17064_v50 = vld [vmem:[#allocation23_spill] sm:$0xff] }
 0x410   : > { %v4622_v61 = vrot.slane %v3862_v52, 2  ;;  %v8310_v57 = vpack.i.bf16 %v3862_v52, %v14726_v30  ;;  %v4624_v32 = vrot.slane %v3863_v18, 2  ;;  %v5623_v25 = vmax.f32 %v5383_v49, 0.0  ;;  %v7549_v14 = vpop.f32.mrf.mxu0  ;;  %v17055_v30 = vld [vmem:[#allocation37_spill] sm:$0xff]  ;;  %v17061_v49 = vld [vmem:[#allocation18_spill] sm:$0xff] }
 0x411   : > { %v17056_v6 = vrot.slane %v17055_v30, 4  ;;  %v17057_v37 = vmov %v17053_v63  ;;  %v17059_v17 = vrot.slane %v17058_v62, 4  ;;  %v14832_v52 = vmax.f32 %v14580_v10, %v14815_v29 }
 0x412   : > { %8311 = vrot.lane.b32.xlu1 %v8310_v57, %s8690_s19  ;;  %v4623_v31 = vsel %vm3947_vm3, %v4620_v21, %v4622_v61  ;;  %v4625_v7 = vsel %vm3947_vm3, %v4622_v61, %v4624_v32  ;;  %v5808_v21 = vrot.slane %v5623_v25, 2  ;;  %v5388_v63 = vadd.f32 %v14211_v54, %v14400_v59 }
 0x413   : > { %v6223_v43 = vsel %vm1798_vm1, %v17057_v37, %v17056_v6  ;;  %v17060_v35 = vmov %v17056_v6  ;;  %v8315_v3 = vpack.i.bf16 %v4625_v7, %v4623_v31  ;;  %v6251_v58 = vsel %vm1798_vm1, %v6248_v56, %v6250_v8  ;;  %v17067_v37 = vld [vmem:[#allocation65_spill] sm:$0xff] }
 0x414   : > { %v6225_v36 = vsel %vm1798_vm1, %v17060_v35, %v17059_v17  ;;  %v6253_v33 = vsel %vm1798_vm1, %v6250_v8, %v6252_v39  ;;  %v17062_v61 = vrot.slane %v17061_v49, 4  ;;  %v17063_v10 = vmov %v17059_v17  ;;  %v17068_v17 = vld [vmem:[#allocation13_spill] sm:$0xff] }
 0x415   : > { %v8335_v18 = vpack.i.bf16 %v6225_v36, %v6223_v43  ;;  %8316 = vrot.lane.b32.xlu0 %v8315_v3, %s8692_s21  ;;  %v6256_v59 = vrot.slane %v14832_v52, 4  ;;  %v5809_v48 = vsel %vm3947_vm3, %v5806_v24, %v5808_v21  ;;  %v8330_v32 = vpack.i.bf16 %v6253_v33, %v6251_v58  ;;  %v17071_v3 = vld [vmem:[#allocation44_spill] sm:$0xff] }
 0x416   : > { %v6227_v57 = vsel %vm1798_vm1, %v17063_v10, %v17062_v61  ;;  %v17065_v14 = vrot.slane %v17064_v50, 4  ;;  %v17066_v56 = vmov %v17062_v61  ;;  %8321 = vrot.lane.b32.xlu1 %v8320_v45, %s8690_s19  ;;  %v14858_v8 = vmax.f32 %v5622_v42, %v5809_v48  ;;  %v17074_v42 = vld [vmem:[#allocation15_spill] sm:$0xff] }
 0x417   : > { %v5624_v7 = vmax.f32 %v5388_v63, 0.0  ;;  %v5391_v43 = vadd.f32 %v14211_v54, %v17067_v37  ;;  %v17069_v35 = vrot.slane %v17068_v17, 4  ;;  %v17072_v58 = vrot.slane %v17071_v3, 4  ;;  %v17075_v37 = vld [vmem:[#allocation63_spill] sm:$0xff] }
 0x418   : > { %v6229_v31 = vsel %vm1798_vm1, %v17066_v56, %v17065_v14  ;;  %v17070_v24 = vmov %v17065_v14  ;;  %v5396_v63 = vadd.f32 %v14211_v54, %v17074_v42  ;;  %v6255_v61 = vsel %vm1798_vm1, %v6252_v39, %v6254_v22 }
 0x419   : > { %v8345_v6 = vpack.i.bf16 %v6229_v31, %v6227_v57  ;;  %v14867_v36 = vsel %vm1798_vm1, %v17070_v24, %v17069_v35  ;;  %v17073_v33 = vmov %v17069_v35  ;;  %v14881_v10 = vmax.f32 %v14625_v1, %v14858_v8  ;;  %8326 = vrot.lane.b32.xlu0 %v8325_v4, %s8690_s19 }
 0x41a   : > { %v14874_v45 = vsel %vm1798_vm1, %v17073_v33, %v17072_v58  ;;  %v5810_v57 = vrot.slane %v5624_v7, 2  ;;  %v5625_v48 = vmax.f32 %v5391_v43, 0.0  ;;  %v5626_v56 = vmax.f32 %v5396_v63, 0.0  ;;  %8331 = vrot.lane.b32.xlu1 %v8330_v32, %s8690_s19 }
 0x41b   : > { %v8355_v14 = vpack.i.bf16 %v14874_v45, %v14867_v36  ;;  %v6257_v31 = vsel %vm1798_vm1, %v6254_v22, %v6256_v59  ;;  %v17076_v35 = vrot.slane %v17075_v37, 4  ;;  %v17077_v24 = vmov %v17072_v58  ;;  %v17078_v58 = vld [vmem:[#allocation26_spill] sm:$0xff]  ;;  %v14910_v37 = vpop.f32.mrf.mxu0 }
 0x41c   : > { %v17079_v1 = vrot.slane %v17078_v58, 4  ;;  %v6258_v36 = vrot.slane %v14881_v10, 4  ;;  %v5811_v4 = vsel %vm3947_vm3, %v5808_v21, %v5810_v57  ;;  %v5812_v22 = vrot.slane %v5625_v48, 2 }
 0x41d   : > { %v14892_v39 = vsel %vm1798_vm1, %v17077_v24, %v17076_v35  ;;  %v17080_v33 = vmov %v17076_v35  ;;  %v8340_v45 = vpack.i.bf16 %v6257_v31, %v6255_v61  ;;  %v14904_v42 = vmax.f32 %v5623_v25, %v5811_v4  ;;  %8336 = vrot.lane.b32.xlu0 %v8335_v18, %s8690_s19  ;;  %v8192_v35 = vpop.permute.xlu1 %8191 }
 0x41e   : > { %v14899_v43 = vsel %vm1798_vm1, %v17080_v33, %v17079_v1  ;;  %v5814_v63 = vrot.slane %v5626_v56, 2  ;;  %v5399_v24 = vadd.f32 %v14211_v54, %v14519_v15  ;;  %v5813_v1 = vsel %vm3947_vm3, %v5810_v57, %v5812_v22 }
 0x41f   : > { %v17081_v33 = vrot.slane %v14487_v53, 4  ;;  %v17082_v21 = vrot.slane %v17078_v58, 4  ;;  %v17083_v25 = vrot.slane %v14533_v9, 4  ;;  %v5404_v15 = vadd.f32 %v14211_v54, %v14588_v46  ;;  %v7552_v58 = vpop.f32.mrf.mxu0  ;;  %8341 = vrot.lane.b32.xlu1 %v8340_v45, %s8690_s19 }
 0x420   : > { %v14932_v57 = vmax.f32 %v14648_v12, %v14904_v42  ;;  %v14934_v4 = vmax.f32 %v5624_v7, %v5813_v1  ;;  %v6259_v18 = vsel %vm1798_vm1, %v6256_v59, %v6258_v36  ;;  %v8194_v50 = vunpack.i.h.bf16 %v8192_v35 }
 0x421   : > { %v14918_v32 = vsel %vm1798_vm1, %v17082_v21, %v17081_v33  ;;  %v17084_v61 = vmov %v17081_v33  ;;  %v5815_v33 = vsel %vm3947_vm3, %v5812_v22, %v5814_v63  ;;  %v5627_v21 = vmax.f32 %v5399_v24, 0.0  ;;  %v14955_v45 = vpop.f32.mrf.mxu0  ;;  %8346 = vrot.lane.b32.xlu0 %v8345_v6, %s8690_s19 }
 0x422   : > { %v14925_v31 = vsel %vm1798_vm1, %v17084_v61, %v17083_v25  ;;  %17085 = vst [vmem:[#allocation57_spill] sm:$0xff] %v14932_v57  ;;  %v14937_v53 = vmax.f32 %v5625_v48, %v5815_v33  ;;  %v5628_v25 = vmax.f32 %v5404_v15, 0.0  ;;  %v6260_v12 = vrot.slane %v14932_v57, 4  ;;  %v17091_v33 = vld [vmem:[#allocation45_spill] sm:$0xff]  ;;  %v8202_v57 = vpop.permute.xlu1 %8201 }
 0x423   : > { %v14946_v7 = vmax.f32 %v14697_v40, %v14934_v4  ;;  %v5816_v22 = vrot.slane %v5627_v21, 2  ;;  %v17087_v24 = vrot.slane %v14597_v16, 4  ;;  %v17088_v48 = vrot.slane %v14533_v9, 4  ;;  %v7553_v3 = vpop.f32.mrf.mxu0 }
 0x424   : > { %v14959_v1 = vmax.f32 %v14716_v13, %v14937_v53  ;;  %v5818_v59 = vrot.slane %v5628_v25, 2  ;;  %v17089_v61 = vrot.slane %v14637_v5, 4  ;;  %v5407_v46 = vadd.f32 %v14211_v54, %v17091_v33 }
 0x425   : > { %17086 = vst [vmem:[#allocation20_spill] sm:$0xff] %v14946_v7  ;;  %v14953_v58 = vsel %vm1798_vm1, %v17088_v48, %v17087_v24  ;;  %v17090_v40 = vmov %v17087_v24  ;;  %v6262_v24 = vrot.slane %v14946_v7, 4  ;;  %v5817_v48 = vsel %vm3947_vm3, %v5814_v63, %v5816_v22  ;;  %8356 = vrot.lane.b32.xlu0 %v8355_v14, %s8690_s19 }
 0x426   : > { %v14966_v15 = vsel %vm1798_vm1, %v17090_v40, %v17089_v61  ;;  %v6261_v13 = vsel %vm1798_vm1, %v6258_v36, %v6260_v12  ;;  %v6264_v16 = vrot.slane %v14959_v1, 4  ;;  %v14977_v17 = vmax.f32 %v5626_v56, %v5817_v48 }
 0x427   : > { %v8385_v9 = vpack.i.bf16 %v14966_v15, %v14953_v58  ;;  %v5819_v61 = vsel %vm3947_vm3, %v5816_v22, %v5818_v59  ;;  %v8350_v40 = vpack.i.bf16 %v6261_v13, %v6259_v18  ;;  %v5629_v6 = vmax.f32 %v5407_v46, 0.0 }
 0x428   : > { %v14980_v33 = vmax.f32 %v5627_v21, %v5819_v61  ;;  %v8193_v7 = vunpack.i.l.bf16 %v8192_v35  ;;  %v14984_v36 = vmax.f32 %v14780_v20, %v14977_v17  ;;  %v14989_v3 = vadd.f32 %v14211_v54, %v14686_v41  ;;  %v8197_v21 = vpop.permute.xlu0 %8196 }
 0x429   : > { %8351 = vrot.lane.b32.xlu1 %v8350_v40, %s8690_s19  ;;  %v6263_v56 = vsel %vm1798_vm1, %v6260_v12, %v6262_v24  ;;  %v6265_v63 = vsel %vm1798_vm1, %v6262_v24, %v6264_v16  ;;  %v5820_v46 = vrot.slane %v5629_v6, 2  ;;  %v5021_v18 = vsel %vm4955_vm6, %v14701_v26, %v8194_v50 }
 0x42a   : > { %v14996_v35 = vmax.f32 %v14782_v34, %v14980_v33  ;;  %v5020_v20 = vsel %vm4955_vm6, %v14709_v27, %v8193_v7  ;;  %v6266_v54 = vrot.slane %v14984_v36, 4  ;;  %v5630_v41 = vmax.f32 %v14989_v3, 0.0  ;;  %v17092_v27 = vld [vmem:[#allocation43_spill] sm:$0xff] }
 0x42b   : > { %v8360_v12 = vpack.i.bf16 %v6265_v63, %v6263_v56  ;;  %v8204_v22 = vunpack.i.h.bf16 %v8202_v57  ;;  %v5821_v14 = vsel %vm3947_vm3, %v5818_v59, %v5820_v46  ;;  %v8203_v48 = vunpack.i.l.bf16 %v8202_v57  ;;  %v17094_v3 = vld [vmem:[#allocation31_spill] sm:$0xff] }
 0x42c   : > { %v6268_v24 = vrot.slane %v14996_v35, 4  ;;  %v8199_v34 = vunpack.i.h.bf16 %v8197_v21  ;;  %v15006_v13 = vmax.f32 %v5628_v25, %v5821_v14  ;;  %v5822_v61 = vrot.slane %v5630_v41, 2  ;;  %v8207_v7 = vpop.permute.xlu0 %8206  ;;  %v15018_v25 = vld [vmem:[#allocation6] ss:$0 sm:$0xff] }
 0x42d   : > { %8361 = vrot.lane.b32.xlu1 %v8360_v12, %s8690_s19  ;;  %v4940_v26 = vsel %vm4872_vm5, %v17092_v27, %v8204_v22  ;;  %v8198_v50 = vunpack.i.l.bf16 %v8197_v21  ;;  %v17093_v40 = vpack.i.bf16 %v14899_v43, %v14892_v39  ;;  %v4939_v59 = vsel %vm4872_vm5, %v17094_v3, %v8203_v48  ;;  %v8212_v21 = vpop.permute.xlu1 %8211 }
 0x42e   : > { %v5104_v57 = vsel %vm5038_vm7, %v5021_v18, %v8199_v34  ;;  %v5415_v56 = vadd.f32 %v15018_v25, %v14722_v19  ;;  %v5420_v63 = vadd.f32 %v15018_v25, %v14765_v28  ;;  %v15026_v12 = vmax.f32 %v14815_v29, %v15006_v13  ;;  %v15031_v18 = vpop.f32.mrf.mxu0 }
 0x42f   : > { %8366 = vrot.lane.b32.xlu0 %v17093_v40, %s8690_s19  ;;  %v5823_v39 = vsel %vm3947_vm3, %v5820_v46, %v5822_v61  ;;  %v5103_v43 = vsel %vm5038_vm7, %v5020_v20, %v8198_v50  ;;  %v6267_v22 = vsel %vm1798_vm1, %v6264_v16, %v6266_v54  ;;  %v6269_v29 = vsel %vm1798_vm1, %v6266_v54, %v6268_v24 }
 0x430   : > { %v15033_v14 = vmax.f32 %v5629_v6, %v5823_v39  ;;  %v5153_v48 = vpack.c.bf16 %v5104_v57, %v5103_v43  ;;  %v5631_v19 = vmax.f32 %v5415_v56, 0.0  ;;  %v5632_v34 = vmax.f32 %v5420_v63, 0.0  ;;  %v7556_v46 = vpop.f32.mrf.mxu0  ;;  %v8217_v63 = vpop.permute.xlu0 %8216 }
 0x431   : > { %v6270_v28 = vrot.slane %v15026_v12, 4  ;;  %v8209_v27 = vunpack.i.h.bf16 %v8207_v7  ;;  %v8208_v40 = vunpack.i.l.bf16 %v8207_v7  ;;  %v17095_v16 = vpack.i.bf16 %v14925_v31, %v14918_v32 }
 0x432   : > { %v15045_v6 = vmax.f32 %v14858_v8, %v15033_v14  ;;  %v5824_v20 = vrot.slane %v5631_v19, 2  ;;  %v5826_v50 = vrot.slane %v5632_v34, 2  ;;  %7599 = vmatmul.mubr.bf16.gmra.mxu0 %v5153_v48  ;;  %v8370_v3 = vpack.i.bf16 %v6269_v29, %v6267_v22  ;;  %v5438_v32 = vpop.f32.mrf.mxu0 }
 0x433   : > { %8376 = vrot.lane.b32.xlu0 %v17095_v16, %s8690_s19  ;;  %v5023_v57 = vsel %vm4955_vm6, %v4940_v26, %v8209_v27  ;;  %v5022_v54 = vsel %vm4955_vm6, %v4939_v59, %v8208_v40  ;;  %v15051_v7 = vadd.f32 %v15018_v25, %v14808_v0  ;;  %v8214_v56 = vunpack.i.h.bf16 %v8212_v21  ;;  %7602 = vmatprep.mubr.msk.bf16.mxu0 %vm8694_vm4, %v16525_v55  ;;  %v8222_v59 = vpop.permute.xlu1 %8221 }
 0x434   : > { %v6272_v8 = vrot.slane %v15045_v6, 4  ;;  %v5825_v31 = vsel %vm3947_vm3, %v5822_v61, %v5824_v20  ;;  %v5827_v39 = vsel %vm3947_vm3, %v5824_v20, %v5826_v50  ;;  %8371 = vrot.lane.b32.xlu1 %v8370_v3, %s8690_s19  ;;  %v8213_v26 = vunpack.i.l.bf16 %v8212_v21  ;;  %v7557_v29 = vpop.f32.mrf.mxu0  ;;  %v8227_v16 = vpop.permute.xlu0 %8226 }
 0x435   : > { %v15059_v43 = vmax.f32 %v5630_v41, %v5825_v31  ;;  %v15061_v0 = vmax.f32 %v5631_v19, %v5827_v39  ;;  %v5633_v22 = vmax.f32 %v15051_v7, 0.0  ;;  %v5106_v48 = vsel %vm5038_vm7, %v5023_v57, %v8214_v56  ;;  %v17096_v57 = vld [vmem:[#allocation50_spill] sm:$0xff] }
 0x436   : > { %v5105_v61 = vsel %vm5038_vm7, %v5022_v54, %v8213_v26  ;;  %v8219_v27 = vunpack.i.h.bf16 %v8217_v63  ;;  %v8218_v46 = vunpack.i.l.bf16 %v8217_v63  ;;  %v6273_v58 = vsel %vm1798_vm1, %v6270_v28, %v6272_v8 }
 0x437   : > { %8386 = vrot.lane.b32.xlu0 %v8385_v9, %s8690_s19  ;;  %v15072_v21 = vmax.f32 %v14904_v42, %v15059_v43  ;;  %v15076_v41 = vmax.f32 %v14934_v4, %v15061_v0  ;;  %v5828_v19 = vrot.slane %v5633_v22, 2  ;;  %v5154_v40 = vpack.c.bf16 %v5106_v48, %v5105_v61  ;;  %v8232_v63 = vpop.permute.xlu1 %8231 }
 0x438   : > { %v6271_v9 = vsel %vm1798_vm1, %v6268_v24, %v6270_v28  ;;  %v8224_v15 = vunpack.i.h.bf16 %v8222_v59  ;;  %v4942_v54 = vsel %vm4872_vm5, %v17096_v57, %v8219_v27  ;;  %v8223_v56 = vunpack.i.l.bf16 %v8222_v59 }
 0x439   : > { %v6274_v42 = vrot.slane %v15072_v21, 4  ;;  %v6276_v20 = vrot.slane %v15076_v41, 4  ;;  %v5829_v4 = vsel %vm3947_vm3, %v5826_v50, %v5828_v19  ;;  %v8380_v3 = vpack.i.bf16 %v6273_v58, %v6271_v9  ;;  %v17097_v50 = vld [vmem:[#allocation30_spill] sm:$0xff] }
 0x43a   : > { %7603 = vmatmul.mubr.bf16.gmra.mxu0 %v5154_v40  ;;  %v15089_v31 = vmax.f32 %v5632_v34, %v5829_v4  ;;  %v8229_v39 = vunpack.i.h.bf16 %v8227_v16  ;;  %v4941_v26 = vsel %vm4872_vm5, %v17097_v50, %v8218_v46  ;;  %v5025_v59 = vsel %vm4955_vm6, %v4942_v54, %v8224_v15  ;;  %v8237_v40 = vpop.permute.xlu0 %8236 }
 0x43b   : > { %8381 = vrot.lane.b32.xlu1 %v8380_v3, %s8690_s19  ;;  %v6275_v24 = vsel %vm1798_vm1, %v6272_v8, %v6274_v42  ;;  %v6277_v28 = vsel %vm1798_vm1, %v6274_v42, %v6276_v20  ;;  %7606 = vmatprep.mubr.msk.bf16.mxu0 %vm8694_vm4, %v16525_v55  ;;  %v8234_v34 = vunpack.i.h.bf16 %v8232_v63  ;;  %v8228_v29 = vunpack.i.l.bf16 %v8227_v16 }
 0x43c   : > { %v8390_v48 = vpack.i.bf16 %v6277_v28, %v6275_v24  ;;  %v5108_v61 = vsel %vm5038_vm7, %v5025_v59, %v8229_v39  ;;  %v5428_v8 = vadd.f32 %v15018_v25, %v14910_v37  ;;  %v5024_v27 = vsel %vm4955_vm6, %v4941_v26, %v8223_v56  ;;  %v17099_v39 = vld [vmem:[#allocation40_spill] sm:$0xff] }
 0x43d   : > { %v5431_v9 = vadd.f32 %v15018_v25, %v14955_v45  ;;  %v5436_v58 = vadd.f32 %v15018_v25, %v15031_v18  ;;  %v5439_v46 = vadd.f32 %v15018_v25, %v5438_v32  ;;  %v15112_v15 = vmax.f32 %v14937_v53, %v15089_v31  ;;  %v17098_v18 = vld [vmem:[#allocation60_spill] sm:$0xff] }
 0x43e   : > { %v8233_v16 = vunpack.i.l.bf16 %v8232_v63  ;;  %v5107_v37 = vsel %vm5038_vm7, %v5024_v27, %v8228_v29  ;;  %v5634_v42 = vmax.f32 %v5428_v8, 0.0  ;;  %v8239_v54 = vunpack.i.h.bf16 %v8237_v40  ;;  %v8242_v29 = vpop.permute.xlu1 %8241 }
 0x43f   : > { %8391 = vrot.lane.b32.xlu1 %v8390_v48, %s8690_s19  ;;  %v5155_v4 = vpack.c.bf16 %v5108_v61, %v5107_v37  ;;  %v5635_v3 = vmax.f32 %v5431_v9, 0.0  ;;  %v5636_v57 = vmax.f32 %v5436_v58, 0.0  ;;  %v8238_v45 = vunpack.i.l.bf16 %v8237_v40  ;;  %v5443_v48 = vpop.f32.mrf.mxu0 }
 0x440   : > { %v5830_v56 = vrot.slane %v5634_v42, 2  ;;  %v5637_v24 = vmax.f32 %v5439_v46, 0.0  ;;  %v4944_v32 = vsel %vm4872_vm5, %v17098_v18, %v8234_v34  ;;  %v6278_v63 = vrot.slane %v15112_v15, 4 }
 0x441   : > { %v5832_v28 = vrot.slane %v5635_v3, 2  ;;  %v5834_v53 = vrot.slane %v5636_v57, 2  ;;  %v4943_v50 = vsel %vm4872_vm5, %v17099_v39, %v8233_v16  ;;  %v5444_v27 = vadd.f32 %v15018_v25, %v5443_v48 }
 0x442   : > { %7607 = vmatmul.mubr.bf16.gmra.mxu0 %v5155_v4  ;;  %v5831_v26 = vsel %vm3947_vm3, %v5828_v19, %v5830_v56  ;;  %v5836_v59 = vrot.slane %v5637_v24, 2  ;;  %v5027_v40 = vsel %vm4955_vm6, %v4944_v32, %v8239_v54  ;;  %v5026_v9 = vsel %vm4955_vm6, %v4943_v50, %v8238_v45  ;;  %v7560_v19 = vpop.f32.mrf.mxu0 }
 0x443   : > { %7610 = vmatprep.mubr.msk.bf16.mxu0 %vm8694_vm4, %v16525_v55  ;;  %v15126_v61 = vmax.f32 %v5633_v22, %v5831_v26  ;;  %v5833_v34 = vsel %vm3947_vm3, %v5830_v56, %v5832_v28  ;;  %v5835_v8 = vsel %vm3947_vm3, %v5832_v28, %v5834_v53  ;;  %v8244_v58 = vunpack.i.h.bf16 %v8242_v29 }
 0x444   : > { %v8243_v46 = vunpack.i.l.bf16 %v8242_v29  ;;  %v15137_v7 = vmax.f32 %v5634_v42, %v5833_v34  ;;  %v15139_v22 = vmax.f32 %v5635_v3, %v5835_v8  ;;  %v5837_v37 = vsel %vm3947_vm3, %v5834_v53, %v5836_v59  ;;  %v5446_v18 = vpop.f32.mrf.mxu0 }
 0x445   : > { %v15135_v16 = vmax.f32 %v14977_v17, %v15126_v61  ;;  %v5110_v56 = vsel %vm5038_vm7, %v5027_v40, %v8244_v58  ;;  %v15144_v54 = vmax.f32 %v5636_v57, %v5837_v37  ;;  %v5638_v45 = vmax.f32 %v5444_v27, 0.0  ;;  %v8247_v58 = vpop.permute.xlu0 %8246  ;;  %v8252_v37 = vpop.permute.xlu1 %8251 }
 0x446   : > { %v5109_v4 = vsel %vm5038_vm7, %v5026_v9, %v8243_v46  ;;  %v15149_v17 = vmax.f32 %v14980_v33, %v15137_v7  ;;  %v15153_v42 = vmax.f32 %v15006_v13, %v15139_v22  ;;  %v6279_v3 = vsel %vm1798_vm1, %v6276_v20, %v6278_v63  ;;  %v7561_v57 = vpop.f32.mrf.mxu0 }
 0x447   : > { %v5156_v32 = vpack.c.bf16 %v5110_v56, %v5109_v4  ;;  %v6280_v28 = vrot.slane %v15135_v16, 4  ;;  %v5838_v53 = vrot.slane %v5638_v45, 2  ;;  %v15163_v33 = vmax.f32 %v15033_v14, %v15144_v54  ;;  %v17101_v57 = vld [vmem:[#allocation25_spill] sm:$0xff] }
 0x448   : > { %v6282_v39 = vrot.slane %v15149_v17, 4  ;;  %v6284_v26 = vrot.slane %v15153_v42, 4  ;;  %v5447_v29 = vadd.f32 %v15018_v25, %v5446_v18  ;;  %v8249_v4 = vunpack.i.h.bf16 %v8247_v58 }
 0x449   : > { %v6281_v50 = vsel %vm1798_vm1, %v6278_v63, %v6280_v28  ;;  %v5839_v48 = vsel %vm3947_vm3, %v5836_v59, %v5838_v53  ;;  %v6286_v14 = vrot.slane %v15163_v33, 4  ;;  %v8248_v56 = vunpack.i.l.bf16 %v8247_v58 }
 0x44a   : > { %7611 = vmatmul.mubr.bf16.gmra.mxu0 %v5156_v32  ;;  %v8395_v13 = vpack.i.bf16 %v6281_v50, %v6279_v3  ;;  %v15168_v20 = vmax.f32 %v5637_v24, %v5839_v48  ;;  %v6283_v34 = vsel %vm1798_vm1, %v6280_v28, %v6282_v39  ;;  %v6285_v63 = vsel %vm1798_vm1, %v6282_v39, %v6284_v26  ;;  %v17100_v28 = vld [vmem:[#allocation53_spill] sm:$0xff] }
 0x44b   : > { %7614 = vmatprep.mubr.msk.bf16.mxu0 %vm8694_vm4, %v16525_v55  ;;  %v8400_v8 = vpack.i.bf16 %v6285_v63, %v6283_v34  ;;  %v5639_v59 = vmax.f32 %v5447_v29, 0.0  ;;  %v6287_v40 = vsel %vm1798_vm1, %v6284_v26, %v6286_v14  ;;  %v8254_v18 = vunpack.i.h.bf16 %v8252_v37  ;;  %v5451_v26 = vpop.f32.mrf.mxu0 }
 0x44c   : > { %8396 = vrot.lane.b32.xlu0 %v8395_v13, %s8690_s19  ;;  %v15177_v27 = vmax.f32 %v15059_v43, %v15168_v20  ;;  %v8253_v43 = vunpack.i.l.bf16 %v8252_v37  ;;  %v4946_v3 = vsel %vm4872_vm5, %v17100_v28, %v8249_v4  ;;  %v4945_v39 = vsel %vm4872_vm5, %v17101_v57, %v8248_v56  ;;  %v8262_v28 = vpop.permute.xlu1 %8261 }
 0x44d   : > { %8401 = vrot.lane.b32.xlu1 %v8400_v8, %s8690_s19  ;;  %v5840_v19 = vrot.slane %v5639_v59, 2  ;;  %v8257_v50 = vpop.permute.xlu0 %8256  ;;  %v5452_v34 = vadd.f32 %v15018_v25, %v5451_v26  ;;  %v5029_v8 = vsel %vm4955_vm6, %v4946_v3, %v8254_v18 }
 0x44e   : > { %v6288_v24 = vrot.slane %v15177_v27, 4  ;;  %v8259_v13 = vunpack.i.h.bf16 %v8257_v50  ;;  %v8258_v48 = vunpack.i.l.bf16 %v8257_v50  ;;  %v5028_v63 = vsel %vm4955_vm6, %v4945_v39, %v8253_v43 }
 0x44f   : > { %v5841_v32 = vsel %vm3947_vm3, %v5838_v53, %v5840_v19  ;;  %v8264_v50 = vunpack.i.h.bf16 %v8262_v28 }
 0x450   : > { %v6289_v9 = vsel %vm1798_vm1, %v6286_v14, %v6288_v24  ;;  %v15189_v29 = vmax.f32 %v5638_v45, %v5841_v32  ;;  %v7564_v14 = vpop.f32.mrf.mxu0  ;;  %v5111_v53 = vsel %vm5038_vm7, %v5028_v63, %v8258_v48 }
 0x451   : > { %v8405_v46 = vpack.i.bf16 %v6289_v9, %v6287_v40  ;;  %v5112_v40 = vsel %vm5038_vm7, %v5029_v8, %v8259_v13  ;;  %v5640_v9 = vmax.f32 %v5452_v34, 0.0  ;;  %v8263_v13 = vunpack.i.l.bf16 %v8262_v28 }
 0x452   : > { %v5157_v58 = vpack.c.bf16 %v5112_v40, %v5111_v53  ;;  %v15198_v37 = vmax.f32 %v15061_v0, %v15189_v29  ;;  %v17103_v53 = vld [vmem:[#allocation24_spill] sm:$0xff] }
 0x453   : > { %8406 = vrot.lane.b32.xlu0 %v8405_v46, %s8690_s19  ;;  %v5454_v46 = vpop.f32.mrf.mxu0  ;;  %v5842_v45 = vrot.slane %v5640_v9, 2 }
 0x454   : > { %v5455_v4 = vadd.f32 %v15018_v25, %v5454_v46  ;;  %7615 = vmatmul.mubr.bf16.gmra.mxu0 %v5157_v58  ;;  %v6290_v3 = vrot.slane %v15198_v37, 4  ;;  %v17104_v46 = vld [vmem:[#allocation17_spill] sm:$0xff] }
 0x455   : > { %v7565_v56 = vpop.f32.mrf.mxu0  ;;  %7618 = vmatprep.mubr.msk.bf16.mxu0 %vm8694_vm4, %v16525_v55  ;;  %v5843_v18 = vsel %vm3947_vm3, %v5840_v19, %v5842_v45 }
 0x456   : > { %v5641_v43 = vmax.f32 %v5455_v4, 0.0  ;;  %v15204_v32 = vmax.f32 %v5639_v59, %v5843_v18  ;;  %v6291_v48 = vsel %vm1798_vm1, %v6288_v24, %v6290_v3  ;;  %v4947_v4 = vsel %vm4872_vm5, %v17104_v46, %v8263_v13 }
 0x457   : > { %v5459_v8 = vpop.f32.mrf.mxu0 }
 0x458   : > { %v15209_v0 = vmax.f32 %v15089_v31, %v15204_v32  ;;  %v5844_v57 = vrot.slane %v5641_v43, 2  ;;  %v4948_v31 = vsel %vm4872_vm5, %v17103_v53, %v8264_v50  ;;  %v5460_v58 = vadd.f32 %v15018_v25, %v5459_v8 }
 0x459   : > { %v7568_v28 = vpop.f32.mrf.mxu0 }
 0x45a   : > { %17102 = vst [vmem:[#allocation41_spill] sm:$0xff] %v15209_v0  ;;  %v8267_v39 = vpop.permute.xlu0 %8266  ;;  %v6292_v26 = vrot.slane %v15209_v0, 4  ;;  %v5845_v59 = vsel %vm3947_vm3, %v5842_v45, %v5844_v57 }
 0x45b   : > { %v8269_v34 = vunpack.i.h.bf16 %v8267_v39  ;;  %v8268_v19 = vunpack.i.l.bf16 %v8267_v39  ;;  %v15220_v24 = vmax.f32 %v5640_v9, %v5845_v59  ;;  %v5642_v39 = vmax.f32 %v5460_v58, 0.0 }
 0x45c   : > { %v6293_v63 = vsel %vm1798_vm1, %v6290_v3, %v6292_v26 }
 0x45d   : > { %v8410_v14 = vpack.i.bf16 %v6293_v63, %v6291_v48  ;;  %v5031_v45 = vsel %vm4955_vm6, %v4948_v31, %v8269_v34  ;;  %v5030_v3 = vsel %vm4955_vm6, %v4947_v4, %v8268_v19  ;;  %v5462_v63 = vpop.f32.mrf.mxu0  ;;  %v5846_v53 = vrot.slane %v5642_v39, 2 }
 0x45e   : > { %v15229_v13 = vmax.f32 %v15126_v61, %v15220_v24  ;;  %v5463_v19 = vadd.f32 %v15018_v25, %v5462_v63  ;;  %v8277_v46 = vpop.permute.xlu0 %8276  ;;  %v17106_v63 = vld [vmem:[#allocation36_spill] sm:$0xff] }
 0x45f   : > { %v8272_v40 = vpop.permute.xlu1 %8271  ;;  %8411 = vrot.lane.b32.xlu1 %v8410_v14, %s8690_s19  ;;  %v7569_v9 = vpop.f32.mrf.mxu0  ;;  %v5847_v59 = vsel %vm3947_vm3, %v5844_v57, %v5846_v53  ;;  %v8278_v28 = vunpack.i.l.bf16 %v8277_v46 }
 0x460   : > { %v8274_v56 = vunpack.i.h.bf16 %v8272_v40  ;;  %v8273_v18 = vunpack.i.l.bf16 %v8272_v40  ;;  %17105 = vst [vmem:[#allocation16_spill] sm:$0xff] %v15229_v13  ;;  %v15234_v34 = vmax.f32 %v5641_v43, %v5847_v59  ;;  %v6294_v14 = vrot.slane %v15229_v13, 4 }
 0x461   : > { %v5643_v40 = vmax.f32 %v5463_v19, 0.0 }
 0x462   : > { %v5113_v50 = vsel %vm5038_vm7, %v5030_v3, %v8273_v18  ;;  %v5114_v48 = vsel %vm5038_vm7, %v5031_v45, %v8274_v56  ;;  %v15240_v31 = vmax.f32 %v15137_v7, %v15234_v34  ;;  %v6295_v57 = vsel %vm1798_vm1, %v6292_v26, %v6294_v14  ;;  %v17107_v26 = vld [vmem:[#allocation48_spill] sm:$0xff] }
 0x463   : > { %v5158_v8 = vpack.c.bf16 %v5114_v48, %v5113_v50  ;;  %v5848_v56 = vrot.slane %v5643_v40, 2  ;;  %v8279_v18 = vunpack.i.h.bf16 %v8277_v46  ;;  %v4949_v9 = vsel %vm4872_vm5, %v17107_v26, %v8278_v28 }
 0x464   : > { %v16271_v61 = vrot.slane %v15240_v31, 4 }
 0x465   : > { %7619 = vmatmul.mubr.bf16.gmra.mxu0 %v5158_v8  ;;  %v5849_v48 = vsel %vm3947_vm3, %v5846_v53, %v5848_v56  ;;  %v4950_v8 = vsel %vm4872_vm5, %v17106_v63, %v8279_v18 }
 0x466   : > { %7622 = vmatprep.mubr.msk.bf16.mxu0 %vm8694_vm4, %v16525_v55  ;;  %v6297_v43 = vsel %vm1798_vm1, %v6294_v14, %v16271_v61  ;;  %v15257_v61 = vmax.f32 %v5642_v39, %v5849_v48 }
 0x467   : > { %v8415_v4 = vpack.i.bf16 %v6297_v43, %v6295_v57 }
 0x468   : > { %v8282_v58 = vpop.permute.xlu1 %8281  ;;  %v15271_v48 = vmax.f32 %v15139_v22, %v15257_v61 }
 0x469   : > { %8416 = vrot.lane.b32.xlu0 %v8415_v4, %s8690_s19  ;;  %v8284_v45 = vunpack.i.h.bf16 %v8282_v58  ;;  %v8283_v7 = vunpack.i.l.bf16 %v8282_v58 }
 0x46a   : > { %17110 = vst [vmem:[#allocation14_spill] sm:$0xff] %v15271_v48 }
 0x46b   : > { %v5032_v14 = vsel %vm4955_vm6, %v4949_v9, %v8283_v7  ;;  %v5033_v46 = vsel %vm4955_vm6, %v4950_v8, %v8284_v45  ;;  %v17108_v7 = vld [vmem:[#allocation55_spill] sm:$0xff]  ;;  %v17109_v8 = vld [vmem:[#allocation58_spill] sm:$0xff] }
 0x46c   : > { %v8292_v3 = vpop.permute.xlu1 %8291 }
 0x46d   : > { %v8294_v57 = vunpack.i.h.bf16 %v8292_v3  ;;  %v8293_v43 = vunpack.i.l.bf16 %v8292_v3 }
 0x46f   : > { %v4952_v3 = vsel %vm4872_vm5, %v17108_v7, %v8294_v57  ;;  %v4951_v9 = vsel %vm4872_vm5, %v17109_v8, %v8293_v43  ;;  %v6298_v8 = vrot.slane %v15271_v48, 4 }
 0x471   : > { %v5467_v53 = vpop.f32.mrf.mxu0 }
 0x472   : > { %v15260_v63 = vadd.f32 %v15018_v25, %v5467_v53 }
 0x473   : > { %v7572_v26 = vpop.f32.mrf.mxu0 }
 0x474   : > { %v5644_v45 = vmax.f32 %v15260_v63, 0.0 }
 0x475   : > { %v8287_v50 = vpop.permute.xlu0 %8286 }
 0x476   : > { %v8289_v59 = vunpack.i.h.bf16 %v8287_v50  ;;  %v8288_v19 = vunpack.i.l.bf16 %v8287_v50 }
 0x478   : > { %v5115_v58 = vsel %vm5038_vm7, %v5032_v14, %v8288_v19  ;;  %v5116_v4 = vsel %vm5038_vm7, %v5033_v46, %v8289_v59  ;;  %v5470_v59 = vpop.f32.mrf.mxu0  ;;  %v5850_v46 = vrot.slane %v5644_v45, 2 }
 0x479   : > { %v5159_v13 = vpack.c.bf16 %v5116_v4, %v5115_v58  ;;  %v8297_v18 = vpop.permute.xlu0 %8296  ;;  %v15274_v58 = vadd.f32 %v15018_v25, %v5470_v59 }
 0x47a   : > { %v8299_v28 = vunpack.i.h.bf16 %v8297_v18  ;;  %v8298_v50 = vunpack.i.l.bf16 %v8297_v18  ;;  %v7573_v4 = vpop.f32.mrf.mxu0  ;;  %v5851_v22 = vsel %vm3947_vm3, %v5848_v56, %v5850_v46 }
 0x47b   : > { %7623 = vmatmul.mubr.bf16.gmra.mxu0 %v5159_v13  ;;  %v16274_v63 = vmax.f32 %v15274_v58, 0.0 }
 0x47c   : > { %7626 = vmatprep.mubr.msk.bf16.mxu0 %vm8694_vm4, %v16525_v55  ;;  %v5035_v57 = vsel %vm4955_vm6, %v4952_v3, %v8299_v28  ;;  %v5034_v43 = vsel %vm4955_vm6, %v4951_v9, %v8298_v50  ;;  %v17111_v9 = vld [vmem:[#allocation27_spill] sm:$0xff] }
 0x47d   : > { %v8302_v39 = vpop.permute.xlu1 %8301  ;;  %v8307_v13 = vpop.permute.xlu0 %8306  ;;  %v5852_v56 = vrot.slane %v16274_v63, 2 }
 0x47e   : > { %v8304_v19 = vunpack.i.h.bf16 %v8302_v39  ;;  %v8303_v14 = vunpack.i.l.bf16 %v8302_v39  ;;  %v8308_v7 = vunpack.i.l.bf16 %v8307_v13  ;;  %v15283_v39 = vmax.f32 %v5643_v40, %v5851_v22 }
 0x47f   : > { %v8309_v59 = vunpack.i.h.bf16 %v8307_v13  ;;  %v17112_v13 = vrot.slane %v15240_v31, 4  ;;  %v5853_v63 = vsel %vm3947_vm3, %v5850_v46, %v5852_v56 }
 0x480   : > { %v5117_v53 = vsel %vm5038_vm7, %v5034_v43, %v8303_v14  ;;  %v5118_v18 = vsel %vm5038_vm7, %v5035_v57, %v8304_v19  ;;  %v15287_v50 = vmax.f32 %v15144_v54, %v15283_v39  ;;  %v4953_v19 = vsel %vm4872_vm5, %v17111_v9, %v8308_v7  ;;  %v17113_v57 = vld [vmem:[#allocation21_spill] sm:$0xff] }
 0x481   : > { %v5160_v26 = vpack.c.bf16 %v5118_v18, %v5117_v53  ;;  %v4954_v54 = vsel %vm4872_vm5, %v17113_v57, %v8309_v59 }
 0x482   : > { %v6300_v40 = vrot.slane %v15287_v50, 4 }
 0x483   : > { %7627 = vmatmul.mubr.bf16.gmra.mxu0 %v5160_v26 }
 0x484   : > { %v8312_v0 = vpop.permute.xlu1 %8311  ;;  %7630 = vmatprep.mubr.msk.bf16.mxu0 %vm8694_vm4, %v16525_v55  ;;  %v6301_v55 = vsel %vm1798_vm1, %v6298_v8, %v6300_v40 }
 0x485   : > { %v8314_v28 = vunpack.i.h.bf16 %v8312_v0  ;;  %v8313_v3 = vunpack.i.l.bf16 %v8312_v0  ;;  %v6299_v0 = vsel %vm1798_vm1, %v17112_v13, %v6298_v8 }
 0x486   : > { %v8420_v59 = vpack.i.bf16 %v6301_v55, %v6299_v0 }
 0x487   : > { %v8317_v14 = vpop.permute.xlu0 %8316  ;;  %v5036_v43 = vsel %vm4955_vm6, %v4953_v19, %v8313_v3  ;;  %v5037_v22 = vsel %vm4955_vm6, %v4954_v54, %v8314_v28 }
 0x488   : > { %v8319_v4 = vunpack.i.h.bf16 %v8317_v14  ;;  %v8318_v53 = vunpack.i.l.bf16 %v8317_v14  ;;  %v8322_v18 = vpop.permute.xlu1 %8321  ;;  %v5475_v14 = vpop.f32.mrf.mxu0  ;;  %8421 = vrot.lane.b32.xlu1 %v8420_v59, %s8690_s19 }
 0x489   : > { %v8324_v26 = vunpack.i.h.bf16 %v8322_v18  ;;  %v8323_v7 = vunpack.i.l.bf16 %v8322_v18 }
 0x48a   : > { %v5119_v9 = vsel %vm5038_vm7, %v5036_v43, %v8318_v53  ;;  %v5120_v13 = vsel %vm5038_vm7, %v5037_v22, %v8319_v4  ;;  %v15316_v43 = vadd.f32 %v15018_v25, %v5475_v14  ;;  %v15319_v4 = vmax.f32 %v5644_v45, %v5853_v63  ;;  %v7576_v53 = vpop.f32.mrf.mxu0 }
 0x48b   : > { %v5161_v57 = vpack.c.bf16 %v5120_v13, %v5119_v9  ;;  %v8327_v3 = vpop.permute.xlu0 %8326  ;;  %v6611_v19 = vsel %vm4955_vm6, %v14637_v5, %v8323_v7  ;;  %v6612_v28 = vsel %vm4955_vm6, %v14664_v38, %v8324_v26 }
 0x48c   : > { %v8329_v54 = vunpack.i.h.bf16 %v8327_v3  ;;  %v8328_v18 = vunpack.i.l.bf16 %v8327_v3  ;;  %v15313_v48 = vpack.c.bf16 %v6612_v28, %v6611_v19  ;;  %v8332_v8 = vpop.permute.xlu1 %8331  ;;  %v5646_v22 = vmax.f32 %v15316_v43, 0.0  ;;  %v5478_v63 = vpop.f32.mrf.mxu0 }
 0x48d   : > { %v8334_v46 = vunpack.i.h.bf16 %v8332_v8  ;;  %v8333_v0 = vunpack.i.l.bf16 %v8332_v8  ;;  %7631 = vmatmul.mubr.bf16.gmra.mxu0 %v5161_v57  ;;  %v15335_v19 = vmax.f32 %v15168_v20, %v15319_v4 }
 0x48e   : > { %6875 = vmatprep.mubr.bf16.mxu1 %v15313_v48  ;;  %v6597_v5 = vsel %vm4955_vm6, %v17048_v23, %v8328_v18  ;;  %v6598_v38 = vsel %vm4955_vm6, %v17046_v60, %v8329_v54  ;;  %v5854_v23 = vrot.slane %v5646_v22, 2  ;;  %v7577_v28 = vpop.f32.mrf.mxu0  ;;  %v17114_v18 = vmax.f32 %v15274_v58, 0.0 }
 0x48f   : > { %v8337_v26 = vpop.permute.xlu0 %8336  ;;  %v6670_v7 = vpack.c.bf16 %v6598_v38, %v6597_v5  ;;  %v6613_v55 = vsel %vm4955_vm6, %v14714_v2, %v8333_v0  ;;  %v6614_v45 = vsel %vm4955_vm6, %v14737_v11, %v8334_v46  ;;  %v15340_v11 = vadd.f32 %v15018_v25, %v5478_v63 }
 0x490   : > { %v8339_v9 = vunpack.i.h.bf16 %v8337_v26  ;;  %v8338_v13 = vunpack.i.l.bf16 %v8337_v26  ;;  %v15331_v59 = vpack.c.bf16 %v6614_v45, %v6613_v55  ;;  %v5855_v2 = vsel %vm3947_vm3, %v5852_v56, %v5854_v23 }
 0x491   : > { %v8342_v57 = vpop.permute.xlu1 %8341  ;;  %6876 = vmatmul.mubr.bf16.vlgmr.msra.gmra.mxu1 %v6670_v7  ;;  %v15348_v8 = vmax.f32 %v17114_v18, %v5855_v2  ;;  %v6302_v46 = vrot.slane %v15335_v19, 4  ;;  %v5647_v58 = vmax.f32 %v15340_v11, 0.0 }
 0x492   : > { %v8344_v3 = vunpack.i.h.bf16 %v8342_v57  ;;  %v8343_v60 = vunpack.i.l.bf16 %v8342_v57  ;;  %6883 = vmatprep.mubr.bf16.mxu1 %v15331_v59  ;;  %v6599_v20 = vsel %vm4955_vm6, %v17052_v51, %v8338_v13  ;;  %v6600_v43 = vsel %vm4955_vm6, %v17055_v30, %v8339_v9 }
 0x493   : > { %v8347_v56 = vpop.permute.xlu0 %8346  ;;  %v15357_v0 = vmax.f32 %v15189_v29, %v15348_v8  ;;  %v6672_v53 = vpack.c.bf16 %v6600_v43, %v6599_v20  ;;  %v6303_v30 = vsel %vm1798_vm1, %v6300_v40, %v6302_v46  ;;  %v5856_v55 = vrot.slane %v5647_v58, 2  ;;  %v17115_v20 = vld [vmem:[#allocation57_spill] sm:$0xff] }
 0x494   : > { %v6615_v14 = vsel %vm4955_vm6, %v14800_v44, %v8343_v60  ;;  %v6616_v54 = vsel %vm4955_vm6, %v14804_v47, %v8344_v3  ;;  %v8349_v26 = vunpack.i.h.bf16 %v8347_v56  ;;  %v8348_v7 = vunpack.i.l.bf16 %v8347_v56  ;;  %v17116_v56 = vld [vmem:[#allocation20_spill] sm:$0xff] }
 0x495   : > { %v15359_v44 = vpack.c.bf16 %v6616_v54, %v6615_v14  ;;  %v6304_v51 = vrot.slane %v15357_v0, 4  ;;  %v5857_v28 = vsel %vm3947_vm3, %v5854_v23, %v5856_v55 }
 0x496   : > { %v6601_v13 = vsel %vm4955_vm6, %v17058_v62, %v8348_v7  ;;  %v6602_v40 = vsel %vm4955_vm6, %v17061_v49, %v8349_v26 }
 0x497   : > { %v6305_v29 = vsel %vm1798_vm1, %v6302_v46, %v6304_v51  ;;  %v8357_v3 = vpop.permute.xlu0 %8356  ;;  %v6674_v2 = vpack.c.bf16 %v6602_v40, %v6601_v13 }
 0x498   : > { %v8425_v45 = vpack.i.bf16 %v6305_v29, %v6303_v30  ;;  %v8359_v14 = vunpack.i.h.bf16 %v8357_v3  ;;  %v8358_v54 = vunpack.i.l.bf16 %v8357_v3 }
 0x499   : > { %6884 = vmatmul.mubr.bf16.gmra.mxu1 %v6672_v53 }
 0x49a   : > { %6891 = vmatprep.mubr.bf16.mxu1 %v15359_v44  ;;  %8426 = vrot.lane.b32.xlu0 %v8425_v45, %s8690_s19 }
 0x49b   : > { %v8352_v47 = vpop.permute.xlu1 %8351 }
 0x49c   : > { %v8354_v5 = vunpack.i.h.bf16 %v8352_v47  ;;  %v8353_v38 = vunpack.i.l.bf16 %v8352_v47  ;;  %v5483_v62 = vpop.f32.mrf.mxu0  ;;  %v17117_v47 = vld [vmem:[#allocation23_spill] sm:$0xff] }
 0x49d   : > { %v5484_v49 = vadd.f32 %v15018_v25, %v5483_v62  ;;  %v6603_v53 = vsel %vm4955_vm6, %v17117_v47, %v8358_v54 }
 0x49e   : > { %v6617_v63 = vsel %vm4955_vm6, %v14832_v52, %v8353_v38  ;;  %v6618_v9 = vsel %vm4955_vm6, %v14881_v10, %v8354_v5  ;;  %v15382_v10 = vmax.f32 %v5646_v22, %v5857_v28  ;;  %v7580_v46 = vpop.f32.mrf.mxu0  ;;  %v17118_v5 = vld [vmem:[#allocation13_spill] sm:$0xff] }
 0x49f   : > { %v8362_v57 = vpop.permute.xlu1 %8361  ;;  %v15379_v60 = vpack.c.bf16 %v6618_v9, %v6617_v63  ;;  %v6604_v22 = vsel %vm4955_vm6, %v17118_v5, %v8359_v14  ;;  %v5648_v26 = vmax.f32 %v5484_v49, 0.0  ;;  %v17119_v14 = vld [vmem:[#allocation44_spill] sm:$0xff]  ;;  %v17120_v49 = vld [vmem:[#allocation63_spill] sm:$0xff] }
 0x4a0   : > { %v8364_v11 = vunpack.i.h.bf16 %v8362_v57  ;;  %v8363_v52 = vunpack.i.l.bf16 %v8362_v57  ;;  %v15396_v7 = vmax.f32 %v15204_v32, %v15382_v10  ;;  %v5486_v30 = vpop.f32.mrf.mxu0  ;;  %v6676_v40 = vpack.c.bf16 %v6604_v22, %v6603_v53 }
 0x4a1   : > { %6892 = vmatmul.mubr.bf16.gmra.mxu1 %v6674_v2  ;;  %v8367_v18 = vpop.permute.xlu0 %8366  ;;  %v5858_v63 = vrot.slane %v5648_v26, 2  ;;  %v5487_v9 = vadd.f32 %v15018_v25, %v5486_v30 }
 0x4a2   : > { %6897 = vmatprep.mubr.bf16.mxu1 %v15379_v60  ;;  %v6619_v43 = vsel %vm4955_vm6, %v17115_v20, %v8363_v52  ;;  %v6620_v23 = vsel %vm4955_vm6, %v17116_v56, %v8364_v11  ;;  %v8368_v29 = vunpack.i.l.bf16 %v8367_v18  ;;  %v8369_v13 = vunpack.i.h.bf16 %v8367_v18  ;;  %v7581_v28 = vpop.f32.mrf.mxu0 }
 0x4a3   : > { %v15398_v45 = vpack.c.bf16 %v6620_v23, %v6619_v43  ;;  %v5859_v2 = vsel %vm3947_vm3, %v5856_v55, %v5858_v63  ;;  %v5649_v11 = vmax.f32 %v5487_v9, 0.0  ;;  %v6306_v32 = vrot.slane %v15396_v7, 4 }
 0x4a4   : > { %v15402_v52 = vmax.f32 %v5647_v58, %v5859_v2  ;;  %v6605_v54 = vsel %vm4955_vm6, %v17119_v14, %v8368_v29  ;;  %v6606_v18 = vsel %vm4955_vm6, %v17120_v49, %v8369_v13  ;;  %v17121_v2 = vld [vmem:[#allocation26_spill] sm:$0xff]  ;;  %v17122_v14 = vld [vmem:[#allocation61_spill] sm:$0xff] }
 0x4a5   : > { %v5860_v62 = vrot.slane %v5649_v11, 2  ;;  %v8377_v43 = vpop.permute.xlu0 %8376  ;;  %v6678_v46 = vpack.c.bf16 %v6606_v18, %v6605_v54 }
 0x4a6   : > { %v8372_v38 = vpop.permute.xlu1 %8371  ;;  %v15412_v20 = vmax.f32 %v15220_v24, %v15402_v52  ;;  %v6307_v24 = vsel %vm1798_vm1, %v6304_v51, %v6306_v32  ;;  %v8379_v30 = vunpack.i.h.bf16 %v8377_v43 }
 0x4a7   : > { %v8374_v57 = vunpack.i.h.bf16 %v8372_v38  ;;  %v8373_v3 = vunpack.i.l.bf16 %v8372_v38  ;;  %v5861_v47 = vsel %vm3947_vm3, %v5858_v63, %v5860_v62 }
 0x4a8   : > { %v6308_v23 = vrot.slane %v15412_v20, 4  ;;  %v15427_v13 = vmax.f32 %v5648_v26, %v5861_v47  ;;  %v6608_v26 = vsel %vm4955_vm6, %v17122_v14, %v8379_v30  ;;  %v17123_v30 = vld [vmem:[#allocation62_spill] sm:$0xff] }
 0x4a9   : > { %6898 = vmatmul.mubr.bf16.gmra.mxu1 %v6676_v40  ;;  %v6621_v55 = vsel %vm4955_vm6, %v14959_v1, %v8373_v3  ;;  %v6622_v58 = vsel %vm4955_vm6, %v14984_v36, %v8374_v57  ;;  %v8378_v36 = vunpack.i.l.bf16 %v8377_v43  ;;  %v8387_v40 = vpop.permute.xlu0 %8386 }
 0x4aa   : > { %6903 = vmatprep.mubr.bf16.mxu1 %v15398_v45  ;;  %v15420_v53 = vpack.c.bf16 %v6622_v58, %v6621_v55  ;;  %v5491_v38 = vpop.f32.mrf.mxu0  ;;  %v6309_v1 = vsel %vm1798_vm1, %v6306_v32, %v6308_v23  ;;  %v8389_v55 = vunpack.i.h.bf16 %v8387_v40  ;;  %v15442_v58 = vmax.f32 %v15234_v34, %v15427_v13 }
 0x4ab   : > { %v5492_v29 = vadd.f32 %v15018_v25, %v5491_v38  ;;  %v8430_v9 = vpack.i.bf16 %v6309_v1, %v6307_v24  ;;  %v6607_v32 = vsel %vm4955_vm6, %v17121_v2, %v8378_v36  ;;  %v8388_v43 = vunpack.i.l.bf16 %v8387_v40 }
 0x4ac   : > { %v7584_v63 = vpop.f32.mrf.mxu0  ;;  %v6680_v47 = vpack.c.bf16 %v6608_v26, %v6607_v32  ;;  %v6310_v1 = vrot.slane %v15442_v58, 4 }
 0x4ad   : > { %v8382_v56 = vpop.permute.xlu1 %8381  ;;  %v5650_v57 = vmax.f32 %v5492_v29, 0.0  ;;  %8431 = vrot.lane.b32.xlu1 %v8430_v9, %s8690_s19  ;;  %v6609_v36 = vsel %vm4955_vm6, %v17123_v30, %v8388_v43  ;;  %v17124_v29 = vld [vmem:[#allocation56_spill] sm:$0xff] }
 0x4ae   : > { %v8384_v5 = vunpack.i.h.bf16 %v8382_v56  ;;  %v8383_v22 = vunpack.i.l.bf16 %v8382_v56  ;;  %v5494_v28 = vpop.f32.mrf.mxu0  ;;  %v6311_v14 = vsel %vm1798_vm1, %v6308_v23, %v6310_v1 }
 0x4af   : > { %v5862_v54 = vrot.slane %v5650_v57, 2  ;;  %v5495_v49 = vadd.f32 %v15018_v25, %v5494_v28 }
 0x4b0   : > { %v6623_v51 = vsel %vm4955_vm6, %v14996_v35, %v8383_v22  ;;  %v6624_v3 = vsel %vm4955_vm6, %v15026_v12, %v8384_v5  ;;  %v7585_v35 = vpop.f32.mrf.mxu0 }
 0x4b1   : > { %6904 = vmatmul.mubr.bf16.gmra.mxu1 %v6678_v46  ;;  %v8392_v18 = vpop.permute.xlu1 %8391  ;;  %v5863_v12 = vsel %vm3947_vm3, %v5860_v62, %v5862_v54  ;;  %v15445_v56 = vpack.c.bf16 %v6624_v3, %v6623_v51  ;;  %v5651_v46 = vmax.f32 %v5495_v49, 0.0 }
 0x4b2   : > { %6909 = vmatprep.mubr.bf16.mxu1 %v15420_v53  ;;  %v15447_v5 = vmax.f32 %v5649_v11, %v5863_v12  ;;  %v8394_v22 = vunpack.i.h.bf16 %v8392_v18  ;;  %v8393_v38 = vunpack.i.l.bf16 %v8392_v18  ;;  %v6610_v11 = vsel %vm4955_vm6, %v17124_v29, %v8389_v55 }
 0x4b3   : > { %v5864_v24 = vrot.slane %v5651_v46, 2 }
 0x4b4   : > { %v15452_v34 = vmax.f32 %v15257_v61, %v15447_v5  ;;  %v6625_v51 = vsel %vm4955_vm6, %v15045_v6, %v8393_v38  ;;  %v6626_v61 = vsel %vm4955_vm6, %v15072_v21, %v8394_v22 }
 0x4b5   : > { %v5865_v62 = vsel %vm3947_vm3, %v5862_v54, %v5864_v24  ;;  %v6682_v54 = vpack.c.bf16 %v6610_v11, %v6609_v36  ;;  %v15470_v49 = vpack.c.bf16 %v6626_v61, %v6625_v51 }
 0x4b6   : > { %v6312_v63 = vrot.slane %v15452_v34, 4  ;;  %v15466_v3 = vmax.f32 %v5650_v57, %v5865_v62 }
 0x4b7   : > { %v5499_v9 = vpop.f32.mrf.mxu0 }
 0x4b8   : > { %v5500_v40 = vadd.f32 %v15018_v25, %v5499_v9  ;;  %v6313_v26 = vsel %vm1798_vm1, %v6310_v1, %v6312_v63  ;;  %v15475_v21 = vmax.f32 %v15283_v39, %v15466_v3 }
 0x4b9   : > { %6910 = vmatmul.mubr.bf16.gmra.mxu1 %v6680_v47  ;;  %v7588_v28 = vpop.f32.mrf.mxu0  ;;  %v8435_v55 = vpack.i.bf16 %v6313_v26, %v6311_v14 }
 0x4ba   : > { %6915 = vmatprep.mubr.bf16.mxu1 %v15445_v56  ;;  %v5652_v32 = vmax.f32 %v5500_v40, 0.0  ;;  %v6314_v36 = vrot.slane %v15475_v21, 4 }
 0x4bb   : > { %v5502_v18 = vpop.f32.mrf.mxu0  ;;  %8436 = vrot.lane.b32.xlu0 %v8435_v55, %s8690_s19 }
 0x4bc   : > { %v5866_v35 = vrot.slane %v5652_v32, 2  ;;  %v5503_v6 = vadd.f32 %v15018_v25, %v5502_v18 }
 0x4bd   : > { %v7589_v57 = vpop.f32.mrf.mxu0 }
 0x4be   : > { %v8397_v2 = vpop.permute.xlu0 %8396  ;;  %v5867_v23 = vsel %vm3947_vm3, %v5864_v24, %v5866_v35  ;;  %v5653_v47 = vmax.f32 %v5503_v6, 0.0 }
 0x4bf   : > { %v8399_v43 = vunpack.i.h.bf16 %v8397_v2  ;;  %v8398_v12 = vunpack.i.l.bf16 %v8397_v2  ;;  %v15479_v22 = vmax.f32 %v5651_v46, %v5867_v23  ;;  %v5507_v38 = vpop.f32.mrf.mxu0  ;;  %v8402_v29 = vpop.permute.xlu1 %8401 }
 0x4c0   : > { %v5868_v1 = vrot.slane %v5653_v47, 2  ;;  %v5508_v62 = vadd.f32 %v15018_v25, %v5507_v38  ;;  %v8404_v2 = vunpack.i.h.bf16 %v8402_v29  ;;  %v8403_v14 = vunpack.i.l.bf16 %v8402_v29 }
 0x4c1   : > { %6916 = vmatmul.mubr.bf16.gmra.mxu1 %v6682_v54  ;;  %v6627_v30 = vsel %vm4955_vm6, %v15076_v41, %v8398_v12  ;;  %v6628_v39 = vsel %vm4955_vm6, %v15112_v15, %v8399_v43  ;;  %v15490_v24 = vmax.f32 %v15319_v4, %v15479_v22  ;;  %v7592_v46 = vpop.f32.mrf.mxu0  ;;  %v6315_v54 = vsel %vm1798_vm1, %v6312_v63, %v6314_v36  ;;  %v15510_v12 = vld [vmem:[#allocation6] ss:$0 sm:$0xff] }
 0x4c2   : > { %6921 = vmatprep.mubr.bf16.mxu1 %v15470_v49  ;;  %v5869_v11 = vsel %vm3947_vm3, %v5866_v35, %v5868_v1  ;;  %v5654_v9 = vmax.f32 %v5508_v62, 0.0  ;;  %v15496_v41 = vpack.c.bf16 %v6628_v39, %v6627_v30  ;;  %v6629_v63 = vsel %vm4955_vm6, %v15135_v16, %v8403_v14 }
 0x4c3   : > { %v6316_v40 = vrot.slane %v15490_v24, 4  ;;  %v15494_v51 = vmax.f32 %v5652_v32, %v5869_v11  ;;  %v5510_v61 = vpop.f32.mrf.mxu0 }
 0x4c4   : > { %v5870_v28 = vrot.slane %v5654_v9, 2  ;;  %v5511_v15 = vadd.f32 %v15018_v25, %v5510_v61 }
 0x4c5   : > { %v15501_v4 = vmax.f32 %v15348_v8, %v15494_v51  ;;  %v7593_v26 = vpop.f32.mrf.mxu0  ;;  %v6317_v18 = vsel %vm1798_vm1, %v6314_v36, %v6316_v40  ;;  %v8407_v38 = vpop.permute.xlu0 %8406 }
 0x4c6   : > { %v5871_v32 = vsel %vm3947_vm3, %v5868_v1, %v5870_v28  ;;  %v5655_v55 = vmax.f32 %v5511_v15, 0.0  ;;  %v8440_v35 = vpack.i.bf16 %v6317_v18, %v6315_v54  ;;  %v8408_v29 = vunpack.i.l.bf16 %v8407_v38 }
 0x4c7   : > { %v15507_v6 = vmax.f32 %v5653_v47, %v5871_v32  ;;  %v5515_v25 = vpop.f32.mrf.mxu0  ;;  %v6318_v57 = vrot.slane %v15501_v4, 4 }
 0x4c8   : > { %v5872_v43 = vrot.slane %v5655_v55, 2  ;;  %v5516_v8 = vadd.f32 %v15510_v12, %v5515_v25  ;;  %8441 = vrot.lane.b32.xlu1 %v8440_v35, %s8690_s19 }
 0x4c9   : > { %6922 = vmatmul.mubr.bf16.gmra.mxu1 %v15313_v48  ;;  %v6630_v48 = vsel %vm4955_vm6, %v15149_v17, %v8404_v2  ;;  %v15521_v23 = vmax.f32 %v15382_v10, %v15507_v6  ;;  %v7596_v47 = vpop.f32.mrf.mxu0  ;;  %v8409_v17 = vunpack.i.h.bf16 %v8407_v38  ;;  %v6319_v61 = vsel %vm1798_vm1, %v6316_v40, %v6318_v57  ;;  %v17125_v38 = vld [vmem:[#allocation41_spill] sm:$0xff] }
 0x4ca   : > { %6929 = vmatprep.mubr.bf16.mxu1 %v15496_v41  ;;  %v5873_v1 = vsel %vm3947_vm3, %v5870_v28, %v5872_v43  ;;  %v5656_v62 = vmax.f32 %v5516_v8, 0.0  ;;  %v15527_v16 = vpack.c.bf16 %v6630_v48, %v6629_v63 }
 0x4cb   : > { %v6320_v30 = vrot.slane %v15521_v23, 4  ;;  %v15525_v39 = vmax.f32 %v5654_v9, %v5873_v1  ;;  %v5518_v36 = vpop.f32.mrf.mxu0  ;;  %v6632_v14 = vsel %vm4955_vm6, %v15163_v33, %v8409_v17  ;;  %v17126_v1 = vld [vmem:[#allocation16_spill] sm:$0xff] }
 0x4cc   : > { %v5874_v46 = vrot.slane %v5656_v62, 2  ;;  %v5519_v8 = vadd.f32 %v15510_v12, %v5518_v36 }
 0x4cd   : > { %v15531_v11 = vmax.f32 %v15402_v52, %v15525_v39  ;;  %v7597_v10 = vpop.f32.mrf.mxu0  ;;  %v6321_v28 = vsel %vm1798_vm1, %v6318_v57, %v6320_v30  ;;  %v6631_v52 = vsel %vm4955_vm6, %v15153_v42, %v8408_v29 }
 0x4ce   : > { %v5875_v15 = vsel %vm3947_vm3, %v5872_v43, %v5874_v46  ;;  %v8445_v2 = vpack.i.bf16 %v6321_v28, %v6319_v61  ;;  %v15551_v54 = vpack.c.bf16 %v6632_v14, %v6631_v52 }
 0x4cf   : > { %v15537_v9 = vmax.f32 %v5655_v55, %v5875_v15  ;;  %v6322_v40 = vrot.slane %v15531_v11, 4 }
 0x4d0   : > { %8446 = vrot.lane.b32.xlu0 %v8445_v2, %s8690_s19 }
 0x4d1   : > { %6930 = vmatmul.mubr.bf16.gmra.mxu1 %v15331_v59  ;;  %v15548_v26 = vmax.f32 %v15427_v13, %v15537_v9  ;;  %v6323_v18 = vsel %vm1798_vm1, %v6320_v30, %v6322_v40  ;;  %v8412_v55 = vpop.permute.xlu1 %8411 }
 0x4d2   : > { %6937 = vmatprep.mubr.bf16.mxu1 %v15527_v16  ;;  %v8414_v42 = vunpack.i.h.bf16 %v8412_v55  ;;  %v8413_v33 = vunpack.i.l.bf16 %v8412_v55 }
 0x4d3   : > { %v6324_v59 = vrot.slane %v15548_v26, 4 }
 0x4d4   : > { %v6633_v13 = vsel %vm4955_vm6, %v15177_v27, %v8413_v33  ;;  %v6634_v25 = vsel %vm4955_vm6, %v15198_v37, %v8414_v42 }
 0x4d5   : > { %v6325_v32 = vsel %vm1798_vm1, %v6322_v40, %v6324_v59  ;;  %v15562_v43 = vpack.c.bf16 %v6634_v25, %v6633_v13 }
 0x4d6   : > { %v8450_v35 = vpack.i.bf16 %v6325_v32, %v6323_v18 }
 0x4d8   : > { %8451 = vrot.lane.b32.xlu1 %v8450_v35, %s8690_s19 }
 0x4d9   : > { %6938 = vmatmul.mubr.bf16.gmra.mxu1 %v15359_v44  ;;  %v5657_v44 = vmax.f32 %v5519_v8, 0.0 }
 0x4da   : > { %6943 = vmatprep.mubr.bf16.mxu1 %v15551_v54 }
 0x4db   : > { %v8417_v63 = vpop.permute.xlu0 %8416  ;;  %v5876_v48 = vrot.slane %v5657_v44, 2 }
 0x4dc   : > { %v8419_v57 = vunpack.i.h.bf16 %v8417_v63  ;;  %v8418_v47 = vunpack.i.l.bf16 %v8417_v63 }
 0x4dd   : > { %v5877_v36 = vsel %vm3947_vm3, %v5874_v46, %v5876_v48 }
 0x4de   : > { %v6635_v27 = vsel %vm4955_vm6, %v17125_v38, %v8418_v47  ;;  %v6636_v37 = vsel %vm4955_vm6, %v17126_v1, %v8419_v57  ;;  %v15577_v29 = vmax.f32 %v5656_v62, %v5877_v36 }
 0x4df   : > { %v15572_v30 = vpack.c.bf16 %v6636_v37, %v6635_v27 }
 0x4e0   : > { %v15583_v2 = vmax.f32 %v15447_v5, %v15577_v29 }
 0x4e1   : > { %6944 = vmatmul.mubr.bf16.gmra.mxu1 %v15379_v60 }
 0x4e2   : > { %6949 = vmatprep.mubr.bf16.mxu1 %v15562_v43  ;;  %v6326_v55 = vrot.slane %v15583_v2, 4 }
 0x4e9   : > { %6950 = vmatmul.mubr.bf16.gmra.mxu1 %v15398_v45 }
 0x4ea   : > { %6955 = vmatprep.mubr.bf16.mxu1 %v15572_v30 }
 0x4f1   : > { %6956 = vmatmul.mubr.bf16.gmra.mxu1 %v15420_v53 }
 0x4f2   : > { %v5523_v60 = vpop.f32.mrf.mxu0 }
 0x4f3   : > { %v5524_v17 = vadd.f32 %v15510_v12, %v5523_v60 }
 0x4f4   : > { %v7600_v10 = vpop.f32.mrf.mxu0 }
 0x4f5   : > { %v5658_v61 = vmax.f32 %v5524_v17, 0.0 }
 0x4f6   : > { %v5526_v45 = vpop.f32.mrf.mxu0 }
 0x4f7   : > { %v5878_v28 = vrot.slane %v5658_v61, 2  ;;  %v5527_v15 = vadd.f32 %v15510_v12, %v5526_v45 }
 0x4f8   : > { %v7601_v46 = vpop.f32.mrf.mxu0 }
 0x4f9   : > { %v5879_v52 = vsel %vm3947_vm3, %v5876_v48, %v5878_v28  ;;  %v5659_v14 = vmax.f32 %v5527_v15, 0.0  ;;  %v6327_v48 = vsel %vm1798_vm1, %v6324_v59, %v6326_v55 }
 0x4fa   : > { %v15586_v40 = vmax.f32 %v5657_v44, %v5879_v52  ;;  %v5531_v62 = vpop.f32.mrf.mxu0  ;;  %v8422_v17 = vpop.permute.xlu1 %8421 }
 0x4fb   : > { %v5880_v18 = vrot.slane %v5659_v14, 2  ;;  %v5532_v32 = vadd.f32 %v15510_v12, %v5531_v62  ;;  %v8423_v45 = vunpack.i.l.bf16 %v8422_v17 }
 0x4fc   : > { %v15592_v53 = vmax.f32 %v15466_v3, %v15586_v40  ;;  %v7604_v35 = vpop.f32.mrf.mxu0 }
 0x4fd   : > { %v5881_v5 = vsel %vm3947_vm3, %v5878_v28, %v5880_v18  ;;  %v5660_v42 = vmax.f32 %v5532_v32, 0.0  ;;  %v6637_v62 = vsel %vm4955_vm6, %v15240_v31, %v8423_v45 }
 0x4fe   : > { %v6328_v33 = vrot.slane %v15592_v53, 4  ;;  %v15596_v13 = vmax.f32 %v5658_v61, %v5881_v5  ;;  %v5534_v25 = vpop.f32.mrf.mxu0  ;;  %v8424_v61 = vunpack.i.h.bf16 %v8422_v17 }
 0x4ff   : > { %v5882_v8 = vrot.slane %v5660_v42, 2  ;;  %v5535_v44 = vadd.f32 %v15510_v12, %v5534_v25 }
 0x500   : > { %v15601_v63 = vmax.f32 %v15479_v22, %v15596_v13  ;;  %v6329_v3 = vsel %vm1798_vm1, %v6326_v55, %v6328_v33  ;;  %v7605_v57 = vpop.f32.mrf.mxu0 }
 0x501   : > { %v5883_v47 = vsel %vm3947_vm3, %v5880_v18, %v5882_v8  ;;  %v5661_v38 = vmax.f32 %v5535_v44, 0.0  ;;  %v8455_v27 = vpack.i.bf16 %v6329_v3, %v6327_v48  ;;  %v17127_v18 = vld [vmem:[#allocation14_spill] sm:$0xff] }
 0x502   : > { %v15606_v1 = vmax.f32 %v5659_v14, %v5883_v47  ;;  %v5539_v37 = vpop.f32.mrf.mxu0  ;;  %v6330_v22 = vrot.slane %v15601_v63, 4  ;;  %v6638_v32 = vsel %vm4955_vm6, %v17127_v18, %v8424_v61 }
 0x503   : > { %v5884_v36 = vrot.slane %v5661_v38, 2  ;;  %8456 = vrot.lane.b32.xlu0 %v8455_v27, %s8690_s19  ;;  %v5540_v60 = vadd.f32 %v15510_v12, %v5539_v37  ;;  %v15624_v35 = vpack.c.bf16 %v6638_v32, %v6637_v62 }
 0x504   : > { %v15613_v59 = vmax.f32 %v15494_v51, %v15606_v1  ;;  %v7608_v10 = vpop.f32.mrf.mxu0  ;;  %v6331_v25 = vsel %vm1798_vm1, %v6328_v33, %v6330_v22 }
 0x505   : > { %v5885_v28 = vsel %vm3947_vm3, %v5882_v8, %v5884_v36  ;;  %v5662_v15 = vmax.f32 %v5540_v60, 0.0  ;;  %6961 = vmatprep.mubr.bf16.mxu1 %v15624_v35 }
 0x506   : > { %v6332_v46 = vrot.slane %v15613_v59, 4  ;;  %v15617_v52 = vmax.f32 %v5660_v42, %v5885_v28  ;;  %v5542_v14 = vpop.f32.mrf.mxu0  ;;  %6962 = vmatmul.mubr.bf16.gmra.mxu1 %v15445_v56 }
 0x507   : > { %v5886_v55 = vrot.slane %v5662_v15, 2  ;;  %v5543_v51 = vadd.f32 %v15510_v12, %v5542_v14 }
 0x508   : > { %v15628_v5 = vmax.f32 %v15507_v6, %v15617_v52  ;;  %v6333_v42 = vsel %vm1798_vm1, %v6330_v22, %v6332_v46  ;;  %v7609_v8 = vpop.f32.mrf.mxu0 }
 0x509   : > { %v5887_v44 = vsel %vm3947_vm3, %v5884_v36, %v5886_v55  ;;  %v5663_v31 = vmax.f32 %v5543_v51, 0.0  ;;  %v8460_v48 = vpack.i.bf16 %v6333_v42, %v6331_v25 }
 0x50a   : > { %v15634_v3 = vmax.f32 %v5661_v38, %v5887_v44  ;;  %v5547_v57 = vpop.f32.mrf.mxu0  ;;  %v6334_v33 = vrot.slane %v15628_v5, 4 }
 0x50b   : > { %v5888_v47 = vrot.slane %v5663_v31, 2  ;;  %8461 = vrot.lane.b32.xlu1 %v8460_v48, %s8690_s19  ;;  %v5548_v6 = vadd.f32 %v15510_v12, %v5547_v57 }
 0x50c   : > { %v15642_v27 = vmax.f32 %v15525_v39, %v15634_v3  ;;  %v7612_v37 = vpop.f32.mrf.mxu0  ;;  %v6335_v45 = vsel %vm1798_vm1, %v6332_v46, %v6334_v33 }
 0x50d   : > { %v5889_v36 = vsel %vm3947_vm3, %v5886_v55, %v5888_v47  ;;  %v5664_v60 = vmax.f32 %v5548_v6, 0.0 }
 0x50e   : > { %v6527_v38 = vrot.slane %v15642_v27, 4  ;;  %v15646_v17 = vmax.f32 %v5662_v15, %v5889_v36  ;;  %v5550_v56 = vpop.f32.mrf.mxu0  ;;  %v8427_v15 = vpop.permute.xlu0 %8426 }
 0x50f   : > { %v5890_v22 = vrot.slane %v5664_v60, 2  ;;  %v5551_v18 = vadd.f32 %v15510_v12, %v5550_v56  ;;  %v8429_v55 = vunpack.i.h.bf16 %v8427_v15  ;;  %v8428_v46 = vunpack.i.l.bf16 %v8427_v15 }
 0x510   : > { %v15650_v10 = vmax.f32 %v15537_v9, %v15646_v17  ;;  %v7613_v61 = vpop.f32.mrf.mxu0  ;;  %v6528_v39 = vsel %vm1798_vm1, %v6334_v33, %v6527_v38 }
 0x511   : > { %v5891_v28 = vsel %vm3947_vm3, %v5888_v47, %v5890_v22  ;;  %v8465_v14 = vpack.i.bf16 %v6528_v39, %v6335_v45  ;;  %v5665_v25 = vmax.f32 %v5551_v18, 0.0  ;;  %v6639_v42 = vsel %vm4955_vm6, %v15287_v50, %v8428_v46 }
 0x512   : > { %v15655_v62 = vmax.f32 %v5663_v31, %v5891_v28  ;;  %v6529_v32 = vrot.slane %v15650_v10, 4  ;;  %v6640_v8 = vsel %vm4955_vm6, %v15335_v19, %v8429_v55 }
 0x513   : > { %8466 = vrot.lane.b32.xlu0 %v8465_v14, %s8690_s19  ;;  %v15669_v44 = vpack.c.bf16 %v6640_v8, %v6639_v42 }
 0x514   : > { %v15662_v9 = vmax.f32 %v15577_v29, %v15655_v62  ;;  %v6530_v31 = vsel %vm1798_vm1, %v6527_v38, %v6529_v32  ;;  %v5892_v29 = vrot.slane %v5665_v25, 2  ;;  %v5555_v50 = vpop.f32.mrf.mxu0 }
 0x515   : > { %6967 = vmatprep.mubr.bf16.mxu1 %v15669_v44  ;;  %v5556_v19 = vadd.f32 %v15510_v12, %v5555_v50 }
 0x516   : > { %v6531_v51 = vrot.slane %v15662_v9, 4  ;;  %6968 = vmatmul.mubr.bf16.gmra.mxu1 %v15470_v49  ;;  %v5893_v47 = vsel %vm3947_vm3, %v5890_v22, %v5892_v29  ;;  %v7616_v33 = vpop.f32.mrf.mxu0 }
 0x517   : > { %v15677_v6 = vmax.f32 %v5664_v60, %v5893_v47  ;;  %v5666_v37 = vmax.f32 %v5556_v19, 0.0 }
 0x518   : > { %v6532_v48 = vsel %vm1798_vm1, %v6529_v32, %v6531_v51  ;;  %v5558_v36 = vpop.f32.mrf.mxu0 }
 0x519   : > { %v8470_v57 = vpack.i.bf16 %v6532_v48, %v6530_v31  ;;  %v15682_v38 = vmax.f32 %v15586_v40, %v15677_v6  ;;  %v5894_v56 = vrot.slane %v5666_v37, 2  ;;  %v5559_v61 = vadd.f32 %v15510_v12, %v5558_v36 }
 0x51a   : > { %v7617_v49 = vpop.f32.mrf.mxu0 }
 0x51b   : > { %8471 = vrot.lane.b32.xlu1 %v8470_v57, %s8690_s19  ;;  %v5895_v45 = vsel %vm3947_vm3, %v5892_v29, %v5894_v56  ;;  %v5667_v39 = vmax.f32 %v5559_v61, 0.0  ;;  %v6533_v60 = vrot.slane %v15682_v38, 4 }
 0x51c   : > { %v15686_v22 = vmax.f32 %v5665_v25, %v5895_v45 }
 0x51d   : > { %v5896_v18 = vrot.slane %v5667_v39, 2  ;;  %v6534_v8 = vsel %vm1798_vm1, %v6531_v51, %v6533_v60 }
 0x51e   : > { %v15691_v14 = vmax.f32 %v15596_v13, %v15686_v22 }
 0x51f   : > { %v8432_v28 = vpop.permute.xlu1 %8431  ;;  %v5897_v42 = vsel %vm3947_vm3, %v5894_v56, %v5896_v18 }
 0x520   : > { %v8434_v15 = vunpack.i.h.bf16 %v8432_v28  ;;  %v8433_v40 = vunpack.i.l.bf16 %v8432_v28  ;;  %v6535_v32 = vrot.slane %v15691_v14, 4  ;;  %v15705_v57 = vmax.f32 %v5666_v37, %v5897_v42 }
 0x522   : > { %v6641_v55 = vsel %vm4955_vm6, %v15357_v0, %v8433_v40  ;;  %v6642_v46 = vsel %vm4955_vm6, %v15396_v7, %v8434_v15  ;;  %v6536_v13 = vsel %vm1798_vm1, %v6533_v60, %v6535_v32  ;;  %v15711_v51 = vmax.f32 %v15606_v1, %v15705_v57 }
 0x523   : > { %v15698_v25 = vpack.c.bf16 %v6642_v46, %v6641_v55  ;;  %v8475_v31 = vpack.i.bf16 %v6536_v13, %v6534_v8 }
 0x524   : > { %v6537_v49 = vrot.slane %v15711_v51, 4 }
 0x525   : > { %6975 = vmatprep.mubr.bf16.mxu1 %v15698_v25  ;;  %v5563_v48 = vpop.f32.mrf.mxu0  ;;  %8476 = vrot.lane.b32.xlu0 %v8475_v31, %s8690_s19 }
 0x526   : > { %6976 = vmatmul.mubr.bf16.gmra.mxu1 %v15496_v41  ;;  %v5564_v0 = vadd.f32 %v15510_v12, %v5563_v48  ;;  %v6538_v40 = vsel %vm1798_vm1, %v6535_v32, %v6537_v49 }
 0x527   : > { %v7620_v7 = vpop.f32.mrf.mxu0 }
 0x528   : > { %v5668_v29 = vmax.f32 %v5564_v0, 0.0 }
 0x529   : > { %v5566_v47 = vpop.f32.mrf.mxu0 }
 0x52a   : > { %v5898_v50 = vrot.slane %v5668_v29, 2  ;;  %v5567_v19 = vadd.f32 %v15510_v12, %v5566_v47 }
 0x52b   : > { %v7621_v33 = vpop.f32.mrf.mxu0 }
 0x52c   : > { %v5899_v36 = vsel %vm3947_vm3, %v5896_v18, %v5898_v50  ;;  %v5669_v60 = vmax.f32 %v5567_v19, 0.0 }
 0x52d   : > { %v8437_v41 = vpop.permute.xlu0 %8436  ;;  %v15715_v37 = vmax.f32 %v5667_v39, %v5899_v36 }
 0x52e   : > { %v8439_v56 = vunpack.i.h.bf16 %v8437_v41  ;;  %v8438_v61 = vunpack.i.l.bf16 %v8437_v41  ;;  %v6055_v18 = vrot.slane %v5669_v60, 2 }
 0x52f   : > { %v15720_v45 = vmax.f32 %v15617_v52, %v15715_v37 }
 0x530   : > { %v6643_v1 = vsel %vm4955_vm6, %v15412_v20, %v8438_v61  ;;  %v6644_v28 = vsel %vm4955_vm6, %v15442_v58, %v8439_v56  ;;  %v6056_v20 = vsel %vm3947_vm3, %v5898_v50, %v6055_v18 }
 0x531   : > { %v15726_v15 = vpack.c.bf16 %v6644_v28, %v6643_v1  ;;  %v6539_v39 = vrot.slane %v15720_v45, 4  ;;  %v6076_v31 = vmax.f32 %v5668_v29, %v6056_v20 }
 0x533   : > { %6983 = vmatprep.mubr.bf16.mxu1 %v15726_v15  ;;  %v6540_v55 = vsel %vm1798_vm1, %v6537_v49, %v6539_v39  ;;  %v15745_v33 = vmax.f32 %v15634_v3, %v6076_v31 }
 0x534   : > { %6984 = vmatmul.mubr.bf16.gmra.mxu1 %v15527_v16  ;;  %v8480_v52 = vpack.i.bf16 %v6540_v55, %v6538_v40 }
 0x535   : > { %v6541_v40 = vrot.slane %v15745_v33, 4 }
 0x536   : > { %8481 = vrot.lane.b32.xlu1 %v8480_v52, %s8690_s19 }
 0x53a   : > { %v8442_v46 = vpop.permute.xlu1 %8441 }
 0x53b   : > { %v5571_v58 = vpop.f32.mrf.mxu0  ;;  %v8444_v42 = vunpack.i.h.bf16 %v8442_v46  ;;  %v8443_v8 = vunpack.i.l.bf16 %v8442_v46 }
 0x53c   : > { %v5572_v13 = vadd.f32 %v15510_v12, %v5571_v58 }
 0x53d   : > { %v7624_v48 = vpop.f32.mrf.mxu0  ;;  %v6645_v32 = vsel %vm4955_vm6, %v15452_v34, %v8443_v8  ;;  %v6646_v0 = vsel %vm4955_vm6, %v15475_v21, %v8444_v42 }
 0x53e   : > { %v5670_v16 = vmax.f32 %v5572_v13, 0.0  ;;  %v15740_v7 = vpack.c.bf16 %v6646_v0, %v6645_v32 }
 0x53f   : > { %v5574_v47 = vpop.f32.mrf.mxu0 }
 0x540   : > { %v6057_v19 = vrot.slane %v5670_v16, 2  ;;  %v5575_v50 = vadd.f32 %v15510_v12, %v5574_v47  ;;  %6989 = vmatprep.mubr.bf16.mxu1 %v15740_v7 }
 0x541   : > { %v7625_v29 = vpop.f32.mrf.mxu0  ;;  %6990 = vmatmul.mubr.bf16.gmra.mxu1 %v15551_v54 }
 0x542   : > { %v6058_v34 = vsel %vm3947_vm3, %v6055_v18, %v6057_v19  ;;  %v5671_v36 = vmax.f32 %v5575_v50, 0.0  ;;  %v8447_v41 = vpop.permute.xlu0 %8446 }
 0x543   : > { %v6077_v21 = vmax.f32 %v5669_v60, %v6058_v34  ;;  %v5579_v56 = vpop.f32.mrf.mxu0  ;;  %v8449_v61 = vunpack.i.h.bf16 %v8447_v41  ;;  %v8448_v49 = vunpack.i.l.bf16 %v8447_v41 }
 0x544   : > { %v6059_v1 = vrot.slane %v5671_v36, 2  ;;  %v5580_v28 = vadd.f32 %v15510_v12, %v5579_v56 }
 0x545   : > { %v15752_v55 = vmax.f32 %v15646_v17, %v6077_v21  ;;  %v7628_v3 = vpop.f32.mrf.mxu0  ;;  %v6647_v54 = vsel %vm4955_vm6, %v15490_v24, %v8448_v49  ;;  %v6648_v18 = vsel %vm4955_vm6, %v15501_v4, %v8449_v61  ;;  %v6542_v4 = vsel %vm1798_vm1, %v6539_v39, %v6541_v40  ;;  %v15782_v49 = vld [vmem:[#allocation9] ss:$0 sm:$0xff] }
 0x546   : > { %v6060_v60 = vsel %vm3947_vm3, %v6057_v19, %v6059_v1  ;;  %v5672_v52 = vmax.f32 %v5580_v28, 0.0  ;;  %v15759_v20 = vpack.c.bf16 %v6648_v18, %v6647_v54 }
 0x547   : > { %v6543_v46 = vrot.slane %v15752_v55, 4  ;;  %v6078_v58 = vmax.f32 %v5670_v16, %v6060_v60  ;;  %v5582_v42 = vpop.f32.mrf.mxu0 }
 0x548   : > { %v6061_v8 = vrot.slane %v5672_v52, 2  ;;  %v5583_v17 = vadd.f32 %v15510_v12, %v5582_v42  ;;  %6995 = vmatprep.mubr.bf16.mxu1 %v15759_v20 }
 0x549   : > { %v15765_v13 = vmax.f32 %v15655_v62, %v6078_v58  ;;  %v7629_v24 = vpop.f32.mrf.mxu0  ;;  %v6544_v31 = vsel %vm1798_vm1, %v6541_v40, %v6543_v46  ;;  %6996 = vmatmul.mubr.bf16.gmra.mxu1 %v15562_v43 }
 0x54a   : > { %v6062_v48 = vsel %vm3947_vm3, %v6059_v1, %v6061_v8  ;;  %v5673_v32 = vmax.f32 %v5583_v17, 0.0  ;;  %v8485_v0 = vpack.i.bf16 %v6544_v31, %v6542_v4  ;;  %v8452_v16 = vpop.permute.xlu1 %8451 }
 0x54b   : > { %v6079_v47 = vmax.f32 %v5671_v36, %v6062_v48  ;;  %v8454_v50 = vunpack.i.h.bf16 %v8452_v16  ;;  %v8453_v29 = vunpack.i.l.bf16 %v8452_v16  ;;  %v6545_v39 = vrot.slane %v15765_v13, 4 }
 0x54c   : > { %v6063_v34 = vrot.slane %v5673_v32, 2  ;;  %8486 = vrot.lane.b32.xlu0 %v8485_v0, %s8690_s19 }
 0x54d   : > { %v5587_v19 = vpop.f32.mrf.mxu0  ;;  %v15775_v41 = vmax.f32 %v15677_v6, %v6079_v47  ;;  %v6649_v21 = vsel %vm4955_vm6, %v15521_v23, %v8453_v29  ;;  %v6650_v36 = vsel %vm4955_vm6, %v15531_v11, %v8454_v50  ;;  %v6546_v42 = vsel %vm1798_vm1, %v6543_v46, %v6545_v39 }
 0x54e   : > { %v5588_v62 = vadd.f32 %v15510_v12, %v5587_v19  ;;  %v6064_v56 = vsel %vm3947_vm3, %v6061_v8, %v6063_v34  ;;  %v15784_v28 = vpack.c.bf16 %v6650_v36, %v6649_v21 }
 0x54f   : > { %v7632_v43 = vpop.f32.mrf.mxu0  ;;  %v6547_v40 = vrot.slane %v15775_v41, 4  ;;  %v6080_v6 = vmax.f32 %v5672_v52, %v6064_v56  ;;  %v7120_v56 = vld [vmem:[%s15808_s20 + $0x8] sm:$0x1] }
 0x550   : > { %v5674_v61 = vmax.f32 %v5588_v62, 0.0  ;;  %7001 = vmatprep.mubr.bf16.mxu1 %v15784_v28 }
 0x551   : > { %v6877_v1 = vpop.f32.mrf.mxu1  ;;  %v5590_v3 = vpop.f32.mrf.mxu0  ;;  %v15790_v11 = vmax.f32 %v15686_v22, %v6080_v6  ;;  %v6548_v8 = vsel %vm1798_vm1, %v6545_v39, %v6547_v40  ;;  %7002 = vmatmul.mubr.bf16.gmra.mxu1 %v15572_v30 }
 0x552   : > { %v6065_v54 = vrot.slane %v5674_v61, 2  ;;  %v5591_v18 = vadd.f32 %v15510_v12, %v5590_v3  ;;  %v6878_v60 = vadd.f32 %v15782_v49, %v6877_v1  ;;  %v8490_v24 = vpack.i.bf16 %v6548_v8, %v6546_v42 }
 0x553   : > { %v6879_v23 = vpop.f32.mrf.mxu1  ;;  %v7633_v58 = vpop.f32.mrf.mxu0  ;;  %v6549_v0 = vrot.slane %v15790_v11, 4 }
 0x554   : > { %v6066_v52 = vsel %vm3947_vm3, %v6063_v34, %v6065_v54  ;;  %v5675_v17 = vmax.f32 %v5591_v18, 0.0  ;;  %8491 = vrot.lane.b32.xlu1 %v8490_v24, %s8690_s19  ;;  %v7075_v16 = vmax.f32 %v6878_v60, 0.0 }
 0x555   : > { %v6880_v12 = vpop.f32.mrf.mxu1  ;;  %v6081_v4 = vmax.f32 %v5673_v32, %v6066_v52  ;;  %v6550_v39 = vsel %vm1798_vm1, %v6547_v40, %v6549_v0 }
 0x556   : > { %v6881_v31 = vadd.f32 %v15782_v49, %v6880_v12  ;;  %v6067_v22 = vrot.slane %v5675_v17, 2 }
 0x557   : > { %v6882_v48 = vpop.f32.mrf.mxu1  ;;  %v15802_v46 = vmax.f32 %v15705_v57, %v6081_v4 }
 0x558   : > { %v7076_v30 = vmax.f32 %v6881_v31, 0.0  ;;  %v6068_v47 = vsel %vm3947_vm3, %v6065_v54, %v6067_v22 }
 0x559   : > { %v6885_v32 = vpop.f32.mrf.mxu1  ;;  %v6551_v19 = vrot.slane %v15802_v46, 4  ;;  %v6082_v50 = vmax.f32 %v5674_v61, %v6068_v47 }
 0x55a   : > { %v7391_v29 = vpack.c.bf16 %v7076_v30, %v7075_v16  ;;  %v6886_v57 = vadd.f32 %v15782_v49, %v6885_v32 }
 0x55b   : > { %v6887_v34 = vpop.f32.mrf.mxu1  ;;  %v6552_v43 = vsel %vm1798_vm1, %v6549_v0, %v6551_v19  ;;  %v6156_v21 = vmax.f32 %v15715_v37, %v6082_v50 }
 0x55c   : > { %7392 = vst [vmem:[%s15808_s20] sm:$0xff] %v7391_v29   ;;  %v7077_v62 = vmax.f32 %v6886_v57, 0.0  ;;  %v8495_v61 = vpack.i.bf16 %v6552_v43, %v6550_v39 }
 0x55d   : > { %v6888_v1 = vpop.f32.mrf.mxu1  ;;  %v6553_v3 = vrot.slane %v6156_v21, 4 }
 0x55e   : > { %v7375_v6 = vpack.c.bf16 %v7077_v62, %v7077_v62  ;;  %8496 = vrot.lane.b32.xlu0 %v8495_v61, %s8690_s19 }
 0x55f   : > { %v6890_v54 = vpop.f32.mrf.mxu1  ;;  %v6554_v40 = vsel %vm1798_vm1, %v6551_v19, %v6553_v3 }
 0x560   : > { %v7121_v18 = vsel %vm15816_vm10, %v7375_v6, %v7120_v56  ;;  %6581 = vrot.lane.b32.xlu1 %v6554_v40, %s8690_s19 }
 0x561   : > { %7122 = vst [vmem:[%s15808_s20 + $0x8] sm:$0x1] %v7121_v18  ;;  %v6893_v37 = vpop.f32.mrf.mxu1 }
 0x563   : > { %v6894_v23 = vpop.f32.mrf.mxu1 }
 0x565   : > { %v6895_v60 = vpop.f32.mrf.mxu1 }
 0x567   : > { %v6896_v58 = vpop.f32.mrf.mxu1 }
 0x569   : > { %v6899_v42 = vpop.f32.mrf.mxu1 }
 0x56b   : > { %v6900_v8 = vpop.f32.mrf.mxu1 }
 0x56d   : > { %v6901_v52 = vpop.f32.mrf.mxu1 }
 0x56f   : > { %v6902_v17 = vpop.f32.mrf.mxu1 }
 0x571   : > { %v6905_v24 = vpop.f32.mrf.mxu1 }
 0x573   : > { %v6906_v22 = vpop.f32.mrf.mxu1 }
 0x575   : > { %v8457_v12 = vpop.permute.xlu0 %8456  ;;  %v6907_v30 = vpop.f32.mrf.mxu1 }
 0x576   : > { %v8459_v4 = vunpack.i.h.bf16 %v8457_v12  ;;  %v8458_v31 = vunpack.i.l.bf16 %v8457_v12 }
 0x577   : > { %v6908_v47 = vpop.f32.mrf.mxu1 }
 0x578   : > { %v6651_v48 = vsel %vm4955_vm6, %v15548_v26, %v8458_v31  ;;  %v6652_v0 = vsel %vm4955_vm6, %v15583_v2, %v8459_v4  ;;  %v7348_v31 = vld [vmem:[%s15808_s20 + $0x14] sm:$0x1] }
 0x579   : > { %v15831_v16 = vpack.c.bf16 %v6652_v0, %v6651_v48  ;;  %v6911_v19 = vpop.f32.mrf.mxu1 }
 0x57b   : > { %7007 = vmatprep.mubr.bf16.mxu1 %v15831_v16  ;;  %v6912_v57 = vpop.f32.mrf.mxu1 }
 0x57c   : > { %7008 = vmatmul.mubr.bf16.gmra.mxu1 %v15624_v35 }
 0x57d   : > { %v8462_v32 = vpop.permute.xlu1 %8461  ;;  %v6913_v62 = vpop.f32.mrf.mxu1 }
 0x57e   : > { %v8464_v50 = vunpack.i.h.bf16 %v8462_v32  ;;  %v8463_v29 = vunpack.i.l.bf16 %v8462_v32 }
 0x57f   : > { %v6914_v39 = vpop.f32.mrf.mxu1 }
 0x580   : > { %v6653_v34 = vsel %vm4955_vm6, %v15592_v53, %v8463_v29  ;;  %v6654_v26 = vsel %vm4955_vm6, %v15601_v63, %v8464_v50 }
 0x581   : > { %v15839_v2 = vpack.c.bf16 %v6654_v26, %v6653_v34  ;;  %v6917_v43 = vpop.f32.mrf.mxu1 }
 0x583   : > { %7013 = vmatprep.mubr.bf16.mxu1 %v15839_v2  ;;  %v6918_v1 = vpop.f32.mrf.mxu1 }
 0x584   : > { %7014 = vmatmul.mubr.bf16.gmra.mxu1 %v15669_v44 }
 0x585   : > { %v8467_v35 = vpop.permute.xlu0 %8466  ;;  %v6919_v6 = vpop.f32.mrf.mxu1 }
 0x586   : > { %v8469_v21 = vunpack.i.h.bf16 %v8467_v35  ;;  %v8468_v56 = vunpack.i.l.bf16 %v8467_v35 }
 0x587   : > { %v6920_v3 = vpop.f32.mrf.mxu1 }
 0x588   : > { %v15845_v61 = vsel %vm4955_vm6, %v15613_v59, %v8468_v56  ;;  %v6656_v53 = vsel %vm4955_vm6, %v15628_v5, %v8469_v21 }
 0x589   : > { %v6699_v63 = vpack.c.bf16 %v6656_v53, %v15845_v61  ;;  %v6923_v54 = vpop.f32.mrf.mxu1 }
 0x58a   : > { %v6924_v37 = vadd.f32 %v15782_v49, %v6923_v54 }
 0x58b   : > { %7021 = vmatprep.mubr.bf16.mxu1 %v6699_v63  ;;  %v6925_v23 = vpop.f32.mrf.mxu1 }
 0x58c   : > { %7022 = vmatmul.mubr.bf16.gmra.mxu1 %v15698_v25  ;;  %v7079_v60 = vmax.f32 %v6924_v37, 0.0 }
 0x58d   : > { %v8472_v44 = vpop.permute.xlu1 %8471  ;;  %v6926_v42 = vpop.f32.mrf.mxu1 }
 0x58e   : > { %v8474_v18 = vunpack.i.h.bf16 %v8472_v44  ;;  %v8473_v40 = vunpack.i.l.bf16 %v8472_v44  ;;  %v7376_v25 = vpack.c.bf16 %v7079_v60, %v7079_v60  ;;  %v6927_v8 = vadd.f32 %v15782_v49, %v6926_v42 }
 0x58f   : > { %v6928_v52 = vpop.f32.mrf.mxu1 }
 0x590   : > { %v6657_v59 = vsel %vm4955_vm6, %v15642_v27, %v8473_v40  ;;  %v6658_v5 = vsel %vm4955_vm6, %v15650_v10, %v8474_v18  ;;  %7346 = vst [vmem:[%s15808_s20 + $0xc] sm:$0xf] %v7376_v25  ;;  %v7080_v17 = vmax.f32 %v6927_v8, 0.0 }
 0x591   : > { %v6700_v58 = vpack.c.bf16 %v6658_v5, %v6657_v59  ;;  %v6931_v12 = vpop.f32.mrf.mxu1 }
 0x592   : > { %v7377_v27 = vpack.c.bf16 %v7080_v17, %v7080_v17  ;;  %v6932_v24 = vadd.f32 %v15782_v49, %v6931_v12 }
 0x593   : > { %7029 = vmatprep.mubr.bf16.mxu1 %v6700_v58  ;;  %v6933_v4 = vpop.f32.mrf.mxu1 }
 0x594   : > { %7030 = vmatmul.mubr.bf16.gmra.mxu1 %v15726_v15  ;;  %7347 = vst [vmem:[%s15808_s20 + $0x10] sm:$0xf] %v7377_v27  ;;  %v7081_v10 = vmax.f32 %v6932_v24, 0.0 }
 0x595   : > { %v6934_v22 = vpop.f32.mrf.mxu1 }
 0x596   : > { %v7378_v48 = vpack.c.bf16 %v7081_v10, %v7081_v10 }
 0x597   : > { %v6936_v0 = vpop.f32.mrf.mxu1  ;;  %v8477_v19 = vpop.permute.xlu0 %8476 }
 0x598   : > { %v7138_v30 = vsel %vm15816_vm10, %v7378_v48, %v7348_v31  ;;  %v8479_v50 = vunpack.i.h.bf16 %v8477_v19  ;;  %v8478_v29 = vunpack.i.l.bf16 %v8477_v19 }
 0x599   : > { %7349 = vst [vmem:[%s15808_s20 + $0x14] sm:$0x1] %v7138_v30  ;;  %v6939_v47 = vpop.f32.mrf.mxu1 }
 0x59a   : > { %v6659_v34 = vsel %vm4955_vm6, %v15662_v9, %v8478_v29  ;;  %v6660_v26 = vsel %vm4955_vm6, %v15682_v38, %v8479_v50 }
 0x59b   : > { %v6940_v32 = vpop.f32.mrf.mxu1  ;;  %v6701_v39 = vpack.c.bf16 %v6660_v26, %v6659_v34 }
 0x59d   : > { %v6941_v15 = vpop.f32.mrf.mxu1  ;;  %7035 = vmatprep.mubr.bf16.mxu1 %v6701_v39 }
 0x59e   : > { %7036 = vmatmul.mubr.bf16.gmra.mxu1 %v15740_v7 }
 0x59f   : > { %v6942_v57 = vpop.f32.mrf.mxu1 }
 0x5a0   : > { %v7355_v57 = vld [vmem:[%s15808_s20 + $0x20] sm:$0x1] }
 0x5a1   : > { %v6945_v62 = vpop.f32.mrf.mxu1 }
 0x5a3   : > { %v6946_v35 = vpop.f32.mrf.mxu1 }
 0x5a5   : > { %v6947_v43 = vpop.f32.mrf.mxu1 }
 0x5a7   : > { %v6948_v21 = vpop.f32.mrf.mxu1 }
 0x5a8   : > { %v8482_v63 = vpop.permute.xlu1 %8481 }
 0x5a9   : > { %v6951_v56 = vpop.f32.mrf.mxu1  ;;  %v8484_v6 = vunpack.i.h.bf16 %v8482_v63  ;;  %v8483_v3 = vunpack.i.l.bf16 %v8482_v63 }
 0x5ab   : > { %v6952_v1 = vpop.f32.mrf.mxu1  ;;  %v6661_v9 = vsel %vm4955_vm6, %v15691_v14, %v8483_v3  ;;  %v6662_v38 = vsel %vm4955_vm6, %v15711_v51, %v8484_v6 }
 0x5ac   : > { %v6702_v18 = vpack.c.bf16 %v6662_v38, %v6661_v9 }
 0x5ad   : > { %v6953_v53 = vpop.f32.mrf.mxu1 }
 0x5ae   : > { %7041 = vmatprep.mubr.bf16.mxu1 %v6702_v18 }
 0x5af   : > { %v6954_v44 = vpop.f32.mrf.mxu1  ;;  %7042 = vmatmul.mubr.bf16.gmra.mxu1 %v15759_v20 }
 0x5b1   : > { %v6957_v54 = vpop.f32.mrf.mxu1 }
 0x5b3   : > { %v6958_v40 = vpop.f32.mrf.mxu1 }
 0x5b5   : > { %v6959_v7 = vpop.f32.mrf.mxu1 }
 0x5b7   : > { %v6960_v37 = vpop.f32.mrf.mxu1 }
 0x5be   : > { %v8487_v23 = vpop.permute.xlu0 %8486 }
 0x5bf   : > { %v8489_v59 = vunpack.i.h.bf16 %v8487_v23  ;;  %v8488_v5 = vunpack.i.l.bf16 %v8487_v23 }
 0x5c1   : > { %v6663_v60 = vsel %vm4955_vm6, %v15720_v45, %v8488_v5  ;;  %v6664_v14 = vsel %vm4955_vm6, %v15745_v33, %v8489_v59 }
 0x5c2   : > { %v6703_v58 = vpack.c.bf16 %v6664_v14, %v6663_v60 }
 0x5c4   : > { %7047 = vmatprep.mubr.bf16.mxu1 %v6703_v58 }
 0x5c5   : > { %7048 = vmatmul.mubr.bf16.gmra.mxu1 %v15784_v28 }
 0x5c6   : > { %v6963_v42 = vpop.f32.mrf.mxu1  ;;  %v8492_v25 = vpop.permute.xlu1 %8491 }
 0x5c7   : > { %v8494_v20 = vunpack.i.h.bf16 %v8492_v25  ;;  %v8493_v52 = vunpack.i.l.bf16 %v8492_v25 }
 0x5c8   : > { %v6964_v51 = vpop.f32.mrf.mxu1 }
 0x5c9   : > { %v6665_v12 = vsel %vm4955_vm6, %v15752_v55, %v8493_v52  ;;  %v6666_v45 = vsel %vm4955_vm6, %v15765_v13, %v8494_v20 }
 0x5ca   : > { %v6965_v8 = vpop.f32.mrf.mxu1  ;;  %v6704_v27 = vpack.c.bf16 %v6666_v45, %v6665_v12 }
 0x5cc   : > { %v6966_v17 = vpop.f32.mrf.mxu1  ;;  %7053 = vmatprep.mubr.bf16.mxu1 %v6704_v27 }
 0x5cd   : > { %7054 = vmatmul.mubr.bf16.gmra.mxu1 %v15831_v16 }
 0x5d0   : > { %v8497_v33 = vpop.permute.xlu0 %8496 }
 0x5d1   : > { %v8499_v24 = vunpack.i.h.bf16 %v8497_v33  ;;  %v8498_v4 = vunpack.i.l.bf16 %v8497_v33  ;;  %v7362_v33 = vld [vmem:[%s15808_s20 + $0x2c] sm:$0x1] }
 0x5d2   : > { %v6582_v10 = vpop.permute.xlu1 %6581 }
 0x5d3   : > { %v6669_v28 = vsel %vm4955_vm6, %v15802_v46, %v6582_v10  ;;  %v6667_v31 = vsel %vm4955_vm6, %v15775_v41, %v8498_v4  ;;  %v6668_v55 = vsel %vm4955_vm6, %v15790_v11, %v8499_v24  ;;  %v6706_v11 = vpack.c.bf16 %v15845_v61, %v15845_v61 }
 0x5d4   : > { %v6705_v22 = vpack.c.bf16 %v6668_v55, %v6667_v31  ;;  %v6707_v48 = vpack.c.bf16 %v6669_v28, %v6669_v28 }
 0x5d6   : > { %v6969_v13 = vpop.f32.mrf.mxu1  ;;  %7059 = vmatprep.mubr.bf16.mxu1 %v6705_v22 }
 0x5d7   : > { %7060 = vmatmul.mubr.bf16.gmra.mxu1 %v15839_v2  ;;  %v6970_v16 = vadd.f32 %v15782_v49, %v6969_v13 }
 0x5d8   : > { %v6971_v0 = vpop.f32.mrf.mxu1  ;;  %7067 = vmatprep.mubr.bf16.mxu1 %v6707_v48 }
 0x5d9   : > { %v7083_v41 = vmax.f32 %v6970_v16, 0.0 }
 0x5da   : > { %v6972_v30 = vpop.f32.mrf.mxu1 }
 0x5db   : > { %v6973_v46 = vadd.f32 %v15782_v49, %v6972_v30 }
 0x5dc   : > { %v6974_v47 = vpop.f32.mrf.mxu1 }
 0x5dd   : > { %v7084_v32 = vmax.f32 %v6973_v46, 0.0 }
 0x5df   : > { %v7396_v15 = vpack.c.bf16 %v7084_v32, %v7083_v41  ;;  %7068 = vmatmul.mubr.bf16.gmra.mxu1 %v6706_v11 }
 0x5e1   : > { %7403 = vst [vmem:[%s15808_s20 + $0x18] sm:$0xff] %v7396_v15  }
 0x5e6   : > { %v6977_v19 = vpop.f32.mrf.mxu1 }
 0x5e7   : > { %v6978_v2 = vadd.f32 %v15782_v49, %v6977_v19 }
 0x5e8   : > { %v6979_v50 = vpop.f32.mrf.mxu1 }
 0x5e9   : > { %v7085_v29 = vmax.f32 %v6978_v2, 0.0 }
 0x5ea   : > { %v6980_v34 = vpop.f32.mrf.mxu1 }
 0x5eb   : > { %v7381_v26 = vpack.c.bf16 %v7085_v29, %v7085_v29 }
 0x5ec   : > { %v6982_v62 = vpop.f32.mrf.mxu1 }
 0x5ed   : > { %v7155_v39 = vsel %vm15816_vm10, %v7381_v26, %v7355_v57 }
 0x5ee   : > { %7356 = vst [vmem:[%s15808_s20 + $0x20] sm:$0x1] %v7155_v39 }
 0x5f4   : > { %v6985_v35 = vpop.f32.mrf.mxu1 }
 0x5f6   : > { %v6986_v43 = vpop.f32.mrf.mxu1 }
 0x5f8   : > { %v6987_v21 = vpop.f32.mrf.mxu1 }
 0x5fa   : > { %v6988_v61 = vpop.f32.mrf.mxu1 }
 0x601   : > { %v6991_v56 = vpop.f32.mrf.mxu1 }
 0x603   : > { %v6992_v1 = vpop.f32.mrf.mxu1 }
 0x605   : > { %v6993_v53 = vpop.f32.mrf.mxu1 }
 0x607   : > { %v6994_v63 = vpop.f32.mrf.mxu1 }
 0x609   : > { %v6997_v6 = vpop.f32.mrf.mxu1 }
 0x60b   : > { %v6998_v3 = vpop.f32.mrf.mxu1 }
 0x60d   : > { %v6999_v44 = vpop.f32.mrf.mxu1 }
 0x60e   : > { %v7369_v44 = vld [vmem:[%s15808_s20 + $0x38] sm:$0x1] }
 0x60f   : > { %v7000_v9 = vpop.f32.mrf.mxu1 }
 0x611   : > { %v7003_v38 = vpop.f32.mrf.mxu1 }
 0x613   : > { %v7004_v54 = vpop.f32.mrf.mxu1 }
 0x615   : > { %v7005_v18 = vpop.f32.mrf.mxu1 }
 0x617   : > { %v7006_v40 = vpop.f32.mrf.mxu1 }
 0x63c   : > { %v7009_v7 = vpop.f32.mrf.mxu1 }
 0x63e   : > { %v7010_v37 = vpop.f32.mrf.mxu1 }
 0x640   : > { %v7011_v23 = vpop.f32.mrf.mxu1 }
 0x642   : > { %v7012_v59 = vpop.f32.mrf.mxu1 }
 0x644   : > { %v7015_v5 = vpop.f32.mrf.mxu1 }
 0x645   : > { %v7016_v60 = vadd.f32 %v15782_v49, %v7015_v5 }
 0x646   : > { %v7017_v14 = vpop.f32.mrf.mxu1 }
 0x647   : > { %v7087_v58 = vmax.f32 %v7016_v60, 0.0 }
 0x648   : > { %v7018_v42 = vpop.f32.mrf.mxu1 }
 0x649   : > { %v7382_v51 = vpack.c.bf16 %v7087_v58, %v7087_v58  ;;  %v7019_v25 = vadd.f32 %v15782_v49, %v7018_v42 }
 0x64a   : > { %v7020_v8 = vpop.f32.mrf.mxu1 }
 0x64b   : > { %7360 = vst [vmem:[%s15808_s20 + $0x24] sm:$0xf] %v7382_v51  ;;  %v7088_v20 = vmax.f32 %v7019_v25, 0.0 }
 0x64c   : > { %v7023_v52 = vpop.f32.mrf.mxu1 }
 0x64d   : > { %v7383_v17 = vpack.c.bf16 %v7088_v20, %v7088_v20  ;;  %v7024_v12 = vadd.f32 %v15782_v49, %v7023_v52 }
 0x64e   : > { %v7025_v45 = vpop.f32.mrf.mxu1 }
 0x64f   : > { %7361 = vst [vmem:[%s15808_s20 + $0x28] sm:$0xf] %v7383_v17  ;;  %v7089_v27 = vmax.f32 %v7024_v12, 0.0 }
 0x650   : > { %v7026_v24 = vpop.f32.mrf.mxu1 }
 0x651   : > { %v7384_v4 = vpack.c.bf16 %v7089_v27, %v7089_v27 }
 0x652   : > { %v7028_v10 = vpop.f32.mrf.mxu1 }
 0x653   : > { %v7172_v28 = vsel %vm15816_vm10, %v7384_v4, %v7362_v33 }
 0x654   : > { %7363 = vst [vmem:[%s15808_s20 + $0x2c] sm:$0x1] %v7172_v28  ;;  %v7031_v31 = vpop.f32.mrf.mxu1 }
 0x656   : > { %v7032_v55 = vpop.f32.mrf.mxu1 }
 0x658   : > { %v7033_v22 = vpop.f32.mrf.mxu1 }
 0x65a   : > { %v7034_v13 = vpop.f32.mrf.mxu1 }
 0x65e   : > { %v7037_v48 = vpop.f32.mrf.mxu1 }
 0x660   : > { %v7038_v0 = vpop.f32.mrf.mxu1 }
 0x662   : > { %v7039_v16 = vpop.f32.mrf.mxu1 }
 0x664   : > { %v7040_v30 = vpop.f32.mrf.mxu1 }
 0x66f   : > { %v7043_v46 = vpop.f32.mrf.mxu1 }
 0x671   : > { %v7044_v47 = vpop.f32.mrf.mxu1 }
 0x673   : > { %v7045_v41 = vpop.f32.mrf.mxu1 }
 0x675   : > { %v7046_v32 = vpop.f32.mrf.mxu1 }
 0x685   : > { %v7049_v11 = vpop.f32.mrf.mxu1 }
 0x687   : > { %v7050_v15 = vpop.f32.mrf.mxu1 }
 0x689   : > { %v7051_v19 = vpop.f32.mrf.mxu1 }
 0x68b   : > { %v7052_v2 = vpop.f32.mrf.mxu1 }
 0x68d   : > { %v7055_v50 = vpop.f32.mrf.mxu1 }
 0x68f   : > { %v7056_v29 = vpop.f32.mrf.mxu1 }
 0x691   : > { %v7057_v57 = vpop.f32.mrf.mxu1 }
 0x693   : > { %v7058_v34 = vpop.f32.mrf.mxu1 }
 0x697   : > { %v7061_v26 = vpop.f32.mrf.mxu1 }
 0x698   : > { %v7062_v39 = vadd.f32 %v15782_v49, %v7061_v26 }
 0x699   : > { %v7063_v62 = vpop.f32.mrf.mxu1 }
 0x69a   : > { %v7091_v61 = vmax.f32 %v7062_v39, 0.0 }
 0x69b   : > { %v7064_v35 = vpop.f32.mrf.mxu1 }
 0x69c   : > { %v7065_v43 = vadd.f32 %v15782_v49, %v7064_v35 }
 0x69d   : > { %v7066_v21 = vpop.f32.mrf.mxu1 }
 0x69e   : > { %v7092_v56 = vmax.f32 %v7065_v43, 0.0 }
 0x69f   : > { %v7069_v1 = vpop.f32.mrf.mxu1 }
 0x6a0   : > { %v7401_v53 = vpack.c.bf16 %v7092_v56, %v7091_v61  ;;  %v7070_v63 = vadd.f32 %v15782_v49, %v7069_v1 }
 0x6a1   : > { %v7071_v6 = vpop.f32.mrf.mxu1 }
 0x6a2   : > { %7404 = vst [vmem:[%s15808_s20 + $0x30] sm:$0xff] %v7401_v53   ;;  %v7093_v3 = vmax.f32 %v7070_v63, 0.0 }
 0x6a3   : > { %v7072_v9 = vpop.f32.mrf.mxu1 }
 0x6a4   : > { %v7387_v38 = vpack.c.bf16 %v7093_v3, %v7093_v3 }
 0x6a5   : > { %v7073_v54 = vpop.f32.mrf.mxu1 }
 0x6a6   : > { %v7189_v18 = vsel %vm15816_vm10, %v7387_v38, %v7369_v44 }
 0x6a7   : > { %7370 = vst [vmem:[%s15808_s20 + $0x38] sm:$0x1] %v7189_v18 }
 0x6a8 PF: > { %s20_s24 = sadd.s32 1, %s8680_s24  }
 0x6a9   : > { %p17_p2 = scmp.ge.s32.totalorder %s20_s24, 4  }
 0x6ab   :  { %19 = sbr.rel (!%p17_p2) target bundleno = 3 (0x3), region = 103 }
 0x6b0   :  { %7212 = vsyncpa [#allocation3], 1 }
 0x6b1   :  { %7214 = vsyncpa [#allocation3 + $0x1], 1 }
 0x6b2   :  { %7215 = vsyncpa [#allocation5], 1 }
 0x6b3   :  { %7216 = vsyncpa [#allocation8], 1 }

</bundles_post_ra>
